<compile_context>
chip_gen: v5e
topology: v5e:2x2
jax: 0.10.0
libtpu: 0.0.40
codegen_flags: <defaults>
</compile_context>

<pallas_src>
import functools
import numpy as np
import jax
import jax.numpy as jnp
from jax.experimental import pallas as pl
from jax.experimental.pallas import tpu as pltpu


# ----------------------------- tiling helpers ------------------------------

def _ceil_to(x, m):
    return ((x + m - 1) // m) * m


def _pick_tile(size, unit, max_tile):
    """Tile that is a multiple of `unit`, divides the padded size, and <= max_tile."""
    padded = _ceil_to(size, unit)
    if padded <= max_tile:
        return padded, padded
    for cand in range(max_tile, unit - 1, -unit):
        if padded % cand == 0:
            return cand, padded
    return unit, padded  # unit always divides padded


def _pick_tile_padded(padded, unit, max_tile):
    """Largest multiple of `unit` that divides an already-padded size (<= max_tile)."""
    if padded <= max_tile:
        return padded
    for cand in range(max_tile, unit - 1, -unit):
        if padded % cand == 0:
            return cand
    return unit


# --------------------- fused conv matmul + BN(+res)(+ReLU) -----------------

def _fused_mm_kernel(a_ref, b_ref, s_ref, c_ref, *rest, relu, has_res):
    if has_res:
        res_ref, o_ref, acc_ref = rest
    else:
        o_ref, acc_ref = rest
        res_ref = None
    k = pl.program_id(2)

    @pl.when(k == 0)
    def _init():
        acc_ref[...] = jnp.zeros_like(acc_ref)

    acc_ref[...] += jnp.dot(a_ref[...], b_ref[...],
                            preferred_element_type=jnp.float32)

    @pl.when(k == pl.num_programs(2) - 1)
    def _finalize():
        y = acc_ref[...] * s_ref[...] + c_ref[...]
        if has_res:
            y = y + res_ref[...].astype(jnp.float32)
        if relu:
            y = jnp.maximum(y, 0.0)
        o_ref[...] = y.astype(o_ref.dtype)


def fused_matmul_bn(a, b, scale, bias, n_out, residual=None, relu=True,
                    out_dtype=jnp.bfloat16):
    """out = act((a @ b) * scale + bias [+ residual])  with bf16 inputs, f32 acc.

    `b`, `scale`, `bias` are already padded to (Kp, Np) / (1, Np) with Kp, Np
    multiples of 128; `n_out` is the true (unpadded) output width.
    """
    M, K = a.shape
    Kp, Np = b.shape
    assert Kp == _ceil_to(K, 128) and Np == _ceil_to(n_out, 128)

    tm, Mp = _pick_tile(M, 8, 512)
    tn = _pick_tile_padded(Np, 128, 256)
    tk = _pick_tile_padded(Kp, 128, 512)

    a_p = jnp.pad(a.astype(jnp.bfloat16), ((0, Mp - M), (0, Kp - K)))
    b_p = b.astype(jnp.bfloat16)
    s_p = scale.astype(jnp.float32)
    c_p = bias.astype(jnp.float32)

    in_specs = [
        pl.BlockSpec((tm, tk), lambda i, j, k: (i, k)),
        pl.BlockSpec((tk, tn), lambda i, j, k: (k, j)),
        pl.BlockSpec((1, tn), lambda i, j, k: (0, j)),
        pl.BlockSpec((1, tn), lambda i, j, k: (0, j)),
    ]
    args = [a_p, b_p, s_p, c_p]
    has_res = residual is not None
    if has_res:
        r_p = jnp.pad(residual.astype(jnp.bfloat16),
                      ((0, Mp - M), (0, Np - n_out)))
        in_specs.append(pl.BlockSpec((tm, tn), lambda i, j, k: (i, j)))
        args.append(r_p)

    out = pl.pallas_call(
        functools.partial(_fused_mm_kernel, relu=relu, has_res=has_res),
        out_shape=jax.ShapeDtypeStruct((Mp, Np), out_dtype),
        grid_spec=pltpu.PrefetchScalarGridSpec(
            num_scalar_prefetch=0,
            grid=(Mp // tm, Np // tn, Kp // tk),
            in_specs=in_specs,
            out_specs=pl.BlockSpec((tm, tn), lambda i, j, k: (i, j)),
            scratch_shapes=[pltpu.VMEM((tm, tn), jnp.float32)],
        ),
        compiler_params=pltpu.CompilerParams(
            dimension_semantics=("parallel", "parallel", "arbitrary")),
    )(*args)
    return out[:M, :n_out]


# ----------------------------- conv glue ------------------------------------

def _im2col(x, kh, kw, stride, pad):
    # x: (B, H, W, C) NHWC -> (B, Ho, Wo, kh*kw, C)
    B, H, W, C = x.shape
    if pad > 0:
        x = jnp.pad(x, ((0, 0), (pad, pad), (pad, pad), (0, 0)))
    Hp, Wp = H + 2 * pad, W + 2 * pad
    Ho = (Hp - kh) // stride + 1
    Wo = (Wp - kw) // stride + 1
    cols = []
    for i in range(kh):
        for j in range(kw):
            cols.append(x[:, i:i + stride * (Ho - 1) + 1:stride,
                          j:j + stride * (Wo - 1) + 1:stride, :])
    patches = jnp.stack(cols, axis=3)
    return patches, Ho, Wo


def conv_bn(x, w_mat, scale, bias, n_out, kh, kw, stride, pad,
            relu=True, residual=None):
    # TODO(synk): im2col patches still materialize once in HBM before the Pallas
    # matmul; a tap-as-grid-axis kernel would remove that extra activation traffic.
    B, H, W, C = x.shape
    patches, Ho, Wo = _im2col(x, kh, kw, stride, pad)
    A = patches.reshape(B * Ho * Wo, kh * kw * C)
    res2d = None
    if residual is not None:
        res2d = residual.reshape(B * Ho * Wo, n_out)
    out = fused_matmul_bn(A, w_mat, scale, bias, n_out,
                          residual=res2d, relu=relu)
    return out.reshape(B, Ho, Wo, n_out)


# ----------------------------- max pool (shifted max) -----------------------

def _maxpool_s1_kernel(x_ref, o_ref):
    Ho, Wo = o_ref.shape[0], o_ref.shape[1]
    x = x_ref[...].astype(jnp.float32)
    m = x[0:Ho, 0:Wo, :]
    for i in range(3):
        for j in range(3):
            if i == 0 and j == 0:
                continue
            m = jnp.maximum(m, x[i:i + Ho, j:j + Wo, :])
    o_ref[...] = m.astype(o_ref.dtype)


def maxpool_3x3_s2(x):
    # x is post-ReLU (>= 0), so zero padding == -inf padding.
    B, H, W, C = x.shape
    xp = jnp.pad(x, ((0, 0), (1, 1), (1, 1), (0, 0)))
    Hp, Wp = H + 2, W + 2
    y = pl.pallas_call(
        _maxpool_s1_kernel,
        out_shape=jax.ShapeDtypeStruct((B, H, W, C), x.dtype),
        grid=(B,),
        in_specs=[pl.BlockSpec((pl.Squeezed(), Hp, Wp, C),
                               lambda b: (b, 0, 0, 0))],
        out_specs=pl.BlockSpec((pl.Squeezed(), H, W, C),
                               lambda b: (b, 0, 0, 0)),
        compiler_params=pltpu.CompilerParams(
            dimension_semantics=("parallel",)),
    )(xp)
    return y[:, ::2, ::2, :]          # stride-2 decimation of the stride-1 pool


# ----------------------------- head: avg-pool + FC --------------------------

def _head_kernel(x_ref, w_ref, b_ref, o_ref):
    pooled = jnp.mean(x_ref[...].astype(jnp.float32), axis=1)          # (B, C)
    o_ref[...] = (jnp.dot(pooled.astype(jnp.bfloat16), w_ref[...],
                          preferred_element_type=jnp.float32) + b_ref[...])


def avgpool_fc(x, fc_w, fc_b):
    B, H, W, C = x.shape
    n_out = fc_w.shape[1]
    Np = _ceil_to(n_out, 128)                      # lane-dense output
    w_p = jnp.pad(fc_w.astype(jnp.bfloat16), ((0, 0), (0, Np - n_out)))
    b_p = jnp.pad(fc_b.astype(jnp.float32), ((0, 0), (0, Np - n_out)))
    x3 = x.reshape(B, H * W, C)
    out = pl.pallas_call(
        _head_kernel,
        out_shape=jax.ShapeDtypeStruct((B, Np), jnp.float32),
        grid=(1,),
        in_specs=[pl.BlockSpec((B, H * W, C), lambda i: (0, 0, 0)),
                  pl.BlockSpec((C, Np), lambda i: (0, 0)),
                  pl.BlockSpec((1, Np), lambda i: (0, 0))],
        out_specs=pl.BlockSpec((B, Np), lambda i: (0, 0)),
    )(x3, w_p, b_p)
    return out[:, :n_out]


# ----------------------------- ResNet-18 ------------------------------------

def _key_stream(key):
    while True:
        key, sub = jax.random.split(key)
        yield sub


def _make_conv_mat(keys, o, c, k):
    # Weight stored pre-reshaped as (kh*kw*Cin, O) bf16 and pre-padded to
    # (ceil(K,128), ceil(O,128)) so no per-forward pad/copy of weights is needed.
    fan_in = c * k * k
    K = k * k * c
    Kp, Np = _ceil_to(K, 128), _ceil_to(o, 128)
    w = jax.random.normal(next(keys), (K, o)) / np.sqrt(fan_in)
    w = jnp.pad(w, ((0, Kp - K), (0, Np - o)))
    return w.astype(jnp.bfloat16)


def _make_bn(keys, c):
    # Eval-mode BN folded into scale/bias (deterministic synthetic stats),
    # pre-padded to the lane-dense channel width used by the conv weight.
    Np = _ceil_to(c, 128)
    gamma = 1.0 + 0.05 * jax.random.normal(next(keys), (c,))
    beta = 0.05 * jax.random.normal(next(keys), (c,))
    mean = 0.05 * jax.random.normal(next(keys), (c,))
    var = jnp.ones((c,))
    scale = gamma / jnp.sqrt(var + 1e-5)
    bias = beta - mean * scale
    scale = jnp.pad(scale.reshape(1, c), ((0, 0), (0, Np - c)))
    bias = jnp.pad(bias.reshape(1, c), ((0, 0), (0, Np - c)))
    return scale.astype(jnp.float32), bias.astype(jnp.float32)


_WIDTHS = [64, 128, 256, 512]


def make_resnet18_params(key, in_channels, out_channels):
    # TODO(synk): pretrained IMAGENET1K_V1 weights cannot be loaded in-script;
    # parameters are synthesized deterministically instead.
    keys = _key_stream(key)
    p = {'conv1_w': _make_conv_mat(keys, 64, in_channels, 7)}
    p['bn1_s'], p['bn1_b'] = _make_bn(keys, 64)
    c_in = 64
    for stage, w in enumerate(_WIDTHS):
        for blk in range(2):
            stride = 2 if (stage > 0 and blk == 0) else 1
            bp = {'conv1_w': _make_conv_mat(keys, w, c_in, 3)}
            bp['bn1_s'], bp['bn1_b'] = _make_bn(keys, w)
            bp['conv2_w'] = _make_conv_mat(keys, w, w, 3)
            bp['bn2_s'], bp['bn2_b'] = _make_bn(keys, w)
            if stride != 1 or c_in != w:
                bp['down_w'] = _make_conv_mat(keys, w, c_in, 1)
                bp['down_s'], bp['down_b'] = _make_bn(keys, w)
            p[f'layer{stage + 1}_{blk}'] = bp
            c_in = w
    p['fc_w'] = (jax.random.normal(next(keys), (512, out_channels))
                 / np.sqrt(512)).astype(jnp.bfloat16)
    p['fc_b'] = (0.05 * jax.random.normal(next(keys),
                                          (1, out_channels))).astype(jnp.float32)
    return p


def basic_block(x, bp, stride, width):
    out = conv_bn(x, bp['conv1_w'], bp['bn1_s'], bp['bn1_b'], width,
                  3, 3, stride, 1, relu=True)
    if 'down_w' in bp:
        sc = conv_bn(x, bp['down_w'], bp['down_s'], bp['down_b'], width,
                     1, 1, stride, 0, relu=False)
    else:
        sc = x
    # second conv: BN + residual add + ReLU all fused in the matmul epilogue
    return conv_bn(out, bp['conv2_w'], bp['bn2_s'], bp['bn2_b'], width,
                   3, 3, 1, 1, relu=True, residual=sc)


def resnet18_forward(x, params):
    # x: (B, H, W, Cin) NHWC  ->  logits (B, out_channels) float32
    x = x.astype(jnp.bfloat16)
    x = conv_bn(x, params['conv1_w'], params['bn1_s'], params['bn1_b'], 64,
                7, 7, 2, 3, relu=True)
    x = maxpool_3x3_s2(x)
    for stage in range(4):
        for blk in range(2):
            stride = 2 if (stage > 0 and blk == 0) else 1
            x = basic_block(x, params[f'layer{stage + 1}_{blk}'],
                            stride, _WIDTHS[stage])
    return avgpool_fc(x, params['fc_w'], params['fc_b'])


_resnet18_jit = jax.jit(resnet18_forward)


# ----------------------------- Conceiver ------------------------------------

class ConceiverPallas:
    def __init__(self, key, in_channels, seg_concept_num, global_index,
                 local_index, relationship, backbone='ResNet18'):
        if backbone != 'ResNet18':
            raise NotImplementedError()
        if not isinstance(global_index[0], list):
            global_index = [global_index]
        if not isinstance(local_index[0], list):
            local_index = [local_index]
        self.global_index = global_index
        self.local_index = local_index
        self.relationship = relationship
        self.params = {}
        keys = _key_stream(key)
        for i, g in enumerate(global_index):
            self.params[f'global_conceiver{i}'] = make_resnet18_params(
                next(keys), in_channels + seg_concept_num, len(g))
        for i, l in enumerate(local_index):
            self.params[f'local_conceiver{i}'] = make_resnet18_params(
                next(keys), in_channels + 1, len(l))

    def forward(self, x):
        image = jnp.transpose(x['image'], (0, 2, 3, 1)).astype(jnp.float32)
        assign = jnp.transpose(x['assign_mtx'], (0, 2, 3, 1)).astype(jnp.float32)
        all_index = sum(self.global_index + self.local_index, [])
        B = image.shape[0]
        concept = jnp.zeros((B, len(all_index)), jnp.float32)

        # global conceivers (input concat hoisted out of the group loop)
        if self.global_index:
            global_inp = jnp.concatenate([image, assign], axis=-1)
            for i, group in enumerate(self.global_index):
                logit = _resnet18_jit(global_inp,
                                      self.params[f'global_conceiver{i}'])
                concept = concept.at[:, np.array(group)].set(logit)

        # local conceivers: batch every concept of a group into a single forward
        for gid, group in enumerate(self.local_index):
            inputs = []
            for idx in group:
                seg_index = self.relationship[idx]
                if isinstance(seg_index, int):
                    seg_index = (seg_index,)
                seg_mask = jnp.sum(assign[..., np.array(seg_index)], axis=-1,
                                   keepdims=True)
                inputs.append(jnp.concatenate([image, seg_mask], axis=-1))
            batched = jnp.concatenate(inputs, axis=0)   # (len(group)*B, H, W, Cin+1)
            logits = _resnet18_jit(batched, self.params[f'local_conceiver{gid}'])
            for i, idx in enumerate(group):
                concept = concept.at[:, idx].set(logits[i * B:(i + 1) * B, i])

        concept_logit, concept_mask, concept_pred = self.seg_based_rule(concept, assign)
        out = dict(x)
        out['concept_logit'] = concept_logit
        out['concept_mask'] = concept_mask
        out['concept_pred'] = concept_pred
        return out

    @staticmethod
    def seg_based_rule(concept, assign_mtx):
        mask = jnp.ones_like(concept)
        return concept, mask, concept


if __name__ == "__main__":
    key = jax.random.PRNGKey(0)
    k_img, k_assign, k_param = jax.random.split(key, 3)

    B, C_img, H, W = 2, 1, 16, 16
    seg_concept_num = 4
    global_index = [[0, 1]]
    local_index = [[2, 3]]
    relationship = {2: (0,), 3: (1, 2)}

    image = jax.random.normal(k_img, (B, C_img, H, W), jnp.float32)
    assign_mtx = jax.nn.softmax(
        jax.random.normal(k_assign, (B, seg_concept_num, H, W), jnp.float32), axis=1)

    model = ConceiverPallas(k_param, C_img, seg_concept_num,
                            global_index, local_index, relationship)
    out = model.forward({'image': image, 'assign_mtx': assign_mtx})
    jax.block_until_ready((out['concept_logit'], out['concept_mask'],
                           out['concept_pred']))

    assert out['concept_logit'].shape == (B, 4)
    assert out['concept_mask'].shape == (B, 4)
    assert out['concept_pred'].shape == (B, 4)
    print("KERNEL_OK")
</pallas_src>

<mosaic_0001>
module attributes {stable_mosaic.version = 11 : i64} {
  func.func @_fused_mm_kernel(%arg0: i32, %arg1: i32, %arg2: i32, %arg3: memref<128x256xbf16, #tpu.memory_space<vmem>>, %arg4: memref<256x128xbf16, #tpu.memory_space<vmem>>, %arg5: memref<1x128xf32, #tpu.memory_space<vmem>>, %arg6: memref<1x128xf32, #tpu.memory_space<vmem>>, %arg7: memref<128x128xbf16, #tpu.memory_space<vmem>>, %arg8: memref<128x128xf32, #tpu.memory_space<vmem>>) attributes {dimension_semantics = [#tpu.dimension_semantics<parallel>, #tpu.dimension_semantics<parallel>, #tpu.dimension_semantics<arbitrary>], iteration_bounds = array<i64: 1, 1, 1>, scalar_prefetch = 0 : i64, scratch_operands = 1 : i64, tpu.core_type = #tpu.core_type<tc>, window_params = [{transform_indices = @transform_0, window_bounds = array<i64: 128, 256>}, {transform_indices = @transform_1, window_bounds = array<i64: 256, 128>}, {transform_indices = @transform_2, window_bounds = array<i64: 1, 128>}, {transform_indices = @transform_3, window_bounds = array<i64: 1, 128>}, {transform_indices = @transform_4, window_bounds = array<i64: 128, 128>}]} {
    %c0_i32 = arith.constant 0 : i32
    %0 = arith.cmpi eq, %arg2, %c0_i32 : i32
    %1 = arith.extui %0 : i1 to i32
    %c0_i32_0 = arith.constant 0 : i32
    %2 = arith.cmpi ne, %1, %c0_i32_0 : i32
    scf.if %2 {
      %cst_10 = arith.constant 0.000000e+00 : f32
      %12 = vector.broadcast %cst_10 : f32 to vector<128x128xf32>
      %c0_11 = arith.constant 0 : index
      %c0_12 = arith.constant 0 : index
      %13 = vector.load %arg8[%c0_11, %c0_12] : memref<128x128xf32, #tpu.memory_space<vmem>>, vector<128x128xf32>
      tpu.vector_store %arg8[%c0_11, %c0_12], %12 {strides = array<i32>} : memref<128x128xf32, #tpu.memory_space<vmem>>, vector<128x128xf32>,
    } else {
    }
    %c0 = arith.constant 0 : index
    %c0_1 = arith.constant 0 : index
    %3 = vector.load %arg8[%c0, %c0_1] : memref<128x128xf32, #tpu.memory_space<vmem>>, vector<128x128xf32>
    %c0_2 = arith.constant 0 : index
    %c0_3 = arith.constant 0 : index
    %4 = vector.load %arg3[%c0_2, %c0_3] : memref<128x256xbf16, #tpu.memory_space<vmem>>, vector<128x256xbf16>
    %c0_4 = arith.constant 0 : index
    %c0_5 = arith.constant 0 : index
    %5 = vector.load %arg4[%c0_4, %c0_5] : memref<256x128xbf16, #tpu.memory_space<vmem>>, vector<256x128xbf16>
    %cst = arith.constant dense<0.000000e+00> : vector<128x128xf32>
    %6 = tpu.matmul %4, %5, %cst {dimension_numbers = #tpu.dot_dimension_numbers<[1], [0], [0], [1], [0, 0, 1, 1], [], []>} : vector<128x256xbf16>, vector<256x128xbf16>, vector<128x128xf32> -> vector<128x128xf32>
    %7 = arith.addf %3, %6 : vector<128x128xf32>
    %c0_6 = arith.constant 0 : index
    %c0_7 = arith.constant 0 : index
    %8 = vector.load %arg8[%c0_6, %c0_7] : memref<128x128xf32, #tpu.memory_space<vmem>>, vector<128x128xf32>
    tpu.vector_store %arg8[%c0_6, %c0_7], %7 {strides = array<i32>} : memref<128x128xf32, #tpu.memory_space<vmem>>, vector<128x128xf32>,
    %c0_i32_8 = arith.constant 0 : i32
    %9 = arith.cmpi eq, %arg2, %c0_i32_8 : i32
    %10 = arith.extui %9 : i1 to i32
    %c0_i32_9 = arith.constant 0 : i32
    %11 = arith.cmpi ne, %10, %c0_i32_9 : i32
    scf.if %11 {
      %c0_10 = arith.constant 0 : index
      %c0_11 = arith.constant 0 : index
      %12 = vector.load %arg8[%c0_10, %c0_11] : memref<128x128xf32, #tpu.memory_space<vmem>>, vector<128x128xf32>
      %c0_12 = arith.constant 0 : index
      %c0_13 = arith.constant 0 : index
      %13 = vector.load %arg5[%c0_12, %c0_13] : memref<1x128xf32, #tpu.memory_space<vmem>>, vector<1x128xf32>
      %14 = vector.broadcast %13 : vector<1x128xf32> to vector<128x128xf32>
      %15 = arith.mulf %12, %14 : vector<128x128xf32>
      %c0_14 = arith.constant 0 : index
      %c0_15 = arith.constant 0 : index
      %16 = vector.load %arg6[%c0_14, %c0_15] : memref<1x128xf32, #tpu.memory_space<vmem>>, vector<1x128xf32>
      %17 = vector.broadcast %16 : vector<1x128xf32> to vector<128x128xf32>
      %18 = arith.addf %15, %17 : vector<128x128xf32>
      %cst_16 = arith.constant 0.000000e+00 : f32
      %19 = vector.broadcast %cst_16 : f32 to vector<128x128xf32>
      %20 = arith.maximumf %18, %19 : vector<128x128xf32>
      %21 = arith.truncf %20 : vector<128x128xf32> to vector<128x128xbf16>
      %c0_17 = arith.constant 0 : index
      %c0_18 = arith.constant 0 : index
      %22 = vector.load %arg7[%c0_17, %c0_18] : memref<128x128xbf16, #tpu.memory_space<vmem>>, vector<128x128xbf16>
      tpu.vector_store %arg7[%c0_17, %c0_18], %21 {strides = array<i32>} : memref<128x128xbf16, #tpu.memory_space<vmem>>, vector<128x128xbf16>,
    } else {
    }
    return
  }
  func.func @transform_0(%arg0: i32, %arg1: i32, %arg2: i32) -> (i32, i32) {
    %c0_i32 = arith.constant 0 : i32
    return %arg0, %arg2 : i32, i32
  }
  func.func @transform_1(%arg0: i32, %arg1: i32, %arg2: i32) -> (i32, i32) {
    %c0_i32 = arith.constant 0 : i32
    return %arg2, %arg1 : i32, i32
  }
  func.func @transform_2(%arg0: i32, %arg1: i32, %arg2: i32) -> (i32, i32) {
    %c0_i32 = arith.constant 0 : i32
    %c0_i32_0 = arith.constant 0 : i32
    return %c0_i32, %arg1 : i32, i32
  }
  func.func @transform_3(%arg0: i32, %arg1: i32, %arg2: i32) -> (i32, i32) {
    %c0_i32 = arith.constant 0 : i32
    %c0_i32_0 = arith.constant 0 : i32
    return %c0_i32, %arg1 : i32, i32
  }
  func.func @transform_4(%arg0: i32, %arg1: i32, %arg2: i32) -> (i32, i32) {
    %c0_i32 = arith.constant 0 : i32
    return %arg0, %arg1 : i32, i32
  }
}

module attributes {stable_mosaic.version = 11 : i64} {
  func.func @_maxpool_s1_kernel(%arg0: i32, %arg1: memref<1x10x10x64xbf16, #tpu.memory_space<vmem>>, %arg2: memref<1x8x8x64xbf16, #tpu.memory_space<vmem>>) attributes {dimension_semantics = [#tpu.dimension_semantics<parallel>], iteration_bounds = array<i64: 2>, scalar_prefetch = 0 : i64, scratch_operands = 0 : i64, tpu.core_type = #tpu.core_type<tc>, window_params = [{transform_indices = @transform_0, window_bounds = array<i64: 1, 10, 10, 64>}, {transform_indices = @transform_1, window_bounds = array<i64: 1, 8, 8, 64>}]} {
    %c0 = arith.constant 0 : index
    %c0_0 = arith.constant 0 : index
    %c0_1 = arith.constant 0 : index
    %c0_2 = arith.constant 0 : index
    %0 = vector.load %arg1[%c0, %c0_0, %c0_1, %c0_2] : memref<1x10x10x64xbf16, #tpu.memory_space<vmem>>, vector<1x10x10x64xbf16>
    %1 = vector.shape_cast %0 : vector<1x10x10x64xbf16> to vector<10x10x64xbf16>
    %2 = arith.extf %1 : vector<10x10x64xbf16> to vector<10x10x64xf32>
    %3 = vector.extract_strided_slice %2 {offsets = [0, 0, 0], sizes = [8, 8, 64], strides = [1, 1, 1]} : vector<10x10x64xf32> to vector<8x8x64xf32>
    %4 = vector.extract_strided_slice %2 {offsets = [0, 1, 0], sizes = [8, 8, 64], strides = [1, 1, 1]} : vector<10x10x64xf32> to vector<8x8x64xf32>
    %5 = arith.maximumf %3, %4 : vector<8x8x64xf32>
    %6 = vector.extract_strided_slice %2 {offsets = [0, 2, 0], sizes = [8, 8, 64], strides = [1, 1, 1]} : vector<10x10x64xf32> to vector<8x8x64xf32>
    %7 = arith.maximumf %5, %6 : vector<8x8x64xf32>
    %8 = vector.extract_strided_slice %2 {offsets = [1, 0, 0], sizes = [8, 8, 64], strides = [1, 1, 1]} : vector<10x10x64xf32> to vector<8x8x64xf32>
    %9 = arith.maximumf %7, %8 : vector<8x8x64xf32>
    %10 = vector.extract_strided_slice %2 {offsets = [1, 1, 0], sizes = [8, 8, 64], strides = [1, 1, 1]} : vector<10x10x64xf32> to vector<8x8x64xf32>
    %11 = arith.maximumf %9, %10 : vector<8x8x64xf32>
    %12 = vector.extract_strided_slice %2 {offsets = [1, 2, 0], sizes = [8, 8, 64], strides = [1, 1, 1]} : vector<10x10x64xf32> to vector<8x8x64xf32>
    %13 = arith.maximumf %11, %12 : vector<8x8x64xf32>
    %14 = vector.extract_strided_slice %2 {offsets = [2, 0, 0], sizes = [8, 8, 64], strides = [1, 1, 1]} : vector<10x10x64xf32> to vector<8x8x64xf32>
    %15 = arith.maximumf %13, %14 : vector<8x8x64xf32>
    %16 = vector.extract_strided_slice %2 {offsets = [2, 1, 0], sizes = [8, 8, 64], strides = [1, 1, 1]} : vector<10x10x64xf32> to vector<8x8x64xf32>
    %17 = arith.maximumf %15, %16 : vector<8x8x64xf32>
    %18 = vector.extract_strided_slice %2 {offsets = [2, 2, 0], sizes = [8, 8, 64], strides = [1, 1, 1]} : vector<10x10x64xf32> to vector<8x8x64xf32>
    %19 = arith.maximumf %17, %18 : vector<8x8x64xf32>
    %20 = arith.truncf %19 : vector<8x8x64xf32> to vector<8x8x64xbf16>
    %c0_3 = arith.constant 0 : index
    %c0_4 = arith.constant 0 : index
    %c0_5 = arith.constant 0 : index
    %c0_6 = arith.constant 0 : index
    %21 = vector.load %arg2[%c0_3, %c0_4, %c0_5, %c0_6] : memref<1x8x8x64xbf16, #tpu.memory_space<vmem>>, vector<1x8x8x64xbf16>
    %22 = vector.shape_cast %21 : vector<1x8x8x64xbf16> to vector<8x8x64xbf16>
    %23 = vector.shape_cast %20 : vector<8x8x64xbf16> to vector<1x8x8x64xbf16>
    tpu.vector_store %arg2[%c0_3, %c0_4, %c0_5, %c0_6], %23 {strides = array<i32>} : memref<1x8x8x64xbf16, #tpu.memory_space<vmem>>, vector<1x8x8x64xbf16>,
    return
  }
  func.func @transform_0(%arg0: i32) -> (i32, i32, i32, i32) {
    %c0_i32 = arith.constant 0 : i32
    %c0_i32_0 = arith.constant 0 : i32
    %c0_i32_1 = arith.constant 0 : i32
    %c0_i32_2 = arith.constant 0 : i32
    return %arg0, %c0_i32, %c0_i32_0, %c0_i32_1 : i32, i32, i32, i32
  }
  func.func @transform_1(%arg0: i32) -> (i32, i32, i32, i32) {
    %c0_i32 = arith.constant 0 : i32
    %c0_i32_0 = arith.constant 0 : i32
    %c0_i32_1 = arith.constant 0 : i32
    %c0_i32_2 = arith.constant 0 : i32
    return %arg0, %c0_i32, %c0_i32_0, %c0_i32_1 : i32, i32, i32, i32
  }
}

module attributes {stable_mosaic.version = 11 : i64} {
  func.func @_fused_mm_kernel(%arg0: i32, %arg1: i32, %arg2: i32, %arg3: memref<32x128xbf16, #tpu.memory_space<vmem>>, %arg4: memref<128x128xbf16, #tpu.memory_space<vmem>>, %arg5: memref<1x128xf32, #tpu.memory_space<vmem>>, %arg6: memref<1x128xf32, #tpu.memory_space<vmem>>, %arg7: memref<32x128xbf16, #tpu.memory_space<vmem>>, %arg8: memref<32x128xbf16, #tpu.memory_space<vmem>>, %arg9: memref<32x128xf32, #tpu.memory_space<vmem>>) attributes {dimension_semantics = [#tpu.dimension_semantics<parallel>, #tpu.dimension_semantics<parallel>, #tpu.dimension_semantics<arbitrary>], iteration_bounds = array<i64: 1, 1, 5>, scalar_prefetch = 0 : i64, scratch_operands = 1 : i64, tpu.core_type = #tpu.core_type<tc>, window_params = [{transform_indices = @transform_0, window_bounds = array<i64: 32, 128>}, {transform_indices = @transform_1, window_bounds = array<i64: 128, 128>}, {transform_indices = @transform_2, window_bounds = array<i64: 1, 128>}, {transform_indices = @transform_3, window_bounds = array<i64: 1, 128>}, {transform_indices = @transform_4, window_bounds = array<i64: 32, 128>}, {transform_indices = @transform_5, window_bounds = array<i64: 32, 128>}]} {
    %c0_i32 = arith.constant 0 : i32
    %0 = arith.cmpi eq, %arg2, %c0_i32 : i32
    %1 = arith.extui %0 : i1 to i32
    %c0_i32_0 = arith.constant 0 : i32
    %2 = arith.cmpi ne, %1, %c0_i32_0 : i32
    scf.if %2 {
      %cst_9 = arith.constant 0.000000e+00 : f32
      %12 = vector.broadcast %cst_9 : f32 to vector<32x128xf32>
      %c0_10 = arith.constant 0 : index
      %c0_11 = arith.constant 0 : index
      %13 = vector.load %arg9[%c0_10, %c0_11] : memref<32x128xf32, #tpu.memory_space<vmem>>, vector<32x128xf32>
      tpu.vector_store %arg9[%c0_10, %c0_11], %12 {strides = array<i32>} : memref<32x128xf32, #tpu.memory_space<vmem>>, vector<32x128xf32>,
    } else {
    }
    %c0 = arith.constant 0 : index
    %c0_1 = arith.constant 0 : index
    %3 = vector.load %arg9[%c0, %c0_1] : memref<32x128xf32, #tpu.memory_space<vmem>>, vector<32x128xf32>
    %c0_2 = arith.constant 0 : index
    %c0_3 = arith.constant 0 : index
    %4 = vector.load %arg3[%c0_2, %c0_3] : memref<32x128xbf16, #tpu.memory_space<vmem>>, vector<32x128xbf16>
    %c0_4 = arith.constant 0 : index
    %c0_5 = arith.constant 0 : index
    %5 = vector.load %arg4[%c0_4, %c0_5] : memref<128x128xbf16, #tpu.memory_space<vmem>>, vector<128x128xbf16>
    %cst = arith.constant dense<0.000000e+00> : vector<32x128xf32>
    %6 = tpu.matmul %4, %5, %cst {dimension_numbers = #tpu.dot_dimension_numbers<[1], [0], [0], [1], [0, 0, 1, 1], [], []>} : vector<32x128xbf16>, vector<128x128xbf16>, vector<32x128xf32> -> vector<32x128xf32>
    %7 = arith.addf %3, %6 : vector<32x128xf32>
    %c0_6 = arith.constant 0 : index
    %c0_7 = arith.constant 0 : index
    %8 = vector.load %arg9[%c0_6, %c0_7] : memref<32x128xf32, #tpu.memory_space<vmem>>, vector<32x128xf32>
    tpu.vector_store %arg9[%c0_6, %c0_7], %7 {strides = array<i32>} : memref<32x128xf32, #tpu.memory_space<vmem>>, vector<32x128xf32>,
    %c4_i32 = arith.constant 4 : i32
    %9 = arith.cmpi eq, %arg2, %c4_i32 : i32
    %10 = arith.extui %9 : i1 to i32
    %c0_i32_8 = arith.constant 0 : i32
    %11 = arith.cmpi ne, %10, %c0_i32_8 : i32
    scf.if %11 {
      %c0_9 = arith.constant 0 : index
      %c0_10 = arith.constant 0 : index
      %12 = vector.load %arg9[%c0_9, %c0_10] : memref<32x128xf32, #tpu.memory_space<vmem>>, vector<32x128xf32>
      %c0_11 = arith.constant 0 : index
      %c0_12 = arith.constant 0 : index
      %13 = vector.load %arg5[%c0_11, %c0_12] : memref<1x128xf32, #tpu.memory_space<vmem>>, vector<1x128xf32>
      %14 = vector.broadcast %13 : vector<1x128xf32> to vector<32x128xf32>
      %15 = arith.mulf %12, %14 : vector<32x128xf32>
      %c0_13 = arith.constant 0 : index
      %c0_14 = arith.constant 0 : index
      %16 = vector.load %arg6[%c0_13, %c0_14] : memref<1x128xf32, #tpu.memory_space<vmem>>, vector<1x128xf32>
      %17 = vector.broadcast %16 : vector<1x128xf32> to vector<32x128xf32>
      %18 = arith.addf %15, %17 : vector<32x128xf32>
      %c0_15 = arith.constant 0 : index
      %c0_16 = arith.constant 0 : index
      %19 = vector.load %arg7[%c0_15, %c0_16] : memref<32x128xbf16, #tpu.memory_space<vmem>>, vector<32x128xbf16>
      %20 = arith.extf %19 : vector<32x128xbf16> to vector<32x128xf32>
      %21 = arith.addf %18, %20 : vector<32x128xf32>
      %cst_17 = arith.constant 0.000000e+00 : f32
      %22 = vector.broadcast %cst_17 : f32 to vector<32x128xf32>
      %23 = arith.maximumf %21, %22 : vector<32x128xf32>
      %24 = arith.truncf %23 : vector<32x128xf32> to vector<32x128xbf16>
      %c0_18 = arith.constant 0 : index
      %c0_19 = arith.constant 0 : index
      %25 = vector.load %arg8[%c0_18, %c0_19] : memref<32x128xbf16, #tpu.memory_space<vmem>>, vector<32x128xbf16>
      tpu.vector_store %arg8[%c0_18, %c0_19], %24 {strides = array<i32>} : memref<32x128xbf16, #tpu.memory_space<vmem>>, vector<32x128xbf16>,
    } else {
    }
    return
  }
  func.func @transform_0(%arg0: i32, %arg1: i32, %arg2: i32) -> (i32, i32) {
    %c0_i32 = arith.constant 0 : i32
    return %arg0, %arg2 : i32, i32
  }
  func.func @transform_1(%arg0: i32, %arg1: i32, %arg2: i32) -> (i32, i32) {
    %c0_i32 = arith.constant 0 : i32
    return %arg2, %arg1 : i32, i32
  }
  func.func @transform_2(%arg0: i32, %arg1: i32, %arg2: i32) -> (i32, i32) {
    %c0_i32 = arith.constant 0 : i32
    %c0_i32_0 = arith.constant 0 : i32
    return %c0_i32, %arg1 : i32, i32
  }
  func.func @transform_3(%arg0: i32, %arg1: i32, %arg2: i32) -> (i32, i32) {
    %c0_i32 = arith.constant 0 : i32
    %c0_i32_0 = arith.constant 0 : i32
    return %c0_i32, %arg1 : i32, i32
  }
  func.func @transform_4(%arg0: i32, %arg1: i32, %arg2: i32) -> (i32, i32) {
    %c0_i32 = arith.constant 0 : i32
    return %arg0, %arg1 : i32, i32
  }
  func.func @transform_5(%arg0: i32, %arg1: i32, %arg2: i32) -> (i32, i32) {
    %c0_i32 = arith.constant 0 : i32
    return %arg0, %arg1 : i32, i32
  }
}

module attributes {stable_mosaic.version = 11 : i64} {
  func.func @_fused_mm_kernel(%arg0: i32, %arg1: i32, %arg2: i32, %arg3: memref<32x128xbf16, #tpu.memory_space<vmem>>, %arg4: memref<128x128xbf16, #tpu.memory_space<vmem>>, %arg5: memref<1x128xf32, #tpu.memory_space<vmem>>, %arg6: memref<1x128xf32, #tpu.memory_space<vmem>>, %arg7: memref<32x128xbf16, #tpu.memory_space<vmem>>, %arg8: memref<32x128xf32, #tpu.memory_space<vmem>>) attributes {dimension_semantics = [#tpu.dimension_semantics<parallel>, #tpu.dimension_semantics<parallel>, #tpu.dimension_semantics<arbitrary>], iteration_bounds = array<i64: 1, 1, 5>, scalar_prefetch = 0 : i64, scratch_operands = 1 : i64, tpu.core_type = #tpu.core_type<tc>, window_params = [{transform_indices = @transform_0, window_bounds = array<i64: 32, 128>}, {transform_indices = @transform_1, window_bounds = array<i64: 128, 128>}, {transform_indices = @transform_2, window_bounds = array<i64: 1, 128>}, {transform_indices = @transform_3, window_bounds = array<i64: 1, 128>}, {transform_indices = @transform_4, window_bounds = array<i64: 32, 128>}]} {
    %c0_i32 = arith.constant 0 : i32
    %0 = arith.cmpi eq, %arg2, %c0_i32 : i32
    %1 = arith.extui %0 : i1 to i32
    %c0_i32_0 = arith.constant 0 : i32
    %2 = arith.cmpi ne, %1, %c0_i32_0 : i32
    scf.if %2 {
      %cst_9 = arith.constant 0.000000e+00 : f32
      %12 = vector.broadcast %cst_9 : f32 to vector<32x128xf32>
      %c0_10 = arith.constant 0 : index
      %c0_11 = arith.constant 0 : index
      %13 = vector.load %arg8[%c0_10, %c0_11] : memref<32x128xf32, #tpu.memory_space<vmem>>, vector<32x128xf32>
      tpu.vector_store %arg8[%c0_10, %c0_11], %12 {strides = array<i32>} : memref<32x128xf32, #tpu.memory_space<vmem>>, vector<32x128xf32>,
    } else {
    }
    %c0 = arith.constant 0 : index
    %c0_1 = arith.constant 0 : index
    %3 = vector.load %arg8[%c0, %c0_1] : memref<32x128xf32, #tpu.memory_space<vmem>>, vector<32x128xf32>
    %c0_2 = arith.constant 0 : index
    %c0_3 = arith.constant 0 : index
    %4 = vector.load %arg3[%c0_2, %c0_3] : memref<32x128xbf16, #tpu.memory_space<vmem>>, vector<32x128xbf16>
    %c0_4 = arith.constant 0 : index
    %c0_5 = arith.constant 0 : index
    %5 = vector.load %arg4[%c0_4, %c0_5] : memref<128x128xbf16, #tpu.memory_space<vmem>>, vector<128x128xbf16>
    %cst = arith.constant dense<0.000000e+00> : vector<32x128xf32>
    %6 = tpu.matmul %4, %5, %cst {dimension_numbers = #tpu.dot_dimension_numbers<[1], [0], [0], [1], [0, 0, 1, 1], [], []>} : vector<32x128xbf16>, vector<128x128xbf16>, vector<32x128xf32> -> vector<32x128xf32>
    %7 = arith.addf %3, %6 : vector<32x128xf32>
    %c0_6 = arith.constant 0 : index
    %c0_7 = arith.constant 0 : index
    %8 = vector.load %arg8[%c0_6, %c0_7] : memref<32x128xf32, #tpu.memory_space<vmem>>, vector<32x128xf32>
    tpu.vector_store %arg8[%c0_6, %c0_7], %7 {strides = array<i32>} : memref<32x128xf32, #tpu.memory_space<vmem>>, vector<32x128xf32>,
    %c4_i32 = arith.constant 4 : i32
    %9 = arith.cmpi eq, %arg2, %c4_i32 : i32
    %10 = arith.extui %9 : i1 to i32
    %c0_i32_8 = arith.constant 0 : i32
    %11 = arith.cmpi ne, %10, %c0_i32_8 : i32
    scf.if %11 {
      %c0_9 = arith.constant 0 : index
      %c0_10 = arith.constant 0 : index
      %12 = vector.load %arg8[%c0_9, %c0_10] : memref<32x128xf32, #tpu.memory_space<vmem>>, vector<32x128xf32>
      %c0_11 = arith.constant 0 : index
      %c0_12 = arith.constant 0 : index
      %13 = vector.load %arg5[%c0_11, %c0_12] : memref<1x128xf32, #tpu.memory_space<vmem>>, vector<1x128xf32>
      %14 = vector.broadcast %13 : vector<1x128xf32> to vector<32x128xf32>
      %15 = arith.mulf %12, %14 : vector<32x128xf32>
      %c0_13 = arith.constant 0 : index
      %c0_14 = arith.constant 0 : index
      %16 = vector.load %arg6[%c0_13, %c0_14] : memref<1x128xf32, #tpu.memory_space<vmem>>, vector<1x128xf32>
      %17 = vector.broadcast %16 : vector<1x128xf32> to vector<32x128xf32>
      %18 = arith.addf %15, %17 : vector<32x128xf32>
      %cst_15 = arith.constant 0.000000e+00 : f32
      %19 = vector.broadcast %cst_15 : f32 to vector<32x128xf32>
      %20 = arith.maximumf %18, %19 : vector<32x128xf32>
      %21 = arith.truncf %20 : vector<32x128xf32> to vector<32x128xbf16>
      %c0_16 = arith.constant 0 : index
      %c0_17 = arith.constant 0 : index
      %22 = vector.load %arg7[%c0_16, %c0_17] : memref<32x128xbf16, #tpu.memory_space<vmem>>, vector<32x128xbf16>
      tpu.vector_store %arg7[%c0_16, %c0_17], %21 {strides = array<i32>} : memref<32x128xbf16, #tpu.memory_space<vmem>>, vector<32x128xbf16>,
    } else {
    }
    return
  }
  func.func @transform_0(%arg0: i32, %arg1: i32, %arg2: i32) -> (i32, i32) {
    %c0_i32 = arith.constant 0 : i32
    return %arg0, %arg2 : i32, i32
  }
  func.func @transform_1(%arg0: i32, %arg1: i32, %arg2: i32) -> (i32, i32) {
    %c0_i32 = arith.constant 0 : i32
    return %arg2, %arg1 : i32, i32
  }
  func.func @transform_2(%arg0: i32, %arg1: i32, %arg2: i32) -> (i32, i32) {
    %c0_i32 = arith.constant 0 : i32
    %c0_i32_0 = arith.constant 0 : i32
    return %c0_i32, %arg1 : i32, i32
  }
  func.func @transform_3(%arg0: i32, %arg1: i32, %arg2: i32) -> (i32, i32) {
    %c0_i32 = arith.constant 0 : i32
    %c0_i32_0 = arith.constant 0 : i32
    return %c0_i32, %arg1 : i32, i32
  }
  func.func @transform_4(%arg0: i32, %arg1: i32, %arg2: i32) -> (i32, i32) {
    %c0_i32 = arith.constant 0 : i32
    return %arg0, %arg1 : i32, i32
  }
}

module attributes {stable_mosaic.version = 11 : i64} {
  func.func @_fused_mm_kernel(%arg0: i32, %arg1: i32, %arg2: i32, %arg3: memref<8x128xbf16, #tpu.memory_space<vmem>>, %arg4: memref<128x128xbf16, #tpu.memory_space<vmem>>, %arg5: memref<1x128xf32, #tpu.memory_space<vmem>>, %arg6: memref<1x128xf32, #tpu.memory_space<vmem>>, %arg7: memref<8x128xbf16, #tpu.memory_space<vmem>>, %arg8: memref<8x128xf32, #tpu.memory_space<vmem>>) attributes {dimension_semantics = [#tpu.dimension_semantics<parallel>, #tpu.dimension_semantics<parallel>, #tpu.dimension_semantics<arbitrary>], iteration_bounds = array<i64: 1, 1, 5>, scalar_prefetch = 0 : i64, scratch_operands = 1 : i64, tpu.core_type = #tpu.core_type<tc>, window_params = [{transform_indices = @transform_0, window_bounds = array<i64: 8, 128>}, {transform_indices = @transform_1, window_bounds = array<i64: 128, 128>}, {transform_indices = @transform_2, window_bounds = array<i64: 1, 128>}, {transform_indices = @transform_3, window_bounds = array<i64: 1, 128>}, {transform_indices = @transform_4, window_bounds = array<i64: 8, 128>}]} {
    %c0_i32 = arith.constant 0 : i32
    %0 = arith.cmpi eq, %arg2, %c0_i32 : i32
    %1 = arith.extui %0 : i1 to i32
    %c0_i32_0 = arith.constant 0 : i32
    %2 = arith.cmpi ne, %1, %c0_i32_0 : i32
    scf.if %2 {
      %cst_9 = arith.constant 0.000000e+00 : f32
      %12 = vector.broadcast %cst_9 : f32 to vector<8x128xf32>
      %c0_10 = arith.constant 0 : index
      %c0_11 = arith.constant 0 : index
      %13 = vector.load %arg8[%c0_10, %c0_11] : memref<8x128xf32, #tpu.memory_space<vmem>>, vector<8x128xf32>
      tpu.vector_store %arg8[%c0_10, %c0_11], %12 {strides = array<i32>} : memref<8x128xf32, #tpu.memory_space<vmem>>, vector<8x128xf32>,
    } else {
    }
    %c0 = arith.constant 0 : index
    %c0_1 = arith.constant 0 : index
    %3 = vector.load %arg8[%c0, %c0_1] : memref<8x128xf32, #tpu.memory_space<vmem>>, vector<8x128xf32>
    %c0_2 = arith.constant 0 : index
    %c0_3 = arith.constant 0 : index
    %4 = vector.load %arg3[%c0_2, %c0_3] : memref<8x128xbf16, #tpu.memory_space<vmem>>, vector<8x128xbf16>
    %c0_4 = arith.constant 0 : index
    %c0_5 = arith.constant 0 : index
    %5 = vector.load %arg4[%c0_4, %c0_5] : memref<128x128xbf16, #tpu.memory_space<vmem>>, vector<128x128xbf16>
    %cst = arith.constant dense<0.000000e+00> : vector<8x128xf32>
    %6 = tpu.matmul %4, %5, %cst {dimension_numbers = #tpu.dot_dimension_numbers<[1], [0], [0], [1], [0, 0, 1, 1], [], []>} : vector<8x128xbf16>, vector<128x128xbf16>, vector<8x128xf32> -> vector<8x128xf32>
    %7 = arith.addf %3, %6 : vector<8x128xf32>
    %c0_6 = arith.constant 0 : index
    %c0_7 = arith.constant 0 : index
    %8 = vector.load %arg8[%c0_6, %c0_7] : memref<8x128xf32, #tpu.memory_space<vmem>>, vector<8x128xf32>
    tpu.vector_store %arg8[%c0_6, %c0_7], %7 {strides = array<i32>} : memref<8x128xf32, #tpu.memory_space<vmem>>, vector<8x128xf32>,
    %c4_i32 = arith.constant 4 : i32
    %9 = arith.cmpi eq, %arg2, %c4_i32 : i32
    %10 = arith.extui %9 : i1 to i32
    %c0_i32_8 = arith.constant 0 : i32
    %11 = arith.cmpi ne, %10, %c0_i32_8 : i32
    scf.if %11 {
      %c0_9 = arith.constant 0 : index
      %c0_10 = arith.constant 0 : index
      %12 = vector.load %arg8[%c0_9, %c0_10] : memref<8x128xf32, #tpu.memory_space<vmem>>, vector<8x128xf32>
      %c0_11 = arith.constant 0 : index
      %c0_12 = arith.constant 0 : index
      %13 = vector.load %arg5[%c0_11, %c0_12] : memref<1x128xf32, #tpu.memory_space<vmem>>, vector<1x128xf32>
      %14 = vector.broadcast %13 : vector<1x128xf32> to vector<8x128xf32>
      %15 = arith.mulf %12, %14 : vector<8x128xf32>
      %c0_13 = arith.constant 0 : index
      %c0_14 = arith.constant 0 : index
      %16 = vector.load %arg6[%c0_13, %c0_14] : memref<1x128xf32, #tpu.memory_space<vmem>>, vector<1x128xf32>
      %17 = vector.broadcast %16 : vector<1x128xf32> to vector<8x128xf32>
      %18 = arith.addf %15, %17 : vector<8x128xf32>
      %cst_15 = arith.constant 0.000000e+00 : f32
      %19 = vector.broadcast %cst_15 : f32 to vector<8x128xf32>
      %20 = arith.maximumf %18, %19 : vector<8x128xf32>
      %21 = arith.truncf %20 : vector<8x128xf32> to vector<8x128xbf16>
      %c0_16 = arith.constant 0 : index
      %c0_17 = arith.constant 0 : index
      %22 = vector.load %arg7[%c0_16, %c0_17] : memref<8x128xbf16, #tpu.memory_space<vmem>>, vector<8x128xbf16>
      tpu.vector_store %arg7[%c0_16, %c0_17], %21 {strides = array<i32>} : memref<8x128xbf16, #tpu.memory_space<vmem>>, vector<8x128xbf16>,
    } else {
    }
    return
  }
  func.func @transform_0(%arg0: i32, %arg1: i32, %arg2: i32) -> (i32, i32) {
    %c0_i32 = arith.constant 0 : i32
    return %arg0, %arg2 : i32, i32
  }
  func.func @transform_1(%arg0: i32, %arg1: i32, %arg2: i32) -> (i32, i32) {
    %c0_i32 = arith.constant 0 : i32
    return %arg2, %arg1 : i32, i32
  }
  func.func @transform_2(%arg0: i32, %arg1: i32, %arg2: i32) -> (i32, i32) {
    %c0_i32 = arith.constant 0 : i32
    %c0_i32_0 = arith.constant 0 : i32
    return %c0_i32, %arg1 : i32, i32
  }
  func.func @transform_3(%arg0: i32, %arg1: i32, %arg2: i32) -> (i32, i32) {
    %c0_i32 = arith.constant 0 : i32
    %c0_i32_0 = arith.constant 0 : i32
    return %c0_i32, %arg1 : i32, i32
  }
  func.func @transform_4(%arg0: i32, %arg1: i32, %arg2: i32) -> (i32, i32) {
    %c0_i32 = arith.constant 0 : i32
    return %arg0, %arg1 : i32, i32
  }
}

module attributes {stable_mosaic.version = 11 : i64} {
  func.func @_fused_mm_kernel(%arg0: i32, %arg1: i32, %arg2: i32, %arg3: memref<8x384xbf16, #tpu.memory_space<vmem>>, %arg4: memref<384x128xbf16, #tpu.memory_space<vmem>>, %arg5: memref<1x128xf32, #tpu.memory_space<vmem>>, %arg6: memref<1x128xf32, #tpu.memory_space<vmem>>, %arg7: memref<8x128xbf16, #tpu.memory_space<vmem>>, %arg8: memref<8x128xbf16, #tpu.memory_space<vmem>>, %arg9: memref<8x128xf32, #tpu.memory_space<vmem>>) attributes {dimension_semantics = [#tpu.dimension_semantics<parallel>, #tpu.dimension_semantics<parallel>, #tpu.dimension_semantics<arbitrary>], iteration_bounds = array<i64: 1, 1, 3>, scalar_prefetch = 0 : i64, scratch_operands = 1 : i64, tpu.core_type = #tpu.core_type<tc>, window_params = [{transform_indices = @transform_0, window_bounds = array<i64: 8, 384>}, {transform_indices = @transform_1, window_bounds = array<i64: 384, 128>}, {transform_indices = @transform_2, window_bounds = array<i64: 1, 128>}, {transform_indices = @transform_3, window_bounds = array<i64: 1, 128>}, {transform_indices = @transform_4, window_bounds = array<i64: 8, 128>}, {transform_indices = @transform_5, window_bounds = array<i64: 8, 128>}]} {
    %c0_i32 = arith.constant 0 : i32
    %0 = arith.cmpi eq, %arg2, %c0_i32 : i32
    %1 = arith.extui %0 : i1 to i32
    %c0_i32_0 = arith.constant 0 : i32
    %2 = arith.cmpi ne, %1, %c0_i32_0 : i32
    scf.if %2 {
      %cst_9 = arith.constant 0.000000e+00 : f32
      %12 = vector.broadcast %cst_9 : f32 to vector<8x128xf32>
      %c0_10 = arith.constant 0 : index
      %c0_11 = arith.constant 0 : index
      %13 = vector.load %arg9[%c0_10, %c0_11] : memref<8x128xf32, #tpu.memory_space<vmem>>, vector<8x128xf32>
      tpu.vector_store %arg9[%c0_10, %c0_11], %12 {strides = array<i32>} : memref<8x128xf32, #tpu.memory_space<vmem>>, vector<8x128xf32>,
    } else {
    }
    %c0 = arith.constant 0 : index
    %c0_1 = arith.constant 0 : index
    %3 = vector.load %arg9[%c0, %c0_1] : memref<8x128xf32, #tpu.memory_space<vmem>>, vector<8x128xf32>
    %c0_2 = arith.constant 0 : index
    %c0_3 = arith.constant 0 : index
    %4 = vector.load %arg3[%c0_2, %c0_3] : memref<8x384xbf16, #tpu.memory_space<vmem>>, vector<8x384xbf16>
    %c0_4 = arith.constant 0 : index
    %c0_5 = arith.constant 0 : index
    %5 = vector.load %arg4[%c0_4, %c0_5] : memref<384x128xbf16, #tpu.memory_space<vmem>>, vector<384x128xbf16>
    %cst = arith.constant dense<0.000000e+00> : vector<8x128xf32>
    %6 = tpu.matmul %4, %5, %cst {dimension_numbers = #tpu.dot_dimension_numbers<[1], [0], [0], [1], [0, 0, 1, 1], [], []>} : vector<8x384xbf16>, vector<384x128xbf16>, vector<8x128xf32> -> vector<8x128xf32>
    %7 = arith.addf %3, %6 : vector<8x128xf32>
    %c0_6 = arith.constant 0 : index
    %c0_7 = arith.constant 0 : index
    %8 = vector.load %arg9[%c0_6, %c0_7] : memref<8x128xf32, #tpu.memory_space<vmem>>, vector<8x128xf32>
    tpu.vector_store %arg9[%c0_6, %c0_7], %7 {strides = array<i32>} : memref<8x128xf32, #tpu.memory_space<vmem>>, vector<8x128xf32>,
    %c2_i32 = arith.constant 2 : i32
    %9 = arith.cmpi eq, %arg2, %c2_i32 : i32
    %10 = arith.extui %9 : i1 to i32
    %c0_i32_8 = arith.constant 0 : i32
    %11 = arith.cmpi ne, %10, %c0_i32_8 : i32
    scf.if %11 {
      %c0_9 = arith.constant 0 : index
      %c0_10 = arith.constant 0 : index
      %12 = vector.load %arg9[%c0_9, %c0_10] : memref<8x128xf32, #tpu.memory_space<vmem>>, vector<8x128xf32>
      %c0_11 = arith.constant 0 : index
      %c0_12 = arith.constant 0 : index
      %13 = vector.load %arg5[%c0_11, %c0_12] : memref<1x128xf32, #tpu.memory_space<vmem>>, vector<1x128xf32>
      %14 = vector.broadcast %13 : vector<1x128xf32> to vector<8x128xf32>
      %15 = arith.mulf %12, %14 : vector<8x128xf32>
      %c0_13 = arith.constant 0 : index
      %c0_14 = arith.constant 0 : index
      %16 = vector.load %arg6[%c0_13, %c0_14] : memref<1x128xf32, #tpu.memory_space<vmem>>, vector<1x128xf32>
      %17 = vector.broadcast %16 : vector<1x128xf32> to vector<8x128xf32>
      %18 = arith.addf %15, %17 : vector<8x128xf32>
      %c0_15 = arith.constant 0 : index
      %c0_16 = arith.constant 0 : index
      %19 = vector.load %arg7[%c0_15, %c0_16] : memref<8x128xbf16, #tpu.memory_space<vmem>>, vector<8x128xbf16>
      %20 = arith.extf %19 : vector<8x128xbf16> to vector<8x128xf32>
      %21 = arith.addf %18, %20 : vector<8x128xf32>
      %cst_17 = arith.constant 0.000000e+00 : f32
      %22 = vector.broadcast %cst_17 : f32 to vector<8x128xf32>
      %23 = arith.maximumf %21, %22 : vector<8x128xf32>
      %24 = arith.truncf %23 : vector<8x128xf32> to vector<8x128xbf16>
      %c0_18 = arith.constant 0 : index
      %c0_19 = arith.constant 0 : index
      %25 = vector.load %arg8[%c0_18, %c0_19] : memref<8x128xbf16, #tpu.memory_space<vmem>>, vector<8x128xbf16>
      tpu.vector_store %arg8[%c0_18, %c0_19], %24 {strides = array<i32>} : memref<8x128xbf16, #tpu.memory_space<vmem>>, vector<8x128xbf16>,
    } else {
    }
    return
  }
  func.func @transform_0(%arg0: i32, %arg1: i32, %arg2: i32) -> (i32, i32) {
    %c0_i32 = arith.constant 0 : i32
    return %arg0, %arg2 : i32, i32
  }
  func.func @transform_1(%arg0: i32, %arg1: i32, %arg2: i32) -> (i32, i32) {
    %c0_i32 = arith.constant 0 : i32
    return %arg2, %arg1 : i32, i32
  }
  func.func @transform_2(%arg0: i32, %arg1: i32, %arg2: i32) -> (i32, i32) {
    %c0_i32 = arith.constant 0 : i32
    %c0_i32_0 = arith.constant 0 : i32
    return %c0_i32, %arg1 : i32, i32
  }
  func.func @transform_3(%arg0: i32, %arg1: i32, %arg2: i32) -> (i32, i32) {
    %c0_i32 = arith.constant 0 : i32
    %c0_i32_0 = arith.constant 0 : i32
    return %c0_i32, %arg1 : i32, i32
  }
  func.func @transform_4(%arg0: i32, %arg1: i32, %arg2: i32) -> (i32, i32) {
    %c0_i32 = arith.constant 0 : i32
    return %arg0, %arg1 : i32, i32
  }
  func.func @transform_5(%arg0: i32, %arg1: i32, %arg2: i32) -> (i32, i32) {
    %c0_i32 = arith.constant 0 : i32
    return %arg0, %arg1 : i32, i32
  }
}

module attributes {stable_mosaic.version = 11 : i64} {
  func.func @_fused_mm_kernel(%arg0: i32, %arg1: i32, %arg2: i32, %arg3: memref<8x128xbf16, #tpu.memory_space<vmem>>, %arg4: memref<128x128xbf16, #tpu.memory_space<vmem>>, %arg5: memref<1x128xf32, #tpu.memory_space<vmem>>, %arg6: memref<1x128xf32, #tpu.memory_space<vmem>>, %arg7: memref<8x128xbf16, #tpu.memory_space<vmem>>, %arg8: memref<8x128xf32, #tpu.memory_space<vmem>>) attributes {dimension_semantics = [#tpu.dimension_semantics<parallel>, #tpu.dimension_semantics<parallel>, #tpu.dimension_semantics<arbitrary>], iteration_bounds = array<i64: 1, 1, 1>, scalar_prefetch = 0 : i64, scratch_operands = 1 : i64, tpu.core_type = #tpu.core_type<tc>, window_params = [{transform_indices = @transform_0, window_bounds = array<i64: 8, 128>}, {transform_indices = @transform_1, window_bounds = array<i64: 128, 128>}, {transform_indices = @transform_2, window_bounds = array<i64: 1, 128>}, {transform_indices = @transform_3, window_bounds = array<i64: 1, 128>}, {transform_indices = @transform_4, window_bounds = array<i64: 8, 128>}]} {
    %c0_i32 = arith.constant 0 : i32
    %0 = arith.cmpi eq, %arg2, %c0_i32 : i32
    %1 = arith.extui %0 : i1 to i32
    %c0_i32_0 = arith.constant 0 : i32
    %2 = arith.cmpi ne, %1, %c0_i32_0 : i32
    scf.if %2 {
      %cst_10 = arith.constant 0.000000e+00 : f32
      %12 = vector.broadcast %cst_10 : f32 to vector<8x128xf32>
      %c0_11 = arith.constant 0 : index
      %c0_12 = arith.constant 0 : index
      %13 = vector.load %arg8[%c0_11, %c0_12] : memref<8x128xf32, #tpu.memory_space<vmem>>, vector<8x128xf32>
      tpu.vector_store %arg8[%c0_11, %c0_12], %12 {strides = array<i32>} : memref<8x128xf32, #tpu.memory_space<vmem>>, vector<8x128xf32>,
    } else {
    }
    %c0 = arith.constant 0 : index
    %c0_1 = arith.constant 0 : index
    %3 = vector.load %arg8[%c0, %c0_1] : memref<8x128xf32, #tpu.memory_space<vmem>>, vector<8x128xf32>
    %c0_2 = arith.constant 0 : index
    %c0_3 = arith.constant 0 : index
    %4 = vector.load %arg3[%c0_2, %c0_3] : memref<8x128xbf16, #tpu.memory_space<vmem>>, vector<8x128xbf16>
    %c0_4 = arith.constant 0 : index
    %c0_5 = arith.constant 0 : index
    %5 = vector.load %arg4[%c0_4, %c0_5] : memref<128x128xbf16, #tpu.memory_space<vmem>>, vector<128x128xbf16>
    %cst = arith.constant dense<0.000000e+00> : vector<8x128xf32>
    %6 = tpu.matmul %4, %5, %cst {dimension_numbers = #tpu.dot_dimension_numbers<[1], [0], [0], [1], [0, 0, 1, 1], [], []>} : vector<8x128xbf16>, vector<128x128xbf16>, vector<8x128xf32> -> vector<8x128xf32>
    %7 = arith.addf %3, %6 : vector<8x128xf32>
    %c0_6 = arith.constant 0 : index
    %c0_7 = arith.constant 0 : index
    %8 = vector.load %arg8[%c0_6, %c0_7] : memref<8x128xf32, #tpu.memory_space<vmem>>, vector<8x128xf32>
    tpu.vector_store %arg8[%c0_6, %c0_7], %7 {strides = array<i32>} : memref<8x128xf32, #tpu.memory_space<vmem>>, vector<8x128xf32>,
    %c0_i32_8 = arith.constant 0 : i32
    %9 = arith.cmpi eq, %arg2, %c0_i32_8 : i32
    %10 = arith.extui %9 : i1 to i32
    %c0_i32_9 = arith.constant 0 : i32
    %11 = arith.cmpi ne, %10, %c0_i32_9 : i32
    scf.if %11 {
      %c0_10 = arith.constant 0 : index
      %c0_11 = arith.constant 0 : index
      %12 = vector.load %arg8[%c0_10, %c0_11] : memref<8x128xf32, #tpu.memory_space<vmem>>, vector<8x128xf32>
      %c0_12 = arith.constant 0 : index
      %c0_13 = arith.constant 0 : index
      %13 = vector.load %arg5[%c0_12, %c0_13] : memref<1x128xf32, #tpu.memory_space<vmem>>, vector<1x128xf32>
      %14 = vector.broadcast %13 : vector<1x128xf32> to vector<8x128xf32>
      %15 = arith.mulf %12, %14 : vector<8x128xf32>
      %c0_14 = arith.constant 0 : index
      %c0_15 = arith.constant 0 : index
      %16 = vector.load %arg6[%c0_14, %c0_15] : memref<1x128xf32, #tpu.memory_space<vmem>>, vector<1x128xf32>
      %17 = vector.broadcast %16 : vector<1x128xf32> to vector<8x128xf32>
      %18 = arith.addf %15, %17 : vector<8x128xf32>
      %19 = arith.truncf %18 : vector<8x128xf32> to vector<8x128xbf16>
      %c0_16 = arith.constant 0 : index
      %c0_17 = arith.constant 0 : index
      %20 = vector.load %arg7[%c0_16, %c0_17] : memref<8x128xbf16, #tpu.memory_space<vmem>>, vector<8x128xbf16>
      tpu.vector_store %arg7[%c0_16, %c0_17], %19 {strides = array<i32>} : memref<8x128xbf16, #tpu.memory_space<vmem>>, vector<8x128xbf16>,
    } else {
    }
    return
  }
  func.func @transform_0(%arg0: i32, %arg1: i32, %arg2: i32) -> (i32, i32) {
    %c0_i32 = arith.constant 0 : i32
    return %arg0, %arg2 : i32, i32
  }
  func.func @transform_1(%arg0: i32, %arg1: i32, %arg2: i32) -> (i32, i32) {
    %c0_i32 = arith.constant 0 : i32
    return %arg2, %arg1 : i32, i32
  }
  func.func @transform_2(%arg0: i32, %arg1: i32, %arg2: i32) -> (i32, i32) {
    %c0_i32 = arith.constant 0 : i32
    %c0_i32_0 = arith.constant 0 : i32
    return %c0_i32, %arg1 : i32, i32
  }
  func.func @transform_3(%arg0: i32, %arg1: i32, %arg2: i32) -> (i32, i32) {
    %c0_i32 = arith.constant 0 : i32
    %c0_i32_0 = arith.constant 0 : i32
    return %c0_i32, %arg1 : i32, i32
  }
  func.func @transform_4(%arg0: i32, %arg1: i32, %arg2: i32) -> (i32, i32) {
    %c0_i32 = arith.constant 0 : i32
    return %arg0, %arg1 : i32, i32
  }
}

module attributes {stable_mosaic.version = 11 : i64} {
  func.func @_fused_mm_kernel(%arg0: i32, %arg1: i32, %arg2: i32, %arg3: memref<8x384xbf16, #tpu.memory_space<vmem>>, %arg4: memref<384x128xbf16, #tpu.memory_space<vmem>>, %arg5: memref<1x128xf32, #tpu.memory_space<vmem>>, %arg6: memref<1x128xf32, #tpu.memory_space<vmem>>, %arg7: memref<8x128xbf16, #tpu.memory_space<vmem>>, %arg8: memref<8x128xf32, #tpu.memory_space<vmem>>) attributes {dimension_semantics = [#tpu.dimension_semantics<parallel>, #tpu.dimension_semantics<parallel>, #tpu.dimension_semantics<arbitrary>], iteration_bounds = array<i64: 1, 1, 3>, scalar_prefetch = 0 : i64, scratch_operands = 1 : i64, tpu.core_type = #tpu.core_type<tc>, window_params = [{transform_indices = @transform_0, window_bounds = array<i64: 8, 384>}, {transform_indices = @transform_1, window_bounds = array<i64: 384, 128>}, {transform_indices = @transform_2, window_bounds = array<i64: 1, 128>}, {transform_indices = @transform_3, window_bounds = array<i64: 1, 128>}, {transform_indices = @transform_4, window_bounds = array<i64: 8, 128>}]} {
    %c0_i32 = arith.constant 0 : i32
    %0 = arith.cmpi eq, %arg2, %c0_i32 : i32
    %1 = arith.extui %0 : i1 to i32
    %c0_i32_0 = arith.constant 0 : i32
    %2 = arith.cmpi ne, %1, %c0_i32_0 : i32
    scf.if %2 {
      %cst_9 = arith.constant 0.000000e+00 : f32
      %12 = vector.broadcast %cst_9 : f32 to vector<8x128xf32>
      %c0_10 = arith.constant 0 : index
      %c0_11 = arith.constant 0 : index
      %13 = vector.load %arg8[%c0_10, %c0_11] : memref<8x128xf32, #tpu.memory_space<vmem>>, vector<8x128xf32>
      tpu.vector_store %arg8[%c0_10, %c0_11], %12 {strides = array<i32>} : memref<8x128xf32, #tpu.memory_space<vmem>>, vector<8x128xf32>,
    } else {
    }
    %c0 = arith.constant 0 : index
    %c0_1 = arith.constant 0 : index
    %3 = vector.load %arg8[%c0, %c0_1] : memref<8x128xf32, #tpu.memory_space<vmem>>, vector<8x128xf32>
    %c0_2 = arith.constant 0 : index
    %c0_3 = arith.constant 0 : index
    %4 = vector.load %arg3[%c0_2, %c0_3] : memref<8x384xbf16, #tpu.memory_space<vmem>>, vector<8x384xbf16>
    %c0_4 = arith.constant 0 : index
    %c0_5 = arith.constant 0 : index
    %5 = vector.load %arg4[%c0_4, %c0_5] : memref<384x128xbf16, #tpu.memory_space<vmem>>, vector<384x128xbf16>
    %cst = arith.constant dense<0.000000e+00> : vector<8x128xf32>
    %6 = tpu.matmul %4, %5, %cst {dimension_numbers = #tpu.dot_dimension_numbers<[1], [0], [0], [1], [0, 0, 1, 1], [], []>} : vector<8x384xbf16>, vector<384x128xbf16>, vector<8x128xf32> -> vector<8x128xf32>
    %7 = arith.addf %3, %6 : vector<8x128xf32>
    %c0_6 = arith.constant 0 : index
    %c0_7 = arith.constant 0 : index
    %8 = vector.load %arg8[%c0_6, %c0_7] : memref<8x128xf32, #tpu.memory_space<vmem>>, vector<8x128xf32>
    tpu.vector_store %arg8[%c0_6, %c0_7], %7 {strides = array<i32>} : memref<8x128xf32, #tpu.memory_space<vmem>>, vector<8x128xf32>,
    %c2_i32 = arith.constant 2 : i32
    %9 = arith.cmpi eq, %arg2, %c2_i32 : i32
    %10 = arith.extui %9 : i1 to i32
    %c0_i32_8 = arith.constant 0 : i32
    %11 = arith.cmpi ne, %10, %c0_i32_8 : i32
    scf.if %11 {
      %c0_9 = arith.constant 0 : index
      %c0_10 = arith.constant 0 : index
      %12 = vector.load %arg8[%c0_9, %c0_10] : memref<8x128xf32, #tpu.memory_space<vmem>>, vector<8x128xf32>
      %c0_11 = arith.constant 0 : index
      %c0_12 = arith.constant 0 : index
      %13 = vector.load %arg5[%c0_11, %c0_12] : memref<1x128xf32, #tpu.memory_space<vmem>>, vector<1x128xf32>
      %14 = vector.broadcast %13 : vector<1x128xf32> to vector<8x128xf32>
      %15 = arith.mulf %12, %14 : vector<8x128xf32>
      %c0_13 = arith.constant 0 : index
      %c0_14 = arith.constant 0 : index
      %16 = vector.load %arg6[%c0_13, %c0_14] : memref<1x128xf32, #tpu.memory_space<vmem>>, vector<1x128xf32>
      %17 = vector.broadcast %16 : vector<1x128xf32> to vector<8x128xf32>
      %18 = arith.addf %15, %17 : vector<8x128xf32>
      %cst_15 = arith.constant 0.000000e+00 : f32
      %19 = vector.broadcast %cst_15 : f32 to vector<8x128xf32>
      %20 = arith.maximumf %18, %19 : vector<8x128xf32>
      %21 = arith.truncf %20 : vector<8x128xf32> to vector<8x128xbf16>
      %c0_16 = arith.constant 0 : index
      %c0_17 = arith.constant 0 : index
      %22 = vector.load %arg7[%c0_16, %c0_17] : memref<8x128xbf16, #tpu.memory_space<vmem>>, vector<8x128xbf16>
      tpu.vector_store %arg7[%c0_16, %c0_17], %21 {strides = array<i32>} : memref<8x128xbf16, #tpu.memory_space<vmem>>, vector<8x128xbf16>,
    } else {
    }
    return
  }
  func.func @transform_0(%arg0: i32, %arg1: i32, %arg2: i32) -> (i32, i32) {
    %c0_i32 = arith.constant 0 : i32
    return %arg0, %arg2 : i32, i32
  }
  func.func @transform_1(%arg0: i32, %arg1: i32, %arg2: i32) -> (i32, i32) {
    %c0_i32 = arith.constant 0 : i32
    return %arg2, %arg1 : i32, i32
  }
  func.func @transform_2(%arg0: i32, %arg1: i32, %arg2: i32) -> (i32, i32) {
    %c0_i32 = arith.constant 0 : i32
    %c0_i32_0 = arith.constant 0 : i32
    return %c0_i32, %arg1 : i32, i32
  }
  func.func @transform_3(%arg0: i32, %arg1: i32, %arg2: i32) -> (i32, i32) {
    %c0_i32 = arith.constant 0 : i32
    %c0_i32_0 = arith.constant 0 : i32
    return %c0_i32, %arg1 : i32, i32
  }
  func.func @transform_4(%arg0: i32, %arg1: i32, %arg2: i32) -> (i32, i32) {
    %c0_i32 = arith.constant 0 : i32
    return %arg0, %arg1 : i32, i32
  }
}

module attributes {stable_mosaic.version = 11 : i64} {
  func.func @_fused_mm_kernel(%arg0: i32, %arg1: i32, %arg2: i32, %arg3: memref<8x384xbf16, #tpu.memory_space<vmem>>, %arg4: memref<384x128xbf16, #tpu.memory_space<vmem>>, %arg5: memref<1x128xf32, #tpu.memory_space<vmem>>, %arg6: memref<1x128xf32, #tpu.memory_space<vmem>>, %arg7: memref<8x128xbf16, #tpu.memory_space<vmem>>, %arg8: memref<8x128xbf16, #tpu.memory_space<vmem>>, %arg9: memref<8x128xf32, #tpu.memory_space<vmem>>) attributes {dimension_semantics = [#tpu.dimension_semantics<parallel>, #tpu.dimension_semantics<parallel>, #tpu.dimension_semantics<arbitrary>], iteration_bounds = array<i64: 1, 1, 3>, scalar_prefetch = 0 : i64, scratch_operands = 1 : i64, tpu.core_type = #tpu.core_type<tc>, window_params = [{transform_indices = @transform_0, window_bounds = array<i64: 8, 384>}, {transform_indices = @transform_1, window_bounds = array<i64: 384, 128>}, {transform_indices = @transform_2, window_bounds = array<i64: 1, 128>}, {transform_indices = @transform_3, window_bounds = array<i64: 1, 128>}, {transform_indices = @transform_4, window_bounds = array<i64: 8, 128>}, {transform_indices = @transform_5, window_bounds = array<i64: 8, 128>}]} {
    %c0_i32 = arith.constant 0 : i32
    %0 = arith.cmpi eq, %arg2, %c0_i32 : i32
    %1 = arith.extui %0 : i1 to i32
    %c0_i32_0 = arith.constant 0 : i32
    %2 = arith.cmpi ne, %1, %c0_i32_0 : i32
    scf.if %2 {
      %cst_9 = arith.constant 0.000000e+00 : f32
      %12 = vector.broadcast %cst_9 : f32 to vector<8x128xf32>
      %c0_10 = arith.constant 0 : index
      %c0_11 = arith.constant 0 : index
      %13 = vector.load %arg9[%c0_10, %c0_11] : memref<8x128xf32, #tpu.memory_space<vmem>>, vector<8x128xf32>
      tpu.vector_store %arg9[%c0_10, %c0_11], %12 {strides = array<i32>} : memref<8x128xf32, #tpu.memory_space<vmem>>, vector<8x128xf32>,
    } else {
    }
    %c0 = arith.constant 0 : index
    %c0_1 = arith.constant 0 : index
    %3 = vector.load %arg9[%c0, %c0_1] : memref<8x128xf32, #tpu.memory_space<vmem>>, vector<8x128xf32>
    %c0_2 = arith.constant 0 : index
    %c0_3 = arith.constant 0 : index
    %4 = vector.load %arg3[%c0_2, %c0_3] : memref<8x384xbf16, #tpu.memory_space<vmem>>, vector<8x384xbf16>
    %c0_4 = arith.constant 0 : index
    %c0_5 = arith.constant 0 : index
    %5 = vector.load %arg4[%c0_4, %c0_5] : memref<384x128xbf16, #tpu.memory_space<vmem>>, vector<384x128xbf16>
    %cst = arith.constant dense<0.000000e+00> : vector<8x128xf32>
    %6 = tpu.matmul %4, %5, %cst {dimension_numbers = #tpu.dot_dimension_numbers<[1], [0], [0], [1], [0, 0, 1, 1], [], []>} : vector<8x384xbf16>, vector<384x128xbf16>, vector<8x128xf32> -> vector<8x128xf32>
    %7 = arith.addf %3, %6 : vector<8x128xf32>
    %c0_6 = arith.constant 0 : index
    %c0_7 = arith.constant 0 : index
    %8 = vector.load %arg9[%c0_6, %c0_7] : memref<8x128xf32, #tpu.memory_space<vmem>>, vector<8x128xf32>
    tpu.vector_store %arg9[%c0_6, %c0_7], %7 {strides = array<i32>} : memref<8x128xf32, #tpu.memory_space<vmem>>, vector<8x128xf32>,
    %c2_i32 = arith.constant 2 : i32
    %9 = arith.cmpi eq, %arg2, %c2_i32 : i32
    %10 = arith.extui %9 : i1 to i32
    %c0_i32_8 = arith.constant 0 : i32
    %11 = arith.cmpi ne, %10, %c0_i32_8 : i32
    scf.if %11 {
      %c0_9 = arith.constant 0 : index
      %c0_10 = arith.constant 0 : index
      %12 = vector.load %arg9[%c0_9, %c0_10] : memref<8x128xf32, #tpu.memory_space<vmem>>, vector<8x128xf32>
      %c0_11 = arith.constant 0 : index
      %c0_12 = arith.constant 0 : index
      %13 = vector.load %arg5[%c0_11, %c0_12] : memref<1x128xf32, #tpu.memory_space<vmem>>, vector<1x128xf32>
      %14 = vector.broadcast %13 : vector<1x128xf32> to vector<8x128xf32>
      %15 = arith.mulf %12, %14 : vector<8x128xf32>
      %c0_13 = arith.constant 0 : index
      %c0_14 = arith.constant 0 : index
      %16 = vector.load %arg6[%c0_13, %c0_14] : memref<1x128xf32, #tpu.memory_space<vmem>>, vector<1x128xf32>
      %17 = vector.broadcast %16 : vector<1x128xf32> to vector<8x128xf32>
      %18 = arith.addf %15, %17 : vector<8x128xf32>
      %c0_15 = arith.constant 0 : index
      %c0_16 = arith.constant 0 : index
      %19 = vector.load %arg7[%c0_15, %c0_16] : memref<8x128xbf16, #tpu.memory_space<vmem>>, vector<8x128xbf16>
      %20 = arith.extf %19 : vector<8x128xbf16> to vector<8x128xf32>
      %21 = arith.addf %18, %20 : vector<8x128xf32>
      %cst_17 = arith.constant 0.000000e+00 : f32
      %22 = vector.broadcast %cst_17 : f32 to vector<8x128xf32>
      %23 = arith.maximumf %21, %22 : vector<8x128xf32>
      %24 = arith.truncf %23 : vector<8x128xf32> to vector<8x128xbf16>
      %c0_18 = arith.constant 0 : index
      %c0_19 = arith.constant 0 : index
      %25 = vector.load %arg8[%c0_18, %c0_19] : memref<8x128xbf16, #tpu.memory_space<vmem>>, vector<8x128xbf16>
      tpu.vector_store %arg8[%c0_18, %c0_19], %24 {strides = array<i32>} : memref<8x128xbf16, #tpu.memory_space<vmem>>, vector<8x128xbf16>,
    } else {
    }
    return
  }
  func.func @transform_0(%arg0: i32, %arg1: i32, %arg2: i32) -> (i32, i32) {
    %c0_i32 = arith.constant 0 : i32
    return %arg0, %arg2 : i32, i32
  }
  func.func @transform_1(%arg0: i32, %arg1: i32, %arg2: i32) -> (i32, i32) {
    %c0_i32 = arith.constant 0 : i32
    return %arg2, %arg1 : i32, i32
  }
  func.func @transform_2(%arg0: i32, %arg1: i32, %arg2: i32) -> (i32, i32) {
    %c0_i32 = arith.constant 0 : i32
    %c0_i32_0 = arith.constant 0 : i32
    return %c0_i32, %arg1 : i32, i32
  }
  func.func @transform_3(%arg0: i32, %arg1: i32, %arg2: i32) -> (i32, i32) {
    %c0_i32 = arith.constant 0 : i32
    %c0_i32_0 = arith.constant 0 : i32
    return %c0_i32, %arg1 : i32, i32
  }
  func.func @transform_4(%arg0: i32, %arg1: i32, %arg2: i32) -> (i32, i32) {
    %c0_i32 = arith.constant 0 : i32
    return %arg0, %arg1 : i32, i32
  }
  func.func @transform_5(%arg0: i32, %arg1: i32, %arg2: i32) -> (i32, i32) {
    %c0_i32 = arith.constant 0 : i32
    return %arg0, %arg1 : i32, i32
  }
}

module attributes {stable_mosaic.version = 11 : i64} {
  func.func @_fused_mm_kernel(%arg0: i32, %arg1: i32, %arg2: i32, %arg3: memref<8x384xbf16, #tpu.memory_space<vmem>>, %arg4: memref<384x256xbf16, #tpu.memory_space<vmem>>, %arg5: memref<1x256xf32, #tpu.memory_space<vmem>>, %arg6: memref<1x256xf32, #tpu.memory_space<vmem>>, %arg7: memref<8x256xbf16, #tpu.memory_space<vmem>>, %arg8: memref<8x256xf32, #tpu.memory_space<vmem>>) attributes {dimension_semantics = [#tpu.dimension_semantics<parallel>, #tpu.dimension_semantics<parallel>, #tpu.dimension_semantics<arbitrary>], iteration_bounds = array<i64: 1, 1, 3>, scalar_prefetch = 0 : i64, scratch_operands = 1 : i64, tpu.core_type = #tpu.core_type<tc>, window_params = [{transform_indices = @transform_0, window_bounds = array<i64: 8, 384>}, {transform_indices = @transform_1, window_bounds = array<i64: 384, 256>}, {transform_indices = @transform_2, window_bounds = array<i64: 1, 256>}, {transform_indices = @transform_3, window_bounds = array<i64: 1, 256>}, {transform_indices = @transform_4, window_bounds = array<i64: 8, 256>}]} {
    %c0_i32 = arith.constant 0 : i32
    %0 = arith.cmpi eq, %arg2, %c0_i32 : i32
    %1 = arith.extui %0 : i1 to i32
    %c0_i32_0 = arith.constant 0 : i32
    %2 = arith.cmpi ne, %1, %c0_i32_0 : i32
    scf.if %2 {
      %cst_9 = arith.constant 0.000000e+00 : f32
      %12 = vector.broadcast %cst_9 : f32 to vector<8x256xf32>
      %c0_10 = arith.constant 0 : index
      %c0_11 = arith.constant 0 : index
      %13 = vector.load %arg8[%c0_10, %c0_11] : memref<8x256xf32, #tpu.memory_space<vmem>>, vector<8x256xf32>
      tpu.vector_store %arg8[%c0_10, %c0_11], %12 {strides = array<i32>} : memref<8x256xf32, #tpu.memory_space<vmem>>, vector<8x256xf32>,
    } else {
    }
    %c0 = arith.constant 0 : index
    %c0_1 = arith.constant 0 : index
    %3 = vector.load %arg8[%c0, %c0_1] : memref<8x256xf32, #tpu.memory_space<vmem>>, vector<8x256xf32>
    %c0_2 = arith.constant 0 : index
    %c0_3 = arith.constant 0 : index
    %4 = vector.load %arg3[%c0_2, %c0_3] : memref<8x384xbf16, #tpu.memory_space<vmem>>, vector<8x384xbf16>
    %c0_4 = arith.constant 0 : index
    %c0_5 = arith.constant 0 : index
    %5 = vector.load %arg4[%c0_4, %c0_5] : memref<384x256xbf16, #tpu.memory_space<vmem>>, vector<384x256xbf16>
    %cst = arith.constant dense<0.000000e+00> : vector<8x256xf32>
    %6 = tpu.matmul %4, %5, %cst {dimension_numbers = #tpu.dot_dimension_numbers<[1], [0], [0], [1], [0, 0, 1, 1], [], []>} : vector<8x384xbf16>, vector<384x256xbf16>, vector<8x256xf32> -> vector<8x256xf32>
    %7 = arith.addf %3, %6 : vector<8x256xf32>
    %c0_6 = arith.constant 0 : index
    %c0_7 = arith.constant 0 : index
    %8 = vector.load %arg8[%c0_6, %c0_7] : memref<8x256xf32, #tpu.memory_space<vmem>>, vector<8x256xf32>
    tpu.vector_store %arg8[%c0_6, %c0_7], %7 {strides = array<i32>} : memref<8x256xf32, #tpu.memory_space<vmem>>, vector<8x256xf32>,
    %c2_i32 = arith.constant 2 : i32
    %9 = arith.cmpi eq, %arg2, %c2_i32 : i32
    %10 = arith.extui %9 : i1 to i32
    %c0_i32_8 = arith.constant 0 : i32
    %11 = arith.cmpi ne, %10, %c0_i32_8 : i32
    scf.if %11 {
      %c0_9 = arith.constant 0 : index
      %c0_10 = arith.constant 0 : index
      %12 = vector.load %arg8[%c0_9, %c0_10] : memref<8x256xf32, #tpu.memory_space<vmem>>, vector<8x256xf32>
      %c0_11 = arith.constant 0 : index
      %c0_12 = arith.constant 0 : index
      %13 = vector.load %arg5[%c0_11, %c0_12] : memref<1x256xf32, #tpu.memory_space<vmem>>, vector<1x256xf32>
      %14 = vector.broadcast %13 : vector<1x256xf32> to vector<8x256xf32>
      %15 = arith.mulf %12, %14 : vector<8x256xf32>
      %c0_13 = arith.constant 0 : index
      %c0_14 = arith.constant 0 : index
      %16 = vector.load %arg6[%c0_13, %c0_14] : memref<1x256xf32, #tpu.memory_space<vmem>>, vector<1x256xf32>
      %17 = vector.broadcast %16 : vector<1x256xf32> to vector<8x256xf32>
      %18 = arith.addf %15, %17 : vector<8x256xf32>
      %cst_15 = arith.constant 0.000000e+00 : f32
      %19 = vector.broadcast %cst_15 : f32 to vector<8x256xf32>
      %20 = arith.maximumf %18, %19 : vector<8x256xf32>
      %21 = arith.truncf %20 : vector<8x256xf32> to vector<8x256xbf16>
      %c0_16 = arith.constant 0 : index
      %c0_17 = arith.constant 0 : index
      %22 = vector.load %arg7[%c0_16, %c0_17] : memref<8x256xbf16, #tpu.memory_space<vmem>>, vector<8x256xbf16>
      tpu.vector_store %arg7[%c0_16, %c0_17], %21 {strides = array<i32>} : memref<8x256xbf16, #tpu.memory_space<vmem>>, vector<8x256xbf16>,
    } else {
    }
    return
  }
  func.func @transform_0(%arg0: i32, %arg1: i32, %arg2: i32) -> (i32, i32) {
    %c0_i32 = arith.constant 0 : i32
    return %arg0, %arg2 : i32, i32
  }
  func.func @transform_1(%arg0: i32, %arg1: i32, %arg2: i32) -> (i32, i32) {
    %c0_i32 = arith.constant 0 : i32
    return %arg2, %arg1 : i32, i32
  }
  func.func @transform_2(%arg0: i32, %arg1: i32, %arg2: i32) -> (i32, i32) {
    %c0_i32 = arith.constant 0 : i32
    %c0_i32_0 = arith.constant 0 : i32
    return %c0_i32, %arg1 : i32, i32
  }
  func.func @transform_3(%arg0: i32, %arg1: i32, %arg2: i32) -> (i32, i32) {
    %c0_i32 = arith.constant 0 : i32
    %c0_i32_0 = arith.constant 0 : i32
    return %c0_i32, %arg1 : i32, i32
  }
  func.func @transform_4(%arg0: i32, %arg1: i32, %arg2: i32) -> (i32, i32) {
    %c0_i32 = arith.constant 0 : i32
    return %arg0, %arg1 : i32, i32
  }
}

module attributes {stable_mosaic.version = 11 : i64} {
  func.func @_fused_mm_kernel(%arg0: i32, %arg1: i32, %arg2: i32, %arg3: memref<8x128xbf16, #tpu.memory_space<vmem>>, %arg4: memref<128x256xbf16, #tpu.memory_space<vmem>>, %arg5: memref<1x256xf32, #tpu.memory_space<vmem>>, %arg6: memref<1x256xf32, #tpu.memory_space<vmem>>, %arg7: memref<8x256xbf16, #tpu.memory_space<vmem>>, %arg8: memref<8x256xf32, #tpu.memory_space<vmem>>) attributes {dimension_semantics = [#tpu.dimension_semantics<parallel>, #tpu.dimension_semantics<parallel>, #tpu.dimension_semantics<arbitrary>], iteration_bounds = array<i64: 1, 1, 1>, scalar_prefetch = 0 : i64, scratch_operands = 1 : i64, tpu.core_type = #tpu.core_type<tc>, window_params = [{transform_indices = @transform_0, window_bounds = array<i64: 8, 128>}, {transform_indices = @transform_1, window_bounds = array<i64: 128, 256>}, {transform_indices = @transform_2, window_bounds = array<i64: 1, 256>}, {transform_indices = @transform_3, window_bounds = array<i64: 1, 256>}, {transform_indices = @transform_4, window_bounds = array<i64: 8, 256>}]} {
    %c0_i32 = arith.constant 0 : i32
    %0 = arith.cmpi eq, %arg2, %c0_i32 : i32
    %1 = arith.extui %0 : i1 to i32
    %c0_i32_0 = arith.constant 0 : i32
    %2 = arith.cmpi ne, %1, %c0_i32_0 : i32
    scf.if %2 {
      %cst_10 = arith.constant 0.000000e+00 : f32
      %12 = vector.broadcast %cst_10 : f32 to vector<8x256xf32>
      %c0_11 = arith.constant 0 : index
      %c0_12 = arith.constant 0 : index
      %13 = vector.load %arg8[%c0_11, %c0_12] : memref<8x256xf32, #tpu.memory_space<vmem>>, vector<8x256xf32>
      tpu.vector_store %arg8[%c0_11, %c0_12], %12 {strides = array<i32>} : memref<8x256xf32, #tpu.memory_space<vmem>>, vector<8x256xf32>,
    } else {
    }
    %c0 = arith.constant 0 : index
    %c0_1 = arith.constant 0 : index
    %3 = vector.load %arg8[%c0, %c0_1] : memref<8x256xf32, #tpu.memory_space<vmem>>, vector<8x256xf32>
    %c0_2 = arith.constant 0 : index
    %c0_3 = arith.constant 0 : index
    %4 = vector.load %arg3[%c0_2, %c0_3] : memref<8x128xbf16, #tpu.memory_space<vmem>>, vector<8x128xbf16>
    %c0_4 = arith.constant 0 : index
    %c0_5 = arith.constant 0 : index
    %5 = vector.load %arg4[%c0_4, %c0_5] : memref<128x256xbf16, #tpu.memory_space<vmem>>, vector<128x256xbf16>
    %cst = arith.constant dense<0.000000e+00> : vector<8x256xf32>
    %6 = tpu.matmul %4, %5, %cst {dimension_numbers = #tpu.dot_dimension_numbers<[1], [0], [0], [1], [0, 0, 1, 1], [], []>} : vector<8x128xbf16>, vector<128x256xbf16>, vector<8x256xf32> -> vector<8x256xf32>
    %7 = arith.addf %3, %6 : vector<8x256xf32>
    %c0_6 = arith.constant 0 : index
    %c0_7 = arith.constant 0 : index
    %8 = vector.load %arg8[%c0_6, %c0_7] : memref<8x256xf32, #tpu.memory_space<vmem>>, vector<8x256xf32>
    tpu.vector_store %arg8[%c0_6, %c0_7], %7 {strides = array<i32>} : memref<8x256xf32, #tpu.memory_space<vmem>>, vector<8x256xf32>,
    %c0_i32_8 = arith.constant 0 : i32
    %9 = arith.cmpi eq, %arg2, %c0_i32_8 : i32
    %10 = arith.extui %9 : i1 to i32
    %c0_i32_9 = arith.constant 0 : i32
    %11 = arith.cmpi ne, %10, %c0_i32_9 : i32
    scf.if %11 {
      %c0_10 = arith.constant 0 : index
      %c0_11 = arith.constant 0 : index
      %12 = vector.load %arg8[%c0_10, %c0_11] : memref<8x256xf32, #tpu.memory_space<vmem>>, vector<8x256xf32>
      %c0_12 = arith.constant 0 : index
      %c0_13 = arith.constant 0 : index
      %13 = vector.load %arg5[%c0_12, %c0_13] : memref<1x256xf32, #tpu.memory_space<vmem>>, vector<1x256xf32>
      %14 = vector.broadcast %13 : vector<1x256xf32> to vector<8x256xf32>
      %15 = arith.mulf %12, %14 : vector<8x256xf32>
      %c0_14 = arith.constant 0 : index
      %c0_15 = arith.constant 0 : index
      %16 = vector.load %arg6[%c0_14, %c0_15] : memref<1x256xf32, #tpu.memory_space<vmem>>, vector<1x256xf32>
      %17 = vector.broadcast %16 : vector<1x256xf32> to vector<8x256xf32>
      %18 = arith.addf %15, %17 : vector<8x256xf32>
      %19 = arith.truncf %18 : vector<8x256xf32> to vector<8x256xbf16>
      %c0_16 = arith.constant 0 : index
      %c0_17 = arith.constant 0 : index
      %20 = vector.load %arg7[%c0_16, %c0_17] : memref<8x256xbf16, #tpu.memory_space<vmem>>, vector<8x256xbf16>
      tpu.vector_store %arg7[%c0_16, %c0_17], %19 {strides = array<i32>} : memref<8x256xbf16, #tpu.memory_space<vmem>>, vector<8x256xbf16>,
    } else {
    }
    return
  }
  func.func @transform_0(%arg0: i32, %arg1: i32, %arg2: i32) -> (i32, i32) {
    %c0_i32 = arith.constant 0 : i32
    return %arg0, %arg2 : i32, i32
  }
  func.func @transform_1(%arg0: i32, %arg1: i32, %arg2: i32) -> (i32, i32) {
    %c0_i32 = arith.constant 0 : i32
    return %arg2, %arg1 : i32, i32
  }
  func.func @transform_2(%arg0: i32, %arg1: i32, %arg2: i32) -> (i32, i32) {
    %c0_i32 = arith.constant 0 : i32
    %c0_i32_0 = arith.constant 0 : i32
    return %c0_i32, %arg1 : i32, i32
  }
  func.func @transform_3(%arg0: i32, %arg1: i32, %arg2: i32) -> (i32, i32) {
    %c0_i32 = arith.constant 0 : i32
    %c0_i32_0 = arith.constant 0 : i32
    return %c0_i32, %arg1 : i32, i32
  }
  func.func @transform_4(%arg0: i32, %arg1: i32, %arg2: i32) -> (i32, i32) {
    %c0_i32 = arith.constant 0 : i32
    return %arg0, %arg1 : i32, i32
  }
}

module attributes {stable_mosaic.version = 11 : i64} {
  func.func @_fused_mm_kernel(%arg0: i32, %arg1: i32, %arg2: i32, %arg3: memref<8x384xbf16, #tpu.memory_space<vmem>>, %arg4: memref<384x256xbf16, #tpu.memory_space<vmem>>, %arg5: memref<1x256xf32, #tpu.memory_space<vmem>>, %arg6: memref<1x256xf32, #tpu.memory_space<vmem>>, %arg7: memref<8x256xbf16, #tpu.memory_space<vmem>>, %arg8: memref<8x256xbf16, #tpu.memory_space<vmem>>, %arg9: memref<8x256xf32, #tpu.memory_space<vmem>>) attributes {dimension_semantics = [#tpu.dimension_semantics<parallel>, #tpu.dimension_semantics<parallel>, #tpu.dimension_semantics<arbitrary>], iteration_bounds = array<i64: 1, 1, 6>, scalar_prefetch = 0 : i64, scratch_operands = 1 : i64, tpu.core_type = #tpu.core_type<tc>, window_params = [{transform_indices = @transform_0, window_bounds = array<i64: 8, 384>}, {transform_indices = @transform_1, window_bounds = array<i64: 384, 256>}, {transform_indices = @transform_2, window_bounds = array<i64: 1, 256>}, {transform_indices = @transform_3, window_bounds = array<i64: 1, 256>}, {transform_indices = @transform_4, window_bounds = array<i64: 8, 256>}, {transform_indices = @transform_5, window_bounds = array<i64: 8, 256>}]} {
    %c0_i32 = arith.constant 0 : i32
    %0 = arith.cmpi eq, %arg2, %c0_i32 : i32
    %1 = arith.extui %0 : i1 to i32
    %c0_i32_0 = arith.constant 0 : i32
    %2 = arith.cmpi ne, %1, %c0_i32_0 : i32
    scf.if %2 {
      %cst_9 = arith.constant 0.000000e+00 : f32
      %12 = vector.broadcast %cst_9 : f32 to vector<8x256xf32>
      %c0_10 = arith.constant 0 : index
      %c0_11 = arith.constant 0 : index
      %13 = vector.load %arg9[%c0_10, %c0_11] : memref<8x256xf32, #tpu.memory_space<vmem>>, vector<8x256xf32>
      tpu.vector_store %arg9[%c0_10, %c0_11], %12 {strides = array<i32>} : memref<8x256xf32, #tpu.memory_space<vmem>>, vector<8x256xf32>,
    } else {
    }
    %c0 = arith.constant 0 : index
    %c0_1 = arith.constant 0 : index
    %3 = vector.load %arg9[%c0, %c0_1] : memref<8x256xf32, #tpu.memory_space<vmem>>, vector<8x256xf32>
    %c0_2 = arith.constant 0 : index
    %c0_3 = arith.constant 0 : index
    %4 = vector.load %arg3[%c0_2, %c0_3] : memref<8x384xbf16, #tpu.memory_space<vmem>>, vector<8x384xbf16>
    %c0_4 = arith.constant 0 : index
    %c0_5 = arith.constant 0 : index
    %5 = vector.load %arg4[%c0_4, %c0_5] : memref<384x256xbf16, #tpu.memory_space<vmem>>, vector<384x256xbf16>
    %cst = arith.constant dense<0.000000e+00> : vector<8x256xf32>
    %6 = tpu.matmul %4, %5, %cst {dimension_numbers = #tpu.dot_dimension_numbers<[1], [0], [0], [1], [0, 0, 1, 1], [], []>} : vector<8x384xbf16>, vector<384x256xbf16>, vector<8x256xf32> -> vector<8x256xf32>
    %7 = arith.addf %3, %6 : vector<8x256xf32>
    %c0_6 = arith.constant 0 : index
    %c0_7 = arith.constant 0 : index
    %8 = vector.load %arg9[%c0_6, %c0_7] : memref<8x256xf32, #tpu.memory_space<vmem>>, vector<8x256xf32>
    tpu.vector_store %arg9[%c0_6, %c0_7], %7 {strides = array<i32>} : memref<8x256xf32, #tpu.memory_space<vmem>>, vector<8x256xf32>,
    %c5_i32 = arith.constant 5 : i32
    %9 = arith.cmpi eq, %arg2, %c5_i32 : i32
    %10 = arith.extui %9 : i1 to i32
    %c0_i32_8 = arith.constant 0 : i32
    %11 = arith.cmpi ne, %10, %c0_i32_8 : i32
    scf.if %11 {
      %c0_9 = arith.constant 0 : index
      %c0_10 = arith.constant 0 : index
      %12 = vector.load %arg9[%c0_9, %c0_10] : memref<8x256xf32, #tpu.memory_space<vmem>>, vector<8x256xf32>
      %c0_11 = arith.constant 0 : index
      %c0_12 = arith.constant 0 : index
      %13 = vector.load %arg5[%c0_11, %c0_12] : memref<1x256xf32, #tpu.memory_space<vmem>>, vector<1x256xf32>
      %14 = vector.broadcast %13 : vector<1x256xf32> to vector<8x256xf32>
      %15 = arith.mulf %12, %14 : vector<8x256xf32>
      %c0_13 = arith.constant 0 : index
      %c0_14 = arith.constant 0 : index
      %16 = vector.load %arg6[%c0_13, %c0_14] : memref<1x256xf32, #tpu.memory_space<vmem>>, vector<1x256xf32>
      %17 = vector.broadcast %16 : vector<1x256xf32> to vector<8x256xf32>
      %18 = arith.addf %15, %17 : vector<8x256xf32>
      %c0_15 = arith.constant 0 : index
      %c0_16 = arith.constant 0 : index
      %19 = vector.load %arg7[%c0_15, %c0_16] : memref<8x256xbf16, #tpu.memory_space<vmem>>, vector<8x256xbf16>
      %20 = arith.extf %19 : vector<8x256xbf16> to vector<8x256xf32>
      %21 = arith.addf %18, %20 : vector<8x256xf32>
      %cst_17 = arith.constant 0.000000e+00 : f32
      %22 = vector.broadcast %cst_17 : f32 to vector<8x256xf32>
      %23 = arith.maximumf %21, %22 : vector<8x256xf32>
      %24 = arith.truncf %23 : vector<8x256xf32> to vector<8x256xbf16>
      %c0_18 = arith.constant 0 : index
      %c0_19 = arith.constant 0 : index
      %25 = vector.load %arg8[%c0_18, %c0_19] : memref<8x256xbf16, #tpu.memory_space<vmem>>, vector<8x256xbf16>
      tpu.vector_store %arg8[%c0_18, %c0_19], %24 {strides = array<i32>} : memref<8x256xbf16, #tpu.memory_space<vmem>>, vector<8x256xbf16>,
    } else {
    }
    return
  }
  func.func @transform_0(%arg0: i32, %arg1: i32, %arg2: i32) -> (i32, i32) {
    %c0_i32 = arith.constant 0 : i32
    return %arg0, %arg2 : i32, i32
  }
  func.func @transform_1(%arg0: i32, %arg1: i32, %arg2: i32) -> (i32, i32) {
    %c0_i32 = arith.constant 0 : i32
    return %arg2, %arg1 : i32, i32
  }
  func.func @transform_2(%arg0: i32, %arg1: i32, %arg2: i32) -> (i32, i32) {
    %c0_i32 = arith.constant 0 : i32
    %c0_i32_0 = arith.constant 0 : i32
    return %c0_i32, %arg1 : i32, i32
  }
  func.func @transform_3(%arg0: i32, %arg1: i32, %arg2: i32) -> (i32, i32) {
    %c0_i32 = arith.constant 0 : i32
    %c0_i32_0 = arith.constant 0 : i32
    return %c0_i32, %arg1 : i32, i32
  }
  func.func @transform_4(%arg0: i32, %arg1: i32, %arg2: i32) -> (i32, i32) {
    %c0_i32 = arith.constant 0 : i32
    return %arg0, %arg1 : i32, i32
  }
  func.func @transform_5(%arg0: i32, %arg1: i32, %arg2: i32) -> (i32, i32) {
    %c0_i32 = arith.constant 0 : i32
    return %arg0, %arg1 : i32, i32
  }
}

module attributes {stable_mosaic.version = 11 : i64} {
  func.func @_fused_mm_kernel(%arg0: i32, %arg1: i32, %arg2: i32, %arg3: memref<8x384xbf16, #tpu.memory_space<vmem>>, %arg4: memref<384x256xbf16, #tpu.memory_space<vmem>>, %arg5: memref<1x256xf32, #tpu.memory_space<vmem>>, %arg6: memref<1x256xf32, #tpu.memory_space<vmem>>, %arg7: memref<8x256xbf16, #tpu.memory_space<vmem>>, %arg8: memref<8x256xf32, #tpu.memory_space<vmem>>) attributes {dimension_semantics = [#tpu.dimension_semantics<parallel>, #tpu.dimension_semantics<parallel>, #tpu.dimension_semantics<arbitrary>], iteration_bounds = array<i64: 1, 1, 6>, scalar_prefetch = 0 : i64, scratch_operands = 1 : i64, tpu.core_type = #tpu.core_type<tc>, window_params = [{transform_indices = @transform_0, window_bounds = array<i64: 8, 384>}, {transform_indices = @transform_1, window_bounds = array<i64: 384, 256>}, {transform_indices = @transform_2, window_bounds = array<i64: 1, 256>}, {transform_indices = @transform_3, window_bounds = array<i64: 1, 256>}, {transform_indices = @transform_4, window_bounds = array<i64: 8, 256>}]} {
    %c0_i32 = arith.constant 0 : i32
    %0 = arith.cmpi eq, %arg2, %c0_i32 : i32
    %1 = arith.extui %0 : i1 to i32
    %c0_i32_0 = arith.constant 0 : i32
    %2 = arith.cmpi ne, %1, %c0_i32_0 : i32
    scf.if %2 {
      %cst_9 = arith.constant 0.000000e+00 : f32
      %12 = vector.broadcast %cst_9 : f32 to vector<8x256xf32>
      %c0_10 = arith.constant 0 : index
      %c0_11 = arith.constant 0 : index
      %13 = vector.load %arg8[%c0_10, %c0_11] : memref<8x256xf32, #tpu.memory_space<vmem>>, vector<8x256xf32>
      tpu.vector_store %arg8[%c0_10, %c0_11], %12 {strides = array<i32>} : memref<8x256xf32, #tpu.memory_space<vmem>>, vector<8x256xf32>,
    } else {
    }
    %c0 = arith.constant 0 : index
    %c0_1 = arith.constant 0 : index
    %3 = vector.load %arg8[%c0, %c0_1] : memref<8x256xf32, #tpu.memory_space<vmem>>, vector<8x256xf32>
    %c0_2 = arith.constant 0 : index
    %c0_3 = arith.constant 0 : index
    %4 = vector.load %arg3[%c0_2, %c0_3] : memref<8x384xbf16, #tpu.memory_space<vmem>>, vector<8x384xbf16>
    %c0_4 = arith.constant 0 : index
    %c0_5 = arith.constant 0 : index
    %5 = vector.load %arg4[%c0_4, %c0_5] : memref<384x256xbf16, #tpu.memory_space<vmem>>, vector<384x256xbf16>
    %cst = arith.constant dense<0.000000e+00> : vector<8x256xf32>
    %6 = tpu.matmul %4, %5, %cst {dimension_numbers = #tpu.dot_dimension_numbers<[1], [0], [0], [1], [0, 0, 1, 1], [], []>} : vector<8x384xbf16>, vector<384x256xbf16>, vector<8x256xf32> -> vector<8x256xf32>
    %7 = arith.addf %3, %6 : vector<8x256xf32>
    %c0_6 = arith.constant 0 : index
    %c0_7 = arith.constant 0 : index
    %8 = vector.load %arg8[%c0_6, %c0_7] : memref<8x256xf32, #tpu.memory_space<vmem>>, vector<8x256xf32>
    tpu.vector_store %arg8[%c0_6, %c0_7], %7 {strides = array<i32>} : memref<8x256xf32, #tpu.memory_space<vmem>>, vector<8x256xf32>,
    %c5_i32 = arith.constant 5 : i32
    %9 = arith.cmpi eq, %arg2, %c5_i32 : i32
    %10 = arith.extui %9 : i1 to i32
    %c0_i32_8 = arith.constant 0 : i32
    %11 = arith.cmpi ne, %10, %c0_i32_8 : i32
    scf.if %11 {
      %c0_9 = arith.constant 0 : index
      %c0_10 = arith.constant 0 : index
      %12 = vector.load %arg8[%c0_9, %c0_10] : memref<8x256xf32, #tpu.memory_space<vmem>>, vector<8x256xf32>
      %c0_11 = arith.constant 0 : index
      %c0_12 = arith.constant 0 : index
      %13 = vector.load %arg5[%c0_11, %c0_12] : memref<1x256xf32, #tpu.memory_space<vmem>>, vector<1x256xf32>
      %14 = vector.broadcast %13 : vector<1x256xf32> to vector<8x256xf32>
      %15 = arith.mulf %12, %14 : vector<8x256xf32>
      %c0_13 = arith.constant 0 : index
      %c0_14 = arith.constant 0 : index
      %16 = vector.load %arg6[%c0_13, %c0_14] : memref<1x256xf32, #tpu.memory_space<vmem>>, vector<1x256xf32>
      %17 = vector.broadcast %16 : vector<1x256xf32> to vector<8x256xf32>
      %18 = arith.addf %15, %17 : vector<8x256xf32>
      %cst_15 = arith.constant 0.000000e+00 : f32
      %19 = vector.broadcast %cst_15 : f32 to vector<8x256xf32>
      %20 = arith.maximumf %18, %19 : vector<8x256xf32>
      %21 = arith.truncf %20 : vector<8x256xf32> to vector<8x256xbf16>
      %c0_16 = arith.constant 0 : index
      %c0_17 = arith.constant 0 : index
      %22 = vector.load %arg7[%c0_16, %c0_17] : memref<8x256xbf16, #tpu.memory_space<vmem>>, vector<8x256xbf16>
      tpu.vector_store %arg7[%c0_16, %c0_17], %21 {strides = array<i32>} : memref<8x256xbf16, #tpu.memory_space<vmem>>, vector<8x256xbf16>,
    } else {
    }
    return
  }
  func.func @transform_0(%arg0: i32, %arg1: i32, %arg2: i32) -> (i32, i32) {
    %c0_i32 = arith.constant 0 : i32
    return %arg0, %arg2 : i32, i32
  }
  func.func @transform_1(%arg0: i32, %arg1: i32, %arg2: i32) -> (i32, i32) {
    %c0_i32 = arith.constant 0 : i32
    return %arg2, %arg1 : i32, i32
  }
  func.func @transform_2(%arg0: i32, %arg1: i32, %arg2: i32) -> (i32, i32) {
    %c0_i32 = arith.constant 0 : i32
    %c0_i32_0 = arith.constant 0 : i32
    return %c0_i32, %arg1 : i32, i32
  }
  func.func @transform_3(%arg0: i32, %arg1: i32, %arg2: i32) -> (i32, i32) {
    %c0_i32 = arith.constant 0 : i32
    %c0_i32_0 = arith.constant 0 : i32
    return %c0_i32, %arg1 : i32, i32
  }
  func.func @transform_4(%arg0: i32, %arg1: i32, %arg2: i32) -> (i32, i32) {
    %c0_i32 = arith.constant 0 : i32
    return %arg0, %arg1 : i32, i32
  }
}

module attributes {stable_mosaic.version = 11 : i64} {
  func.func @_fused_mm_kernel(%arg0: i32, %arg1: i32, %arg2: i32, %arg3: memref<8x384xbf16, #tpu.memory_space<vmem>>, %arg4: memref<384x256xbf16, #tpu.memory_space<vmem>>, %arg5: memref<1x256xf32, #tpu.memory_space<vmem>>, %arg6: memref<1x256xf32, #tpu.memory_space<vmem>>, %arg7: memref<8x256xbf16, #tpu.memory_space<vmem>>, %arg8: memref<8x256xbf16, #tpu.memory_space<vmem>>, %arg9: memref<8x256xf32, #tpu.memory_space<vmem>>) attributes {dimension_semantics = [#tpu.dimension_semantics<parallel>, #tpu.dimension_semantics<parallel>, #tpu.dimension_semantics<arbitrary>], iteration_bounds = array<i64: 1, 1, 6>, scalar_prefetch = 0 : i64, scratch_operands = 1 : i64, tpu.core_type = #tpu.core_type<tc>, window_params = [{transform_indices = @transform_0, window_bounds = array<i64: 8, 384>}, {transform_indices = @transform_1, window_bounds = array<i64: 384, 256>}, {transform_indices = @transform_2, window_bounds = array<i64: 1, 256>}, {transform_indices = @transform_3, window_bounds = array<i64: 1, 256>}, {transform_indices = @transform_4, window_bounds = array<i64: 8, 256>}, {transform_indices = @transform_5, window_bounds = array<i64: 8, 256>}]} {
    %c0_i32 = arith.constant 0 : i32
    %0 = arith.cmpi eq, %arg2, %c0_i32 : i32
    %1 = arith.extui %0 : i1 to i32
    %c0_i32_0 = arith.constant 0 : i32
    %2 = arith.cmpi ne, %1, %c0_i32_0 : i32
    scf.if %2 {
      %cst_9 = arith.constant 0.000000e+00 : f32
      %12 = vector.broadcast %cst_9 : f32 to vector<8x256xf32>
      %c0_10 = arith.constant 0 : index
      %c0_11 = arith.constant 0 : index
      %13 = vector.load %arg9[%c0_10, %c0_11] : memref<8x256xf32, #tpu.memory_space<vmem>>, vector<8x256xf32>
      tpu.vector_store %arg9[%c0_10, %c0_11], %12 {strides = array<i32>} : memref<8x256xf32, #tpu.memory_space<vmem>>, vector<8x256xf32>,
    } else {
    }
    %c0 = arith.constant 0 : index
    %c0_1 = arith.constant 0 : index
    %3 = vector.load %arg9[%c0, %c0_1] : memref<8x256xf32, #tpu.memory_space<vmem>>, vector<8x256xf32>
    %c0_2 = arith.constant 0 : index
    %c0_3 = arith.constant 0 : index
    %4 = vector.load %arg3[%c0_2, %c0_3] : memref<8x384xbf16, #tpu.memory_space<vmem>>, vector<8x384xbf16>
    %c0_4 = arith.constant 0 : index
    %c0_5 = arith.constant 0 : index
    %5 = vector.load %arg4[%c0_4, %c0_5] : memref<384x256xbf16, #tpu.memory_space<vmem>>, vector<384x256xbf16>
    %cst = arith.constant dense<0.000000e+00> : vector<8x256xf32>
    %6 = tpu.matmul %4, %5, %cst {dimension_numbers = #tpu.dot_dimension_numbers<[1], [0], [0], [1], [0, 0, 1, 1], [], []>} : vector<8x384xbf16>, vector<384x256xbf16>, vector<8x256xf32> -> vector<8x256xf32>
    %7 = arith.addf %3, %6 : vector<8x256xf32>
    %c0_6 = arith.constant 0 : index
    %c0_7 = arith.constant 0 : index
    %8 = vector.load %arg9[%c0_6, %c0_7] : memref<8x256xf32, #tpu.memory_space<vmem>>, vector<8x256xf32>
    tpu.vector_store %arg9[%c0_6, %c0_7], %7 {strides = array<i32>} : memref<8x256xf32, #tpu.memory_space<vmem>>, vector<8x256xf32>,
    %c5_i32 = arith.constant 5 : i32
    %9 = arith.cmpi eq, %arg2, %c5_i32 : i32
    %10 = arith.extui %9 : i1 to i32
    %c0_i32_8 = arith.constant 0 : i32
    %11 = arith.cmpi ne, %10, %c0_i32_8 : i32
    scf.if %11 {
      %c0_9 = arith.constant 0 : index
      %c0_10 = arith.constant 0 : index
      %12 = vector.load %arg9[%c0_9, %c0_10] : memref<8x256xf32, #tpu.memory_space<vmem>>, vector<8x256xf32>
      %c0_11 = arith.constant 0 : index
      %c0_12 = arith.constant 0 : index
      %13 = vector.load %arg5[%c0_11, %c0_12] : memref<1x256xf32, #tpu.memory_space<vmem>>, vector<1x256xf32>
      %14 = vector.broadcast %13 : vector<1x256xf32> to vector<8x256xf32>
      %15 = arith.mulf %12, %14 : vector<8x256xf32>
      %c0_13 = arith.constant 0 : index
      %c0_14 = arith.constant 0 : index
      %16 = vector.load %arg6[%c0_13, %c0_14] : memref<1x256xf32, #tpu.memory_space<vmem>>, vector<1x256xf32>
      %17 = vector.broadcast %16 : vector<1x256xf32> to vector<8x256xf32>
      %18 = arith.addf %15, %17 : vector<8x256xf32>
      %c0_15 = arith.constant 0 : index
      %c0_16 = arith.constant 0 : index
      %19 = vector.load %arg7[%c0_15, %c0_16] : memref<8x256xbf16, #tpu.memory_space<vmem>>, vector<8x256xbf16>
      %20 = arith.extf %19 : vector<8x256xbf16> to vector<8x256xf32>
      %21 = arith.addf %18, %20 : vector<8x256xf32>
      %cst_17 = arith.constant 0.000000e+00 : f32
      %22 = vector.broadcast %cst_17 : f32 to vector<8x256xf32>
      %23 = arith.maximumf %21, %22 : vector<8x256xf32>
      %24 = arith.truncf %23 : vector<8x256xf32> to vector<8x256xbf16>
      %c0_18 = arith.constant 0 : index
      %c0_19 = arith.constant 0 : index
      %25 = vector.load %arg8[%c0_18, %c0_19] : memref<8x256xbf16, #tpu.memory_space<vmem>>, vector<8x256xbf16>
      tpu.vector_store %arg8[%c0_18, %c0_19], %24 {strides = array<i32>} : memref<8x256xbf16, #tpu.memory_space<vmem>>, vector<8x256xbf16>,
    } else {
    }
    return
  }
  func.func @transform_0(%arg0: i32, %arg1: i32, %arg2: i32) -> (i32, i32) {
    %c0_i32 = arith.constant 0 : i32
    return %arg0, %arg2 : i32, i32
  }
  func.func @transform_1(%arg0: i32, %arg1: i32, %arg2: i32) -> (i32, i32) {
    %c0_i32 = arith.constant 0 : i32
    return %arg2, %arg1 : i32, i32
  }
  func.func @transform_2(%arg0: i32, %arg1: i32, %arg2: i32) -> (i32, i32) {
    %c0_i32 = arith.constant 0 : i32
    %c0_i32_0 = arith.constant 0 : i32
    return %c0_i32, %arg1 : i32, i32
  }
  func.func @transform_3(%arg0: i32, %arg1: i32, %arg2: i32) -> (i32, i32) {
    %c0_i32 = arith.constant 0 : i32
    %c0_i32_0 = arith.constant 0 : i32
    return %c0_i32, %arg1 : i32, i32
  }
  func.func @transform_4(%arg0: i32, %arg1: i32, %arg2: i32) -> (i32, i32) {
    %c0_i32 = arith.constant 0 : i32
    return %arg0, %arg1 : i32, i32
  }
  func.func @transform_5(%arg0: i32, %arg1: i32, %arg2: i32) -> (i32, i32) {
    %c0_i32 = arith.constant 0 : i32
    return %arg0, %arg1 : i32, i32
  }
}

module attributes {stable_mosaic.version = 11 : i64} {
  func.func @_fused_mm_kernel(%arg0: i32, %arg1: i32, %arg2: i32, %arg3: memref<8x384xbf16, #tpu.memory_space<vmem>>, %arg4: memref<384x256xbf16, #tpu.memory_space<vmem>>, %arg5: memref<1x256xf32, #tpu.memory_space<vmem>>, %arg6: memref<1x256xf32, #tpu.memory_space<vmem>>, %arg7: memref<8x256xbf16, #tpu.memory_space<vmem>>, %arg8: memref<8x256xf32, #tpu.memory_space<vmem>>) attributes {dimension_semantics = [#tpu.dimension_semantics<parallel>, #tpu.dimension_semantics<parallel>, #tpu.dimension_semantics<arbitrary>], iteration_bounds = array<i64: 1, 2, 6>, scalar_prefetch = 0 : i64, scratch_operands = 1 : i64, tpu.core_type = #tpu.core_type<tc>, window_params = [{transform_indices = @transform_0, window_bounds = array<i64: 8, 384>}, {transform_indices = @transform_1, window_bounds = array<i64: 384, 256>}, {transform_indices = @transform_2, window_bounds = array<i64: 1, 256>}, {transform_indices = @transform_3, window_bounds = array<i64: 1, 256>}, {transform_indices = @transform_4, window_bounds = array<i64: 8, 256>}]} {
    %c0_i32 = arith.constant 0 : i32
    %0 = arith.cmpi eq, %arg2, %c0_i32 : i32
    %1 = arith.extui %0 : i1 to i32
    %c0_i32_0 = arith.constant 0 : i32
    %2 = arith.cmpi ne, %1, %c0_i32_0 : i32
    scf.if %2 {
      %cst_9 = arith.constant 0.000000e+00 : f32
      %12 = vector.broadcast %cst_9 : f32 to vector<8x256xf32>
      %c0_10 = arith.constant 0 : index
      %c0_11 = arith.constant 0 : index
      %13 = vector.load %arg8[%c0_10, %c0_11] : memref<8x256xf32, #tpu.memory_space<vmem>>, vector<8x256xf32>
      tpu.vector_store %arg8[%c0_10, %c0_11], %12 {strides = array<i32>} : memref<8x256xf32, #tpu.memory_space<vmem>>, vector<8x256xf32>,
    } else {
    }
    %c0 = arith.constant 0 : index
    %c0_1 = arith.constant 0 : index
    %3 = vector.load %arg8[%c0, %c0_1] : memref<8x256xf32, #tpu.memory_space<vmem>>, vector<8x256xf32>
    %c0_2 = arith.constant 0 : index
    %c0_3 = arith.constant 0 : index
    %4 = vector.load %arg3[%c0_2, %c0_3] : memref<8x384xbf16, #tpu.memory_space<vmem>>, vector<8x384xbf16>
    %c0_4 = arith.constant 0 : index
    %c0_5 = arith.constant 0 : index
    %5 = vector.load %arg4[%c0_4, %c0_5] : memref<384x256xbf16, #tpu.memory_space<vmem>>, vector<384x256xbf16>
    %cst = arith.constant dense<0.000000e+00> : vector<8x256xf32>
    %6 = tpu.matmul %4, %5, %cst {dimension_numbers = #tpu.dot_dimension_numbers<[1], [0], [0], [1], [0, 0, 1, 1], [], []>} : vector<8x384xbf16>, vector<384x256xbf16>, vector<8x256xf32> -> vector<8x256xf32>
    %7 = arith.addf %3, %6 : vector<8x256xf32>
    %c0_6 = arith.constant 0 : index
    %c0_7 = arith.constant 0 : index
    %8 = vector.load %arg8[%c0_6, %c0_7] : memref<8x256xf32, #tpu.memory_space<vmem>>, vector<8x256xf32>
    tpu.vector_store %arg8[%c0_6, %c0_7], %7 {strides = array<i32>} : memref<8x256xf32, #tpu.memory_space<vmem>>, vector<8x256xf32>,
    %c5_i32 = arith.constant 5 : i32
    %9 = arith.cmpi eq, %arg2, %c5_i32 : i32
    %10 = arith.extui %9 : i1 to i32
    %c0_i32_8 = arith.constant 0 : i32
    %11 = arith.cmpi ne, %10, %c0_i32_8 : i32
    scf.if %11 {
      %c0_9 = arith.constant 0 : index
      %c0_10 = arith.constant 0 : index
      %12 = vector.load %arg8[%c0_9, %c0_10] : memref<8x256xf32, #tpu.memory_space<vmem>>, vector<8x256xf32>
      %c0_11 = arith.constant 0 : index
      %c0_12 = arith.constant 0 : index
      %13 = vector.load %arg5[%c0_11, %c0_12] : memref<1x256xf32, #tpu.memory_space<vmem>>, vector<1x256xf32>
      %14 = vector.broadcast %13 : vector<1x256xf32> to vector<8x256xf32>
      %15 = arith.mulf %12, %14 : vector<8x256xf32>
      %c0_13 = arith.constant 0 : index
      %c0_14 = arith.constant 0 : index
      %16 = vector.load %arg6[%c0_13, %c0_14] : memref<1x256xf32, #tpu.memory_space<vmem>>, vector<1x256xf32>
      %17 = vector.broadcast %16 : vector<1x256xf32> to vector<8x256xf32>
      %18 = arith.addf %15, %17 : vector<8x256xf32>
      %cst_15 = arith.constant 0.000000e+00 : f32
      %19 = vector.broadcast %cst_15 : f32 to vector<8x256xf32>
      %20 = arith.maximumf %18, %19 : vector<8x256xf32>
      %21 = arith.truncf %20 : vector<8x256xf32> to vector<8x256xbf16>
      %c0_16 = arith.constant 0 : index
      %c0_17 = arith.constant 0 : index
      %22 = vector.load %arg7[%c0_16, %c0_17] : memref<8x256xbf16, #tpu.memory_space<vmem>>, vector<8x256xbf16>
      tpu.vector_store %arg7[%c0_16, %c0_17], %21 {strides = array<i32>} : memref<8x256xbf16, #tpu.memory_space<vmem>>, vector<8x256xbf16>,
    } else {
    }
    return
  }
  func.func @transform_0(%arg0: i32, %arg1: i32, %arg2: i32) -> (i32, i32) {
    %c0_i32 = arith.constant 0 : i32
    return %arg0, %arg2 : i32, i32
  }
  func.func @transform_1(%arg0: i32, %arg1: i32, %arg2: i32) -> (i32, i32) {
    %c0_i32 = arith.constant 0 : i32
    return %arg2, %arg1 : i32, i32
  }
  func.func @transform_2(%arg0: i32, %arg1: i32, %arg2: i32) -> (i32, i32) {
    %c0_i32 = arith.constant 0 : i32
    %c0_i32_0 = arith.constant 0 : i32
    return %c0_i32, %arg1 : i32, i32
  }
  func.func @transform_3(%arg0: i32, %arg1: i32, %arg2: i32) -> (i32, i32) {
    %c0_i32 = arith.constant 0 : i32
    %c0_i32_0 = arith.constant 0 : i32
    return %c0_i32, %arg1 : i32, i32
  }
  func.func @transform_4(%arg0: i32, %arg1: i32, %arg2: i32) -> (i32, i32) {
    %c0_i32 = arith.constant 0 : i32
    return %arg0, %arg1 : i32, i32
  }
}

module attributes {stable_mosaic.version = 11 : i64} {
  func.func @_fused_mm_kernel(%arg0: i32, %arg1: i32, %arg2: i32, %arg3: memref<8x512xbf16, #tpu.memory_space<vmem>>, %arg4: memref<512x256xbf16, #tpu.memory_space<vmem>>, %arg5: memref<1x256xf32, #tpu.memory_space<vmem>>, %arg6: memref<1x256xf32, #tpu.memory_space<vmem>>, %arg7: memref<8x256xbf16, #tpu.memory_space<vmem>>, %arg8: memref<8x256xbf16, #tpu.memory_space<vmem>>, %arg9: memref<8x256xf32, #tpu.memory_space<vmem>>) attributes {dimension_semantics = [#tpu.dimension_semantics<parallel>, #tpu.dimension_semantics<parallel>, #tpu.dimension_semantics<arbitrary>], iteration_bounds = array<i64: 1, 2, 9>, scalar_prefetch = 0 : i64, scratch_operands = 1 : i64, tpu.core_type = #tpu.core_type<tc>, window_params = [{transform_indices = @transform_0, window_bounds = array<i64: 8, 512>}, {transform_indices = @transform_1, window_bounds = array<i64: 512, 256>}, {transform_indices = @transform_2, window_bounds = array<i64: 1, 256>}, {transform_indices = @transform_3, window_bounds = array<i64: 1, 256>}, {transform_indices = @transform_4, window_bounds = array<i64: 8, 256>}, {transform_indices = @transform_5, window_bounds = array<i64: 8, 256>}]} {
    %c0_i32 = arith.constant 0 : i32
    %0 = arith.cmpi eq, %arg2, %c0_i32 : i32
    %1 = arith.extui %0 : i1 to i32
    %c0_i32_0 = arith.constant 0 : i32
    %2 = arith.cmpi ne, %1, %c0_i32_0 : i32
    scf.if %2 {
      %cst_9 = arith.constant 0.000000e+00 : f32
      %12 = vector.broadcast %cst_9 : f32 to vector<8x256xf32>
      %c0_10 = arith.constant 0 : index
      %c0_11 = arith.constant 0 : index
      %13 = vector.load %arg9[%c0_10, %c0_11] : memref<8x256xf32, #tpu.memory_space<vmem>>, vector<8x256xf32>
      tpu.vector_store %arg9[%c0_10, %c0_11], %12 {strides = array<i32>} : memref<8x256xf32, #tpu.memory_space<vmem>>, vector<8x256xf32>,
    } else {
    }
    %c0 = arith.constant 0 : index
    %c0_1 = arith.constant 0 : index
    %3 = vector.load %arg9[%c0, %c0_1] : memref<8x256xf32, #tpu.memory_space<vmem>>, vector<8x256xf32>
    %c0_2 = arith.constant 0 : index
    %c0_3 = arith.constant 0 : index
    %4 = vector.load %arg3[%c0_2, %c0_3] : memref<8x512xbf16, #tpu.memory_space<vmem>>, vector<8x512xbf16>
    %c0_4 = arith.constant 0 : index
    %c0_5 = arith.constant 0 : index
    %5 = vector.load %arg4[%c0_4, %c0_5] : memref<512x256xbf16, #tpu.memory_space<vmem>>, vector<512x256xbf16>
    %cst = arith.constant dense<0.000000e+00> : vector<8x256xf32>
    %6 = tpu.matmul %4, %5, %cst {dimension_numbers = #tpu.dot_dimension_numbers<[1], [0], [0], [1], [0, 0, 1, 1], [], []>} : vector<8x512xbf16>, vector<512x256xbf16>, vector<8x256xf32> -> vector<8x256xf32>
    %7 = arith.addf %3, %6 : vector<8x256xf32>
    %c0_6 = arith.constant 0 : index
    %c0_7 = arith.constant 0 : index
    %8 = vector.load %arg9[%c0_6, %c0_7] : memref<8x256xf32, #tpu.memory_space<vmem>>, vector<8x256xf32>
    tpu.vector_store %arg9[%c0_6, %c0_7], %7 {strides = array<i32>} : memref<8x256xf32, #tpu.memory_space<vmem>>, vector<8x256xf32>,
    %c8_i32 = arith.constant 8 : i32
    %9 = arith.cmpi eq, %arg2, %c8_i32 : i32
    %10 = arith.extui %9 : i1 to i32
    %c0_i32_8 = arith.constant 0 : i32
    %11 = arith.cmpi ne, %10, %c0_i32_8 : i32
    scf.if %11 {
      %c0_9 = arith.constant 0 : index
      %c0_10 = arith.constant 0 : index
      %12 = vector.load %arg9[%c0_9, %c0_10] : memref<8x256xf32, #tpu.memory_space<vmem>>, vector<8x256xf32>
      %c0_11 = arith.constant 0 : index
      %c0_12 = arith.constant 0 : index
      %13 = vector.load %arg5[%c0_11, %c0_12] : memref<1x256xf32, #tpu.memory_space<vmem>>, vector<1x256xf32>
      %14 = vector.broadcast %13 : vector<1x256xf32> to vector<8x256xf32>
      %15 = arith.mulf %12, %14 : vector<8x256xf32>
      %c0_13 = arith.constant 0 : index
      %c0_14 = arith.constant 0 : index
      %16 = vector.load %arg6[%c0_13, %c0_14] : memref<1x256xf32, #tpu.memory_space<vmem>>, vector<1x256xf32>
      %17 = vector.broadcast %16 : vector<1x256xf32> to vector<8x256xf32>
      %18 = arith.addf %15, %17 : vector<8x256xf32>
      %c0_15 = arith.constant 0 : index
      %c0_16 = arith.constant 0 : index
      %19 = vector.load %arg7[%c0_15, %c0_16] : memref<8x256xbf16, #tpu.memory_space<vmem>>, vector<8x256xbf16>
      %20 = arith.extf %19 : vector<8x256xbf16> to vector<8x256xf32>
      %21 = arith.addf %18, %20 : vector<8x256xf32>
      %cst_17 = arith.constant 0.000000e+00 : f32
      %22 = vector.broadcast %cst_17 : f32 to vector<8x256xf32>
      %23 = arith.maximumf %21, %22 : vector<8x256xf32>
      %24 = arith.truncf %23 : vector<8x256xf32> to vector<8x256xbf16>
      %c0_18 = arith.constant 0 : index
      %c0_19 = arith.constant 0 : index
      %25 = vector.load %arg8[%c0_18, %c0_19] : memref<8x256xbf16, #tpu.memory_space<vmem>>, vector<8x256xbf16>
      tpu.vector_store %arg8[%c0_18, %c0_19], %24 {strides = array<i32>} : memref<8x256xbf16, #tpu.memory_space<vmem>>, vector<8x256xbf16>,
    } else {
    }
    return
  }
  func.func @transform_0(%arg0: i32, %arg1: i32, %arg2: i32) -> (i32, i32) {
    %c0_i32 = arith.constant 0 : i32
    return %arg0, %arg2 : i32, i32
  }
  func.func @transform_1(%arg0: i32, %arg1: i32, %arg2: i32) -> (i32, i32) {
    %c0_i32 = arith.constant 0 : i32
    return %arg2, %arg1 : i32, i32
  }
  func.func @transform_2(%arg0: i32, %arg1: i32, %arg2: i32) -> (i32, i32) {
    %c0_i32 = arith.constant 0 : i32
    %c0_i32_0 = arith.constant 0 : i32
    return %c0_i32, %arg1 : i32, i32
  }
  func.func @transform_3(%arg0: i32, %arg1: i32, %arg2: i32) -> (i32, i32) {
    %c0_i32 = arith.constant 0 : i32
    %c0_i32_0 = arith.constant 0 : i32
    return %c0_i32, %arg1 : i32, i32
  }
  func.func @transform_4(%arg0: i32, %arg1: i32, %arg2: i32) -> (i32, i32) {
    %c0_i32 = arith.constant 0 : i32
    return %arg0, %arg1 : i32, i32
  }
  func.func @transform_5(%arg0: i32, %arg1: i32, %arg2: i32) -> (i32, i32) {
    %c0_i32 = arith.constant 0 : i32
    return %arg0, %arg1 : i32, i32
  }
}

module attributes {stable_mosaic.version = 11 : i64} {
  func.func @_fused_mm_kernel(%arg0: i32, %arg1: i32, %arg2: i32, %arg3: memref<8x256xbf16, #tpu.memory_space<vmem>>, %arg4: memref<256x256xbf16, #tpu.memory_space<vmem>>, %arg5: memref<1x256xf32, #tpu.memory_space<vmem>>, %arg6: memref<1x256xf32, #tpu.memory_space<vmem>>, %arg7: memref<8x256xbf16, #tpu.memory_space<vmem>>, %arg8: memref<8x256xf32, #tpu.memory_space<vmem>>) attributes {dimension_semantics = [#tpu.dimension_semantics<parallel>, #tpu.dimension_semantics<parallel>, #tpu.dimension_semantics<arbitrary>], iteration_bounds = array<i64: 1, 2, 1>, scalar_prefetch = 0 : i64, scratch_operands = 1 : i64, tpu.core_type = #tpu.core_type<tc>, window_params = [{transform_indices = @transform_0, window_bounds = array<i64: 8, 256>}, {transform_indices = @transform_1, window_bounds = array<i64: 256, 256>}, {transform_indices = @transform_2, window_bounds = array<i64: 1, 256>}, {transform_indices = @transform_3, window_bounds = array<i64: 1, 256>}, {transform_indices = @transform_4, window_bounds = array<i64: 8, 256>}]} {
    %c0_i32 = arith.constant 0 : i32
    %0 = arith.cmpi eq, %arg2, %c0_i32 : i32
    %1 = arith.extui %0 : i1 to i32
    %c0_i32_0 = arith.constant 0 : i32
    %2 = arith.cmpi ne, %1, %c0_i32_0 : i32
    scf.if %2 {
      %cst_10 = arith.constant 0.000000e+00 : f32
      %12 = vector.broadcast %cst_10 : f32 to vector<8x256xf32>
      %c0_11 = arith.constant 0 : index
      %c0_12 = arith.constant 0 : index
      %13 = vector.load %arg8[%c0_11, %c0_12] : memref<8x256xf32, #tpu.memory_space<vmem>>, vector<8x256xf32>
      tpu.vector_store %arg8[%c0_11, %c0_12], %12 {strides = array<i32>} : memref<8x256xf32, #tpu.memory_space<vmem>>, vector<8x256xf32>,
    } else {
    }
    %c0 = arith.constant 0 : index
    %c0_1 = arith.constant 0 : index
    %3 = vector.load %arg8[%c0, %c0_1] : memref<8x256xf32, #tpu.memory_space<vmem>>, vector<8x256xf32>
    %c0_2 = arith.constant 0 : index
    %c0_3 = arith.constant 0 : index
    %4 = vector.load %arg3[%c0_2, %c0_3] : memref<8x256xbf16, #tpu.memory_space<vmem>>, vector<8x256xbf16>
    %c0_4 = arith.constant 0 : index
    %c0_5 = arith.constant 0 : index
    %5 = vector.load %arg4[%c0_4, %c0_5] : memref<256x256xbf16, #tpu.memory_space<vmem>>, vector<256x256xbf16>
    %cst = arith.constant dense<0.000000e+00> : vector<8x256xf32>
    %6 = tpu.matmul %4, %5, %cst {dimension_numbers = #tpu.dot_dimension_numbers<[1], [0], [0], [1], [0, 0, 1, 1], [], []>} : vector<8x256xbf16>, vector<256x256xbf16>, vector<8x256xf32> -> vector<8x256xf32>
    %7 = arith.addf %3, %6 : vector<8x256xf32>
    %c0_6 = arith.constant 0 : index
    %c0_7 = arith.constant 0 : index
    %8 = vector.load %arg8[%c0_6, %c0_7] : memref<8x256xf32, #tpu.memory_space<vmem>>, vector<8x256xf32>
    tpu.vector_store %arg8[%c0_6, %c0_7], %7 {strides = array<i32>} : memref<8x256xf32, #tpu.memory_space<vmem>>, vector<8x256xf32>,
    %c0_i32_8 = arith.constant 0 : i32
    %9 = arith.cmpi eq, %arg2, %c0_i32_8 : i32
    %10 = arith.extui %9 : i1 to i32
    %c0_i32_9 = arith.constant 0 : i32
    %11 = arith.cmpi ne, %10, %c0_i32_9 : i32
    scf.if %11 {
      %c0_10 = arith.constant 0 : index
      %c0_11 = arith.constant 0 : index
      %12 = vector.load %arg8[%c0_10, %c0_11] : memref<8x256xf32, #tpu.memory_space<vmem>>, vector<8x256xf32>
      %c0_12 = arith.constant 0 : index
      %c0_13 = arith.constant 0 : index
      %13 = vector.load %arg5[%c0_12, %c0_13] : memref<1x256xf32, #tpu.memory_space<vmem>>, vector<1x256xf32>
      %14 = vector.broadcast %13 : vector<1x256xf32> to vector<8x256xf32>
      %15 = arith.mulf %12, %14 : vector<8x256xf32>
      %c0_14 = arith.constant 0 : index
      %c0_15 = arith.constant 0 : index
      %16 = vector.load %arg6[%c0_14, %c0_15] : memref<1x256xf32, #tpu.memory_space<vmem>>, vector<1x256xf32>
      %17 = vector.broadcast %16 : vector<1x256xf32> to vector<8x256xf32>
      %18 = arith.addf %15, %17 : vector<8x256xf32>
      %19 = arith.truncf %18 : vector<8x256xf32> to vector<8x256xbf16>
      %c0_16 = arith.constant 0 : index
      %c0_17 = arith.constant 0 : index
      %20 = vector.load %arg7[%c0_16, %c0_17] : memref<8x256xbf16, #tpu.memory_space<vmem>>, vector<8x256xbf16>
      tpu.vector_store %arg7[%c0_16, %c0_17], %19 {strides = array<i32>} : memref<8x256xbf16, #tpu.memory_space<vmem>>, vector<8x256xbf16>,
    } else {
    }
    return
  }
  func.func @transform_0(%arg0: i32, %arg1: i32, %arg2: i32) -> (i32, i32) {
    %c0_i32 = arith.constant 0 : i32
    return %arg0, %arg2 : i32, i32
  }
  func.func @transform_1(%arg0: i32, %arg1: i32, %arg2: i32) -> (i32, i32) {
    %c0_i32 = arith.constant 0 : i32
    return %arg2, %arg1 : i32, i32
  }
  func.func @transform_2(%arg0: i32, %arg1: i32, %arg2: i32) -> (i32, i32) {
    %c0_i32 = arith.constant 0 : i32
    %c0_i32_0 = arith.constant 0 : i32
    return %c0_i32, %arg1 : i32, i32
  }
  func.func @transform_3(%arg0: i32, %arg1: i32, %arg2: i32) -> (i32, i32) {
    %c0_i32 = arith.constant 0 : i32
    %c0_i32_0 = arith.constant 0 : i32
    return %c0_i32, %arg1 : i32, i32
  }
  func.func @transform_4(%arg0: i32, %arg1: i32, %arg2: i32) -> (i32, i32) {
    %c0_i32 = arith.constant 0 : i32
    return %arg0, %arg1 : i32, i32
  }
}

module attributes {stable_mosaic.version = 11 : i64} {
  func.func @_fused_mm_kernel(%arg0: i32, %arg1: i32, %arg2: i32, %arg3: memref<8x512xbf16, #tpu.memory_space<vmem>>, %arg4: memref<512x256xbf16, #tpu.memory_space<vmem>>, %arg5: memref<1x256xf32, #tpu.memory_space<vmem>>, %arg6: memref<1x256xf32, #tpu.memory_space<vmem>>, %arg7: memref<8x256xbf16, #tpu.memory_space<vmem>>, %arg8: memref<8x256xbf16, #tpu.memory_space<vmem>>, %arg9: memref<8x256xf32, #tpu.memory_space<vmem>>) attributes {dimension_semantics = [#tpu.dimension_semantics<parallel>, #tpu.dimension_semantics<parallel>, #tpu.dimension_semantics<arbitrary>], iteration_bounds = array<i64: 1, 2, 9>, scalar_prefetch = 0 : i64, scratch_operands = 1 : i64, tpu.core_type = #tpu.core_type<tc>, window_params = [{transform_indices = @transform_0, window_bounds = array<i64: 8, 512>}, {transform_indices = @transform_1, window_bounds = array<i64: 512, 256>}, {transform_indices = @transform_2, window_bounds = array<i64: 1, 256>}, {transform_indices = @transform_3, window_bounds = array<i64: 1, 256>}, {transform_indices = @transform_4, window_bounds = array<i64: 8, 256>}, {transform_indices = @transform_5, window_bounds = array<i64: 8, 256>}]} {
    %c0_i32 = arith.constant 0 : i32
    %0 = arith.cmpi eq, %arg2, %c0_i32 : i32
    %1 = arith.extui %0 : i1 to i32
    %c0_i32_0 = arith.constant 0 : i32
    %2 = arith.cmpi ne, %1, %c0_i32_0 : i32
    scf.if %2 {
      %cst_9 = arith.constant 0.000000e+00 : f32
      %12 = vector.broadcast %cst_9 : f32 to vector<8x256xf32>
      %c0_10 = arith.constant 0 : index
      %c0_11 = arith.constant 0 : index
      %13 = vector.load %arg9[%c0_10, %c0_11] : memref<8x256xf32, #tpu.memory_space<vmem>>, vector<8x256xf32>
      tpu.vector_store %arg9[%c0_10, %c0_11], %12 {strides = array<i32>} : memref<8x256xf32, #tpu.memory_space<vmem>>, vector<8x256xf32>,
    } else {
    }
    %c0 = arith.constant 0 : index
    %c0_1 = arith.constant 0 : index
    %3 = vector.load %arg9[%c0, %c0_1] : memref<8x256xf32, #tpu.memory_space<vmem>>, vector<8x256xf32>
    %c0_2 = arith.constant 0 : index
    %c0_3 = arith.constant 0 : index
    %4 = vector.load %arg3[%c0_2, %c0_3] : memref<8x512xbf16, #tpu.memory_space<vmem>>, vector<8x512xbf16>
    %c0_4 = arith.constant 0 : index
    %c0_5 = arith.constant 0 : index
    %5 = vector.load %arg4[%c0_4, %c0_5] : memref<512x256xbf16, #tpu.memory_space<vmem>>, vector<512x256xbf16>
    %cst = arith.constant dense<0.000000e+00> : vector<8x256xf32>
    %6 = tpu.matmul %4, %5, %cst {dimension_numbers = #tpu.dot_dimension_numbers<[1], [0], [0], [1], [0, 0, 1, 1], [], []>} : vector<8x512xbf16>, vector<512x256xbf16>, vector<8x256xf32> -> vector<8x256xf32>
    %7 = arith.addf %3, %6 : vector<8x256xf32>
    %c0_6 = arith.constant 0 : index
    %c0_7 = arith.constant 0 : index
    %8 = vector.load %arg9[%c0_6, %c0_7] : memref<8x256xf32, #tpu.memory_space<vmem>>, vector<8x256xf32>
    tpu.vector_store %arg9[%c0_6, %c0_7], %7 {strides = array<i32>} : memref<8x256xf32, #tpu.memory_space<vmem>>, vector<8x256xf32>,
    %c8_i32 = arith.constant 8 : i32
    %9 = arith.cmpi eq, %arg2, %c8_i32 : i32
    %10 = arith.extui %9 : i1 to i32
    %c0_i32_8 = arith.constant 0 : i32
    %11 = arith.cmpi ne, %10, %c0_i32_8 : i32
    scf.if %11 {
      %c0_9 = arith.constant 0 : index
      %c0_10 = arith.constant 0 : index
      %12 = vector.load %arg9[%c0_9, %c0_10] : memref<8x256xf32, #tpu.memory_space<vmem>>, vector<8x256xf32>
      %c0_11 = arith.constant 0 : index
      %c0_12 = arith.constant 0 : index
      %13 = vector.load %arg5[%c0_11, %c0_12] : memref<1x256xf32, #tpu.memory_space<vmem>>, vector<1x256xf32>
      %14 = vector.broadcast %13 : vector<1x256xf32> to vector<8x256xf32>
      %15 = arith.mulf %12, %14 : vector<8x256xf32>
      %c0_13 = arith.constant 0 : index
      %c0_14 = arith.constant 0 : index
      %16 = vector.load %arg6[%c0_13, %c0_14] : memref<1x256xf32, #tpu.memory_space<vmem>>, vector<1x256xf32>
      %17 = vector.broadcast %16 : vector<1x256xf32> to vector<8x256xf32>
      %18 = arith.addf %15, %17 : vector<8x256xf32>
      %c0_15 = arith.constant 0 : index
      %c0_16 = arith.constant 0 : index
      %19 = vector.load %arg7[%c0_15, %c0_16] : memref<8x256xbf16, #tpu.memory_space<vmem>>, vector<8x256xbf16>
      %20 = arith.extf %19 : vector<8x256xbf16> to vector<8x256xf32>
      %21 = arith.addf %18, %20 : vector<8x256xf32>
      %cst_17 = arith.constant 0.000000e+00 : f32
      %22 = vector.broadcast %cst_17 : f32 to vector<8x256xf32>
      %23 = arith.maximumf %21, %22 : vector<8x256xf32>
      %24 = arith.truncf %23 : vector<8x256xf32> to vector<8x256xbf16>
      %c0_18 = arith.constant 0 : index
      %c0_19 = arith.constant 0 : index
      %25 = vector.load %arg8[%c0_18, %c0_19] : memref<8x256xbf16, #tpu.memory_space<vmem>>, vector<8x256xbf16>
      tpu.vector_store %arg8[%c0_18, %c0_19], %24 {strides = array<i32>} : memref<8x256xbf16, #tpu.memory_space<vmem>>, vector<8x256xbf16>,
    } else {
    }
    return
  }
  func.func @transform_0(%arg0: i32, %arg1: i32, %arg2: i32) -> (i32, i32) {
    %c0_i32 = arith.constant 0 : i32
    return %arg0, %arg2 : i32, i32
  }
  func.func @transform_1(%arg0: i32, %arg1: i32, %arg2: i32) -> (i32, i32) {
    %c0_i32 = arith.constant 0 : i32
    return %arg2, %arg1 : i32, i32
  }
  func.func @transform_2(%arg0: i32, %arg1: i32, %arg2: i32) -> (i32, i32) {
    %c0_i32 = arith.constant 0 : i32
    %c0_i32_0 = arith.constant 0 : i32
    return %c0_i32, %arg1 : i32, i32
  }
  func.func @transform_3(%arg0: i32, %arg1: i32, %arg2: i32) -> (i32, i32) {
    %c0_i32 = arith.constant 0 : i32
    %c0_i32_0 = arith.constant 0 : i32
    return %c0_i32, %arg1 : i32, i32
  }
  func.func @transform_4(%arg0: i32, %arg1: i32, %arg2: i32) -> (i32, i32) {
    %c0_i32 = arith.constant 0 : i32
    return %arg0, %arg1 : i32, i32
  }
  func.func @transform_5(%arg0: i32, %arg1: i32, %arg2: i32) -> (i32, i32) {
    %c0_i32 = arith.constant 0 : i32
    return %arg0, %arg1 : i32, i32
  }
}

module attributes {stable_mosaic.version = 11 : i64} {
  func.func @_fused_mm_kernel(%arg0: i32, %arg1: i32, %arg2: i32, %arg3: memref<8x512xbf16, #tpu.memory_space<vmem>>, %arg4: memref<512x256xbf16, #tpu.memory_space<vmem>>, %arg5: memref<1x256xf32, #tpu.memory_space<vmem>>, %arg6: memref<1x256xf32, #tpu.memory_space<vmem>>, %arg7: memref<8x256xbf16, #tpu.memory_space<vmem>>, %arg8: memref<8x256xf32, #tpu.memory_space<vmem>>) attributes {dimension_semantics = [#tpu.dimension_semantics<parallel>, #tpu.dimension_semantics<parallel>, #tpu.dimension_semantics<arbitrary>], iteration_bounds = array<i64: 1, 2, 9>, scalar_prefetch = 0 : i64, scratch_operands = 1 : i64, tpu.core_type = #tpu.core_type<tc>, window_params = [{transform_indices = @transform_0, window_bounds = array<i64: 8, 512>}, {transform_indices = @transform_1, window_bounds = array<i64: 512, 256>}, {transform_indices = @transform_2, window_bounds = array<i64: 1, 256>}, {transform_indices = @transform_3, window_bounds = array<i64: 1, 256>}, {transform_indices = @transform_4, window_bounds = array<i64: 8, 256>}]} {
    %c0_i32 = arith.constant 0 : i32
    %0 = arith.cmpi eq, %arg2, %c0_i32 : i32
    %1 = arith.extui %0 : i1 to i32
    %c0_i32_0 = arith.constant 0 : i32
    %2 = arith.cmpi ne, %1, %c0_i32_0 : i32
    scf.if %2 {
      %cst_9 = arith.constant 0.000000e+00 : f32
      %12 = vector.broadcast %cst_9 : f32 to vector<8x256xf32>
      %c0_10 = arith.constant 0 : index
      %c0_11 = arith.constant 0 : index
      %13 = vector.load %arg8[%c0_10, %c0_11] : memref<8x256xf32, #tpu.memory_space<vmem>>, vector<8x256xf32>
      tpu.vector_store %arg8[%c0_10, %c0_11], %12 {strides = array<i32>} : memref<8x256xf32, #tpu.memory_space<vmem>>, vector<8x256xf32>,
    } else {
    }
    %c0 = arith.constant 0 : index
    %c0_1 = arith.constant 0 : index
    %3 = vector.load %arg8[%c0, %c0_1] : memref<8x256xf32, #tpu.memory_space<vmem>>, vector<8x256xf32>
    %c0_2 = arith.constant 0 : index
    %c0_3 = arith.constant 0 : index
    %4 = vector.load %arg3[%c0_2, %c0_3] : memref<8x512xbf16, #tpu.memory_space<vmem>>, vector<8x512xbf16>
    %c0_4 = arith.constant 0 : index
    %c0_5 = arith.constant 0 : index
    %5 = vector.load %arg4[%c0_4, %c0_5] : memref<512x256xbf16, #tpu.memory_space<vmem>>, vector<512x256xbf16>
    %cst = arith.constant dense<0.000000e+00> : vector<8x256xf32>
    %6 = tpu.matmul %4, %5, %cst {dimension_numbers = #tpu.dot_dimension_numbers<[1], [0], [0], [1], [0, 0, 1, 1], [], []>} : vector<8x512xbf16>, vector<512x256xbf16>, vector<8x256xf32> -> vector<8x256xf32>
    %7 = arith.addf %3, %6 : vector<8x256xf32>
    %c0_6 = arith.constant 0 : index
    %c0_7 = arith.constant 0 : index
    %8 = vector.load %arg8[%c0_6, %c0_7] : memref<8x256xf32, #tpu.memory_space<vmem>>, vector<8x256xf32>
    tpu.vector_store %arg8[%c0_6, %c0_7], %7 {strides = array<i32>} : memref<8x256xf32, #tpu.memory_space<vmem>>, vector<8x256xf32>,
    %c8_i32 = arith.constant 8 : i32
    %9 = arith.cmpi eq, %arg2, %c8_i32 : i32
    %10 = arith.extui %9 : i1 to i32
    %c0_i32_8 = arith.constant 0 : i32
    %11 = arith.cmpi ne, %10, %c0_i32_8 : i32
    scf.if %11 {
      %c0_9 = arith.constant 0 : index
      %c0_10 = arith.constant 0 : index
      %12 = vector.load %arg8[%c0_9, %c0_10] : memref<8x256xf32, #tpu.memory_space<vmem>>, vector<8x256xf32>
      %c0_11 = arith.constant 0 : index
      %c0_12 = arith.constant 0 : index
      %13 = vector.load %arg5[%c0_11, %c0_12] : memref<1x256xf32, #tpu.memory_space<vmem>>, vector<1x256xf32>
      %14 = vector.broadcast %13 : vector<1x256xf32> to vector<8x256xf32>
      %15 = arith.mulf %12, %14 : vector<8x256xf32>
      %c0_13 = arith.constant 0 : index
      %c0_14 = arith.constant 0 : index
      %16 = vector.load %arg6[%c0_13, %c0_14] : memref<1x256xf32, #tpu.memory_space<vmem>>, vector<1x256xf32>
      %17 = vector.broadcast %16 : vector<1x256xf32> to vector<8x256xf32>
      %18 = arith.addf %15, %17 : vector<8x256xf32>
      %cst_15 = arith.constant 0.000000e+00 : f32
      %19 = vector.broadcast %cst_15 : f32 to vector<8x256xf32>
      %20 = arith.maximumf %18, %19 : vector<8x256xf32>
      %21 = arith.truncf %20 : vector<8x256xf32> to vector<8x256xbf16>
      %c0_16 = arith.constant 0 : index
      %c0_17 = arith.constant 0 : index
      %22 = vector.load %arg7[%c0_16, %c0_17] : memref<8x256xbf16, #tpu.memory_space<vmem>>, vector<8x256xbf16>
      tpu.vector_store %arg7[%c0_16, %c0_17], %21 {strides = array<i32>} : memref<8x256xbf16, #tpu.memory_space<vmem>>, vector<8x256xbf16>,
    } else {
    }
    return
  }
  func.func @transform_0(%arg0: i32, %arg1: i32, %arg2: i32) -> (i32, i32) {
    %c0_i32 = arith.constant 0 : i32
    return %arg0, %arg2 : i32, i32
  }
  func.func @transform_1(%arg0: i32, %arg1: i32, %arg2: i32) -> (i32, i32) {
    %c0_i32 = arith.constant 0 : i32
    return %arg2, %arg1 : i32, i32
  }
  func.func @transform_2(%arg0: i32, %arg1: i32, %arg2: i32) -> (i32, i32) {
    %c0_i32 = arith.constant 0 : i32
    %c0_i32_0 = arith.constant 0 : i32
    return %c0_i32, %arg1 : i32, i32
  }
  func.func @transform_3(%arg0: i32, %arg1: i32, %arg2: i32) -> (i32, i32) {
    %c0_i32 = arith.constant 0 : i32
    %c0_i32_0 = arith.constant 0 : i32
    return %c0_i32, %arg1 : i32, i32
  }
  func.func @transform_4(%arg0: i32, %arg1: i32, %arg2: i32) -> (i32, i32) {
    %c0_i32 = arith.constant 0 : i32
    return %arg0, %arg1 : i32, i32
  }
}

module attributes {stable_mosaic.version = 11 : i64} {
  func.func @_head_kernel(%arg0: i32, %arg1: memref<2x1x512xbf16, #tpu.memory_space<vmem>>, %arg2: memref<512x128xbf16, #tpu.memory_space<vmem>>, %arg3: memref<1x128xf32, #tpu.memory_space<vmem>>, %arg4: memref<2x128xf32, #tpu.memory_space<vmem>>) attributes {dimension_semantics = [#tpu.dimension_semantics<arbitrary>], iteration_bounds = array<i64: 1>, scalar_prefetch = 0 : i64, scratch_operands = 0 : i64, tpu.core_type = #tpu.core_type<tc>, window_params = [{pipeline_mode = #tpu.pipeline_mode<synchronous>, transform_indices = @transform_0, window_bounds = array<i64: 2, 1, 512>}, {pipeline_mode = #tpu.pipeline_mode<synchronous>, transform_indices = @transform_1, window_bounds = array<i64: 512, 128>}, {pipeline_mode = #tpu.pipeline_mode<synchronous>, transform_indices = @transform_2, window_bounds = array<i64: 1, 128>}, {pipeline_mode = #tpu.pipeline_mode<synchronous>, transform_indices = @transform_3, window_bounds = array<i64: 2, 128>}]} {
    %c0 = arith.constant 0 : index
    %c0_0 = arith.constant 0 : index
    %c0_1 = arith.constant 0 : index
    %0 = vector.load %arg1[%c0, %c0_0, %c0_1] : memref<2x1x512xbf16, #tpu.memory_space<vmem>>, vector<2x1x512xbf16>
    %1 = arith.extf %0 : vector<2x1x512xbf16> to vector<2x1x512xf32>
    %cst = arith.constant dense<0.000000e+00> : vector<2x512xf32>
    %2 = vector.multi_reduction <add>, %1, %cst [1] : vector<2x1x512xf32> to vector<2x512xf32>
    %cst_2 = arith.constant 1.000000e+00 : f32
    %3 = vector.broadcast %cst_2 : f32 to vector<2x512xf32>
    %4 = arith.divf %2, %3 : vector<2x512xf32>
    %5 = arith.truncf %4 : vector<2x512xf32> to vector<2x512xbf16>
    %c0_3 = arith.constant 0 : index
    %c0_4 = arith.constant 0 : index
    %6 = vector.load %arg2[%c0_3, %c0_4] : memref<512x128xbf16, #tpu.memory_space<vmem>>, vector<512x128xbf16>
    %cst_5 = arith.constant dense<0.000000e+00> : vector<2x128xf32>
    %7 = tpu.matmul %5, %6, %cst_5 {dimension_numbers = #tpu.dot_dimension_numbers<[1], [0], [0], [1], [0, 0, 1, 1], [], []>} : vector<2x512xbf16>, vector<512x128xbf16>, vector<2x128xf32> -> vector<2x128xf32>
    %c0_6 = arith.constant 0 : index
    %c0_7 = arith.constant 0 : index
    %8 = vector.load %arg3[%c0_6, %c0_7] : memref<1x128xf32, #tpu.memory_space<vmem>>, vector<1x128xf32>
    %9 = vector.broadcast %8 : vector<1x128xf32> to vector<2x128xf32>
    %10 = arith.addf %7, %9 : vector<2x128xf32>
    %c0_8 = arith.constant 0 : index
    %c0_9 = arith.constant 0 : index
    %11 = vector.load %arg4[%c0_8, %c0_9] : memref<2x128xf32, #tpu.memory_space<vmem>>, vector<2x128xf32>
    tpu.vector_store %arg4[%c0_8, %c0_9], %10 {strides = array<i32>} : memref<2x128xf32, #tpu.memory_space<vmem>>, vector<2x128xf32>,
    return
  }
  func.func @transform_0(%arg0: i32) -> (i32, i32, i32) {
    %c0_i32 = arith.constant 0 : i32
    %c0_i32_0 = arith.constant 0 : i32
    %c0_i32_1 = arith.constant 0 : i32
    %c0_i32_2 = arith.constant 0 : i32
    return %c0_i32, %c0_i32_0, %c0_i32_1 : i32, i32, i32
  }
  func.func @transform_1(%arg0: i32) -> (i32, i32) {
    %c0_i32 = arith.constant 0 : i32
    %c0_i32_0 = arith.constant 0 : i32
    %c0_i32_1 = arith.constant 0 : i32
    return %c0_i32, %c0_i32_0 : i32, i32
  }
  func.func @transform_2(%arg0: i32) -> (i32, i32) {
    %c0_i32 = arith.constant 0 : i32
    %c0_i32_0 = arith.constant 0 : i32
    %c0_i32_1 = arith.constant 0 : i32
    return %c0_i32, %c0_i32_0 : i32, i32
  }
  func.func @transform_3(%arg0: i32) -> (i32, i32) {
    %c0_i32 = arith.constant 0 : i32
    %c0_i32_0 = arith.constant 0 : i32
    %c0_i32_1 = arith.constant 0 : i32
    return %c0_i32, %c0_i32_0 : i32, i32
  }
}

</mosaic_0001>

<bundles_post_ra>
// kernel: resnet18_forward.23
= control target key start
LH: loop header
LB: loop body
LE: loop exit
PB: predicated region body
PF: predicated region fallthrough
CT: control target
= control target key end

     0   :  { %s433_s6 = smov 0   ;;  %s526_s0 = inlined_call_operand.vmem [shape: bf16[2,10,10,64], index: 0, kind: input, shape index: {}]   ;;  %s527_s1 = inlined_call_operand.vmem [shape: bf16[2,8,8,64], index: 1, kind: output, shape index: {}]  }
   0x1 LB: > { %s395_s7 = sadd.s32 4294967295, %s421_s6   ;;  %p399_p0 = scmp.ge.s32.totalorder %s421_s6, 1  ;;  %s421_s6 = sphi %s433_s6, %s11_s6  }
   0x2   : > { %p87_p1 = scmp.lt.s32.totalorder %s421_s6, 3 }
   0x4   : > { %p88_p2 = pnand %p399_p0, %p87_p1 }
   0x5   : > { %p107_p3 = scmp.lt.s32.totalorder (!%p88_p2), %s395_s7, 1 }
   0x6   : > { %91 = sbr.rel (%p88_p2) target bundleno = 64 (0x40), region = 24 }
   0xb   : > { %s529_s7 = smov (!%p107_p3, %s395_s7), 1  ;;  %vm173_vm0 = vcmask 1046528   ;;  %vm214_vm1 = vcmask 1045504   ;;  %vm331_vm2 = vcmask 519168  }
   0xc   : > { %s406_s8 = smul.u32 80, %s529_s7  ;;  %s405_s12 = sshll.u32 %s529_s7, 5 }
   0xd   : > { %s492_s15 = scalar_lea.vmem %s527_s1, %s405_s12 }
   0xe   : > { %s447_s11 = scalar_lea.vmem %s526_s0, %s406_s8 }
   0xf   : > { %v117_v0 = vld [vmem:[%s447_s11] sm:$0xf]  ;;  %v118_v1 = vld [vmem:[%s447_s11 + $0x4] sm:$0x1]  ;;  %v119_v2 = vld [vmem:[%s447_s11 + $0x8] sm:$0xf] }
  0x10   : > { %v120_v3 = vld [vmem:[%s447_s11 + $0xc] sm:$0x1]  ;;  %v121_v4 = vld [vmem:[%s447_s11 + $0x10] sm:$0xf]  ;;  %v122_v5 = vld [vmem:[%s447_s11 + $0x14] sm:$0x1]  ;;  %v137_v6 = vunpack.c.l.bf16 %v117_v0  ;;  %v138_v7 = vunpack.c.l.bf16 %v118_v1  ;;  %v139_v8 = vunpack.c.l.bf16 %v119_v2 }
  0x11   : > { %v123_v9 = vld [vmem:[%s447_s11 + $0x18] sm:$0xf]  ;;  %v140_v10 = vunpack.c.l.bf16 %v120_v3  ;;  %v141_v11 = vunpack.c.l.bf16 %v121_v4  ;;  %v142_v12 = vunpack.c.l.bf16 %v122_v5  ;;  %v124_v21 = vld [vmem:[%s447_s11 + $0x1c] sm:$0x1]  ;;  %v125_v26 = vld [vmem:[%s447_s11 + $0x20] sm:$0xf] }
  0x12   : > { %v456_v13 = vunpack.c.l.bf16 %v123_v9  ;;  %v174_v14 = vrot.slane %v137_v6, 1  ;;  %v175_v15 = vrot.slane %v138_v7, 1  ;;  %v177_v16 = vrot.slane %v139_v8, 1  ;;  %v126_v31 = vld [vmem:[%s447_s11 + $0x24] sm:$0x1] }
  0x13   : > { %v178_v17 = vrot.slane %v140_v10, 1  ;;  %v180_v18 = vrot.slane %v141_v11, 1  ;;  %v181_v19 = vrot.slane %v142_v12, 1  ;;  %v215_v20 = vrot.slane %v137_v6, 2  ;;  %v127_v40 = vld [vmem:[%s447_s11 + $0x28] sm:$0xf] }
  0x14   : > { %v176_v22 = vsel %vm173_vm0, %v174_v14, %v175_v15  ;;  %v216_v23 = vrot.slane %v138_v7, 2  ;;  %v218_v24 = vrot.slane %v139_v8, 2  ;;  %v219_v25 = vrot.slane %v140_v10, 2  ;;  %v128_v53 = vld [vmem:[%s447_s11 + $0x2c] sm:$0x1] }
  0x15   : > { %v179_v27 = vsel %vm173_vm0, %v177_v16, %v178_v17  ;;  %v463_v28 = vsel %vm173_vm0, %v180_v18, %v181_v19  ;;  %v206_v29 = vmax.f32 %v137_v6, %v176_v22  ;;  %v221_v30 = vrot.slane %v141_v11, 2  ;;  %v129_v62 = vld [vmem:[%s447_s11 + $0x30] sm:$0xf]  ;;  %v130_v17 = vld [vmem:[%s447_s11 + $0x34] sm:$0x1] }
  0x16   : > { %v207_v32 = vmax.f32 %v139_v8, %v179_v27  ;;  %v208_v33 = vmax.f32 %v141_v11, %v463_v28  ;;  %v217_v34 = vsel %vm214_vm1, %v215_v20, %v216_v23  ;;  %v220_v35 = vsel %vm214_vm1, %v218_v24, %v219_v25  ;;  %v131_v25 = vld [vmem:[%s447_s11 + $0x38] sm:$0xf] }
  0x17   : > { %v222_v36 = vrot.slane %v142_v12, 2  ;;  %v247_v37 = vmax.f32 %v206_v29, %v217_v34  ;;  %v144_v38 = vunpack.c.l.bf16 %v124_v21  ;;  %v145_v39 = vunpack.c.l.bf16 %v125_v26 }
  0x18   : > { %v248_v41 = vmax.f32 %v207_v32, %v220_v35  ;;  %v183_v42 = vrot.slane %v456_v13, 1  ;;  %v224_v43 = vrot.slane %v456_v13, 2  ;;  %v146_v44 = vunpack.c.l.bf16 %v126_v31 }
  0x19   : > { %v223_v45 = vsel %vm214_vm1, %v221_v30, %v222_v36  ;;  %v255_v46 = vmax.f32 %v247_v37, %v139_v8  ;;  %v184_v47 = vrot.slane %v144_v38, 1  ;;  %v225_v48 = vrot.slane %v144_v38, 2  ;;  %v132_v37 = vld [vmem:[%s447_s11 + $0x3c] sm:$0x1] }
  0x1a   : > { %v249_v49 = vmax.f32 %v208_v33, %v223_v45  ;;  %v256_v50 = vmax.f32 %v248_v41, %v141_v11  ;;  %v147_v51 = vunpack.c.l.bf16 %v127_v40  ;;  %v186_v52 = vrot.slane %v145_v39, 1 }
  0x1b   : > { %v269_v54 = vmax.f32 %v255_v46, %v179_v27  ;;  %v185_v55 = vsel %vm173_vm0, %v183_v42, %v184_v47  ;;  %v226_v56 = vsel %vm214_vm1, %v224_v43, %v225_v48  ;;  %v187_v57 = vrot.slane %v146_v44, 1 }
  0x1c   : > { %v257_v58 = vmax.f32 %v249_v49, %v456_v13  ;;  %v270_v59 = vmax.f32 %v256_v50, %v463_v28  ;;  %v209_v60 = vmax.f32 %v456_v13, %v185_v55  ;;  %v227_v61 = vrot.slane %v145_v39, 2  ;;  %v133_v50 = vld [vmem:[%s447_s11 + $0x40] sm:$0xf] }
  0x1d   : > { %v281_v63 = vmax.f32 %v269_v54, %v220_v35  ;;  %v188_v0 = vsel %vm173_vm0, %v186_v52, %v187_v57  ;;  %v228_v1 = vrot.slane %v146_v44, 2  ;;  %v148_v2 = vunpack.c.l.bf16 %v128_v53 }
  0x1e   : > { %v282_v3 = vmax.f32 %v270_v59, %v223_v45  ;;  %v250_v4 = vmax.f32 %v209_v60, %v226_v56  ;;  %v271_v5 = vmax.f32 %v257_v58, %v185_v55  ;;  %v210_v6 = vmax.f32 %v145_v39, %v188_v0  ;;  %v134_v59 = vld [vmem:[%s447_s11 + $0x44] sm:$0x1] }
  0x1f   : > { %v289_v7 = vmax.f32 %v281_v63, %v141_v11  ;;  %v229_v8 = vsel %vm214_vm1, %v227_v61, %v228_v1  ;;  %v149_v9 = vunpack.c.l.bf16 %v129_v62  ;;  %v189_v10 = vrot.slane %v147_v51, 1 }
  0x20   : > { %v258_v12 = vmax.f32 %v250_v4, %v145_v39  ;;  %v283_v14 = vmax.f32 %v271_v5, %v226_v56  ;;  %v290_v15 = vmax.f32 %v282_v3, %v456_v13  ;;  %v251_v16 = vmax.f32 %v210_v6, %v229_v8 }
  0x21   : > { %v303_v18 = vmax.f32 %v289_v7, %v463_v28  ;;  %v190_v19 = vrot.slane %v148_v2, 1  ;;  %v230_v20 = vrot.slane %v147_v51, 2  ;;  %v231_v21 = vrot.slane %v148_v2, 2 }
  0x22   : > { %v304_v22 = vmax.f32 %v290_v15, %v185_v55  ;;  %v259_v23 = vmax.f32 %v251_v16, %v147_v51  ;;  %v272_v11 = vmax.f32 %v258_v12, %v188_v0  ;;  %v291_v24 = vmax.f32 %v283_v14, %v145_v39 }
  0x23   : > { %v315_v26 = vmax.f32 %v303_v18, %v223_v45  ;;  %v191_v27 = vsel %vm173_vm0, %v189_v10, %v190_v19  ;;  %v232_v29 = vsel %vm214_vm1, %v230_v20, %v231_v21  ;;  %v150_v13 = vunpack.c.l.bf16 %v130_v17 }
  0x24   : > { %v316_v28 = vmax.f32 %v304_v22, %v226_v56  ;;  %v284_v30 = vmax.f32 %v272_v11, %v229_v8  ;;  %v305_v31 = vmax.f32 %v291_v24, %v188_v0  ;;  %v211_v32 = vmax.f32 %v147_v51, %v191_v27 }
  0x25   : > { %v323_v33 = vpack.c.bf16 %v315_v26, %v315_v26  ;;  %v273_v34 = vmax.f32 %v259_v23, %v191_v27  ;;  %v151_v35 = vunpack.c.l.bf16 %v131_v25  ;;  %v192_v36 = vrot.slane %v149_v9, 1 }
  0x26   : > { %v324_v38 = vpack.c.bf16 %v316_v28, %v316_v28  ;;  %v317_v39 = vmax.f32 %v305_v31, %v229_v8  ;;  %v252_v40 = vmax.f32 %v211_v32, %v232_v29  ;;  %v292_v41 = vmax.f32 %v284_v30, %v147_v51  ;;  %v135_v8 = vld [vmem:[%s447_s11 + $0x48] sm:$0xf] }
  0x27   : > { %332 = vst.msk [vmem:[%s492_s15] sm:$0xf] %vm331_vm2, %v323_v33  ;;  %v285_v42 = vmax.f32 %v273_v34, %v232_v29  ;;  %v193_v43 = vrot.slane %v150_v13, 1  ;;  %v233_v44 = vrot.slane %v149_v9, 2  ;;  %v234_v45 = vrot.slane %v150_v13, 2 }
  0x28   : > { %333 = vst.msk [vmem:[%s492_s15 + $0x4] sm:$0xf] %vm331_vm2, %v324_v38  ;;  %v325_v46 = vpack.c.bf16 %v317_v39, %v317_v39  ;;  %v260_v47 = vmax.f32 %v252_v40, %v149_v9  ;;  %v306_v48 = vmax.f32 %v292_v41, %v191_v27  ;;  %v152_v49 = vunpack.c.l.bf16 %v132_v37 }
  0x29   : > { %v194_v52 = vsel %vm173_vm0, %v192_v36, %v193_v43  ;;  %v235_v53 = vsel %vm214_vm1, %v233_v44, %v234_v45  ;;  %v293_v51 = vmax.f32 %v285_v42, %v149_v9  ;;  %v195_v54 = vrot.slane %v151_v35, 1 }
  0x2a   : > { %334 = vst.msk [vmem:[%s492_s15 + $0x8] sm:$0xf] %vm331_vm2, %v325_v46  ;;  %v318_v55 = vmax.f32 %v306_v48, %v232_v29  ;;  %v212_v56 = vmax.f32 %v149_v9, %v194_v52  ;;  %v274_v57 = vmax.f32 %v260_v47, %v194_v52  ;;  %v196_v58 = vrot.slane %v152_v49, 1  ;;  %v136_v9 = vld [vmem:[%s447_s11 + $0x4c] sm:$0x1] }
  0x2b   : > { %v307_v60 = vmax.f32 %v293_v51, %v194_v52  ;;  %v236_v61 = vrot.slane %v151_v35, 2  ;;  %v237_v62 = vrot.slane %v152_v49, 2  ;;  %v153_v63 = vunpack.c.l.bf16 %v133_v50 }
  0x2c   : > { %v326_v0 = vpack.c.bf16 %v318_v55, %v318_v55  ;;  %v253_v1 = vmax.f32 %v212_v56, %v235_v53  ;;  %v286_v2 = vmax.f32 %v274_v57, %v235_v53  ;;  %v197_v3 = vsel %vm173_vm0, %v195_v54, %v196_v58 }
  0x2d   : > { %v319_v4 = vmax.f32 %v307_v60, %v235_v53  ;;  %v213_v5 = vmax.f32 %v151_v35, %v197_v3  ;;  %v238_v6 = vsel %vm214_vm1, %v236_v61, %v237_v62  ;;  %v154_v7 = vunpack.c.l.bf16 %v134_v59 }
  0x2e   : > { %335 = vst.msk [vmem:[%s492_s15 + $0xc] sm:$0xf] %vm331_vm2, %v326_v0  ;;  %v261_v10 = vmax.f32 %v253_v1, %v151_v35  ;;  %v294_v12 = vmax.f32 %v286_v2, %v151_v35  ;;  %v265_v14 = vrot.slane %v153_v63, 1  ;;  %v277_v15 = vrot.slane %v153_v63, 2 }
  0x2f   : > { %v327_v16 = vpack.c.bf16 %v319_v4, %v319_v4  ;;  %v254_v17 = vmax.f32 %v213_v5, %v238_v6  ;;  %v266_v18 = vrot.slane %v154_v7, 1  ;;  %v278_v19 = vrot.slane %v154_v7, 2 }
  0x30   : > { %v275_v20 = vmax.f32 %v261_v10, %v197_v3  ;;  %v308_v21 = vmax.f32 %v294_v12, %v197_v3  ;;  %v155_v22 = vunpack.c.l.bf16 %v135_v8  ;;  %v156_v23 = vunpack.c.l.bf16 %v136_v9 }
  0x31   : > { %336 = vst.msk [vmem:[%s492_s15 + $0x10] sm:$0xf] %vm331_vm2, %v327_v16  ;;  %v262_v11 = vmax.f32 %v254_v17, %v153_v63  ;;  %v267_v24 = vsel %vm173_vm0, %v265_v14, %v266_v18  ;;  %v279_v25 = vsel %vm214_vm1, %v277_v15, %v278_v19 }
  0x32   : > { %v287_v26 = vmax.f32 %v275_v20, %v238_v6  ;;  %v320_v27 = vmax.f32 %v308_v21, %v238_v6  ;;  %v299_v29 = vrot.slane %v155_v22, 1  ;;  %v300_v13 = vrot.slane %v156_v23, 1 }
  0x33   : > { %v276_v28 = vmax.f32 %v262_v11, %v267_v24  ;;  %v311_v32 = vrot.slane %v155_v22, 2  ;;  %v312_v33 = vrot.slane %v156_v23, 2 }
  0x34   : > { %v328_v30 = vpack.c.bf16 %v320_v27, %v320_v27  ;;  %v295_v31 = vmax.f32 %v287_v26, %v153_v63  ;;  %v301_v36 = vsel %vm173_vm0, %v299_v29, %v300_v13 }
  0x35   : > { %v288_v34 = vmax.f32 %v276_v28, %v279_v25  ;;  %v313_v39 = vsel %vm214_vm1, %v311_v32, %v312_v33 }
  0x36   : > { %337 = vst.msk [vmem:[%s492_s15 + $0x14] sm:$0xf] %vm331_vm2, %v328_v30  ;;  %v309_v35 = vmax.f32 %v295_v31, %v267_v24 }
  0x37   : > { %v296_v37 = vmax.f32 %v288_v34, %v155_v22 }
  0x38   : > { %v321_v38 = vmax.f32 %v309_v35, %v279_v25 }
  0x39   : > { %v310_v40 = vmax.f32 %v296_v37, %v301_v36 }
  0x3a   : > { %v329_v41 = vpack.c.bf16 %v321_v38, %v321_v38 }
  0x3b   : > { %v322_v42 = vmax.f32 %v310_v40, %v313_v39 }
  0x3c   : > { %338 = vst.msk [vmem:[%s492_s15 + $0x18] sm:$0xf] %vm331_vm2, %v329_v41 }
  0x3d   : > { %v330_v43 = vpack.c.bf16 %v322_v42, %v322_v42 }
  0x3f   : > { %339 = vst.msk [vmem:[%s492_s15 + $0x1c] sm:$0xf] %vm331_vm2, %v330_v43 }
  0x40 PF: > { %s11_s6 = sadd.s32 1, %s421_s6  }
  0x41   : > { %p8_p4 = scmp.ge.s32.totalorder %s11_s6, 4  }
  0x43   :  { %10 = sbr.rel (!%p8_p4) target bundleno = 1 (0x1), region = 54 }

// kernel: resnet18_forward.22
= control target key start
LH: loop header
LB: loop body
LE: loop exit
PB: predicated region body
PF: predicated region fallthrough
CT: control target
= control target key end

     0   :  { %9 = vsyncpa [#allocation4], 0  ;;  %s1025_s0 = inlined_call_operand.vmem [shape: bf16[128,256], index: 0, kind: input, shape index: {}]   ;;  %s1026_s1 = inlined_call_operand.hbm [shape: bf16[256,128], index: 1, kind: input, shape index: {}]   ;;  %s1027_s2 = inlined_call_operand.vmem [shape: f32[1,128], index: 2, kind: input, shape index: {}]   ;;  %s1028_s3 = inlined_call_operand.hbm [shape: f32[1,128], index: 3, kind: input, shape index: {}]   ;;  %s1029_s4 = inlined_call_operand.vmem [shape: bf16[128,128], index: 4, kind: output, shape index: {}]  }
   0x1   :  { %s17_s17 = sshll.u32 %s1026_s1, 4  ;;  %s18_s17 = int_to_ptr.hbm [resolvable:$true] %s17_s17 }
   0x2   :  { %10 = vsyncpa [#allocation6], 0  ;;  %s831_s18 = smov [#allocation3]   ;;  %s33_s22 = sshll.u32 %s1028_s3, 4  ;;  %s34_s22 = int_to_ptr.hbm [resolvable:$true] %s33_s22 }
   0x3   :  { %s19_s19 = sshll.u32 %s831_s18, 4  ;;  %s832_s23 = smov 64   ;;  %s20_s19 = int_to_ptr.vmem [resolvable:$true] %s19_s19 }
   0x4   :  { %s833_s24 = smov 4   ;;  %s834_s25 = smov [#allocation5]  }
   0x5   :  { %25 = dma.hbm_to_vmem [thread:$0]  %s18_s17, 2048, %s20_s19, [#allocation4], %s832_s23, %s832_s23, %s833_s24  }
   0x6   :  { %s35_s26 = sshll.u32 %s834_s25, 4  ;;  %s36_s26 = int_to_ptr.vmem [resolvable:$true] %s35_s26 }
   0x7   :  { %38 = dma.hbm_to_vmem [thread:$0]  %s34_s22, 16, %s36_s26, [#allocation6]  }
   0x8   :  { %827 = dma.done.wait [#allocation4], 2048  }
   0x9   :  { %828 = vsyncadd [#allocation4], 4294965248 }
   0xa   :  { %829 = dma.done.wait [#allocation6], 16  }
   0xb   :  { %830 = vsyncadd [#allocation6], 4294967280  ;;  %v701_v0 = vld [vmem:[#allocation3 + $0x38] sm:$0xff]  ;;  %v700_v2 = vld [vmem:[#allocation3 + $0x30] sm:$0xff] }
   0xc   :  { %v709_v1 = vld [vmem:[#allocation3 + $0x78] sm:$0xff]  ;;  %307 = vmatpush.bf16.msra.mxu0 %v701_v0  ;;  %757 = vmatpush.bf16.msra.mxu2 %v701_v0  ;;  %v708_v3 = vld [vmem:[#allocation3 + $0x70] sm:$0xff]  ;;  %v699_v4 = vld [vmem:[#allocation3 + $0x28] sm:$0xff] }
   0xd   :  { %356 = vmatpush.bf16.msra.mxu1 %v709_v1  ;;  %765 = vmatpush.bf16.msra.mxu3 %v709_v1  ;;  %v707_v5 = vld [vmem:[#allocation3 + $0x68] sm:$0xff]  ;;  %v698_v6 = vld [vmem:[#allocation3 + $0x20] sm:$0xff]  ;;  %v697_v8 = vld [vmem:[#allocation3 + $0x18] sm:$0xff] }
   0xe   :  { %v706_v7 = vld [vmem:[#allocation3 + $0x60] sm:$0xff]  ;;  %v705_v9 = vld [vmem:[#allocation3 + $0x58] sm:$0xff]  ;;  %v696_v10 = vld [vmem:[#allocation3 + $0x10] sm:$0xff] }
   0xf   :  { %v704_v11 = vld [vmem:[#allocation3 + $0x50] sm:$0xff]  ;;  %v695_v12 = vld [vmem:[#allocation3 + $0x8] sm:$0xff]  ;;  %v694_v14 = vld [vmem:[#allocation3] sm:$0xff] }
  0x10   :  { %308 = vmatpush.bf16.msra.mxu0 %v700_v2  ;;  %758 = vmatpush.bf16.msra.mxu2 %v700_v2  ;;  %v703_v13 = vld [vmem:[#allocation3 + $0x48] sm:$0xff]  ;;  %v702_v15 = vld [vmem:[#allocation3 + $0x40] sm:$0xff]  ;;  %v560_v28 = vld [vmem:[%s1025_s0 + $0x10] sm:$0xf] }
  0x11   :  { %357 = vmatpush.bf16.msra.mxu1 %v708_v3  ;;  %766 = vmatpush.bf16.msra.mxu3 %v708_v3  ;;  %v552_v16 = vld [vmem:[%s1025_s0] sm:$0xf]  ;;  %v679_v17 = vld [vmem:[%s1025_s0 + $0x4] sm:$0xf0]  ;;  %v678_v20 = vld [vmem:[%s1025_s0 + $0x4] sm:$0xf] }
  0x12   :  { %v584_v18 = vld [vmem:[%s1025_s0 + $0x40] sm:$0xf]  ;;  %v687_v19 = vld [vmem:[%s1025_s0 + $0x44] sm:$0xf0]  ;;  %v554_v21 = vld [vmem:[%s1025_s0 + $0x8] sm:$0xf0]  ;;  %v553_v24 = vor.u32 %v679_v17, %v552_v16 }
  0x13   :  { %v686_v22 = vld [vmem:[%s1025_s0 + $0x44] sm:$0xf]  ;;  %v586_v23 = vld [vmem:[%s1025_s0 + $0x48] sm:$0xf0]  ;;  %v585_v25 = vor.u32 %v687_v19, %v584_v18  ;;  %v557_v26 = vor.u32 %v678_v20, %v554_v21  ;;  %v681_v29 = vld [vmem:[%s1025_s0 + $0x14] sm:$0xf0] }
  0x14   :  { %309 = vmatpush.bf16.msra.mxu0 %v699_v4  ;;  %759 = vmatpush.bf16.msra.mxu2 %v699_v4  ;;  %v589_v27 = vor.u32 %v686_v22, %v586_v23  ;;  %v592_v30 = vld [vmem:[%s1025_s0 + $0x50] sm:$0xf]  ;;  %v689_v31 = vld [vmem:[%s1025_s0 + $0x54] sm:$0xf0]  ;;  %v680_v32 = vld [vmem:[%s1025_s0 + $0x14] sm:$0xf]  ;;  %v561_v36 = vor.u32 %v681_v29, %v560_v28 }
  0x15   :  { %358 = vmatpush.bf16.msra.mxu1 %v707_v5  ;;  %767 = vmatpush.bf16.msra.mxu3 %v707_v5  ;;  %v562_v33 = vld [vmem:[%s1025_s0 + $0x18] sm:$0xf0]  ;;  %v688_v34 = vld [vmem:[%s1025_s0 + $0x54] sm:$0xf]  ;;  %v593_v37 = vor.u32 %v689_v31, %v592_v30  ;;  %v568_v40 = vld [vmem:[%s1025_s0 + $0x20] sm:$0xf] }
  0x16   :  { %v594_v35 = vld [vmem:[%s1025_s0 + $0x58] sm:$0xf0]  ;;  %v565_v38 = vor.u32 %v680_v32, %v562_v33  ;;  %v683_v41 = vld [vmem:[%s1025_s0 + $0x24] sm:$0xf0]  ;;  %v600_v42 = vld [vmem:[%s1025_s0 + $0x60] sm:$0xf] }
  0x17   :  { %v597_v39 = vor.u32 %v688_v34, %v594_v35  ;;  %v691_v43 = vld [vmem:[%s1025_s0 + $0x64] sm:$0xf0]  ;;  %v682_v44 = vld [vmem:[%s1025_s0 + $0x24] sm:$0xf]  ;;  %v570_v45 = vld [vmem:[%s1025_s0 + $0x28] sm:$0xf0]  ;;  %v569_v48 = vor.u32 %v683_v41, %v568_v40 }
  0x18   :  { %310 = vmatpush.bf16.msra.mxu0 %v698_v6  ;;  %760 = vmatpush.bf16.msra.mxu2 %v698_v6  ;;  %v690_v46 = vld [vmem:[%s1025_s0 + $0x64] sm:$0xf]  ;;  %v602_v47 = vld [vmem:[%s1025_s0 + $0x68] sm:$0xf0]  ;;  %v601_v49 = vor.u32 %v691_v43, %v600_v42  ;;  %v573_v50 = vor.u32 %v682_v44, %v570_v45  ;;  %v576_v52 = vld [vmem:[%s1025_s0 + $0x30] sm:$0xf] }
  0x19   :  { %359 = vmatpush.bf16.msra.mxu1 %v706_v7  ;;  %768 = vmatpush.bf16.msra.mxu3 %v706_v7  ;;  %v605_v51 = vor.u32 %v690_v46, %v602_v47  ;;  %v685_v53 = vld [vmem:[%s1025_s0 + $0x34] sm:$0xf0]  ;;  %v608_v54 = vld [vmem:[%s1025_s0 + $0x70] sm:$0xf]  ;;  %v684_v56 = vld [vmem:[%s1025_s0 + $0x34] sm:$0xf] }
  0x1a   :  { %v693_v55 = vld [vmem:[%s1025_s0 + $0x74] sm:$0xf0]  ;;  %v578_v57 = vld [vmem:[%s1025_s0 + $0x38] sm:$0xf0]  ;;  %v692_v58 = vld [vmem:[%s1025_s0 + $0x74] sm:$0xf]  ;;  %v577_v60 = vor.u32 %v685_v53, %v576_v52 }
  0x1b   :  { %v610_v59 = vld [vmem:[%s1025_s0 + $0x78] sm:$0xf0]  ;;  %v609_v61 = vor.u32 %v693_v55, %v608_v54  ;;  %v581_v62 = vor.u32 %v684_v56, %v578_v57  ;;  %v965_v3 = vld [vmem:[%s1027_s2] ss:$0 sm:$0xff] }
  0x1c   :  { %311 = vmatpush.bf16.msra.mxu0 %v697_v8  ;;  %761 = vmatpush.bf16.msra.mxu2 %v697_v8  ;;  %v613_v63 = vor.u32 %v692_v58, %v610_v59  ;;  %v968_v7 = vld [vmem:[#allocation5] ss:$0 sm:$0xff] }
  0x1d   :  { %360 = vmatpush.bf16.msra.mxu1 %v705_v9  ;;  %769 = vmatpush.bf16.msra.mxu3 %v705_v9 }
  0x20   :  { %312 = vmatpush.bf16.msra.mxu0 %v696_v10  ;;  %762 = vmatpush.bf16.msra.mxu2 %v696_v10 }
  0x21   :  { %361 = vmatpush.bf16.msra.mxu1 %v704_v11  ;;  %770 = vmatpush.bf16.msra.mxu3 %v704_v11 }
  0x24   :  { %313 = vmatpush.bf16.msra.mxu0 %v695_v12  ;;  %763 = vmatpush.bf16.msra.mxu2 %v695_v12 }
  0x25   :  { %362 = vmatpush.bf16.msra.mxu1 %v703_v13  ;;  %771 = vmatpush.bf16.msra.mxu3 %v703_v13 }
  0x28   :  { %314 = vmatpush.bf16.msra.mxu0 %v694_v14  ;;  %764 = vmatpush.bf16.msra.mxu2 %v694_v14 }
  0x29   :  { %363 = vmatpush.bf16.msra.mxu1 %v702_v15  ;;  %772 = vmatpush.bf16.msra.mxu3 %v702_v15 }
  0x2b   :  { %315 = vmatmul.bf16.vlgmr.msra.gmra.mxu0 %v553_v24  ;;  %335 = vmatmul.bf16.vlgmr.msra.gmra.mxu2 %v585_v25 }
  0x2c   :  { %364 = vmatmul.bf16.vlgmr.msra.gmra.mxu1 %v557_v26  ;;  %384 = vmatmul.bf16.vlgmr.msra.gmra.mxu3 %v589_v27 }
  0x3b   :  { %320 = vmatmul.bf16.gmra.mxu0 %v561_v36  ;;  %340 = vmatmul.bf16.gmra.mxu2 %v593_v37 }
  0x3c   :  { %369 = vmatmul.bf16.gmra.mxu1 %v565_v38  ;;  %389 = vmatmul.bf16.gmra.mxu3 %v597_v39 }
  0x4b   :  { %325 = vmatmul.bf16.gmra.mxu0 %v569_v48  ;;  %345 = vmatmul.bf16.gmra.mxu2 %v601_v49 }
  0x4c   :  { %374 = vmatmul.bf16.gmra.mxu1 %v573_v50  ;;  %394 = vmatmul.bf16.gmra.mxu3 %v605_v51 }
  0x5b   :  { %330 = vmatmul.bf16.gmra.mxu0 %v577_v60  ;;  %350 = vmatmul.bf16.gmra.mxu2 %v609_v61 }
  0x5c   :  { %379 = vmatmul.bf16.gmra.mxu1 %v581_v62  ;;  %399 = vmatmul.bf16.gmra.mxu3 %v613_v63 }
  0xa8   :  { %v316_v0 = vpop.f32.mrf.mxu0 }
  0xa9   :  { %v365_v1 = vpop.f32.mrf.mxu1 }
  0xaa   :  { %v366_v2 = vadd.f32 %v365_v1, %v316_v0 }
  0xac   :  { %v460_v6 = vmul.f32 %v965_v3, %v366_v2 }
  0xae   :  { %v336_v4 = vpop.f32.mrf.mxu2  ;;  %v480_v12 = vadd.f32 %v968_v7, %v460_v6 }
  0xaf   :  { %v385_v5 = vpop.f32.mrf.mxu3 }
  0xb0   :  { %v318_v8 = vpop.f32.mrf.mxu0  ;;  %v386_v10 = vadd.f32 %v385_v5, %v336_v4  ;;  %v496_v18 = vmax.f32 %v480_v12, 0.0 }
  0xb1   :  { %v367_v9 = vpop.f32.mrf.mxu1 }
  0xb2   :  { %v368_v11 = vadd.f32 %v367_v9, %v318_v8  ;;  %v468_v14 = vmul.f32 %v965_v3, %v386_v10 }
  0xb4   :  { %v461_v13 = vmul.f32 %v965_v3, %v368_v11  ;;  %v488_v23 = vadd.f32 %v968_v7, %v468_v14 }
  0xb6   :  { %v481_v15 = vadd.f32 %v968_v7, %v461_v13  ;;  %v338_v16 = vpop.f32.mrf.mxu2  ;;  %v504_v28 = vmax.f32 %v488_v23, 0.0 }
  0xb7   :  { %v387_v17 = vpop.f32.mrf.mxu3 }
  0xb8   :  { %v497_v19 = vmax.f32 %v481_v15, 0.0  ;;  %v388_v20 = vadd.f32 %v387_v17, %v338_v16  ;;  %v321_v21 = vpop.f32.mrf.mxu0 }
  0xb9   :  { %v370_v22 = vpop.f32.mrf.mxu1 }
  0xba   :  { %v713_v24 = vpack.c.bf16 %v497_v19, %v496_v18  ;;  %v469_v25 = vmul.f32 %v965_v3, %v388_v20  ;;  %v371_v27 = vadd.f32 %v370_v22, %v321_v21 }
  0xbc   :  { %714 = vst [vmem:[%s1029_s4] sm:$0xff] %v713_v24   ;;  %v489_v26 = vadd.f32 %v968_v7, %v469_v25  ;;  %v462_v33 = vmul.f32 %v965_v3, %v371_v27 }
  0xbe   :  { %v505_v29 = vmax.f32 %v489_v26, 0.0  ;;  %v341_v30 = vpop.f32.mrf.mxu2  ;;  %v482_v38 = vadd.f32 %v968_v7, %v462_v33 }
  0xbf   :  { %v390_v31 = vpop.f32.mrf.mxu3 }
  0xc0   :  { %v733_v32 = vpack.c.bf16 %v505_v29, %v504_v28  ;;  %v323_v34 = vpop.f32.mrf.mxu0  ;;  %v391_v36 = vadd.f32 %v390_v31, %v341_v30  ;;  %v498_v44 = vmax.f32 %v482_v38, 0.0 }
  0xc1   :  { %v372_v35 = vpop.f32.mrf.mxu1 }
  0xc2   :  { %753 = vst [vmem:[%s1029_s4 + $0x20] sm:$0xff] %v733_v32   ;;  %v373_v37 = vadd.f32 %v372_v35, %v323_v34  ;;  %v470_v40 = vmul.f32 %v965_v3, %v391_v36 }
  0xc4   :  { %v463_v39 = vmul.f32 %v965_v3, %v373_v37  ;;  %v490_v49 = vadd.f32 %v968_v7, %v470_v40 }
  0xc6   :  { %v483_v41 = vadd.f32 %v968_v7, %v463_v39  ;;  %v343_v42 = vpop.f32.mrf.mxu2  ;;  %v506_v54 = vmax.f32 %v490_v49, 0.0 }
  0xc7   :  { %v392_v43 = vpop.f32.mrf.mxu3 }
  0xc8   :  { %v499_v45 = vmax.f32 %v483_v41, 0.0  ;;  %v393_v46 = vadd.f32 %v392_v43, %v343_v42  ;;  %v326_v47 = vpop.f32.mrf.mxu0 }
  0xc9   :  { %v375_v48 = vpop.f32.mrf.mxu1 }
  0xca   :  { %v718_v50 = vpack.c.bf16 %v499_v45, %v498_v44  ;;  %v471_v51 = vmul.f32 %v965_v3, %v393_v46  ;;  %v376_v53 = vadd.f32 %v375_v48, %v326_v47 }
  0xcc   :  { %750 = vst [vmem:[%s1029_s4 + $0x8] sm:$0xff] %v718_v50   ;;  %v491_v52 = vadd.f32 %v968_v7, %v471_v51  ;;  %v464_v59 = vmul.f32 %v965_v3, %v376_v53 }
  0xce   :  { %v507_v55 = vmax.f32 %v491_v52, 0.0  ;;  %v346_v56 = vpop.f32.mrf.mxu2  ;;  %v484_v0 = vadd.f32 %v968_v7, %v464_v59 }
  0xcf   :  { %v395_v57 = vpop.f32.mrf.mxu3 }
  0xd0   :  { %v738_v58 = vpack.c.bf16 %v507_v55, %v506_v54  ;;  %v328_v60 = vpop.f32.mrf.mxu0  ;;  %v396_v62 = vadd.f32 %v395_v57, %v346_v56  ;;  %v500_v8 = vmax.f32 %v484_v0, 0.0 }
  0xd1   :  { %v377_v61 = vpop.f32.mrf.mxu1 }
  0xd2   :  { %754 = vst [vmem:[%s1029_s4 + $0x28] sm:$0xff] %v738_v58   ;;  %v378_v63 = vadd.f32 %v377_v61, %v328_v60  ;;  %v472_v2 = vmul.f32 %v965_v3, %v396_v62 }
  0xd4   :  { %v465_v1 = vmul.f32 %v965_v3, %v378_v63  ;;  %v492_v13 = vadd.f32 %v968_v7, %v472_v2 }
  0xd6   :  { %v485_v4 = vadd.f32 %v968_v7, %v465_v1  ;;  %v348_v5 = vpop.f32.mrf.mxu2  ;;  %v508_v18 = vmax.f32 %v492_v13, 0.0 }
  0xd7   :  { %v397_v6 = vpop.f32.mrf.mxu3 }
  0xd8   :  { %v501_v9 = vmax.f32 %v485_v4, 0.0  ;;  %v398_v10 = vadd.f32 %v397_v6, %v348_v5  ;;  %v331_v11 = vpop.f32.mrf.mxu0 }
  0xd9   :  { %v380_v12 = vpop.f32.mrf.mxu1 }
  0xda   :  { %v723_v14 = vpack.c.bf16 %v501_v9, %v500_v8  ;;  %v473_v15 = vmul.f32 %v965_v3, %v398_v10  ;;  %v381_v17 = vadd.f32 %v380_v12, %v331_v11 }
  0xdc   :  { %751 = vst [vmem:[%s1029_s4 + $0x10] sm:$0xff] %v723_v14   ;;  %v493_v16 = vadd.f32 %v968_v7, %v473_v15  ;;  %v466_v23 = vmul.f32 %v965_v3, %v381_v17 }
  0xde   :  { %v509_v19 = vmax.f32 %v493_v16, 0.0  ;;  %v351_v20 = vpop.f32.mrf.mxu2  ;;  %v486_v28 = vadd.f32 %v968_v7, %v466_v23 }
  0xdf   :  { %v400_v21 = vpop.f32.mrf.mxu3 }
  0xe0   :  { %v743_v22 = vpack.c.bf16 %v509_v19, %v508_v18  ;;  %v333_v24 = vpop.f32.mrf.mxu0  ;;  %v401_v26 = vadd.f32 %v400_v21, %v351_v20  ;;  %v502_v34 = vmax.f32 %v486_v28, 0.0 }
  0xe1   :  { %v382_v25 = vpop.f32.mrf.mxu1 }
  0xe2   :  { %755 = vst [vmem:[%s1029_s4 + $0x30] sm:$0xff] %v743_v22   ;;  %v383_v27 = vadd.f32 %v382_v25, %v333_v24  ;;  %v474_v30 = vmul.f32 %v965_v3, %v401_v26 }
  0xe4   :  { %v467_v29 = vmul.f32 %v965_v3, %v383_v27  ;;  %v494_v37 = vadd.f32 %v968_v7, %v474_v30 }
  0xe6   :  { %v487_v31 = vadd.f32 %v968_v7, %v467_v29  ;;  %v353_v32 = vpop.f32.mrf.mxu2  ;;  %v510_v41 = vmax.f32 %v494_v37, 0.0 }
  0xe7   :  { %v402_v33 = vpop.f32.mrf.mxu3 }
  0xe8   :  { %v503_v35 = vmax.f32 %v487_v31, 0.0  ;;  %v403_v36 = vadd.f32 %v402_v33, %v353_v32 }
  0xea   :  { %v728_v38 = vpack.c.bf16 %v503_v35, %v502_v34  ;;  %v475_v39 = vmul.f32 %v965_v3, %v403_v36 }
  0xec   :  { %752 = vst [vmem:[%s1029_s4 + $0x18] sm:$0xff] %v728_v38   ;;  %v495_v40 = vadd.f32 %v968_v7, %v475_v39 }
  0xee   :  { %v511_v42 = vmax.f32 %v495_v40, 0.0 }
  0xf0   :  { %v748_v43 = vpack.c.bf16 %v511_v42, %v510_v41 }
  0xf2   :  { %756 = vst [vmem:[%s1029_s4 + $0x38] sm:$0xff] %v748_v43  }
  0xf3   :  { %548 = vsyncpa [#allocation4], 1 }
  0xf4   :  { %549 = vsyncpa [#allocation6], 1 }

// kernel: resnet18_forward.25
= control target key start
LH: loop header
LB: loop body
LE: loop exit
PB: predicated region body
PF: predicated region fallthrough
CT: control target
= control target key end

     0   :  { %10 = vsyncpa [#allocation5], 0  ;;  %s1248_s0 = inlined_call_operand.vmem [shape: bf16[32,640], index: 0, kind: input, shape index: {}]   ;;  %s1249_s1 = inlined_call_operand.hbm [shape: bf16[640,128], index: 1, kind: input, shape index: {}]   ;;  %s1250_s2 = inlined_call_operand.hbm [shape: f32[1,128], index: 2, kind: input, shape index: {}]   ;;  %s1251_s3 = inlined_call_operand.hbm [shape: f32[1,128], index: 3, kind: input, shape index: {}]   ;;  %s1252_s4 = inlined_call_operand.vmem [shape: bf16[32,128], index: 4, kind: input, shape index: {}]   ;;  %s1253_s5 = inlined_call_operand.vmem [shape: bf16[32,128], index: 5, kind: output, shape index: {}]  }
   0x1   :  { %12 = vsyncpa [#allocation5 + $0x1], 0 }
   0x2   :  { %13 = vsyncpa [#allocation7], 0  ;;  %s1104_s18 = smov 0   ;;  %s1106_s19 = smov 0  }
   0x3   :  { %s1108_s20 = smov 0   ;;  %s1110_s21 = smov 0  }
   0x4   :  { %s1112_s22 = smov 0   ;;  %s1114_s23 = smov 0  }
   0x5 LB: > { %s748_s24 = sadd.s32 4294967295, %s1067_s23   ;;  %s31_s25 = sadd.s32 1, %s1063_s22  ;;  %s1067_s23 = sphi %s1114_s23, %s19_s23   ;;  %s1063_s22 = sphi %s1112_s22, %s1262_s22   ;;  %s1059_s21 = sphi %s1110_s21, %s1261_s21   ;;  %s1055_s20 = sphi %s1108_s20, %s1260_s20   ;;  %s1051_s19 = sphi %s1106_s19, %s1259_s19   ;;  %s1047_s18 = sphi %s1104_s18, %s1258_s18  }
   0x6   : > { %p32_p0 = scmp.ge.s32.totalorder %s31_s25, 5  ;;  %s47_s26 = sadd.s32 1, %s1055_s20 }
   0x7   : > { %p54_p1 = scmp.ne.s32.totalorder %s1055_s20, %s1051_s19  ;;  %p55_p2 = scmp.eq.s32.totalorder %s1067_s23, 0 }
   0x8   : > { %s1264_s25 = smov (%p32_p0, %s31_s25), 0  ;;  %p88_p4 = scmp.ne.s32.totalorder %s1051_s19, %s1047_s18 }
   0x9   : > { %p1140_p3 = por %p55_p2, %p54_p1  ;;  %s43_s28 = ssub.s32 %s1063_s22, %s1264_s25 }
   0xa   : > { %p1147_p5 = scmp.eq.s32.totalorder %s748_s24, 0  ;;  %p45_p6 = scmp.eq.s32.totalorder %s43_s28, 0 }
   0xb   : > { %p749_p7 = scmp.ge.s32.totalorder %s1067_s23, 1  ;;  %p207_p9 = scmp.lt.s32.totalorder %s1067_s23, 6 }
   0xc   : > { %p1154_p8 = por %p1147_p5, %p88_p4  ;;  %s220_s10 = sshll.u32 %s1250_s2, 4  ;;  %s221_s10 = int_to_ptr.hbm [resolvable:$true] %s220_s10 }
   0xd   : > { %s1160_s6 = scalar_select %p45_p6, %s1055_s20, %s47_s26  }
   0xe   : > { %p1162_p10 = pnand %p749_p7, %p207_p9  ;;  %s1069_s11 = smov [#allocation6]  }
   0xf   : > { %s222_s12 = sshll.u32 %s1069_s11, 4  ;;  %s233_s15 = sshll.u32 %s1251_s3, 4  ;;  %s223_s12 = int_to_ptr.vmem [resolvable:$true] %s222_s12  ;;  %s234_s15 = int_to_ptr.hbm [resolvable:$true] %s233_s15 }
  0x10   : > { %p859_p11 = pneg %p1162_p10  ;;  %s1070_s16 = smov [#allocation8]  }
  0x11   : > { %s235_s17 = sshll.u32 %s1070_s16, 4  ;;  %p753_p13 = scmp.ge.s32.totalorder %s1067_s23, 5  ;;  %s236_s17 = int_to_ptr.vmem [resolvable:$true] %s235_s17 }
  0x12   : > { %p860_p12 = pnand %p859_p11, %p1147_p5 }
  0x13   : > { %254 = sbr.rel (%p753_p13) target bundleno = 38 (0x26), region = 28 }
  0x14   : > { %862 = dma.hbm_to_vmem [thread:$0]  (!%p860_p12), %s221_s10, 16, %s223_s12, [#allocation7]  }
  0x15   : > { %865 = dma.hbm_to_vmem [thread:$0]  (!%p860_p12), %s234_s15, 16, %s236_s17, [#allocation7]  }
  0x18   : > { %257 = sbr.rel (!%p1140_p3) target bundleno = 32 (0x20), region = 32  ;;  %s259_s18 = sand.u32 (%p1140_p3), 1, %s1055_s20  }
  0x19   : > { %s755_s24 = sshll.u32 (%p1140_p3), %s1063_s22, 2  ;;  %s754_s26 = sshll.u32 (%p1140_p3), %s259_s18, 4 }
  0x1a   : > { %s266_s9 = scalar_lea.vmem (%p1140_p3), %s1248_s0, %s755_s24  ;;  %s261_s10 = scalar_lea.vmem (%p1140_p3), [#allocation3], %s754_s26 }
  0x1b   : > { %v283_v0 = vld [vmem:[%s266_s9] sm:$0xf] (%p1140_p3)  ;;  %v285_v1 = vld [vmem:[%s266_s9 + $0x14] sm:$0xf] (%p1140_p3)  ;;  %v287_v2 = vld [vmem:[%s266_s9 + $0x28] sm:$0xf] (%p1140_p3) }
  0x1c   : > { %284 = vst [vmem:[%s261_s10] sm:$0xf] (%p1140_p3), %v283_v0  ;;  %v289_v3 = vld [vmem:[%s266_s9 + $0x3c] sm:$0xf] (%p1140_p3) }
  0x1d   : > { %286 = vst [vmem:[%s261_s10 + $0x4] sm:$0xf] %v285_v1 }
  0x1e   : > { %288 = vst [vmem:[%s261_s10 + $0x8] sm:$0xf] %v287_v2 }
  0x1f   : > { %290 = vst [vmem:[%s261_s10 + $0xc] sm:$0xf] %v289_v3 }
  0x20 PF: > { %s323_s11 = sand.u32 1, %s1055_s20   ;;  %s810_s12 = sshll.u32 %s1063_s22, 6 }
  0x21   : > { %s756_s13 = sshll.u32 %s323_s11, 6  ;;  %s333_s16 = scalar_lea.hbm %s1249_s1, %s810_s12 }
  0x22   : > { %s334_s17 = sshll.u32 %s333_s16, 4  ;;  %s327_s18 = scalar_lea.vmem [#allocation4], %s756_s13  ;;  %s335_s17 = int_to_ptr.hbm [resolvable:$true] %s334_s17 }
  0x23   : > { %s336_s24 = sshll.u32 %s327_s18, 4  ;;  %s324_s26 = scalar_lea.sflag [#allocation5], %s323_s11  ;;  %s337_s24 = int_to_ptr.vmem [resolvable:$true] %s336_s24 }
  0x24   : > { %s1071_s28 = smov 64   ;;  %s1072_s8 = smov 4  }
  0x25   : > { %853 = dma.hbm_to_vmem [thread:$0]  (%p1140_p3), %s335_s17, 1024, %s337_s24, %s324_s26, %s1071_s28, %s1071_s28, %s1072_s8  }
  0x26 PF: > { %348 = sbr.rel (%p1162_p10) target bundleno = 246 (0xf6), region = 77  ;;  %s351_s9 = sand.u32 (!%p1162_p10), 1, %s1051_s19  }
  0x27   : > { %s760_s10 = sshll.u32 (!%p1162_p10), %s351_s9, 4  ;;  %s761_s14 = sshll.u32 (!%p1162_p10), %s351_s9, 6 }
  0x28   : > { %s1194_s12 = scalar_lea.vmem (!%p1162_p10), [#allocation3], %s760_s10  ;;  %s358_s13 = scalar_lea.sflag (!%p1162_p10), [#allocation5], %s351_s9 }
  0x29   : > { %s1196_s15 = scalar_lea.vmem (!%p1162_p10), [#allocation4], %s761_s14 }
  0x2b   : > { %1038 = dma.done.wait (%p1154_p8), %s358_s13, 1024  }
  0x2c   : > { %1040 = vsyncadd (%p1154_p8), %s358_s13, 4294966272 }
  0x2d   : > { %1042 = dma.done.wait (%p1147_p5), [#allocation7], 32  }
  0x2e   : > { %1044 = vsyncadd (%p1147_p5), [#allocation7], 4294967264  ;;  %p764_p0 = scmp.ne.s32.totalorder %s1059_s21, 0 }
  0x30   : > { %437 = sbr.rel (%p764_p0) target bundleno = 58 (0x3a), region = 97 }
  0x35   : > { %v1073_v4 = vmov 0.0  }
  0x36   : > { %438 = vst [vmem:[#allocation2 + $0x10] sm:$0xff] %v1073_v4 }
  0x37   : > { %439 = vst [vmem:[#allocation2] sm:$0xff] %v1073_v4 }
  0x38   : > { %440 = vst [vmem:[#allocation2 + $0x18] sm:$0xff] %v1073_v4 }
  0x39   : > { %441 = vst [vmem:[#allocation2 + $0x8] sm:$0xff] %v1073_v4 }
  0x3a PF: > { %v820_v5 = vld [vmem:[%s1196_s15 + $0x38] sm:$0xff]  ;;  %v819_v6 = vld [vmem:[%s1196_s15 + $0x30] sm:$0xff]  ;;  %v818_v7 = vld [vmem:[%s1196_s15 + $0x28] sm:$0xff]  ;;  %p805_p1 = scmp.ne.s32.totalorder %s1059_s21, 4 }
  0x3b   : > { %526 = vmatpush.bf16.msra.mxu0 %v820_v5  ;;  %841 = vmatpush.bf16.msra.mxu1 %v820_v5  ;;  %v817_v8 = vld [vmem:[%s1196_s15 + $0x20] sm:$0xff]  ;;  %v816_v9 = vld [vmem:[%s1196_s15 + $0x18] sm:$0xff]  ;;  %v815_v10 = vld [vmem:[%s1196_s15 + $0x10] sm:$0xff] }
  0x3c   : > { %v814_v11 = vld [vmem:[%s1196_s15 + $0x8] sm:$0xff]  ;;  %v813_v12 = vld [vmem:[%s1196_s15] sm:$0xff] }
  0x3d   : > { %v811_v13 = vld [vmem:[%s1194_s12] sm:$0xff]  ;;  %v812_v14 = vld [vmem:[%s1194_s12 + $0x8] sm:$0xff] }
  0x3e   : > { %v442_v15 = vld [vmem:[#allocation2 + $0x10] sm:$0xff]  ;;  %v443_v21 = vld [vmem:[#allocation2] sm:$0xff] }
  0x3f   : > { %527 = vmatpush.bf16.msra.mxu0 %v819_v6  ;;  %842 = vmatpush.bf16.msra.mxu1 %v819_v6  ;;  %v444_v16 = vld [vmem:[#allocation2 + $0x18] sm:$0xff] }
  0x40   : > { %v445_v22 = vld [vmem:[#allocation2 + $0x8] sm:$0xff] }
  0x43   : > { %528 = vmatpush.bf16.msra.mxu0 %v818_v7  ;;  %843 = vmatpush.bf16.msra.mxu1 %v818_v7 }
  0x47   : > { %529 = vmatpush.bf16.msra.mxu0 %v817_v8  ;;  %844 = vmatpush.bf16.msra.mxu1 %v817_v8 }
  0x4b   : > { %530 = vmatpush.bf16.msra.mxu0 %v816_v9  ;;  %845 = vmatpush.bf16.msra.mxu1 %v816_v9 }
  0x4f   : > { %531 = vmatpush.bf16.msra.mxu0 %v815_v10  ;;  %846 = vmatpush.bf16.msra.mxu1 %v815_v10 }
  0x53   : > { %532 = vmatpush.bf16.msra.mxu0 %v814_v11  ;;  %847 = vmatpush.bf16.msra.mxu1 %v814_v11 }
  0x57   : > { %533 = vmatpush.bf16.msra.mxu0 %v813_v12  ;;  %848 = vmatpush.bf16.msra.mxu1 %v813_v12 }
  0x5a   : > { %534 = vmatmul.bf16.vlgmr.msra.gmra.mxu0 %v811_v13  ;;  %539 = vmatmul.bf16.vlgmr.msra.gmra.mxu1 %v812_v14 }
  0xd7   : > { %v535_v17 = vpop.f32.mrf.mxu0  ;;  %v540_v18 = vpop.f32.mrf.mxu1 }
  0xd8   : > { %v545_v19 = vadd.f32 %v535_v17, %v442_v15  ;;  %v547_v20 = vadd.f32 %v540_v18, %v444_v16 }
  0xda   : > { %549 = vst [vmem:[#allocation2 + $0x10] sm:$0xff] %v545_v19 }
  0xdb   : > { %551 = vst [vmem:[#allocation2 + $0x18] sm:$0xff] %v547_v20 }
  0xdf   : > { %v537_v23 = vpop.f32.mrf.mxu0  ;;  %v542_v24 = vpop.f32.mrf.mxu1  ;;  %556 = sbr.rel (%p805_p1) target bundleno = 246 (0xf6), region = 101 }
  0xe0   : > { %v546_v25 = vadd.f32 %v537_v23, %v443_v21  ;;  %v548_v26 = vadd.f32 %v542_v24, %v445_v22 }
  0xe2   : > { %550 = vst [vmem:[#allocation2] sm:$0xff] %v546_v25 }
  0xe3   : > { %552 = vst [vmem:[#allocation2 + $0x8] sm:$0xff] %v548_v26 }
  0xe4   : > { %v557_v27 = vld [vmem:[#allocation2 + $0x10] sm:$0xff]  ;;  %v923_v29 = vld [vmem:[#allocation6] ss:$0 sm:$0xff]  ;;  %v924_v30 = vld [vmem:[#allocation8] ss:$0 sm:$0xff] }
  0xe5   : > { %v822_v31 = vld [vmem:[%s1252_s4] sm:$0xff]   ;;  %v559_v32 = vld [vmem:[#allocation2 + $0x18] sm:$0xff]  ;;  %v565_v34 = vmul.f32 %v923_v29, %v557_v27  ;;  %v839_v38 = vld [vmem:[%s1252_s4 + $0x8] sm:$0xff]  }
  0xe6   : > { %v823_v36 = vunpack.c.l.bf16 %v822_v31  ;;  %v824_v37 = vunpack.c.h.bf16 %v822_v31  ;;  %v567_v39 = vmul.f32 %v923_v29, %v559_v32  ;;  %v827_v41 = vunpack.c.l.bf16 %v839_v38 }
  0xe7   : > { %v828_v42 = vunpack.c.h.bf16 %v839_v38  ;;  %v573_v43 = vadd.f32 %v924_v30, %v565_v34 }
  0xe8   : > { %v575_v45 = vadd.f32 %v924_v30, %v567_v39 }
  0xe9   : > { %v558_v28 = vld [vmem:[#allocation2] sm:$0xff]  ;;  %v585_v47 = vadd.f32 %v823_v36, %v573_v43 }
  0xea   : > { %v560_v33 = vld [vmem:[#allocation2 + $0x8] sm:$0xff]  ;;  %v566_v35 = vmul.f32 %v923_v29, %v558_v28  ;;  %v587_v49 = vadd.f32 %v827_v41, %v575_v45 }
  0xeb   : > { %v568_v40 = vmul.f32 %v923_v29, %v560_v33  ;;  %v589_v51 = vmax.f32 %v585_v47, 0.0 }
  0xec   : > { %v574_v44 = vadd.f32 %v924_v30, %v566_v35  ;;  %v591_v53 = vmax.f32 %v587_v49, 0.0 }
  0xed   : > { %v576_v46 = vadd.f32 %v924_v30, %v568_v40 }
  0xee   : > { %v586_v48 = vadd.f32 %v824_v37, %v574_v44 }
  0xef   : > { %v588_v50 = vadd.f32 %v828_v42, %v576_v46 }
  0xf0   : > { %v590_v52 = vmax.f32 %v586_v48, 0.0 }
  0xf1   : > { %v592_v54 = vmax.f32 %v588_v50, 0.0 }
  0xf2   : > { %v832_v55 = vpack.c.bf16 %v590_v52, %v589_v51 }
  0xf3   : > { %v837_v56 = vpack.c.bf16 %v592_v54, %v591_v53 }
  0xf4   : > { %833 = vst [vmem:[%s1253_s5] sm:$0xff] %v832_v55  }
  0xf5   : > { %840 = vst [vmem:[%s1253_s5 + $0x8] sm:$0xff] %v837_v56  }
  0xf6 PF: > { %s19_s23 = sadd.s32 1, %s1067_s23   ;;  %s1258_s18 = smov %s1051_s19 }
  0xf7   : > { %p16_p2 = scmp.ge.s32.totalorder %s19_s23, 7   ;;  %s1259_s19 = smov %s1055_s20 }
  0xf8   : > { %s1260_s20 = smov %s1160_s6  ;;  %s1261_s21 = smov %s1063_s22 }
  0xf9   : > { %s1262_s22 = smov %s1264_s25  ;;  %18 = sbr.rel (!%p16_p2) target bundleno = 5 (0x5), region = 150 }
  0xfe   :  { %629 = vsyncpa [#allocation5], 1 }
  0xff   :  { %631 = vsyncpa [#allocation5 + $0x1], 1 }
 0x100   :  { %632 = vsyncpa [#allocation7], 1 }

// kernel: resnet18_forward.24
= control target key start
LH: loop header
LB: loop body
LE: loop exit
PB: predicated region body
PF: predicated region fallthrough
CT: control target
= control target key end

     0   :  { %9 = vsyncpa [#allocation5], 0  ;;  %s1137_s0 = inlined_call_operand.vmem [shape: bf16[32,640], index: 0, kind: input, shape index: {}]   ;;  %s1138_s1 = inlined_call_operand.hbm [shape: bf16[640,128], index: 1, kind: input, shape index: {}]   ;;  %s1139_s2 = inlined_call_operand.hbm [shape: f32[1,128], index: 2, kind: input, shape index: {}]   ;;  %s1140_s3 = inlined_call_operand.hbm [shape: f32[1,128], index: 3, kind: input, shape index: {}]   ;;  %s1141_s4 = inlined_call_operand.vmem [shape: bf16[32,128], index: 4, kind: output, shape index: {}]  }
   0x1   :  { %11 = vsyncpa [#allocation5 + $0x1], 0 }
   0x2   :  { %12 = vsyncpa [#allocation7], 0  ;;  %s999_s15 = smov 0   ;;  %s1001_s16 = smov 0  }
   0x3   :  { %s1003_s17 = smov 0   ;;  %s1005_s18 = smov 0  }
   0x4   :  { %s1007_s19 = smov 0   ;;  %s1009_s20 = smov 0  }
   0x5 LB: > { %s658_s21 = sadd.s32 4294967295, %s967_s20   ;;  %s30_s22 = sadd.s32 1, %s963_s19  ;;  %s967_s20 = sphi %s1009_s20, %s18_s20   ;;  %s963_s19 = sphi %s1007_s19, %s1150_s19   ;;  %s959_s18 = sphi %s1005_s18, %s1149_s18   ;;  %s955_s17 = sphi %s1003_s17, %s1148_s17   ;;  %s951_s16 = sphi %s1001_s16, %s1147_s16   ;;  %s947_s15 = sphi %s999_s15, %s1146_s15  }
   0x6   : > { %p31_p0 = scmp.ge.s32.totalorder %s30_s22, 5  ;;  %s46_s23 = sadd.s32 1, %s955_s17 }
   0x7   : > { %p53_p1 = scmp.ne.s32.totalorder %s955_s17, %s951_s16  ;;  %p54_p2 = scmp.eq.s32.totalorder %s967_s20, 0 }
   0x8   : > { %s1152_s22 = smov (%p31_p0, %s30_s22), 0  ;;  %p87_p4 = scmp.ne.s32.totalorder %s951_s16, %s947_s15 }
   0x9   : > { %p1035_p3 = por %p54_p2, %p53_p1  ;;  %s42_s25 = ssub.s32 %s963_s19, %s1152_s22 }
   0xa   : > { %p1042_p5 = scmp.eq.s32.totalorder %s658_s21, 0  ;;  %p44_p6 = scmp.eq.s32.totalorder %s42_s25, 0 }
   0xb   : > { %p659_p7 = scmp.ge.s32.totalorder %s967_s20, 1  ;;  %p178_p9 = scmp.lt.s32.totalorder %s967_s20, 6 }
   0xc   : > { %p1049_p8 = por %p1042_p5, %p87_p4  ;;  %s191_s6 = sshll.u32 %s1139_s2, 4  ;;  %s192_s6 = int_to_ptr.hbm [resolvable:$true] %s191_s6 }
   0xd   : > { %s1055_s28 = scalar_select %p44_p6, %s955_s17, %s46_s23  }
   0xe   : > { %p1057_p10 = pnand %p659_p7, %p178_p9  ;;  %s969_s7 = smov [#allocation6]  }
   0xf   : > { %s193_s8 = sshll.u32 %s969_s7, 4  ;;  %s204_s11 = sshll.u32 %s1140_s3, 4  ;;  %s194_s8 = int_to_ptr.vmem [resolvable:$true] %s193_s8  ;;  %s205_s11 = int_to_ptr.hbm [resolvable:$true] %s204_s11 }
  0x10   : > { %p759_p11 = pneg %p1057_p10  ;;  %s970_s12 = smov [#allocation8]  }
  0x11   : > { %s206_s13 = sshll.u32 %s970_s12, 4  ;;  %p662_p13 = scmp.ge.s32.totalorder %s967_s20, 5  ;;  %s207_s13 = int_to_ptr.vmem [resolvable:$true] %s206_s13 }
  0x12   : > { %p760_p12 = pnand %p759_p11, %p1042_p5 }
  0x13   : > { %213 = sbr.rel (%p662_p13) target bundleno = 38 (0x26), region = 24 }
  0x14   : > { %762 = dma.hbm_to_vmem [thread:$0]  (!%p760_p12), %s192_s6, 16, %s194_s8, [#allocation7]  }
  0x15   : > { %765 = dma.hbm_to_vmem [thread:$0]  (!%p760_p12), %s205_s11, 16, %s207_s13, [#allocation7]  }
  0x18   : > { %216 = sbr.rel (!%p1035_p3) target bundleno = 32 (0x20), region = 28  ;;  %s218_s14 = sand.u32 (%p1035_p3), 1, %s955_s17  }
  0x19   : > { %s664_s15 = sshll.u32 (%p1035_p3), %s963_s19, 2  ;;  %s663_s21 = sshll.u32 (%p1035_p3), %s218_s14, 4 }
  0x1a   : > { %s225_s30 = scalar_lea.vmem (%p1035_p3), %s1137_s0, %s664_s15  ;;  %s220_s5 = scalar_lea.vmem (%p1035_p3), [#allocation3], %s663_s21 }
  0x1b   : > { %v242_v0 = vld [vmem:[%s225_s30] sm:$0xf] (%p1035_p3)  ;;  %v244_v1 = vld [vmem:[%s225_s30 + $0x14] sm:$0xf] (%p1035_p3)  ;;  %v246_v2 = vld [vmem:[%s225_s30 + $0x28] sm:$0xf] (%p1035_p3) }
  0x1c   : > { %243 = vst [vmem:[%s220_s5] sm:$0xf] (%p1035_p3), %v242_v0  ;;  %v248_v3 = vld [vmem:[%s225_s30 + $0x3c] sm:$0xf] (%p1035_p3) }
  0x1d   : > { %245 = vst [vmem:[%s220_s5 + $0x4] sm:$0xf] %v244_v1 }
  0x1e   : > { %247 = vst [vmem:[%s220_s5 + $0x8] sm:$0xf] %v246_v2 }
  0x1f   : > { %249 = vst [vmem:[%s220_s5 + $0xc] sm:$0xf] %v248_v3 }
  0x20 PF: > { %s282_s6 = sand.u32 1, %s955_s17   ;;  %s719_s7 = sshll.u32 %s963_s19, 6 }
  0x21   : > { %s665_s8 = sshll.u32 %s282_s6, 6  ;;  %s292_s11 = scalar_lea.hbm %s1138_s1, %s719_s7 }
  0x22   : > { %s293_s12 = sshll.u32 %s292_s11, 4  ;;  %s286_s13 = scalar_lea.vmem [#allocation4], %s665_s8  ;;  %s294_s12 = int_to_ptr.hbm [resolvable:$true] %s293_s12 }
  0x23   : > { %s295_s14 = sshll.u32 %s286_s13, 4  ;;  %s283_s15 = scalar_lea.sflag [#allocation5], %s282_s6  ;;  %s296_s14 = int_to_ptr.vmem [resolvable:$true] %s295_s14 }
  0x24   : > { %s971_s21 = smov 64   ;;  %s972_s23 = smov 4  }
  0x25   : > { %753 = dma.hbm_to_vmem [thread:$0]  (%p1035_p3), %s294_s12, 1024, %s296_s14, %s283_s15, %s971_s21, %s971_s21, %s972_s23  }
  0x26 PF: > { %307 = sbr.rel (%p1057_p10) target bundleno = 244 (0xf4), region = 73  ;;  %s310_s25 = sand.u32 (!%p1057_p10), 1, %s951_s16  }
  0x27   : > { %s669_s30 = sshll.u32 (!%p1057_p10), %s310_s25, 4  ;;  %s670_s5 = sshll.u32 (!%p1057_p10), %s310_s25, 6 }
  0x28   : > { %s1089_s7 = scalar_lea.vmem (!%p1057_p10), [#allocation3], %s669_s30  ;;  %s317_s8 = scalar_lea.sflag (!%p1057_p10), [#allocation5], %s310_s25 }
  0x29   : > { %s1091_s9 = scalar_lea.vmem (!%p1057_p10), [#allocation4], %s670_s5 }
  0x2b   : > { %938 = dma.done.wait (%p1049_p8), %s317_s8, 1024  }
  0x2c   : > { %940 = vsyncadd (%p1049_p8), %s317_s8, 4294966272 }
  0x2d   : > { %942 = dma.done.wait (%p1042_p5), [#allocation7], 32  }
  0x2e   : > { %944 = vsyncadd (%p1042_p5), [#allocation7], 4294967264  ;;  %p673_p0 = scmp.ne.s32.totalorder %s959_s18, 0 }
  0x30   : > { %377 = sbr.rel (%p673_p0) target bundleno = 58 (0x3a), region = 93 }
  0x35   : > { %v973_v4 = vmov 0.0  }
  0x36   : > { %378 = vst [vmem:[#allocation2 + $0x10] sm:$0xff] %v973_v4 }
  0x37   : > { %379 = vst [vmem:[#allocation2] sm:$0xff] %v973_v4 }
  0x38   : > { %380 = vst [vmem:[#allocation2 + $0x18] sm:$0xff] %v973_v4 }
  0x39   : > { %381 = vst [vmem:[#allocation2 + $0x8] sm:$0xff] %v973_v4 }
  0x3a PF: > { %v729_v5 = vld [vmem:[%s1091_s9 + $0x38] sm:$0xff]  ;;  %v728_v6 = vld [vmem:[%s1091_s9 + $0x30] sm:$0xff]  ;;  %v727_v7 = vld [vmem:[%s1091_s9 + $0x28] sm:$0xff]  ;;  %p714_p1 = scmp.ne.s32.totalorder %s959_s18, 4 }
  0x3b   : > { %466 = vmatpush.bf16.msra.mxu0 %v729_v5  ;;  %741 = vmatpush.bf16.msra.mxu1 %v729_v5  ;;  %v726_v8 = vld [vmem:[%s1091_s9 + $0x20] sm:$0xff]  ;;  %v725_v9 = vld [vmem:[%s1091_s9 + $0x18] sm:$0xff]  ;;  %v724_v10 = vld [vmem:[%s1091_s9 + $0x10] sm:$0xff] }
  0x3c   : > { %v723_v11 = vld [vmem:[%s1091_s9 + $0x8] sm:$0xff]  ;;  %v722_v12 = vld [vmem:[%s1091_s9] sm:$0xff] }
  0x3d   : > { %v720_v13 = vld [vmem:[%s1089_s7] sm:$0xff]  ;;  %v721_v14 = vld [vmem:[%s1089_s7 + $0x8] sm:$0xff] }
  0x3e   : > { %v382_v15 = vld [vmem:[#allocation2 + $0x10] sm:$0xff]  ;;  %v383_v21 = vld [vmem:[#allocation2] sm:$0xff] }
  0x3f   : > { %467 = vmatpush.bf16.msra.mxu0 %v728_v6  ;;  %742 = vmatpush.bf16.msra.mxu1 %v728_v6  ;;  %v384_v16 = vld [vmem:[#allocation2 + $0x18] sm:$0xff] }
  0x40   : > { %v385_v22 = vld [vmem:[#allocation2 + $0x8] sm:$0xff] }
  0x43   : > { %468 = vmatpush.bf16.msra.mxu0 %v727_v7  ;;  %743 = vmatpush.bf16.msra.mxu1 %v727_v7 }
  0x47   : > { %469 = vmatpush.bf16.msra.mxu0 %v726_v8  ;;  %744 = vmatpush.bf16.msra.mxu1 %v726_v8 }
  0x4b   : > { %470 = vmatpush.bf16.msra.mxu0 %v725_v9  ;;  %745 = vmatpush.bf16.msra.mxu1 %v725_v9 }
  0x4f   : > { %471 = vmatpush.bf16.msra.mxu0 %v724_v10  ;;  %746 = vmatpush.bf16.msra.mxu1 %v724_v10 }
  0x53   : > { %472 = vmatpush.bf16.msra.mxu0 %v723_v11  ;;  %747 = vmatpush.bf16.msra.mxu1 %v723_v11 }
  0x57   : > { %473 = vmatpush.bf16.msra.mxu0 %v722_v12  ;;  %748 = vmatpush.bf16.msra.mxu1 %v722_v12 }
  0x5a   : > { %474 = vmatmul.bf16.vlgmr.msra.gmra.mxu0 %v720_v13  ;;  %479 = vmatmul.bf16.vlgmr.msra.gmra.mxu1 %v721_v14 }
  0xd7   : > { %v475_v17 = vpop.f32.mrf.mxu0  ;;  %v480_v18 = vpop.f32.mrf.mxu1 }
  0xd8   : > { %v485_v19 = vadd.f32 %v475_v17, %v382_v15  ;;  %v487_v20 = vadd.f32 %v480_v18, %v384_v16 }
  0xda   : > { %489 = vst [vmem:[#allocation2 + $0x10] sm:$0xff] %v485_v19 }
  0xdb   : > { %491 = vst [vmem:[#allocation2 + $0x18] sm:$0xff] %v487_v20 }
  0xdf   : > { %v477_v23 = vpop.f32.mrf.mxu0  ;;  %v482_v24 = vpop.f32.mrf.mxu1  ;;  %496 = sbr.rel (%p714_p1) target bundleno = 244 (0xf4), region = 97 }
  0xe0   : > { %v486_v25 = vadd.f32 %v477_v23, %v383_v21  ;;  %v488_v26 = vadd.f32 %v482_v24, %v385_v22 }
  0xe2   : > { %490 = vst [vmem:[#allocation2] sm:$0xff] %v486_v25 }
  0xe3   : > { %492 = vst [vmem:[#allocation2 + $0x8] sm:$0xff] %v488_v26 }
  0xe4   : > { %v497_v27 = vld [vmem:[#allocation2 + $0x10] sm:$0xff]  ;;  %v823_v29 = vld [vmem:[#allocation6] ss:$0 sm:$0xff]  ;;  %v824_v30 = vld [vmem:[#allocation8] ss:$0 sm:$0xff] }
  0xe5   : > { %v499_v31 = vld [vmem:[#allocation2 + $0x18] sm:$0xff]  ;;  %v505_v33 = vmul.f32 %v823_v29, %v497_v27 }
  0xe6   : > { %v507_v35 = vmul.f32 %v823_v29, %v499_v31 }
  0xe7   : > { %v513_v37 = vadd.f32 %v824_v30, %v505_v33 }
  0xe8   : > { %v515_v39 = vadd.f32 %v824_v30, %v507_v35 }
  0xe9   : > { %v498_v28 = vld [vmem:[#allocation2] sm:$0xff]  ;;  %v517_v41 = vmax.f32 %v513_v37, 0.0 }
  0xea   : > { %v500_v32 = vld [vmem:[#allocation2 + $0x8] sm:$0xff]  ;;  %v506_v34 = vmul.f32 %v823_v29, %v498_v28  ;;  %v519_v43 = vmax.f32 %v515_v39, 0.0 }
  0xeb   : > { %v508_v36 = vmul.f32 %v823_v29, %v500_v32 }
  0xec   : > { %v514_v38 = vadd.f32 %v824_v30, %v506_v34 }
  0xed   : > { %v516_v40 = vadd.f32 %v824_v30, %v508_v36 }
  0xee   : > { %v518_v42 = vmax.f32 %v514_v38, 0.0 }
  0xef   : > { %v520_v44 = vmax.f32 %v516_v40, 0.0 }
  0xf0   : > { %v733_v45 = vpack.c.bf16 %v518_v42, %v517_v41 }
  0xf1   : > { %v738_v46 = vpack.c.bf16 %v520_v44, %v519_v43 }
  0xf2   : > { %734 = vst [vmem:[%s1141_s4] sm:$0xff] %v733_v45  }
  0xf3   : > { %740 = vst [vmem:[%s1141_s4 + $0x8] sm:$0xff] %v738_v46  }
  0xf4 PF: > { %s18_s20 = sadd.s32 1, %s967_s20   ;;  %s1146_s15 = smov %s951_s16 }
  0xf5   : > { %p15_p2 = scmp.ge.s32.totalorder %s18_s20, 7   ;;  %s1147_s16 = smov %s955_s17 }
  0xf6   : > { %s1148_s17 = smov %s1055_s28  ;;  %s1149_s18 = smov %s963_s19 }
  0xf7   : > { %s1150_s19 = smov %s1152_s22  ;;  %17 = sbr.rel (!%p15_p2) target bundleno = 5 (0x5), region = 143 }
  0xfc   :  { %557 = vsyncpa [#allocation5], 1 }
  0xfd   :  { %559 = vsyncpa [#allocation5 + $0x1], 1 }
  0xfe   :  { %560 = vsyncpa [#allocation7], 1 }

// kernel: resnet18_forward.28
= control target key start
LH: loop header
LB: loop body
LE: loop exit
PB: predicated region body
PF: predicated region fallthrough
CT: control target
= control target key end

     0   :  { %9 = vsyncpa [#allocation4], 0  ;;  %s992_s0 = inlined_call_operand.vmem [shape: bf16[8,640], index: 0, kind: input, shape index: {}]   ;;  %s993_s1 = inlined_call_operand.hbm [shape: bf16[640,128], index: 1, kind: input, shape index: {}]   ;;  %s994_s2 = inlined_call_operand.hbm [shape: f32[1,128], index: 2, kind: input, shape index: {}]   ;;  %s995_s3 = inlined_call_operand.hbm [shape: f32[1,128], index: 3, kind: input, shape index: {}]   ;;  %s996_s4 = inlined_call_operand.vmem [shape: bf16[8,128], index: 4, kind: output, shape index: {}]  }
   0x1   :  { %11 = vsyncpa [#allocation4 + $0x1], 0 }
   0x2   :  { %12 = vsyncpa [#allocation6], 0  ;;  %s865_s15 = smov 0   ;;  %s867_s16 = smov 0  }
   0x3   :  { %s869_s17 = smov 0   ;;  %s871_s18 = smov 0  }
   0x4   :  { %s873_s19 = smov 0   ;;  %s875_s20 = smov 0  }
   0x5 LB: > { %s549_s21 = sadd.s32 4294967295, %s833_s20   ;;  %s74_s22 = sadd.s32 1, %s821_s17  ;;  %s833_s20 = sphi %s875_s20, %s18_s20   ;;  %s829_s19 = sphi %s873_s19, %s1006_s19   ;;  %s825_s18 = sphi %s871_s18, %s1005_s18   ;;  %s821_s17 = sphi %s869_s17, %s1004_s17   ;;  %s817_s16 = sphi %s867_s16, %s1003_s16   ;;  %s813_s15 = sphi %s865_s15, %s1002_s15  }
   0x6   : > { %p81_p0 = scmp.ne.s32.totalorder %s821_s17, %s817_s16  ;;  %p82_p1 = scmp.eq.s32.totalorder %s833_s20, 0 }
   0x7   : > { %p87_p2 = scmp.ne.s32.totalorder %s817_s16, %s813_s15  ;;  %p899_p3 = scmp.eq.s32.totalorder %s549_s21, 0 }
   0x8   : > { %p903_p4 = por %p82_p1, %p81_p0  ;;  %p550_p5 = scmp.ge.s32.totalorder %s833_s20, 1 }
   0x9   : > { %p910_p6 = por %p899_p3, %p87_p2  ;;  %p178_p7 = scmp.lt.s32.totalorder %s833_s20, 6 }
   0xa   : > { %s191_s28 = sshll.u32 %s994_s2, 4  ;;  %s835_s30 = smov [#allocation5]   ;;  %s192_s28 = int_to_ptr.hbm [resolvable:$true] %s191_s28 }
   0xb   : > { %p918_p8 = pnand %p550_p5, %p178_p7  ;;  %s193_s5 = sshll.u32 %s835_s30, 4  ;;  %s194_s5 = int_to_ptr.vmem [resolvable:$true] %s193_s5 }
   0xc   : > { %p631_p10 = scmp.lt.s32.totalorder %s833_s20, 5  ;;  %s204_s8 = sshll.u32 %s995_s3, 4  ;;  %s205_s8 = int_to_ptr.hbm [resolvable:$true] %s204_s8 }
   0xd   : > { %p618_p9 = pneg %p918_p8  ;;  %s836_s10 = smov [#allocation7]  }
   0xe   : > { %p932_p12 = pnand %p631_p10, %p903_p4  ;;  %s206_s11 = sshll.u32 %s836_s10, 4  ;;  %s207_s11 = int_to_ptr.vmem [resolvable:$true] %s206_s11 }
   0xf   : > { %p619_p11 = pnand %p618_p9, %p899_p3  ;;  %s228_s12 = sand.u32 1, %s821_s17  }
  0x10   : > { %s30_s13 = sadd.s32 1, %s829_s19  ;;  %s554_s14 = sshll.u32 %s228_s12, 6 }
  0x11   : > { %621 = dma.hbm_to_vmem [thread:$0]  (!%p619_p11), %s192_s28, 16, %s194_s5, [#allocation6]  }
  0x12   : > { %624 = dma.hbm_to_vmem [thread:$0]  (!%p619_p11), %s205_s8, 16, %s207_s11, [#allocation6]  }
  0x13   : > { %p31_p13 = scmp.ge.s32.totalorder %s30_s13, 5  ;;  %s599_s15 = sshll.u32 %s829_s19, 6 }
  0x14   : > { %s238_s26 = scalar_lea.hbm %s993_s1, %s599_s15  ;;  %s232_s27 = scalar_lea.vmem [#allocation3], %s554_s14 }
  0x15   : > { %s1008_s13 = smov (%p31_p13, %s30_s13), 0  ;;  %s241_s28 = sshll.u32 %s232_s27, 4  ;;  %s242_s28 = int_to_ptr.vmem [resolvable:$true] %s241_s28 }
  0x16   : > { %s69_s30 = ssub.s32 %s829_s19, %s1008_s13  ;;  %s239_s5 = sshll.u32 %s238_s26, 4  ;;  %s240_s5 = int_to_ptr.hbm [resolvable:$true] %s239_s5 }
  0x17   : > { %p72_p0 = scmp.eq.s32.totalorder %s69_s30, 0  ;;  %s229_s7 = scalar_lea.sflag [#allocation4], %s228_s12 }
  0x18   : > { %s837_s8 = smov 64   ;;  %s838_s10 = smov 4  }
  0x19   : > { %s949_s6 = scalar_select %p72_p0, %s821_s17, %s74_s22  }
  0x1a   : > { %628 = dma.hbm_to_vmem [thread:$0]  (!%p932_p12), %s240_s5, 1024, %s242_s28, %s229_s7, %s837_s8, %s837_s8, %s838_s10  }
  0x1b   : > { %253 = sbr.rel (%p918_p8) target bundleno = 222 (0xde), region = 36  ;;  %s255_s11 = sand.u32 (!%p918_p8), 1, %s817_s16  }
  0x1c   : > { %s558_s14 = sshll.u32 (!%p918_p8), %s255_s11, 6  ;;  %s256_s15 = scalar_lea.sflag (!%p918_p8), [#allocation4], %s255_s11 }
  0x1d   : > { %s259_s21 = scalar_lea.vmem (!%p918_p8), [#allocation3], %s558_s14 }
  0x20   : > { %804 = dma.done.wait (%p910_p6), %s256_s15, 1024  }
  0x21   : > { %806 = vsyncadd (%p910_p6), %s256_s15, 4294966272 }
  0x22   : > { %808 = dma.done.wait (%p899_p3), [#allocation6], 32  }
  0x23   : > { %810 = vsyncadd (%p899_p3), [#allocation6], 4294967264  ;;  %p307_p1 = scmp.lt.s32.totalorder %s825_s18, 4  ;;  %p562_p2 = scmp.ne.s32.totalorder %s825_s18, 0 }
  0x25   : > { %s308_s22 = scalar_select %p307_p1, %s825_s18, 4 }
  0x26   : > { %324 = sbr.rel (%p562_p2) target bundleno = 45 (0x2d), region = 52 }
  0x27   : > { %s561_s29 = sshll.u32 %s308_s22, 2 }
  0x28   : > { %s312_s24 = scalar_lea.vmem %s992_s0, %s561_s29 }
  0x2b   : > { %v839_v0 = vmov 0.0  }
  0x2c   : > { %325 = vst [vmem:[#allocation2] sm:$0xff] %v839_v0 }
  0x2d PF: > { %v607_v1 = vld [vmem:[%s259_s21 + $0x38] sm:$0xff]  ;;  %v606_v2 = vld [vmem:[%s259_s21 + $0x30] sm:$0xff]  ;;  %v605_v3 = vld [vmem:[%s259_s21 + $0x28] sm:$0xff]  ;;  %p595_p3 = scmp.ne.s32.totalorder %s825_s18, 4 }
  0x2e   : > { %392 = vmatpush.bf16.msra.mxu0 %v607_v1  ;;  %v604_v4 = vld [vmem:[%s259_s21 + $0x20] sm:$0xff]  ;;  %v603_v5 = vld [vmem:[%s259_s21 + $0x18] sm:$0xff]  ;;  %v602_v6 = vld [vmem:[%s259_s21 + $0x10] sm:$0xff] }
  0x2f   : > { %v601_v7 = vld [vmem:[%s259_s21 + $0x8] sm:$0xff]  ;;  %v600_v8 = vld [vmem:[%s259_s21] sm:$0xff]  ;;  %v327_v9 = vld [vmem:[%s312_s24] sm:$0xf] }
  0x32   : > { %393 = vmatpush.bf16.msra.mxu0 %v606_v2 }
  0x33   : > { %v326_v10 = vld [vmem:[#allocation2] sm:$0xff] }
  0x36   : > { %394 = vmatpush.bf16.msra.mxu0 %v605_v3 }
  0x3a   : > { %395 = vmatpush.bf16.msra.mxu0 %v604_v4 }
  0x3e   : > { %396 = vmatpush.bf16.msra.mxu0 %v603_v5 }
  0x42   : > { %397 = vmatpush.bf16.msra.mxu0 %v602_v6 }
  0x46   : > { %398 = vmatpush.bf16.msra.mxu0 %v601_v7 }
  0x4a   : > { %399 = vmatpush.bf16.msra.mxu0 %v600_v8 }
  0x4d   : > { %400 = vmatmul.bf16.vlgmr.msra.gmra.mxu0 %v327_v9 }
  0xca   : > { %v401_v11 = vpop.f32.mrf.mxu0 }
  0xcb   : > { %v405_v12 = vadd.f32 %v401_v11, %v326_v10 }
  0xcd   : > { %406 = vst [vmem:[#allocation2] sm:$0xff] %v405_v12 }
  0xce   : > { %410 = sbr.rel (%p595_p3) target bundleno = 222 (0xde), region = 56 }
  0xd2   : > { %v403_v13 = vpop.f32.mrf.mxu0 }
  0xd3   : > { %v687_v15 = vld [vmem:[#allocation5] ss:$0 sm:$0xff]  ;;  %v688_v16 = vld [vmem:[#allocation7] ss:$0 sm:$0xff] }
  0xd4   : > { %v411_v14 = vld [vmem:[#allocation2] sm:$0xff] }
  0xd5   : > { %v416_v17 = vmul.f32 %v687_v15, %v411_v14 }
  0xd7   : > { %v421_v18 = vadd.f32 %v688_v16, %v416_v17 }
  0xd9   : > { %v422_v19 = vmax.f32 %v421_v18, 0.0 }
  0xdb   : > { %v423_v20 = vpack.c.bf16 %v422_v19, %v422_v19 }
  0xdd   : > { %424 = vst [vmem:[%s996_s4] sm:$0xf] %v423_v20 }
  0xde PF: > { %s18_s20 = sadd.s32 1, %s833_s20   ;;  %s1002_s15 = smov %s817_s16 }
  0xdf   : > { %p15_p4 = scmp.ge.s32.totalorder %s18_s20, 7   ;;  %s1003_s16 = smov %s821_s17 }
  0xe0   : > { %s1004_s17 = smov %s949_s6  ;;  %s1005_s18 = smov %s829_s19 }
  0xe1   : > { %s1006_s19 = smov %s1008_s13  ;;  %17 = sbr.rel (!%p15_p4) target bundleno = 5 (0x5), region = 97 }
  0xe6   :  { %450 = vsyncpa [#allocation4], 1 }
  0xe7   :  { %452 = vsyncpa [#allocation4 + $0x1], 1 }
  0xe8   :  { %453 = vsyncpa [#allocation6], 1 }

// kernel: resnet18_forward.30
= control target key start
LH: loop header
LB: loop body
LE: loop exit
PB: predicated region body
PF: predicated region fallthrough
CT: control target
= control target key end

     0   :  { %10 = vsyncpa [#allocation4], 0  ;;  %s1190_s0 = inlined_call_operand.vmem [shape: bf16[8,1152], index: 0, kind: input, shape index: {}]   ;;  %s1191_s1 = inlined_call_operand.vmem [shape: bf16[1152,128], index: 1, kind: input, shape index: {}]   ;;  %s1192_s2 = inlined_call_operand.hbm [shape: f32[1,128], index: 2, kind: input, shape index: {}]   ;;  %s1193_s3 = inlined_call_operand.hbm [shape: f32[1,128], index: 3, kind: input, shape index: {}]   ;;  %s1194_s4 = inlined_call_operand.vmem [shape: bf16[8,128], index: 4, kind: input, shape index: {}]   ;;  %s1195_s5 = inlined_call_operand.vmem [shape: bf16[8,128], index: 5, kind: output, shape index: {}]  }
   0x1   :  { %11 = vsyncpa [#allocation6], 0  ;;  %s1086_s18 = smov 0   ;;  %s1088_s19 = smov 0  }
   0x2   :  { %s1090_s20 = smov 0  }
   0x3 LB: > { %s777_s21 = sadd.s32 4294967295, %s1051_s20   ;;  %s29_s22 = sadd.s32 1, %s1047_s19  ;;  %s1051_s20 = sphi %s1090_s20, %s17_s20   ;;  %s1047_s19 = sphi %s1088_s19, %s1199_s19   ;;  %s1043_s18 = sphi %s1086_s18, %s1198_s18  }
   0x4   : > { %p30_p0 = scmp.ge.s32.totalorder %s29_s22, 3  ;;  %p778_p1 = scmp.ge.s32.totalorder %s1051_s20, 1 }
   0x5   : > { %p205_p2 = scmp.lt.s32.totalorder %s1051_s20, 4  ;;  %p1111_p4 = scmp.eq.s32.totalorder %s777_s21, 0 }
   0x6   : > { %s1201_s22 = smov (%p30_p0, %s29_s22), 0  ;;  %s218_s27 = sshll.u32 %s1192_s2, 4  ;;  %s219_s27 = int_to_ptr.hbm [resolvable:$true] %s218_s27 }
   0x7   : > { %p1107_p3 = pnand %p778_p1, %p205_p2  ;;  %s1053_s28 = smov [#allocation3]  }
   0x8   : > { %s220_s29 = sshll.u32 %s1053_s28, 4  ;;  %s231_s7 = sshll.u32 %s1193_s3, 4  ;;  %s221_s29 = int_to_ptr.vmem [resolvable:$true] %s220_s29  ;;  %s232_s7 = int_to_ptr.hbm [resolvable:$true] %s231_s7 }
   0x9   : > { %p921_p5 = pneg %p1107_p3  ;;  %s1054_s8 = smov [#allocation5]  }
   0xa   : > { %s233_s9 = sshll.u32 %s1054_s8, 4  ;;  %281 = sbr.rel (%p1107_p3) target bundleno = 217 (0xd9), region = 40  ;;  %s234_s9 = int_to_ptr.vmem [resolvable:$true] %s233_s9 }
   0xb   : > { %p922_p6 = pnand %p1111_p4, %p921_p5 }
   0xd   : > { %924 = dma.hbm_to_vmem [thread:$0]  (!%p922_p6), %s219_s27, 16, %s221_s29, [#allocation4]  }
   0xe   : > { %927 = dma.hbm_to_vmem [thread:$0]  (!%p922_p6), %s232_s7, 16, %s234_s9, [#allocation6]  }
   0xf   : > { %1034 = dma.done.wait (%p1111_p4), [#allocation4], 16  }
  0x10   : > { %1036 = vsyncadd (%p1111_p4), [#allocation4], 4294967280 }
  0x11   : > { %1038 = dma.done.wait (%p1111_p4), [#allocation6], 16  }
  0x12   : > { %1040 = vsyncadd (%p1111_p4), [#allocation6], 4294967280  ;;  %s336_s10 = smul.u32 3, %s1043_s18  ;;  %p788_p9 = scmp.ne.s32.totalorder %s1043_s18, 0 }
  0x13   : > { %s346_s11 = smul.u32 48, %s1043_s18 }
  0x14   : > { %p339_p7 = scmp.lt.s32.totalorder %s336_s10, 8 }
  0x15   : > { %p347_p8 = scmp.lt.s32.totalorder %s346_s11, 143  ;;  %372 = sbr.rel (%p788_p9) target bundleno = 28 (0x1c), region = 52 }
  0x16   : > { %s1203_s10 = smov (!%p339_p7, %s336_s10), 8 }
  0x17   : > { %s1205_s11 = smov (!%p347_p8, %s346_s11), 143  ;;  %s786_s12 = sshll.u32 %s1203_s10, 2 }
  0x18   : > { %s1140_s15 = scalar_lea.vmem %s1190_s0, %s786_s12  ;;  %s787_s16 = sshll.u32 %s1205_s11, 2 }
  0x19   : > { %s1145_s23 = scalar_lea.vmem %s1191_s1, %s787_s16 }
  0x1a   : > { %v1055_v0 = vmov 0.0  }
  0x1b   : > { %373 = vst [vmem:[#allocation2] sm:$0xff] %v1055_v0 }
  0x1c PF: > { %v896_v1 = vld [vmem:[%s1145_s23 + $0x38] sm:$0xff]  ;;  %v895_v4 = vld [vmem:[%s1145_s23 + $0x30] sm:$0xff]  ;;  %v894_v7 = vld [vmem:[%s1145_s23 + $0x28] sm:$0xff]  ;;  %p885_p10 = scmp.ne.s32.totalorder %s1043_s18, 2 }
  0x1d   : > { %v904_v2 = vld [vmem:[%s1145_s23 + $0x78] sm:$0xff]  ;;  %580 = vmatpush.bf16.msra.mxu0 %v896_v1  ;;  %v903_v5 = vld [vmem:[%s1145_s23 + $0x70] sm:$0xff]  ;;  %v902_v8 = vld [vmem:[%s1145_s23 + $0x68] sm:$0xff] }
  0x1e   : > { %v912_v3 = vld [vmem:[%s1145_s23 + $0xb8] sm:$0xff]  ;;  %593 = vmatpush.bf16.msra.mxu1 %v904_v2  ;;  %v911_v6 = vld [vmem:[%s1145_s23 + $0xb0] sm:$0xff]  ;;  %v910_v9 = vld [vmem:[%s1145_s23 + $0xa8] sm:$0xff] }
  0x1f   : > { %606 = vmatpush.bf16.msra.mxu2 %v912_v3  ;;  %v893_v10 = vld [vmem:[%s1145_s23 + $0x20] sm:$0xff]  ;;  %v892_v13 = vld [vmem:[%s1145_s23 + $0x18] sm:$0xff]  ;;  %v891_v16 = vld [vmem:[%s1145_s23 + $0x10] sm:$0xff] }
  0x20   : > { %v901_v11 = vld [vmem:[%s1145_s23 + $0x60] sm:$0xff]  ;;  %v900_v14 = vld [vmem:[%s1145_s23 + $0x58] sm:$0xff]  ;;  %v899_v17 = vld [vmem:[%s1145_s23 + $0x50] sm:$0xff] }
  0x21   : > { %581 = vmatpush.bf16.msra.mxu0 %v895_v4  ;;  %v909_v12 = vld [vmem:[%s1145_s23 + $0xa0] sm:$0xff]  ;;  %v908_v15 = vld [vmem:[%s1145_s23 + $0x98] sm:$0xff]  ;;  %v907_v18 = vld [vmem:[%s1145_s23 + $0x90] sm:$0xff] }
  0x22   : > { %594 = vmatpush.bf16.msra.mxu1 %v903_v5  ;;  %v890_v19 = vld [vmem:[%s1145_s23 + $0x8] sm:$0xff]  ;;  %v375_v21 = vld [vmem:[%s1140_s15] sm:$0xff] }
  0x23   : > { %607 = vmatpush.bf16.msra.mxu2 %v911_v6  ;;  %v898_v20 = vld [vmem:[%s1145_s23 + $0x48] sm:$0xff]  ;;  %v427_v24 = vunpack.c.l.b16 %v375_v21  ;;  %v428_v25 = vunpack.c.h.b16 %v375_v21  ;;  %v889_v26 = vld [vmem:[%s1145_s23] sm:$0xff] }
  0x24   : > { %v906_v22 = vld [vmem:[%s1145_s23 + $0x88] sm:$0xff]  ;;  %v897_v27 = vld [vmem:[%s1145_s23 + $0x40] sm:$0xff] }
  0x25   : > { %582 = vmatpush.bf16.msra.mxu0 %v894_v7  ;;  %v376_v23 = vld [vmem:[%s1140_s15 + $0x8] sm:$0xf]  ;;  %v905_v29 = vld [vmem:[%s1145_s23 + $0x80] sm:$0xff]  ;;  %v430_v30 = vpack.c.b16 %v427_v24, %v427_v24  ;;  %v431_v31 = vpack.c.b16 %v428_v25, %v428_v25 }
  0x26   : > { %595 = vmatpush.bf16.msra.mxu1 %v902_v8  ;;  %v429_v28 = vunpack.c.l.b16 %v376_v23  ;;  %v374_v36 = vld [vmem:[#allocation2] sm:$0xff] }
  0x27   : > { %608 = vmatpush.bf16.msra.mxu2 %v910_v9 }
  0x28   : > { %v432_v32 = vpack.c.b16 %v429_v28, %v429_v28 }
  0x29   : > { %583 = vmatpush.bf16.msra.mxu0 %v893_v10 }
  0x2a   : > { %596 = vmatpush.bf16.msra.mxu1 %v901_v11 }
  0x2b   : > { %609 = vmatpush.bf16.msra.mxu2 %v909_v12 }
  0x2d   : > { %584 = vmatpush.bf16.msra.mxu0 %v892_v13 }
  0x2e   : > { %597 = vmatpush.bf16.msra.mxu1 %v900_v14 }
  0x2f   : > { %610 = vmatpush.bf16.msra.mxu2 %v908_v15 }
  0x31   : > { %585 = vmatpush.bf16.msra.mxu0 %v891_v16 }
  0x32   : > { %598 = vmatpush.bf16.msra.mxu1 %v899_v17 }
  0x33   : > { %611 = vmatpush.bf16.msra.mxu2 %v907_v18 }
  0x35   : > { %586 = vmatpush.bf16.msra.mxu0 %v890_v19 }
  0x36   : > { %599 = vmatpush.bf16.msra.mxu1 %v898_v20 }
  0x37   : > { %612 = vmatpush.bf16.msra.mxu2 %v906_v22 }
  0x39   : > { %587 = vmatpush.bf16.msra.mxu0 %v889_v26 }
  0x3a   : > { %600 = vmatpush.bf16.msra.mxu1 %v897_v27 }
  0x3b   : > { %613 = vmatpush.bf16.msra.mxu2 %v905_v29 }
  0x3c   : > { %588 = vmatmul.bf16.vlgmr.msra.gmra.mxu0 %v430_v30 }
  0x3d   : > { %601 = vmatmul.bf16.vlgmr.msra.gmra.mxu1 %v431_v31 }
  0x3e   : > { %614 = vmatmul.bf16.vlgmr.msra.gmra.mxu2 %v432_v32 }
  0xb9   : > { %v589_v33 = vpop.f32.mrf.mxu0 }
  0xba   : > { %v602_v34 = vpop.f32.mrf.mxu1 }
  0xbb   : > { %v603_v35 = vadd.f32 %v602_v34, %v589_v33 }
  0xc1   : > { %v615_v37 = vpop.f32.mrf.mxu2  ;;  %v591_v39 = vpop.f32.mrf.mxu0 }
  0xc2   : > { %v616_v38 = vadd.f32 %v615_v37, %v603_v35  ;;  %v604_v40 = vpop.f32.mrf.mxu1 }
  0xc4   : > { %v619_v41 = vadd.f32 %v616_v38, %v374_v36 }
  0xc5   : > { %624 = sbr.rel (%p885_p10) target bundleno = 217 (0xd9), region = 56 }
  0xc6   : > { %620 = vst [vmem:[#allocation2] sm:$0xff] %v619_v41 }
  0xc9   : > { %v617_v42 = vpop.f32.mrf.mxu2 }
  0xca   : > { %v959_v44 = vld [vmem:[#allocation3] ss:$0 sm:$0xff]  ;;  %v960_v45 = vld [vmem:[#allocation5] ss:$0 sm:$0xff]  ;;  %v636_v46 = vld [vmem:[%s1194_s4] sm:$0xf] }
  0xcb   : > { %v637_v48 = vunpack.c.l.bf16 %v636_v46 }
  0xcd   : > { %v625_v43 = vld [vmem:[#allocation2] sm:$0xff] }
  0xce   : > { %v630_v47 = vmul.f32 %v959_v44, %v625_v43 }
  0xd0   : > { %v635_v49 = vadd.f32 %v960_v45, %v630_v47 }
  0xd2   : > { %v638_v50 = vadd.f32 %v637_v48, %v635_v49 }
  0xd4   : > { %v639_v51 = vmax.f32 %v638_v50, 0.0 }
  0xd6   : > { %v640_v52 = vpack.c.bf16 %v639_v51, %v639_v51 }
  0xd8   : > { %641 = vst [vmem:[%s1195_s5] sm:$0xf] %v640_v52 }
  0xd9 PF: > { %s17_s20 = sadd.s32 1, %s1051_s20   ;;  %s1198_s18 = smov %s1047_s19 }
  0xda   : > { %p14_p11 = scmp.ge.s32.totalorder %s17_s20, 5   ;;  %s1199_s19 = smov %s1201_s22 }
  0xdc   :  { %16 = sbr.rel (!%p14_p11) target bundleno = 3 (0x3), region = 95 }
  0xe1   :  { %667 = vsyncpa [#allocation4], 1 }
  0xe2   :  { %669 = vsyncpa [#allocation4 + $0x1], 1 }
  0xe3   :  { %670 = vsyncpa [#allocation6], 1 }

// kernel: resnet18_forward.29
= control target key start
LH: loop header
LB: loop body
LE: loop exit
PB: predicated region body
PF: predicated region fallthrough
CT: control target
= control target key end

     0   :  { %9 = vsyncpa [#allocation4], 0  ;;  %s312_s0 = inlined_call_operand.vmem [shape: bf16[8,128], index: 0, kind: input, shape index: {}]   ;;  %s313_s1 = inlined_call_operand.vmem [shape: bf16[128,128], index: 1, kind: input, shape index: {}]   ;;  %s314_s2 = inlined_call_operand.hbm [shape: f32[1,128], index: 2, kind: input, shape index: {}]   ;;  %s315_s3 = inlined_call_operand.hbm [shape: f32[1,128], index: 3, kind: input, shape index: {}]   ;;  %s316_s4 = inlined_call_operand.vmem [shape: bf16[8,128], index: 4, kind: output, shape index: {}]  }
   0x1   :  { %s20_s17 = sshll.u32 %s314_s2, 4  ;;  %s21_s17 = int_to_ptr.hbm [resolvable:$true] %s20_s17 }
   0x2   :  { %10 = vsyncpa [#allocation6], 0  ;;  %s249_s18 = smov [#allocation3]   ;;  %s31_s22 = sshll.u32 %s315_s3, 4  ;;  %s32_s22 = int_to_ptr.hbm [resolvable:$true] %s31_s22 }
   0x3   :  { %s22_s19 = sshll.u32 %s249_s18, 4  ;;  %s250_s23 = smov [#allocation5]   ;;  %s23_s19 = int_to_ptr.vmem [resolvable:$true] %s22_s19 }
   0x4   :  { %25 = dma.hbm_to_vmem [thread:$0]  %s21_s17, 16, %s23_s19, [#allocation4]  }
   0x5   :  { %s33_s24 = sshll.u32 %s250_s23, 4  ;;  %s34_s24 = int_to_ptr.vmem [resolvable:$true] %s33_s24 }
   0x6   :  { %36 = dma.hbm_to_vmem [thread:$0]  %s32_s22, 16, %s34_s24, [#allocation6]  }
   0x7   :  { %245 = dma.done.wait [#allocation4], 16  }
   0x8   :  { %246 = vsyncadd [#allocation4], 4294967280 }
   0x9   :  { %247 = dma.done.wait [#allocation6], 16  }
   0xa   :  { %248 = vsyncadd [#allocation6], 4294967280  ;;  %v192_v0 = vld [vmem:[%s313_s1 + $0x38] sm:$0xff]  ;;  %v191_v1 = vld [vmem:[%s313_s1 + $0x30] sm:$0xff] }
   0xb   :  { %116 = vmatpush.bf16.msra.mxu0 %v192_v0  ;;  %v190_v2 = vld [vmem:[%s313_s1 + $0x28] sm:$0xff]  ;;  %v189_v3 = vld [vmem:[%s313_s1 + $0x20] sm:$0xff]  ;;  %v188_v4 = vld [vmem:[%s313_s1 + $0x18] sm:$0xff] }
   0xc   :  { %v187_v5 = vld [vmem:[%s313_s1 + $0x10] sm:$0xff]  ;;  %v186_v6 = vld [vmem:[%s313_s1 + $0x8] sm:$0xff]  ;;  %v185_v7 = vld [vmem:[%s313_s1] sm:$0xff] }
   0xd   :  { %v51_v8 = vld [vmem:[%s312_s0] sm:$0xf] }
   0xe   :  { %v195_v9 = vld [vmem:[#allocation3] ss:$0 sm:$0xff]  ;;  %v196_v10 = vld [vmem:[#allocation5] ss:$0 sm:$0xff] }
   0xf   :  { %117 = vmatpush.bf16.msra.mxu0 %v191_v1 }
  0x13   :  { %118 = vmatpush.bf16.msra.mxu0 %v190_v2 }
  0x17   :  { %119 = vmatpush.bf16.msra.mxu0 %v189_v3 }
  0x1b   :  { %120 = vmatpush.bf16.msra.mxu0 %v188_v4 }
  0x1f   :  { %121 = vmatpush.bf16.msra.mxu0 %v187_v5 }
  0x23   :  { %122 = vmatpush.bf16.msra.mxu0 %v186_v6 }
  0x27   :  { %123 = vmatpush.bf16.msra.mxu0 %v185_v7 }
  0x2a   :  { %124 = vmatmul.bf16.vlgmr.msra.gmra.mxu0 %v51_v8 }
  0xa7   :  { %v125_v11 = vpop.f32.mrf.mxu0 }
  0xa8   :  { %v139_v12 = vmul.f32 %v195_v9, %v125_v11 }
  0xaa   :  { %v144_v13 = vadd.f32 %v196_v10, %v139_v12 }
  0xac   :  { %v145_v14 = vpack.c.bf16 %v144_v13, %v144_v13 }
  0xae   :  { %146 = vst [vmem:[%s316_s4] sm:$0xf] %v145_v14 }
  0xaf   :  { %v127_v15 = vpop.f32.mrf.mxu0 }
  0xb0   :  { %151 = vsyncpa [#allocation4], 1 }
  0xb1   :  { %152 = vsyncpa [#allocation6], 1 }

// kernel: resnet18_forward.31
= control target key start
LH: loop header
LB: loop body
LE: loop exit
PB: predicated region body
PF: predicated region fallthrough
CT: control target
= control target key end

     0   :  { %9 = vsyncpa [#allocation4], 0  ;;  %s1271_s0 = inlined_call_operand.vmem [shape: bf16[8,1152], index: 0, kind: input, shape index: {}]   ;;  %s1272_s1 = inlined_call_operand.hbm [shape: bf16[1152,128], index: 1, kind: input, shape index: {}]   ;;  %s1273_s2 = inlined_call_operand.hbm [shape: f32[1,128], index: 2, kind: input, shape index: {}]   ;;  %s1274_s3 = inlined_call_operand.hbm [shape: f32[1,128], index: 3, kind: input, shape index: {}]   ;;  %s1275_s4 = inlined_call_operand.vmem [shape: bf16[8,128], index: 4, kind: output, shape index: {}]  }
   0x1   :  { %11 = vsyncpa [#allocation4 + $0x1], 0 }
   0x2   :  { %12 = vsyncpa [#allocation6], 0  ;;  %s1115_s15 = smov 0   ;;  %s1117_s16 = smov 0  }
   0x3   :  { %s1119_s17 = smov 0   ;;  %s1121_s18 = smov 0  }
   0x4   :  { %s1123_s19 = smov 0   ;;  %s1125_s20 = smov 0  }
   0x5 LB: > { %s720_s21 = sadd.s32 4294967295, %s1083_s20   ;;  %s74_s22 = sadd.s32 1, %s1071_s17  ;;  %s1083_s20 = sphi %s1125_s20, %s18_s20   ;;  %s1079_s19 = sphi %s1123_s19, %s1285_s19   ;;  %s1075_s18 = sphi %s1121_s18, %s1284_s18   ;;  %s1071_s17 = sphi %s1119_s17, %s1283_s17   ;;  %s1067_s16 = sphi %s1117_s16, %s1282_s16   ;;  %s1063_s15 = sphi %s1115_s15, %s1281_s15  }
   0x6   : > { %p81_p0 = scmp.ne.s32.totalorder %s1071_s17, %s1067_s16  ;;  %p82_p1 = scmp.eq.s32.totalorder %s1083_s20, 0 }
   0x7   : > { %p87_p2 = scmp.ne.s32.totalorder %s1067_s16, %s1063_s15  ;;  %p1149_p3 = scmp.eq.s32.totalorder %s720_s21, 0 }
   0x8   : > { %p1153_p4 = por %p82_p1, %p81_p0  ;;  %p721_p5 = scmp.ge.s32.totalorder %s1083_s20, 1 }
   0x9   : > { %p1160_p6 = por %p1149_p3, %p87_p2  ;;  %p178_p7 = scmp.lt.s32.totalorder %s1083_s20, 4 }
   0xa   : > { %s191_s28 = sshll.u32 %s1273_s2, 4  ;;  %s1085_s30 = smov [#allocation5]   ;;  %s192_s28 = int_to_ptr.hbm [resolvable:$true] %s191_s28 }
   0xb   : > { %p1168_p8 = pnand %p721_p5, %p178_p7  ;;  %s193_s5 = sshll.u32 %s1085_s30, 4  ;;  %s194_s5 = int_to_ptr.vmem [resolvable:$true] %s193_s5 }
   0xc   : > { %p881_p10 = scmp.lt.s32.totalorder %s1083_s20, 3  ;;  %s204_s8 = sshll.u32 %s1274_s3, 4  ;;  %s205_s8 = int_to_ptr.hbm [resolvable:$true] %s204_s8 }
   0xd   : > { %p868_p9 = pneg %p1168_p8  ;;  %s1086_s10 = smov [#allocation7]  }
   0xe   : > { %p1182_p12 = pnand %p881_p10, %p1153_p4  ;;  %s206_s11 = sshll.u32 %s1086_s10, 4  ;;  %s207_s11 = int_to_ptr.vmem [resolvable:$true] %s206_s11 }
   0xf   : > { %p869_p11 = pnand %p868_p9, %p1149_p3  ;;  %s230_s12 = sand.u32 1, %s1071_s17  }
  0x10   : > { %s30_s13 = sadd.s32 1, %s1079_s19  ;;  %s856_s14 = smul.u32 192, %s230_s12 }
  0x11   : > { %871 = dma.hbm_to_vmem [thread:$0]  (!%p869_p11), %s192_s28, 16, %s194_s5, [#allocation6]  }
  0x12   : > { %874 = dma.hbm_to_vmem [thread:$0]  (!%p869_p11), %s205_s8, 16, %s207_s11, [#allocation6]  }
  0x13   : > { %p31_p13 = scmp.ge.s32.totalorder %s30_s13, 3  ;;  %s831_s15 = smul.u32 192, %s1079_s19 }
  0x14   : > { %s234_s30 = scalar_lea.vmem [#allocation3], %s856_s14  ;;  %s231_s7 = scalar_lea.sflag [#allocation4], %s230_s12 }
  0x15   : > { %s1287_s13 = smov (%p31_p13, %s30_s13), 0  ;;  %s240_s26 = scalar_lea.hbm %s1272_s1, %s831_s15 }
  0x16   : > { %s69_s27 = ssub.s32 %s1079_s19, %s1287_s13  ;;  %s241_s28 = sshll.u32 %s240_s26, 4  ;;  %s242_s28 = int_to_ptr.hbm [resolvable:$true] %s241_s28 }
  0x17   : > { %p72_p0 = scmp.eq.s32.totalorder %s69_s27, 0  ;;  %s243_s5 = sshll.u32 %s234_s30, 4  ;;  %s244_s5 = int_to_ptr.vmem [resolvable:$true] %s243_s5 }
  0x18   : > { %s1087_s8 = smov 64   ;;  %s1088_s10 = smov 4  }
  0x19   : > { %s1199_s6 = scalar_select %p72_p0, %s1071_s17, %s74_s22  }
  0x1a   : > { %878 = dma.hbm_to_vmem [thread:$0]  (!%p1182_p12), %s242_s28, 3072, %s244_s5, %s231_s7, %s1087_s8, %s1087_s8, %s1088_s10  }
  0x1b   : > { %255 = sbr.rel (%p1168_p8) target bundleno = 231 (0xe7), region = 36  ;;  %s257_s11 = sand.u32 (!%p1168_p8), 1, %s1067_s16  }
  0x1c   : > { %s857_s15 = smul.u32 (!%p1168_p8), 192, %s257_s11  ;;  %s258_s21 = scalar_lea.sflag (!%p1168_p8), [#allocation4], %s257_s11 }
  0x1e   : > { %s1206_s24 = scalar_lea.vmem (!%p1168_p8), [#allocation3], %s857_s15 }
  0x20   : > { %1054 = dma.done.wait (%p1160_p6), %s258_s21, 3072  }
  0x21   : > { %1056 = vsyncadd (%p1160_p6), %s258_s21, 4294964224 }
  0x22   : > { %1058 = dma.done.wait (%p1149_p3), [#allocation6], 32  }
  0x23   : > { %1060 = vsyncadd (%p1149_p3), [#allocation6], 4294967264  ;;  %s308_s22 = smul.u32 3, %s1075_s18  ;;  %p730_p2 = scmp.ne.s32.totalorder %s1075_s18, 0 }
  0x25   : > { %p311_p1 = scmp.lt.s32.totalorder %s308_s22, 8  ;;  %329 = sbr.rel (%p730_p2) target bundleno = 44 (0x2c), region = 52 }
  0x27   : > { %s1289_s22 = smov (!%p311_p1, %s308_s22), 8 }
  0x28   : > { %s729_s29 = sshll.u32 %s1289_s22, 2 }
  0x29   : > { %s1220_s14 = scalar_lea.vmem %s1271_s0, %s729_s29 }
  0x2a   : > { %v1089_v0 = vmov 0.0  }
  0x2b   : > { %330 = vst [vmem:[#allocation2] sm:$0xff] %v1089_v0 }
  0x2c PF: > { %v839_v1 = vld [vmem:[%s1206_s24 + $0x38] sm:$0xff]  ;;  %v838_v4 = vld [vmem:[%s1206_s24 + $0x30] sm:$0xff]  ;;  %v837_v7 = vld [vmem:[%s1206_s24 + $0x28] sm:$0xff]  ;;  %p827_p3 = scmp.ne.s32.totalorder %s1075_s18, 2 }
  0x2d   : > { %v847_v2 = vld [vmem:[%s1206_s24 + $0x78] sm:$0xff]  ;;  %537 = vmatpush.bf16.msra.mxu0 %v839_v1  ;;  %v846_v5 = vld [vmem:[%s1206_s24 + $0x70] sm:$0xff]  ;;  %v845_v8 = vld [vmem:[%s1206_s24 + $0x68] sm:$0xff] }
  0x2e   : > { %v855_v3 = vld [vmem:[%s1206_s24 + $0xb8] sm:$0xff]  ;;  %550 = vmatpush.bf16.msra.mxu1 %v847_v2  ;;  %v854_v6 = vld [vmem:[%s1206_s24 + $0xb0] sm:$0xff]  ;;  %v853_v9 = vld [vmem:[%s1206_s24 + $0xa8] sm:$0xff] }
  0x2f   : > { %563 = vmatpush.bf16.msra.mxu2 %v855_v3  ;;  %v836_v10 = vld [vmem:[%s1206_s24 + $0x20] sm:$0xff]  ;;  %v835_v13 = vld [vmem:[%s1206_s24 + $0x18] sm:$0xff]  ;;  %v834_v16 = vld [vmem:[%s1206_s24 + $0x10] sm:$0xff] }
  0x30   : > { %v844_v11 = vld [vmem:[%s1206_s24 + $0x60] sm:$0xff]  ;;  %v843_v14 = vld [vmem:[%s1206_s24 + $0x58] sm:$0xff]  ;;  %v842_v17 = vld [vmem:[%s1206_s24 + $0x50] sm:$0xff] }
  0x31   : > { %538 = vmatpush.bf16.msra.mxu0 %v838_v4  ;;  %v852_v12 = vld [vmem:[%s1206_s24 + $0xa0] sm:$0xff]  ;;  %v851_v15 = vld [vmem:[%s1206_s24 + $0x98] sm:$0xff]  ;;  %v850_v18 = vld [vmem:[%s1206_s24 + $0x90] sm:$0xff] }
  0x32   : > { %551 = vmatpush.bf16.msra.mxu1 %v846_v5  ;;  %v833_v19 = vld [vmem:[%s1206_s24 + $0x8] sm:$0xff]  ;;  %v332_v21 = vld [vmem:[%s1220_s14] sm:$0xff]  ;;  %v333_v23 = vld [vmem:[%s1220_s14 + $0x8] sm:$0xf] }
  0x33   : > { %564 = vmatpush.bf16.msra.mxu2 %v854_v6  ;;  %v841_v20 = vld [vmem:[%s1206_s24 + $0x48] sm:$0xff]  ;;  %v384_v24 = vunpack.c.l.b16 %v332_v21  ;;  %v385_v25 = vunpack.c.h.b16 %v332_v21  ;;  %v832_v26 = vld [vmem:[%s1206_s24] sm:$0xff]  ;;  %v386_v28 = vunpack.c.l.b16 %v333_v23  ;;  %v331_v36 = vld [vmem:[#allocation2] sm:$0xff] }
  0x34   : > { %v849_v22 = vld [vmem:[%s1206_s24 + $0x88] sm:$0xff]  ;;  %v840_v27 = vld [vmem:[%s1206_s24 + $0x40] sm:$0xff] }
  0x35   : > { %539 = vmatpush.bf16.msra.mxu0 %v837_v7  ;;  %v848_v29 = vld [vmem:[%s1206_s24 + $0x80] sm:$0xff]  ;;  %v387_v30 = vpack.c.b16 %v384_v24, %v384_v24  ;;  %v388_v31 = vpack.c.b16 %v385_v25, %v385_v25  ;;  %v389_v32 = vpack.c.b16 %v386_v28, %v386_v28 }
  0x36   : > { %552 = vmatpush.bf16.msra.mxu1 %v845_v8 }
  0x37   : > { %565 = vmatpush.bf16.msra.mxu2 %v853_v9 }
  0x39   : > { %540 = vmatpush.bf16.msra.mxu0 %v836_v10 }
  0x3a   : > { %553 = vmatpush.bf16.msra.mxu1 %v844_v11 }
  0x3b   : > { %566 = vmatpush.bf16.msra.mxu2 %v852_v12 }
  0x3d   : > { %541 = vmatpush.bf16.msra.mxu0 %v835_v13 }
  0x3e   : > { %554 = vmatpush.bf16.msra.mxu1 %v843_v14 }
  0x3f   : > { %567 = vmatpush.bf16.msra.mxu2 %v851_v15 }
  0x41   : > { %542 = vmatpush.bf16.msra.mxu0 %v834_v16 }
  0x42   : > { %555 = vmatpush.bf16.msra.mxu1 %v842_v17 }
  0x43   : > { %568 = vmatpush.bf16.msra.mxu2 %v850_v18 }
  0x45   : > { %543 = vmatpush.bf16.msra.mxu0 %v833_v19 }
  0x46   : > { %556 = vmatpush.bf16.msra.mxu1 %v841_v20 }
  0x47   : > { %569 = vmatpush.bf16.msra.mxu2 %v849_v22 }
  0x49   : > { %544 = vmatpush.bf16.msra.mxu0 %v832_v26 }
  0x4a   : > { %557 = vmatpush.bf16.msra.mxu1 %v840_v27 }
  0x4b   : > { %570 = vmatpush.bf16.msra.mxu2 %v848_v29 }
  0x4c   : > { %545 = vmatmul.bf16.vlgmr.msra.gmra.mxu0 %v387_v30 }
  0x4d   : > { %558 = vmatmul.bf16.vlgmr.msra.gmra.mxu1 %v388_v31 }
  0x4e   : > { %571 = vmatmul.bf16.vlgmr.msra.gmra.mxu2 %v389_v32 }
  0xc9   : > { %v546_v33 = vpop.f32.mrf.mxu0 }
  0xca   : > { %v559_v34 = vpop.f32.mrf.mxu1 }
  0xcb   : > { %v560_v35 = vadd.f32 %v559_v34, %v546_v33 }
  0xd1   : > { %v572_v37 = vpop.f32.mrf.mxu2  ;;  %v548_v39 = vpop.f32.mrf.mxu0 }
  0xd2   : > { %v573_v38 = vadd.f32 %v572_v37, %v560_v35  ;;  %v561_v40 = vpop.f32.mrf.mxu1 }
  0xd4   : > { %v576_v41 = vadd.f32 %v573_v38, %v331_v36 }
  0xd5   : > { %581 = sbr.rel (%p827_p3) target bundleno = 231 (0xe7), region = 56 }
  0xd6   : > { %577 = vst [vmem:[#allocation2] sm:$0xff] %v576_v41 }
  0xd9   : > { %v574_v42 = vpop.f32.mrf.mxu2 }
  0xda   : > { %v937_v44 = vld [vmem:[#allocation5] ss:$0 sm:$0xff]  ;;  %v938_v45 = vld [vmem:[#allocation7] ss:$0 sm:$0xff] }
  0xdd   : > { %v582_v43 = vld [vmem:[#allocation2] sm:$0xff] }
  0xde   : > { %v587_v46 = vmul.f32 %v937_v44, %v582_v43 }
  0xe0   : > { %v592_v47 = vadd.f32 %v938_v45, %v587_v46 }
  0xe2   : > { %v593_v48 = vmax.f32 %v592_v47, 0.0 }
  0xe4   : > { %v594_v49 = vpack.c.bf16 %v593_v48, %v593_v48 }
  0xe6   : > { %595 = vst [vmem:[%s1275_s4] sm:$0xf] %v594_v49 }
  0xe7 PF: > { %s18_s20 = sadd.s32 1, %s1083_s20   ;;  %s1281_s15 = smov %s1067_s16 }
  0xe8   : > { %p15_p4 = scmp.ge.s32.totalorder %s18_s20, 5   ;;  %s1282_s16 = smov %s1071_s17 }
  0xe9   : > { %s1283_s17 = smov %s1199_s6  ;;  %s1284_s18 = smov %s1079_s19 }
  0xea   : > { %s1285_s19 = smov %s1287_s13  ;;  %17 = sbr.rel (!%p15_p4) target bundleno = 5 (0x5), region = 97 }
  0xef   :  { %621 = vsyncpa [#allocation4], 1 }
  0xf0   :  { %623 = vsyncpa [#allocation4 + $0x1], 1 }
  0xf1   :  { %624 = vsyncpa [#allocation6], 1 }

// kernel: resnet18_forward.32
= control target key start
LH: loop header
LB: loop body
LE: loop exit
PB: predicated region body
PF: predicated region fallthrough
CT: control target
= control target key end

     0   :  { %10 = vsyncpa [#allocation4], 0  ;;  %s1356_s0 = inlined_call_operand.vmem [shape: bf16[8,1152], index: 0, kind: input, shape index: {}]   ;;  %s1357_s1 = inlined_call_operand.hbm [shape: bf16[1152,128], index: 1, kind: input, shape index: {}]   ;;  %s1358_s2 = inlined_call_operand.hbm [shape: f32[1,128], index: 2, kind: input, shape index: {}]   ;;  %s1359_s3 = inlined_call_operand.hbm [shape: f32[1,128], index: 3, kind: input, shape index: {}]   ;;  %s1360_s4 = inlined_call_operand.vmem [shape: bf16[8,128], index: 4, kind: input, shape index: {}]   ;;  %s1361_s5 = inlined_call_operand.vmem [shape: bf16[8,128], index: 5, kind: output, shape index: {}]  }
   0x1   :  { %12 = vsyncpa [#allocation4 + $0x1], 0 }
   0x2   :  { %13 = vsyncpa [#allocation6], 0  ;;  %s1197_s18 = smov 0   ;;  %s1199_s19 = smov 0  }
   0x3   :  { %s1201_s20 = smov 0   ;;  %s1203_s21 = smov 0  }
   0x4   :  { %s1205_s22 = smov 0   ;;  %s1207_s23 = smov 0  }
   0x5 LB: > { %s796_s24 = sadd.s32 4294967295, %s1160_s23   ;;  %s75_s25 = sadd.s32 1, %s1148_s20  ;;  %s1160_s23 = sphi %s1207_s23, %s19_s23   ;;  %s1156_s22 = sphi %s1205_s22, %s1371_s22   ;;  %s1152_s21 = sphi %s1203_s21, %s1370_s21   ;;  %s1148_s20 = sphi %s1201_s20, %s1369_s20   ;;  %s1144_s19 = sphi %s1199_s19, %s1368_s19   ;;  %s1140_s18 = sphi %s1197_s18, %s1367_s18  }
   0x6   : > { %p82_p0 = scmp.ne.s32.totalorder %s1148_s20, %s1144_s19  ;;  %p83_p1 = scmp.eq.s32.totalorder %s1160_s23, 0 }
   0x7   : > { %p88_p2 = scmp.ne.s32.totalorder %s1144_s19, %s1140_s18  ;;  %p1231_p3 = scmp.eq.s32.totalorder %s796_s24, 0 }
   0x8   : > { %p1235_p4 = por %p83_p1, %p82_p0  ;;  %p797_p5 = scmp.ge.s32.totalorder %s1160_s23, 1 }
   0x9   : > { %p1242_p6 = por %p1231_p3, %p88_p2  ;;  %p207_p7 = scmp.lt.s32.totalorder %s1160_s23, 4 }
   0xa   : > { %s220_s6 = sshll.u32 %s1358_s2, 4  ;;  %s1162_s8 = smov [#allocation5]   ;;  %s221_s6 = int_to_ptr.hbm [resolvable:$true] %s220_s6 }
   0xb   : > { %p1250_p8 = pnand %p797_p5, %p207_p7  ;;  %s222_s9 = sshll.u32 %s1162_s8, 4  ;;  %s223_s9 = int_to_ptr.vmem [resolvable:$true] %s222_s9 }
   0xc   : > { %p958_p10 = scmp.lt.s32.totalorder %s1160_s23, 3  ;;  %s233_s12 = sshll.u32 %s1359_s3, 4  ;;  %s234_s12 = int_to_ptr.hbm [resolvable:$true] %s233_s12 }
   0xd   : > { %p945_p9 = pneg %p1250_p8  ;;  %s1163_s14 = smov [#allocation7]  }
   0xe   : > { %p1264_p12 = pnand %p958_p10, %p1235_p4  ;;  %s235_s15 = sshll.u32 %s1163_s14, 4  ;;  %s236_s15 = int_to_ptr.vmem [resolvable:$true] %s235_s15 }
   0xf   : > { %p946_p11 = pnand %p945_p9, %p1231_p3  ;;  %s269_s16 = sand.u32 1, %s1148_s20  }
  0x10   : > { %s31_s17 = sadd.s32 1, %s1156_s22  ;;  %s933_s18 = smul.u32 192, %s269_s16 }
  0x11   : > { %948 = dma.hbm_to_vmem [thread:$0]  (!%p946_p11), %s221_s6, 16, %s223_s9, [#allocation6]  }
  0x12   : > { %951 = dma.hbm_to_vmem [thread:$0]  (!%p946_p11), %s234_s12, 16, %s236_s15, [#allocation6]  }
  0x13   : > { %p32_p13 = scmp.ge.s32.totalorder %s31_s17, 3  ;;  %s908_s24 = smul.u32 192, %s1156_s22 }
  0x14   : > { %s273_s9 = scalar_lea.vmem [#allocation3], %s933_s18  ;;  %s270_s12 = scalar_lea.sflag [#allocation4], %s269_s16 }
  0x15   : > { %s1373_s17 = smov (%p32_p13, %s31_s17), 0  ;;  %s279_s30 = scalar_lea.hbm %s1357_s1, %s908_s24 }
  0x16   : > { %s70_s6 = ssub.s32 %s1156_s22, %s1373_s17  ;;  %s280_s8 = sshll.u32 %s279_s30, 4  ;;  %s281_s8 = int_to_ptr.hbm [resolvable:$true] %s280_s8 }
  0x17   : > { %p73_p0 = scmp.eq.s32.totalorder %s70_s6, 0  ;;  %s282_s10 = sshll.u32 %s273_s9, 4  ;;  %s283_s10 = int_to_ptr.vmem [resolvable:$true] %s282_s10 }
  0x18   : > { %s1164_s14 = smov 64   ;;  %s1165_s15 = smov 4  }
  0x19   : > { %s1281_s11 = scalar_select %p73_p0, %s1148_s20, %s75_s25  }
  0x1a   : > { %955 = dma.hbm_to_vmem [thread:$0]  (!%p1264_p12), %s281_s8, 3072, %s283_s10, %s270_s12, %s1164_s14, %s1164_s14, %s1165_s15  }
  0x1b   : > { %294 = sbr.rel (%p1250_p8) target bundleno = 233 (0xe9), region = 40  ;;  %s296_s24 = sand.u32 (!%p1250_p8), 1, %s1144_s19  }
  0x1c   : > { %s934_s27 = smul.u32 (!%p1250_p8), 192, %s296_s24  ;;  %s297_s29 = scalar_lea.sflag (!%p1250_p8), [#allocation4], %s296_s24 }
  0x1e   : > { %s1288_s30 = scalar_lea.vmem (!%p1250_p8), [#allocation3], %s934_s27 }
  0x20   : > { %1131 = dma.done.wait (%p1242_p6), %s297_s29, 3072  }
  0x21   : > { %1133 = vsyncadd (%p1242_p6), %s297_s29, 4294964224 }
  0x22   : > { %1135 = dma.done.wait (%p1231_p3), [#allocation6], 32  }
  0x23   : > { %1137 = vsyncadd (%p1231_p3), [#allocation6], 4294967264  ;;  %s356_s25 = smul.u32 3, %s1152_s21  ;;  %p807_p2 = scmp.ne.s32.totalorder %s1152_s21, 0 }
  0x25   : > { %p359_p1 = scmp.lt.s32.totalorder %s356_s25, 8  ;;  %384 = sbr.rel (%p807_p2) target bundleno = 44 (0x2c), region = 56 }
  0x27   : > { %s1375_s25 = smov (!%p359_p1, %s356_s25), 8 }
  0x28   : > { %s806_s7 = sshll.u32 %s1375_s25, 2 }
  0x29   : > { %s1302_s18 = scalar_lea.vmem %s1356_s0, %s806_s7 }
  0x2a   : > { %v1166_v0 = vmov 0.0  }
  0x2b   : > { %385 = vst [vmem:[#allocation2] sm:$0xff] %v1166_v0 }
  0x2c PF: > { %v916_v1 = vld [vmem:[%s1288_s30 + $0x38] sm:$0xff]  ;;  %v915_v4 = vld [vmem:[%s1288_s30 + $0x30] sm:$0xff]  ;;  %v914_v7 = vld [vmem:[%s1288_s30 + $0x28] sm:$0xff]  ;;  %p904_p3 = scmp.ne.s32.totalorder %s1152_s21, 2 }
  0x2d   : > { %v924_v2 = vld [vmem:[%s1288_s30 + $0x78] sm:$0xff]  ;;  %592 = vmatpush.bf16.msra.mxu0 %v916_v1  ;;  %v923_v5 = vld [vmem:[%s1288_s30 + $0x70] sm:$0xff]  ;;  %v922_v8 = vld [vmem:[%s1288_s30 + $0x68] sm:$0xff] }
  0x2e   : > { %v932_v3 = vld [vmem:[%s1288_s30 + $0xb8] sm:$0xff]  ;;  %605 = vmatpush.bf16.msra.mxu1 %v924_v2  ;;  %v931_v6 = vld [vmem:[%s1288_s30 + $0xb0] sm:$0xff]  ;;  %v930_v9 = vld [vmem:[%s1288_s30 + $0xa8] sm:$0xff] }
  0x2f   : > { %618 = vmatpush.bf16.msra.mxu2 %v932_v3  ;;  %v913_v10 = vld [vmem:[%s1288_s30 + $0x20] sm:$0xff]  ;;  %v912_v13 = vld [vmem:[%s1288_s30 + $0x18] sm:$0xff]  ;;  %v911_v16 = vld [vmem:[%s1288_s30 + $0x10] sm:$0xff] }
  0x30   : > { %v921_v11 = vld [vmem:[%s1288_s30 + $0x60] sm:$0xff]  ;;  %v920_v14 = vld [vmem:[%s1288_s30 + $0x58] sm:$0xff]  ;;  %v919_v17 = vld [vmem:[%s1288_s30 + $0x50] sm:$0xff] }
  0x31   : > { %593 = vmatpush.bf16.msra.mxu0 %v915_v4  ;;  %v929_v12 = vld [vmem:[%s1288_s30 + $0xa0] sm:$0xff]  ;;  %v928_v15 = vld [vmem:[%s1288_s30 + $0x98] sm:$0xff]  ;;  %v927_v18 = vld [vmem:[%s1288_s30 + $0x90] sm:$0xff] }
  0x32   : > { %606 = vmatpush.bf16.msra.mxu1 %v923_v5  ;;  %v910_v19 = vld [vmem:[%s1288_s30 + $0x8] sm:$0xff]  ;;  %v387_v21 = vld [vmem:[%s1302_s18] sm:$0xff]  ;;  %v388_v23 = vld [vmem:[%s1302_s18 + $0x8] sm:$0xf] }
  0x33   : > { %619 = vmatpush.bf16.msra.mxu2 %v931_v6  ;;  %v918_v20 = vld [vmem:[%s1288_s30 + $0x48] sm:$0xff]  ;;  %v439_v24 = vunpack.c.l.b16 %v387_v21  ;;  %v440_v25 = vunpack.c.h.b16 %v387_v21  ;;  %v909_v26 = vld [vmem:[%s1288_s30] sm:$0xff]  ;;  %v441_v28 = vunpack.c.l.b16 %v388_v23  ;;  %v386_v36 = vld [vmem:[#allocation2] sm:$0xff] }
  0x34   : > { %v926_v22 = vld [vmem:[%s1288_s30 + $0x88] sm:$0xff]  ;;  %v917_v27 = vld [vmem:[%s1288_s30 + $0x40] sm:$0xff] }
  0x35   : > { %594 = vmatpush.bf16.msra.mxu0 %v914_v7  ;;  %v925_v29 = vld [vmem:[%s1288_s30 + $0x80] sm:$0xff]  ;;  %v442_v30 = vpack.c.b16 %v439_v24, %v439_v24  ;;  %v443_v31 = vpack.c.b16 %v440_v25, %v440_v25  ;;  %v444_v32 = vpack.c.b16 %v441_v28, %v441_v28 }
  0x36   : > { %607 = vmatpush.bf16.msra.mxu1 %v922_v8 }
  0x37   : > { %620 = vmatpush.bf16.msra.mxu2 %v930_v9 }
  0x39   : > { %595 = vmatpush.bf16.msra.mxu0 %v913_v10 }
  0x3a   : > { %608 = vmatpush.bf16.msra.mxu1 %v921_v11 }
  0x3b   : > { %621 = vmatpush.bf16.msra.mxu2 %v929_v12 }
  0x3d   : > { %596 = vmatpush.bf16.msra.mxu0 %v912_v13 }
  0x3e   : > { %609 = vmatpush.bf16.msra.mxu1 %v920_v14 }
  0x3f   : > { %622 = vmatpush.bf16.msra.mxu2 %v928_v15 }
  0x41   : > { %597 = vmatpush.bf16.msra.mxu0 %v911_v16 }
  0x42   : > { %610 = vmatpush.bf16.msra.mxu1 %v919_v17 }
  0x43   : > { %623 = vmatpush.bf16.msra.mxu2 %v927_v18 }
  0x45   : > { %598 = vmatpush.bf16.msra.mxu0 %v910_v19 }
  0x46   : > { %611 = vmatpush.bf16.msra.mxu1 %v918_v20 }
  0x47   : > { %624 = vmatpush.bf16.msra.mxu2 %v926_v22 }
  0x49   : > { %599 = vmatpush.bf16.msra.mxu0 %v909_v26 }
  0x4a   : > { %612 = vmatpush.bf16.msra.mxu1 %v917_v27 }
  0x4b   : > { %625 = vmatpush.bf16.msra.mxu2 %v925_v29 }
  0x4c   : > { %600 = vmatmul.bf16.vlgmr.msra.gmra.mxu0 %v442_v30 }
  0x4d   : > { %613 = vmatmul.bf16.vlgmr.msra.gmra.mxu1 %v443_v31 }
  0x4e   : > { %626 = vmatmul.bf16.vlgmr.msra.gmra.mxu2 %v444_v32 }
  0xc9   : > { %v601_v33 = vpop.f32.mrf.mxu0 }
  0xca   : > { %v614_v34 = vpop.f32.mrf.mxu1 }
  0xcb   : > { %v615_v35 = vadd.f32 %v614_v34, %v601_v33 }
  0xd1   : > { %v627_v37 = vpop.f32.mrf.mxu2  ;;  %v603_v39 = vpop.f32.mrf.mxu0 }
  0xd2   : > { %v628_v38 = vadd.f32 %v627_v37, %v615_v35  ;;  %v616_v40 = vpop.f32.mrf.mxu1 }
  0xd4   : > { %v631_v41 = vadd.f32 %v628_v38, %v386_v36 }
  0xd5   : > { %636 = sbr.rel (%p904_p3) target bundleno = 233 (0xe9), region = 60 }
  0xd6   : > { %632 = vst [vmem:[#allocation2] sm:$0xff] %v631_v41 }
  0xd9   : > { %v629_v42 = vpop.f32.mrf.mxu2 }
  0xda   : > { %v1014_v44 = vld [vmem:[#allocation5] ss:$0 sm:$0xff]  ;;  %v1015_v45 = vld [vmem:[#allocation7] ss:$0 sm:$0xff]  ;;  %v648_v46 = vld [vmem:[%s1360_s4] sm:$0xf] }
  0xdb   : > { %v649_v48 = vunpack.c.l.bf16 %v648_v46 }
  0xdd   : > { %v637_v43 = vld [vmem:[#allocation2] sm:$0xff] }
  0xde   : > { %v642_v47 = vmul.f32 %v1014_v44, %v637_v43 }
  0xe0   : > { %v647_v49 = vadd.f32 %v1015_v45, %v642_v47 }
  0xe2   : > { %v650_v50 = vadd.f32 %v649_v48, %v647_v49 }
  0xe4   : > { %v651_v51 = vmax.f32 %v650_v50, 0.0 }
  0xe6   : > { %v652_v52 = vpack.c.bf16 %v651_v51, %v651_v51 }
  0xe8   : > { %653 = vst [vmem:[%s1361_s5] sm:$0xf] %v652_v52 }
  0xe9 PF: > { %s19_s23 = sadd.s32 1, %s1160_s23   ;;  %s1367_s18 = smov %s1144_s19 }
  0xea   : > { %p16_p4 = scmp.ge.s32.totalorder %s19_s23, 5   ;;  %s1368_s19 = smov %s1148_s20 }
  0xeb   : > { %s1369_s20 = smov %s1281_s11  ;;  %s1370_s21 = smov %s1156_s22 }
  0xec   : > { %s1371_s22 = smov %s1373_s17  ;;  %18 = sbr.rel (!%p16_p4) target bundleno = 5 (0x5), region = 104 }
  0xf1   :  { %679 = vsyncpa [#allocation4], 1 }
  0xf2   :  { %681 = vsyncpa [#allocation4 + $0x1], 1 }
  0xf3   :  { %682 = vsyncpa [#allocation6], 1 }

// kernel: resnet18_forward.33
= control target key start
LH: loop header
LB: loop body
LE: loop exit
PB: predicated region body
PF: predicated region fallthrough
CT: control target
= control target key end

     0   :  { %9 = vsyncpa [#allocation4], 0  ;;  %s1596_s0 = inlined_call_operand.vmem [shape: bf16[8,1152], index: 0, kind: input, shape index: {}]   ;;  %s1597_s1 = inlined_call_operand.hbm [shape: bf16[1152,256], index: 1, kind: input, shape index: {}]   ;;  %s1598_s2 = inlined_call_operand.vmem [shape: f32[1,256], index: 2, kind: input, shape index: {}]   ;;  %s1599_s3 = inlined_call_operand.hbm [shape: f32[1,256], index: 3, kind: input, shape index: {}]   ;;  %s1600_s4 = inlined_call_operand.vmem [shape: bf16[8,256], index: 4, kind: output, shape index: {}]  }
   0x1   :  { %11 = vsyncpa [#allocation4 + $0x1], 0 }
   0x2   :  { %12 = vsyncpa [#allocation6], 0  ;;  %s1364_s15 = smov 0   ;;  %s1366_s16 = smov 0  }
   0x3   :  { %s1368_s17 = smov 0   ;;  %s1370_s18 = smov 0  }
   0x4   :  { %s1372_s19 = smov 0   ;;  %s1374_s20 = smov 0  }
   0x5 LB: > { %s889_s21 = sadd.s32 4294967295, %s1333_s20   ;;  %s74_s22 = sadd.s32 1, %s1321_s17  ;;  %s1333_s20 = sphi %s1374_s20, %s18_s20   ;;  %s1329_s19 = sphi %s1372_s19, %s1610_s19   ;;  %s1325_s18 = sphi %s1370_s18, %s1609_s18   ;;  %s1321_s17 = sphi %s1368_s17, %s1608_s17   ;;  %s1317_s16 = sphi %s1366_s16, %s1607_s16   ;;  %s1313_s15 = sphi %s1364_s15, %s1606_s15  }
   0x6   : > { %p81_p0 = scmp.ne.s32.totalorder %s1321_s17, %s1317_s16  ;;  %p82_p1 = scmp.eq.s32.totalorder %s1333_s20, 0 }
   0x7   : > { %p87_p2 = scmp.ne.s32.totalorder %s1317_s16, %s1313_s15  ;;  %p1398_p3 = scmp.eq.s32.totalorder %s889_s21, 0 }
   0x8   : > { %p1402_p4 = por %p82_p1, %p81_p0  ;;  %p890_p5 = scmp.ge.s32.totalorder %s1333_s20, 1 }
   0x9   : > { %p1409_p6 = por %p1398_p3, %p87_p2  ;;  %p178_p7 = scmp.lt.s32.totalorder %s1333_s20, 4 }
   0xa   : > { %s200_s28 = sshll.u32 %s1599_s3, 4  ;;  %s1335_s30 = smov [#allocation5]   ;;  %s201_s28 = int_to_ptr.hbm [resolvable:$true] %s200_s28 }
   0xb   : > { %p1417_p8 = pnand %p890_p5, %p178_p7  ;;  %s202_s5 = sshll.u32 %s1335_s30, 4  ;;  %s203_s5 = int_to_ptr.vmem [resolvable:$true] %s202_s5 }
   0xc   : > { %p1165_p10 = scmp.lt.s32.totalorder %s1333_s20, 3  ;;  %s30_s7 = sadd.s32 1, %s1329_s19 }
   0xd   : > { %p1156_p9 = pneg %p1417_p8  ;;  %p31_p13 = scmp.ge.s32.totalorder %s30_s7, 3 }
   0xe   : > { %p1428_p12 = pnand %p1165_p10, %p1402_p4  ;;  %s226_s8 = sand.u32 1, %s1321_s17  }
   0xf   : > { %p1157_p11 = pnand %p1156_p9, %p1398_p3  ;;  %s1147_s9 = smul.u32 384, %s1329_s19 }
  0x10   : > { %s1612_s7 = smov (%p31_p13, %s30_s7), 0  ;;  %s1148_s10 = smul.u32 384, %s226_s8 }
  0x11   : > { %1159 = dma.hbm_to_vmem [thread:$0]  (!%p1157_p11), %s201_s28, 32, %s203_s5, [#allocation6]  }
  0x12   : > { %s69_s11 = ssub.s32 %s1329_s19, %s1612_s7  ;;  %s238_s14 = scalar_lea.hbm %s1597_s1, %s1147_s9 }
  0x13   : > { %p72_p0 = scmp.eq.s32.totalorder %s69_s11, 0  ;;  %s239_s15 = sshll.u32 %s238_s14, 4  ;;  %s240_s15 = int_to_ptr.hbm [resolvable:$true] %s239_s15 }
  0x14   : > { %s230_s21 = scalar_lea.vmem [#allocation3], %s1148_s10  ;;  %s227_s27 = scalar_lea.sflag [#allocation4], %s226_s8 }
  0x15   : > { %s241_s24 = sshll.u32 %s230_s21, 4  ;;  %s1336_s28 = smov 128   ;;  %s242_s24 = int_to_ptr.vmem [resolvable:$true] %s241_s24 }
  0x16   : > { %s1445_s26 = scalar_select %p72_p0, %s1321_s17, %s74_s22  }
  0x17   : > { %s1337_s30 = smov 8   ;;  %253 = sbr.rel (%p1417_p8) target bundleno = 257 (0x101), region = 36 }
  0x18   : > { %1163 = dma.hbm_to_vmem [thread:$0]  (!%p1428_p12), %s240_s15, 6144, %s242_s24, %s227_s27, %s1336_s28, %s1336_s28, %s1337_s30  }
  0x19   : > { %s255_s5 = sand.u32 (!%p1417_p8), 1, %s1317_s16  }
  0x1a   : > { %s1149_s9 = smul.u32 (!%p1417_p8), 384, %s255_s5  ;;  %s256_s11 = scalar_lea.sflag (!%p1417_p8), [#allocation4], %s255_s5 }
  0x1c   : > { %s1452_s10 = scalar_lea.vmem [#allocation3], %s1149_s9 }
  0x1d   : > { %1304 = dma.done.wait (%p1409_p6), %s256_s11, 6144  }
  0x1e   : > { %1306 = vsyncadd (%p1409_p6), %s256_s11, 4294961152 }
  0x1f   : > { %1308 = dma.done.wait (%p1398_p3), [#allocation6], 32  }
  0x20   : > { %1310 = vsyncadd (%p1398_p3), [#allocation6], 4294967264  ;;  %s307_s22 = smul.u32 3, %s1325_s18  ;;  %p899_p2 = scmp.ne.s32.totalorder %s1325_s18, 0 }
  0x22   : > { %p310_p1 = scmp.lt.s32.totalorder %s307_s22, 8  ;;  %338 = sbr.rel (%p899_p2) target bundleno = 42 (0x2a), region = 48 }
  0x24   : > { %s1614_s22 = smov (!%p310_p1, %s307_s22), 8 }
  0x25   : > { %s898_s29 = sshll.u32 %s1614_s22, 2 }
  0x26   : > { %s1466_s12 = scalar_lea.vmem %s1596_s0, %s898_s29 }
  0x27   : > { %v1338_v0 = vmov 0.0  }
  0x28   : > { %339 = vst [vmem:[#allocation2] sm:$0xff] %v1338_v0 }
  0x29   : > { %340 = vst [vmem:[#allocation2 + $0x8] sm:$0xff] %v1338_v0 }
  0x2a PF: > { %v958_v1 = vld [vmem:[%s1452_s10 + $0x70] sm:$0xf]  ;;  %v1114_v2 = vld [vmem:[%s1452_s10 + $0x74] sm:$0xf0]  ;;  %v950_v6 = vld [vmem:[%s1452_s10 + $0x60] sm:$0xf] }
  0x2b   : > { %v1022_v3 = vld [vmem:[%s1452_s10 + $0xf0] sm:$0xf]  ;;  %v959_v4 = vor.u32 %v1114_v2, %v958_v1  ;;  %v1130_v5 = vld [vmem:[%s1452_s10 + $0xf4] sm:$0xf0]  ;;  %v1112_v7 = vld [vmem:[%s1452_s10 + $0x64] sm:$0xf0] }
  0x2c   : > { %v1023_v8 = vor.u32 %v1130_v5, %v1022_v3  ;;  %v1014_v9 = vld [vmem:[%s1452_s10 + $0xe0] sm:$0xf]  ;;  %v1128_v10 = vld [vmem:[%s1452_s10 + $0xe4] sm:$0xf0]  ;;  %v951_v11 = vor.u32 %v1112_v7, %v950_v6  ;;  %v942_v12 = vld [vmem:[%s1452_s10 + $0x50] sm:$0xf] }
  0x2d   : > { %644 = vmatpush.bf16.msra.mxu0 %v959_v4  ;;  %v1015_v13 = vor.u32 %v1128_v10, %v1014_v9  ;;  %v1110_v14 = vld [vmem:[%s1452_s10 + $0x54] sm:$0xf0]  ;;  %v1086_v15 = vld [vmem:[%s1452_s10 + $0x170] sm:$0xf]  ;;  %v1078_v20 = vld [vmem:[%s1452_s10 + $0x160] sm:$0xf] }
  0x2e   : > { %657 = vmatpush.bf16.msra.mxu1 %v1023_v8  ;;  %v1146_v16 = vld [vmem:[%s1452_s10 + $0x174] sm:$0xf0]  ;;  %v1006_v17 = vld [vmem:[%s1452_s10 + $0xd0] sm:$0xf]  ;;  %v1144_v21 = vld [vmem:[%s1452_s10 + $0x164] sm:$0xf0]  ;;  %v943_v23 = vor.u32 %v1110_v14, %v942_v12 }
  0x2f   : > { %v1126_v18 = vld [vmem:[%s1452_s10 + $0xd4] sm:$0xf0]  ;;  %v1087_v19 = vor.u32 %v1146_v16, %v1086_v15  ;;  %v1113_v22 = vld [vmem:[%s1452_s10 + $0x74] sm:$0xf]  ;;  %v934_v24 = vld [vmem:[%s1452_s10 + $0x40] sm:$0xf]  ;;  %v1079_v26 = vor.u32 %v1144_v21, %v1078_v20 }
  0x30   : > { %v1108_v25 = vld [vmem:[%s1452_s10 + $0x44] sm:$0xf0]  ;;  %v960_v27 = vld [vmem:[%s1452_s10 + $0x78] sm:$0xf0]  ;;  %v1007_v28 = vor.u32 %v1126_v18, %v1006_v17  ;;  %v998_v29 = vld [vmem:[%s1452_s10 + $0xc0] sm:$0xf] }
  0x31   : > { %645 = vmatpush.bf16.msra.mxu0 %v951_v11  ;;  %670 = vmatpush.bf16.msra.mxu2 %v1087_v19  ;;  %v1124_v30 = vld [vmem:[%s1452_s10 + $0xc4] sm:$0xf0]  ;;  %v963_v31 = vor.u32 %v1113_v22, %v960_v27  ;;  %v1070_v32 = vld [vmem:[%s1452_s10 + $0x150] sm:$0xf]  ;;  %v1142_v33 = vld [vmem:[%s1452_s10 + $0x154] sm:$0xf0]  ;;  %v935_v37 = vor.u32 %v1108_v25, %v934_v24 }
  0x32   : > { %658 = vmatpush.bf16.msra.mxu1 %v1015_v13  ;;  %v1111_v34 = vld [vmem:[%s1452_s10 + $0x64] sm:$0xf]  ;;  %v952_v35 = vld [vmem:[%s1452_s10 + $0x68] sm:$0xf0]  ;;  %v926_v38 = vld [vmem:[%s1452_s10 + $0x30] sm:$0xf]  ;;  %v1071_v40 = vor.u32 %v1142_v33, %v1070_v32  ;;  %v999_v42 = vor.u32 %v1124_v30, %v998_v29 }
  0x33   : > { %683 = vmatpush.bf16.msra.mxu3 %v963_v31  ;;  %v955_v36 = vor.u32 %v1111_v34, %v952_v35  ;;  %v1106_v39 = vld [vmem:[%s1452_s10 + $0x34] sm:$0xf0]  ;;  %v1062_v41 = vld [vmem:[%s1452_s10 + $0x140] sm:$0xf]  ;;  %v1140_v43 = vld [vmem:[%s1452_s10 + $0x144] sm:$0xf0] }
  0x34   : > { %v1109_v44 = vld [vmem:[%s1452_s10 + $0x54] sm:$0xf]  ;;  %v944_v45 = vld [vmem:[%s1452_s10 + $0x58] sm:$0xf0]  ;;  %v990_v46 = vld [vmem:[%s1452_s10 + $0xb0] sm:$0xf]  ;;  %v927_v49 = vor.u32 %v1106_v39, %v926_v38  ;;  %v1063_v51 = vor.u32 %v1140_v43, %v1062_v41 }
  0x35   : > { %646 = vmatpush.bf16.msra.mxu0 %v943_v23  ;;  %671 = vmatpush.bf16.msra.mxu2 %v1079_v26  ;;  %v1122_v47 = vld [vmem:[%s1452_s10 + $0xb4] sm:$0xf0]  ;;  %v947_v48 = vor.u32 %v1109_v44, %v944_v45  ;;  %v918_v50 = vld [vmem:[%s1452_s10 + $0x20] sm:$0xf]  ;;  %v1107_v52 = vld [vmem:[%s1452_s10 + $0x44] sm:$0xf] }
  0x36   : > { %659 = vmatpush.bf16.msra.mxu1 %v1007_v28  ;;  %v936_v53 = vld [vmem:[%s1452_s10 + $0x48] sm:$0xf0]  ;;  %v991_v54 = vor.u32 %v1122_v47, %v990_v46  ;;  %v1104_v55 = vld [vmem:[%s1452_s10 + $0x24] sm:$0xf0]  ;;  %v1054_v56 = vld [vmem:[%s1452_s10 + $0x130] sm:$0xf] }
  0x37   : > { %684 = vmatpush.bf16.msra.mxu3 %v955_v36  ;;  %v1138_v57 = vld [vmem:[%s1452_s10 + $0x134] sm:$0xf0]  ;;  %v982_v58 = vld [vmem:[%s1452_s10 + $0xa0] sm:$0xf]  ;;  %v1120_v59 = vld [vmem:[%s1452_s10 + $0xa4] sm:$0xf0]  ;;  %v939_v60 = vor.u32 %v1107_v52, %v936_v53  ;;  %v919_v61 = vor.u32 %v1104_v55, %v918_v50 }
  0x38   : > { %v910_v62 = vld [vmem:[%s1452_s10 + $0x10] sm:$0xf]  ;;  %v1055_v63 = vor.u32 %v1138_v57, %v1054_v56  ;;  %v1105_v0 = vld [vmem:[%s1452_s10 + $0x34] sm:$0xf]  ;;  %v928_v1 = vld [vmem:[%s1452_s10 + $0x38] sm:$0xf0]  ;;  %v983_v2 = vor.u32 %v1120_v59, %v982_v58 }
  0x39   : > { %647 = vmatpush.bf16.msra.mxu0 %v935_v37  ;;  %672 = vmatpush.bf16.msra.mxu2 %v1071_v40  ;;  %v1102_v3 = vld [vmem:[%s1452_s10 + $0x14] sm:$0xf0]  ;;  %v1046_v4 = vld [vmem:[%s1452_s10 + $0x120] sm:$0xf]  ;;  %v1136_v5 = vld [vmem:[%s1452_s10 + $0x124] sm:$0xf0]  ;;  %v931_v10 = vor.u32 %v1105_v0, %v928_v1 }
  0x3a   : > { %660 = vmatpush.bf16.msra.mxu1 %v999_v42  ;;  %v974_v6 = vld [vmem:[%s1452_s10 + $0x90] sm:$0xf]  ;;  %v1118_v7 = vld [vmem:[%s1452_s10 + $0x94] sm:$0xf0]  ;;  %v902_v8 = vld [vmem:[%s1452_s10] sm:$0xf]  ;;  %v911_v11 = vor.u32 %v1102_v3, %v910_v62  ;;  %v1047_v12 = vor.u32 %v1136_v5, %v1046_v4 }
  0x3b   : > { %685 = vmatpush.bf16.msra.mxu3 %v947_v48  ;;  %v1100_v9 = vld [vmem:[%s1452_s10 + $0x4] sm:$0xf0]  ;;  %v1103_v13 = vld [vmem:[%s1452_s10 + $0x24] sm:$0xf]  ;;  %v920_v14 = vld [vmem:[%s1452_s10 + $0x28] sm:$0xf0]  ;;  %v975_v16 = vor.u32 %v1118_v7, %v974_v6 }
  0x3c   : > { %v343_v15 = vld [vmem:[%s1466_s12] sm:$0xff]  ;;  %v966_v17 = vld [vmem:[%s1452_s10 + $0x80] sm:$0xf]  ;;  %v1134_v19 = vld [vmem:[%s1452_s10 + $0x114] sm:$0xf0]  ;;  %v923_v25 = vor.u32 %v1103_v13, %v920_v14  ;;  %v903_v27 = vor.u32 %v1100_v9, %v902_v8  ;;  %p1092_p3 = scmp.ne.s32.totalorder %s1325_s18, 2 }
  0x3d   : > { %648 = vmatpush.bf16.msra.mxu0 %v927_v49  ;;  %673 = vmatpush.bf16.msra.mxu2 %v1063_v51  ;;  %v1038_v18 = vld [vmem:[%s1452_s10 + $0x110] sm:$0xf]  ;;  %v1116_v20 = vld [vmem:[%s1452_s10 + $0x84] sm:$0xf0]  ;;  %v1129_v21 = vld [vmem:[%s1452_s10 + $0xf4] sm:$0xf]  ;;  %v395_v26 = vunpack.c.l.b16 %v343_v15  ;;  %v396_v29 = vunpack.c.h.b16 %v343_v15 }
  0x3e   : > { %661 = vmatpush.bf16.msra.mxu1 %v991_v54  ;;  %v1024_v22 = vld [vmem:[%s1452_s10 + $0xf8] sm:$0xf0]  ;;  %v1145_v23 = vld [vmem:[%s1452_s10 + $0x174] sm:$0xf]  ;;  %v1039_v28 = vor.u32 %v1134_v19, %v1038_v18  ;;  %v344_v32 = vld [vmem:[%s1466_s12 + $0x8] sm:$0xf]  ;;  %v967_v33 = vor.u32 %v1116_v20, %v966_v17 }
  0x3f   : > { %686 = vmatpush.bf16.msra.mxu3 %v939_v60  ;;  %v1088_v24 = vld [vmem:[%s1452_s10 + $0x178] sm:$0xf0]  ;;  %v1101_v30 = vld [vmem:[%s1452_s10 + $0x14] sm:$0xf]  ;;  %v1027_v34 = vor.u32 %v1129_v21, %v1024_v22  ;;  %v1030_v35 = vld [vmem:[%s1452_s10 + $0x100] sm:$0xf]  ;;  %v398_v42 = vpack.c.b16 %v395_v26, %v395_v26  ;;  %v397_v44 = vunpack.c.l.b16 %v344_v32  ;;  %v1541_v45 = vpack.c.b16 %v396_v29, %v396_v29 }
  0x40   : > { %v912_v31 = vld [vmem:[%s1452_s10 + $0x18] sm:$0xf0]  ;;  %v1132_v36 = vld [vmem:[%s1452_s10 + $0x104] sm:$0xf0]  ;;  %v1091_v37 = vor.u32 %v1145_v23, %v1088_v24  ;;  %v1127_v38 = vld [vmem:[%s1452_s10 + $0xe4] sm:$0xf] }
  0x41   : > { %649 = vmatpush.bf16.msra.mxu0 %v919_v61  ;;  %674 = vmatpush.bf16.msra.mxu2 %v1055_v63  ;;  %v1016_v39 = vld [vmem:[%s1452_s10 + $0xe8] sm:$0xf0]  ;;  %v1143_v40 = vld [vmem:[%s1452_s10 + $0x164] sm:$0xf]  ;;  %v915_v43 = vor.u32 %v1101_v30, %v912_v31  ;;  %v1031_v46 = vor.u32 %v1132_v36, %v1030_v35  ;;  %v1125_v51 = vld [vmem:[%s1452_s10 + $0xd4] sm:$0xf]  ;;  %v400_v55 = vpack.c.b16 %v397_v44, %v397_v44 }
  0x42   : > { %662 = vmatpush.bf16.msra.mxu1 %v983_v2  ;;  %v1080_v41 = vld [vmem:[%s1452_s10 + $0x168] sm:$0xf0]  ;;  %v1099_v47 = vld [vmem:[%s1452_s10 + $0x4] sm:$0xf]  ;;  %v1019_v49 = vor.u32 %v1127_v38, %v1016_v39  ;;  %v1008_v52 = vld [vmem:[%s1452_s10 + $0xd8] sm:$0xf0] }
  0x43   : > { %687 = vmatpush.bf16.msra.mxu3 %v931_v10  ;;  %v904_v48 = vld [vmem:[%s1452_s10 + $0x8] sm:$0xf0]  ;;  %v1083_v50 = vor.u32 %v1143_v40, %v1080_v41  ;;  %v1141_v53 = vld [vmem:[%s1452_s10 + $0x154] sm:$0xf]  ;;  %v1072_v54 = vld [vmem:[%s1452_s10 + $0x158] sm:$0xf0]  ;;  %v1011_v57 = vor.u32 %v1125_v51, %v1008_v52 }
  0x44   : > { %v907_v56 = vor.u32 %v1099_v47, %v904_v48  ;;  %v1075_v58 = vor.u32 %v1141_v53, %v1072_v54  ;;  %v1123_v59 = vld [vmem:[%s1452_s10 + $0xc4] sm:$0xf]  ;;  %v1000_v60 = vld [vmem:[%s1452_s10 + $0xc8] sm:$0xf0]  ;;  %v1121_v1 = vld [vmem:[%s1452_s10 + $0xb4] sm:$0xf] }
  0x45   : > { %650 = vmatpush.bf16.msra.mxu0 %v911_v11  ;;  %675 = vmatpush.bf16.msra.mxu2 %v1047_v12  ;;  %v1139_v61 = vld [vmem:[%s1452_s10 + $0x144] sm:$0xf]  ;;  %v1064_v62 = vld [vmem:[%s1452_s10 + $0x148] sm:$0xf0]  ;;  %v1003_v63 = vor.u32 %v1123_v59, %v1000_v60  ;;  %v992_v2 = vld [vmem:[%s1452_s10 + $0xb8] sm:$0xf0] }
  0x46   : > { %663 = vmatpush.bf16.msra.mxu1 %v975_v16  ;;  %v1067_v0 = vor.u32 %v1139_v61, %v1064_v62  ;;  %v1137_v3 = vld [vmem:[%s1452_s10 + $0x134] sm:$0xf]  ;;  %v1056_v4 = vld [vmem:[%s1452_s10 + $0x138] sm:$0xf0]  ;;  %v995_v5 = vor.u32 %v1121_v1, %v992_v2  ;;  %v1119_v7 = vld [vmem:[%s1452_s10 + $0xa4] sm:$0xf] }
  0x47   : > { %688 = vmatpush.bf16.msra.mxu3 %v923_v25  ;;  %v1059_v6 = vor.u32 %v1137_v3, %v1056_v4  ;;  %v984_v8 = vld [vmem:[%s1452_s10 + $0xa8] sm:$0xf0]  ;;  %v1135_v9 = vld [vmem:[%s1452_s10 + $0x124] sm:$0xf]  ;;  %v1117_v13 = vld [vmem:[%s1452_s10 + $0x94] sm:$0xf] }
  0x48   : > { %v1048_v10 = vld [vmem:[%s1452_s10 + $0x128] sm:$0xf0]  ;;  %v987_v11 = vor.u32 %v1119_v7, %v984_v8  ;;  %v976_v14 = vld [vmem:[%s1452_s10 + $0x98] sm:$0xf0]  ;;  %v1133_v15 = vld [vmem:[%s1452_s10 + $0x114] sm:$0xf] }
  0x49   : > { %651 = vmatpush.bf16.msra.mxu0 %v903_v27  ;;  %676 = vmatpush.bf16.msra.mxu2 %v1039_v28  ;;  %v1051_v12 = vor.u32 %v1135_v9, %v1048_v10  ;;  %v1040_v16 = vld [vmem:[%s1452_s10 + $0x118] sm:$0xf0]  ;;  %v979_v17 = vor.u32 %v1117_v13, %v976_v14  ;;  %v1115_v19 = vld [vmem:[%s1452_s10 + $0x84] sm:$0xf]  ;;  %v968_v20 = vld [vmem:[%s1452_s10 + $0x88] sm:$0xf0] }
  0x4a   : > { %664 = vmatpush.bf16.msra.mxu1 %v967_v33  ;;  %v1043_v18 = vor.u32 %v1133_v15, %v1040_v16  ;;  %v1131_v21 = vld [vmem:[%s1452_s10 + $0x104] sm:$0xf]  ;;  %v1032_v22 = vld [vmem:[%s1452_s10 + $0x108] sm:$0xf0]  ;;  %v971_v23 = vor.u32 %v1115_v19, %v968_v20  ;;  %v341_v30 = vld [vmem:[#allocation2] sm:$0xff] }
  0x4b   : > { %689 = vmatpush.bf16.msra.mxu3 %v915_v43  ;;  %v1035_v24 = vor.u32 %v1131_v21, %v1032_v22  ;;  %v342_v40 = vld [vmem:[#allocation2 + $0x8] sm:$0xff] }
  0x4c   : > { %652 = vmatmul.bf16.vlgmr.msra.gmra.mxu0 %v398_v42 }
  0x4d   : > { %696 = vmatpush.bf16.msrb.mxu0 %v1027_v34  ;;  %665 = vmatmul.bf16.vlgmr.msra.gmra.mxu1 %v1541_v45 }
  0x4e   : > { %709 = vmatpush.bf16.msrb.mxu1 %v1091_v37  ;;  %677 = vmatpush.bf16.msra.mxu2 %v1031_v46 }
  0x4f   : > { %690 = vmatpush.bf16.msra.mxu3 %v907_v56 }
  0x51   : > { %697 = vmatpush.bf16.msrb.mxu0 %v1019_v49  ;;  %678 = vmatmul.bf16.vlgmr.msra.gmra.mxu2 %v400_v55 }
  0x52   : > { %710 = vmatpush.bf16.msrb.mxu1 %v1083_v50  ;;  %691 = vmatmul.bf16.vlgmr.msra.gmra.mxu3 %v398_v42 }
  0x55   : > { %698 = vmatpush.bf16.msrb.mxu0 %v1011_v57 }
  0x56   : > { %711 = vmatpush.bf16.msrb.mxu1 %v1075_v58 }
  0x59   : > { %699 = vmatpush.bf16.msrb.mxu0 %v1003_v63 }
  0x5a   : > { %712 = vmatpush.bf16.msrb.mxu1 %v1067_v0 }
  0x5d   : > { %700 = vmatpush.bf16.msrb.mxu0 %v995_v5 }
  0x5e   : > { %713 = vmatpush.bf16.msrb.mxu1 %v1059_v6 }
  0x61   : > { %701 = vmatpush.bf16.msrb.mxu0 %v987_v11 }
  0x62   : > { %714 = vmatpush.bf16.msrb.mxu1 %v1051_v12 }
  0x65   : > { %702 = vmatpush.bf16.msrb.mxu0 %v979_v17 }
  0x66   : > { %715 = vmatpush.bf16.msrb.mxu1 %v1043_v18 }
  0x69   : > { %703 = vmatpush.bf16.msrb.mxu0 %v971_v23 }
  0x6a   : > { %716 = vmatpush.bf16.msrb.mxu1 %v1035_v24 }
  0x6c   : > { %704 = vmatmul.bf16.vlgmr.msrb.gmra.mxu0 %v1541_v45 }
  0x6d   : > { %717 = vmatmul.bf16.vlgmr.msrb.gmra.mxu1 %v400_v55 }
  0xc9   : > { %v653_v25 = vpop.f32.mrf.mxu0 }
  0xca   : > { %v666_v26 = vpop.f32.mrf.mxu1 }
  0xcb   : > { %v667_v27 = vadd.f32 %v666_v26, %v653_v25 }
  0xd1   : > { %v655_v28 = vpop.f32.mrf.mxu0 }
  0xd2   : > { %v668_v29 = vpop.f32.mrf.mxu1 }
  0xd4   : > { %v679_v31 = vpop.f32.mrf.mxu2 }
  0xd5   : > { %v680_v32 = vadd.f32 %v679_v31, %v667_v27  ;;  %v692_v34 = vpop.f32.mrf.mxu3 }
  0xd7   : > { %v722_v33 = vadd.f32 %v680_v32, %v341_v30 }
  0xd9   : > { %724 = vst [vmem:[#allocation2] sm:$0xff] %v722_v33 }
  0xdc   : > { %v681_v35 = vpop.f32.mrf.mxu2 }
  0xdd   : > { %v694_v36 = vpop.f32.mrf.mxu3 }
  0xe9   : > { %v705_v37 = vpop.f32.mrf.mxu0 }
  0xea   : > { %v706_v38 = vadd.f32 %v705_v37, %v692_v34  ;;  %v718_v39 = vpop.f32.mrf.mxu1 }
  0xec   : > { %v719_v41 = vadd.f32 %v718_v39, %v706_v38 }
  0xee   : > { %v723_v42 = vadd.f32 %v719_v41, %v342_v40  ;;  %729 = sbr.rel (%p1092_p3) target bundleno = 257 (0x101), region = 52 }
  0xf0   : > { %725 = vst [vmem:[#allocation2 + $0x8] sm:$0xff] %v723_v42 }
  0xf1   : > { %v707_v43 = vpop.f32.mrf.mxu0 }
  0xf2   : > { %v720_v44 = vpop.f32.mrf.mxu1 }
  0xf3   : > { %v730_v45 = vld [vmem:[#allocation2] sm:$0xff]  ;;  %v740_v50 = vld [vmem:[#allocation5] sm:$0x3] }
  0xf4   : > { %v732_v47 = vld [vmem:[%s1598_s2] sm:$0x3]  ;;  %v742_v51 = vperm.slane %v740_v50, 0  ;;  %v743_v52 = vperm.slane %v740_v50, 1 }
  0xf5   : > { %v734_v48 = vperm.slane %v732_v47, 0  ;;  %v735_v49 = vperm.slane %v732_v47, 1 }
  0xf7   : > { %v731_v46 = vld [vmem:[#allocation2 + $0x8] sm:$0xff]  ;;  %v738_v53 = vmul.f32 %v734_v48, %v730_v45 }
  0xf8   : > { %v739_v54 = vmul.f32 %v735_v49, %v731_v46 }
  0xf9   : > { %v746_v55 = vadd.f32 %v742_v51, %v738_v53 }
  0xfa   : > { %v747_v56 = vadd.f32 %v743_v52, %v739_v54 }
  0xfb   : > { %v748_v57 = vmax.f32 %v746_v55, 0.0 }
  0xfc   : > { %v749_v58 = vmax.f32 %v747_v56, 0.0 }
  0xfe   : > { %v750_v59 = vpack.c.bf16 %v749_v58, %v748_v57 }
 0x100   : > { %751 = vst [vmem:[%s1600_s4] sm:$0xff] %v750_v59 }
 0x101 PF: > { %s18_s20 = sadd.s32 1, %s1333_s20   ;;  %s1606_s15 = smov %s1317_s16 }
 0x102   : > { %p15_p4 = scmp.ge.s32.totalorder %s18_s20, 5   ;;  %s1607_s16 = smov %s1321_s17 }
 0x103   : > { %s1608_s17 = smov %s1445_s26  ;;  %s1609_s18 = smov %s1329_s19 }
 0x104   : > { %s1610_s19 = smov %s1612_s7  ;;  %17 = sbr.rel (!%p15_p4) target bundleno = 5 (0x5), region = 95 }
 0x109   :  { %782 = vsyncpa [#allocation4], 1 }
 0x10a   :  { %784 = vsyncpa [#allocation4 + $0x1], 1 }
 0x10b   :  { %785 = vsyncpa [#allocation6], 1 }

// kernel: resnet18_forward.34
= control target key start
LH: loop header
LB: loop body
LE: loop exit
PB: predicated region body
PF: predicated region fallthrough
CT: control target
= control target key end

     0   :  { %9 = vsyncpa [#allocation4], 0  ;;  %s430_s0 = inlined_call_operand.vmem [shape: bf16[8,128], index: 0, kind: input, shape index: {}]   ;;  %s431_s1 = inlined_call_operand.hbm [shape: bf16[128,256], index: 1, kind: input, shape index: {}]   ;;  %s432_s2 = inlined_call_operand.hbm [shape: f32[1,256], index: 2, kind: input, shape index: {}]   ;;  %s433_s3 = inlined_call_operand.hbm [shape: f32[1,256], index: 3, kind: input, shape index: {}]   ;;  %s434_s4 = inlined_call_operand.vmem [shape: bf16[8,256], index: 4, kind: output, shape index: {}]  }
   0x1   :  { %10 = vsyncpa [#allocation6], 0  ;;  %s31_s17 = sshll.u32 %s432_s2, 4  ;;  %s385_s18 = smov [#allocation5]   ;;  %s32_s17 = int_to_ptr.hbm [resolvable:$true] %s31_s17 }
   0x2   :  { %s33_s19 = sshll.u32 %s385_s18, 4  ;;  %s17_s22 = sshll.u32 %s431_s1, 4  ;;  %s34_s19 = int_to_ptr.vmem [resolvable:$true] %s33_s19  ;;  %s18_s22 = int_to_ptr.hbm [resolvable:$true] %s17_s22 }
   0x3   :  { %36 = dma.hbm_to_vmem [thread:$0]  %s32_s17, 32, %s34_s19, [#allocation6]  }
   0x4   :  { %s386_s23 = smov [#allocation3]   ;;  %s387_s25 = smov 128  }
   0x5   :  { %s19_s24 = sshll.u32 %s386_s23, 4  ;;  %s388_s26 = smov 8   ;;  %s20_s24 = int_to_ptr.vmem [resolvable:$true] %s19_s24 }
   0x6   :  { %25 = dma.hbm_to_vmem [thread:$0]  %s18_s22, 2048, %s20_s24, [#allocation4], %s387_s25, %s387_s25, %s388_s26  }
   0x7   :  { %s42_s2 = sshll.u32 %s433_s3, 4  ;;  %s389_s29 = smov [#allocation7]   ;;  %s43_s2 = int_to_ptr.hbm [resolvable:$true] %s42_s2 }
   0x8   :  { %s44_s30 = sshll.u32 %s389_s29, 4  ;;  %s45_s30 = int_to_ptr.vmem [resolvable:$true] %s44_s30 }
   0x9   :  { %47 = dma.hbm_to_vmem [thread:$0]  %s43_s2, 32, %s45_s30, [#allocation6]  }
   0xa   :  { %381 = dma.done.wait [#allocation4], 2048  }
   0xb   :  { %382 = vsyncadd [#allocation4], 4294965248 }
   0xc   :  { %383 = dma.done.wait [#allocation6], 64  }
   0xd   :  { %384 = vsyncadd [#allocation6], 4294967232  ;;  %v282_v0 = vld [vmem:[#allocation3 + $0x70] sm:$0xf]  ;;  %v303_v1 = vld [vmem:[#allocation3 + $0x74] sm:$0xf0] }
   0xe   :  { %v302_v2 = vld [vmem:[#allocation3 + $0x74] sm:$0xf]  ;;  %v283_v3 = vor.u32 %v303_v1, %v282_v0  ;;  %v284_v4 = vld [vmem:[#allocation3 + $0x78] sm:$0xf0]  ;;  %v274_v5 = vld [vmem:[#allocation3 + $0x60] sm:$0xf] }
   0xf   :  { %v301_v6 = vld [vmem:[#allocation3 + $0x64] sm:$0xf0]  ;;  %v287_v7 = vor.u32 %v302_v2, %v284_v4  ;;  %v300_v8 = vld [vmem:[#allocation3 + $0x64] sm:$0xf]  ;;  %v276_v9 = vld [vmem:[#allocation3 + $0x68] sm:$0xf0] }
  0x10   :  { %165 = vmatpush.bf16.msra.mxu0 %v283_v3  ;;  %v275_v10 = vor.u32 %v301_v6, %v274_v5  ;;  %v279_v11 = vor.u32 %v300_v8, %v276_v9  ;;  %v266_v12 = vld [vmem:[#allocation3 + $0x50] sm:$0xf]  ;;  %v299_v13 = vld [vmem:[#allocation3 + $0x54] sm:$0xf0]  ;;  %v298_v14 = vld [vmem:[#allocation3 + $0x54] sm:$0xf] }
  0x11   :  { %178 = vmatpush.bf16.msra.mxu1 %v287_v7  ;;  %v268_v15 = vld [vmem:[#allocation3 + $0x58] sm:$0xf0]  ;;  %v267_v16 = vor.u32 %v299_v13, %v266_v12  ;;  %v258_v18 = vld [vmem:[#allocation3 + $0x40] sm:$0xf]  ;;  %v297_v19 = vld [vmem:[#allocation3 + $0x44] sm:$0xf0] }
  0x12   :  { %v271_v17 = vor.u32 %v298_v14, %v268_v15  ;;  %v296_v20 = vld [vmem:[#allocation3 + $0x44] sm:$0xf]  ;;  %v260_v21 = vld [vmem:[#allocation3 + $0x48] sm:$0xf0]  ;;  %v259_v22 = vor.u32 %v297_v19, %v258_v18  ;;  %v250_v24 = vld [vmem:[#allocation3 + $0x30] sm:$0xf] }
  0x13   :  { %v263_v23 = vor.u32 %v296_v20, %v260_v21  ;;  %v295_v25 = vld [vmem:[#allocation3 + $0x34] sm:$0xf0]  ;;  %v294_v26 = vld [vmem:[#allocation3 + $0x34] sm:$0xf]  ;;  %v252_v27 = vld [vmem:[#allocation3 + $0x38] sm:$0xf0] }
  0x14   :  { %166 = vmatpush.bf16.msra.mxu0 %v275_v10  ;;  %v251_v28 = vor.u32 %v295_v25, %v250_v24  ;;  %v255_v29 = vor.u32 %v294_v26, %v252_v27  ;;  %v242_v30 = vld [vmem:[#allocation3 + $0x20] sm:$0xf]  ;;  %v293_v31 = vld [vmem:[#allocation3 + $0x24] sm:$0xf0]  ;;  %v292_v32 = vld [vmem:[#allocation3 + $0x24] sm:$0xf] }
  0x15   :  { %179 = vmatpush.bf16.msra.mxu1 %v279_v11  ;;  %v244_v33 = vld [vmem:[#allocation3 + $0x28] sm:$0xf0]  ;;  %v243_v34 = vor.u32 %v293_v31, %v242_v30  ;;  %v234_v36 = vld [vmem:[#allocation3 + $0x10] sm:$0xf]  ;;  %v291_v37 = vld [vmem:[#allocation3 + $0x14] sm:$0xf0] }
  0x16   :  { %v247_v35 = vor.u32 %v292_v32, %v244_v33  ;;  %v290_v38 = vld [vmem:[#allocation3 + $0x14] sm:$0xf]  ;;  %v236_v39 = vld [vmem:[#allocation3 + $0x18] sm:$0xf0]  ;;  %v235_v40 = vor.u32 %v291_v37, %v234_v36  ;;  %v226_v42 = vld [vmem:[#allocation3] sm:$0xf] }
  0x17   :  { %v239_v41 = vor.u32 %v290_v38, %v236_v39  ;;  %v289_v43 = vld [vmem:[#allocation3 + $0x4] sm:$0xf0]  ;;  %v288_v44 = vld [vmem:[#allocation3 + $0x4] sm:$0xf]  ;;  %v228_v45 = vld [vmem:[#allocation3 + $0x8] sm:$0xf0] }
  0x18   :  { %167 = vmatpush.bf16.msra.mxu0 %v267_v16  ;;  %v227_v46 = vor.u32 %v289_v43, %v226_v42  ;;  %v231_v47 = vor.u32 %v288_v44, %v228_v45  ;;  %v68_v48 = vld [vmem:[%s430_s0] sm:$0xf] }
  0x19   :  { %180 = vmatpush.bf16.msra.mxu1 %v271_v17  ;;  %v200_v49 = vld [vmem:[#allocation5] sm:$0x3]  ;;  %v208_v50 = vld [vmem:[#allocation7] sm:$0x3] }
  0x1a   :  { %v202_v51 = vperm.slane %v200_v49, 0  ;;  %v203_v52 = vperm.slane %v200_v49, 1  ;;  %v210_v53 = vperm.slane %v208_v50, 0  ;;  %v211_v55 = vperm.slane %v208_v50, 1 }
  0x1c   :  { %168 = vmatpush.bf16.msra.mxu0 %v259_v22 }
  0x1d   :  { %181 = vmatpush.bf16.msra.mxu1 %v263_v23 }
  0x20   :  { %169 = vmatpush.bf16.msra.mxu0 %v251_v28 }
  0x21   :  { %182 = vmatpush.bf16.msra.mxu1 %v255_v29 }
  0x24   :  { %170 = vmatpush.bf16.msra.mxu0 %v243_v34 }
  0x25   :  { %183 = vmatpush.bf16.msra.mxu1 %v247_v35 }
  0x28   :  { %171 = vmatpush.bf16.msra.mxu0 %v235_v40 }
  0x29   :  { %184 = vmatpush.bf16.msra.mxu1 %v239_v41 }
  0x2c   :  { %172 = vmatpush.bf16.msra.mxu0 %v227_v46 }
  0x2d   :  { %185 = vmatpush.bf16.msra.mxu1 %v231_v47 }
  0x2f   :  { %173 = vmatmul.bf16.vlgmr.msra.gmra.mxu0 %v68_v48 }
  0x30   :  { %186 = vmatmul.bf16.vlgmr.msra.gmra.mxu1 %v68_v48 }
  0xac   :  { %v174_v54 = vpop.f32.mrf.mxu0 }
  0xad   :  { %v206_v56 = vmul.f32 %v202_v51, %v174_v54  ;;  %v187_v57 = vpop.f32.mrf.mxu1 }
  0xae   :  { %v207_v58 = vmul.f32 %v203_v52, %v187_v57 }
  0xaf   :  { %v214_v59 = vadd.f32 %v210_v53, %v206_v56 }
  0xb0   :  { %v215_v60 = vadd.f32 %v211_v55, %v207_v58 }
  0xb2   :  { %v216_v61 = vpack.c.bf16 %v215_v60, %v214_v59 }
  0xb4   :  { %217 = vst [vmem:[%s434_s4] sm:$0xff] %v216_v61  ;;  %v176_v62 = vpop.f32.mrf.mxu0 }
  0xb5   :  { %v189_v63 = vpop.f32.mrf.mxu1 }
  0xb6   :  { %222 = vsyncpa [#allocation4], 1 }
  0xb7   :  { %223 = vsyncpa [#allocation6], 1 }

// kernel: resnet18_forward.37
= control target key start
LH: loop header
LB: loop body
LE: loop exit
PB: predicated region body
PF: predicated region fallthrough
CT: control target
= control target key end

     0   :  { %10 = vsyncpa [#allocation4], 0  ;;  %s1738_s0 = inlined_call_operand.vmem [shape: bf16[8,2304], index: 0, kind: input, shape index: {}]   ;;  %s1739_s1 = inlined_call_operand.hbm [shape: bf16[2304,256], index: 1, kind: input, shape index: {}]   ;;  %s1740_s2 = inlined_call_operand.hbm [shape: f32[1,256], index: 2, kind: input, shape index: {}]   ;;  %s1741_s3 = inlined_call_operand.hbm [shape: f32[1,256], index: 3, kind: input, shape index: {}]   ;;  %s1742_s4 = inlined_call_operand.vmem [shape: bf16[8,256], index: 4, kind: input, shape index: {}]   ;;  %s1743_s5 = inlined_call_operand.vmem [shape: bf16[8,256], index: 5, kind: output, shape index: {}]  }
   0x1   :  { %12 = vsyncpa [#allocation4 + $0x1], 0 }
   0x2   :  { %13 = vsyncpa [#allocation6], 0  ;;  %s1503_s18 = smov 0   ;;  %s1505_s19 = smov 0  }
   0x3   :  { %s1507_s20 = smov 0   ;;  %s1509_s21 = smov 0  }
   0x4   :  { %s1511_s22 = smov 0   ;;  %s1513_s23 = smov 0  }
   0x5 LB: > { %s980_s24 = sadd.s32 4294967295, %s1466_s23   ;;  %s75_s25 = sadd.s32 1, %s1454_s20  ;;  %s1466_s23 = sphi %s1513_s23, %s19_s23   ;;  %s1462_s22 = sphi %s1511_s22, %s1753_s22   ;;  %s1458_s21 = sphi %s1509_s21, %s1752_s21   ;;  %s1454_s20 = sphi %s1507_s20, %s1751_s20   ;;  %s1450_s19 = sphi %s1505_s19, %s1750_s19   ;;  %s1446_s18 = sphi %s1503_s18, %s1749_s18  }
   0x6   : > { %p82_p0 = scmp.ne.s32.totalorder %s1454_s20, %s1450_s19  ;;  %p83_p1 = scmp.eq.s32.totalorder %s1466_s23, 0 }
   0x7   : > { %p88_p2 = scmp.ne.s32.totalorder %s1450_s19, %s1446_s18  ;;  %p1537_p3 = scmp.eq.s32.totalorder %s980_s24, 0 }
   0x8   : > { %p1541_p4 = por %p83_p1, %p82_p0  ;;  %p981_p5 = scmp.ge.s32.totalorder %s1466_s23, 1 }
   0x9   : > { %p1548_p6 = por %p1537_p3, %p88_p2  ;;  %p207_p7 = scmp.lt.s32.totalorder %s1466_s23, 7 }
   0xa   : > { %s221_s6 = sshll.u32 %s1740_s2, 4  ;;  %s1468_s8 = smov [#allocation5]   ;;  %s222_s6 = int_to_ptr.hbm [resolvable:$true] %s221_s6 }
   0xb   : > { %p1556_p8 = pnand %p981_p5, %p207_p7  ;;  %s223_s9 = sshll.u32 %s1468_s8, 4  ;;  %s224_s9 = int_to_ptr.vmem [resolvable:$true] %s223_s9 }
   0xc   : > { %p1266_p10 = scmp.lt.s32.totalorder %s1466_s23, 6  ;;  %s235_s12 = sshll.u32 %s1741_s3, 4  ;;  %s236_s12 = int_to_ptr.hbm [resolvable:$true] %s235_s12 }
   0xd   : > { %p1253_p9 = pneg %p1556_p8  ;;  %s1469_s14 = smov [#allocation7]  }
   0xe   : > { %p1570_p12 = pnand %p1266_p10, %p1541_p4  ;;  %s237_s15 = sshll.u32 %s1469_s14, 4  ;;  %s238_s15 = int_to_ptr.vmem [resolvable:$true] %s237_s15 }
   0xf   : > { %p1254_p11 = pnand %p1253_p9, %p1537_p3  ;;  %s274_s16 = sand.u32 1, %s1454_s20  }
  0x10   : > { %s31_s17 = sadd.s32 1, %s1462_s22  ;;  %s1241_s18 = smul.u32 384, %s274_s16 }
  0x11   : > { %1256 = dma.hbm_to_vmem [thread:$0]  (!%p1254_p11), %s222_s6, 32, %s224_s9, [#allocation6]  }
  0x12   : > { %1259 = dma.hbm_to_vmem [thread:$0]  (!%p1254_p11), %s236_s12, 32, %s238_s15, [#allocation6]  }
  0x13   : > { %p32_p13 = scmp.ge.s32.totalorder %s31_s17, 6  ;;  %s1240_s24 = smul.u32 384, %s1462_s22 }
  0x14   : > { %s278_s9 = scalar_lea.vmem [#allocation3], %s1241_s18  ;;  %s275_s12 = scalar_lea.sflag [#allocation4], %s274_s16 }
  0x15   : > { %s1755_s17 = smov (%p32_p13, %s31_s17), 0  ;;  %s286_s30 = scalar_lea.hbm %s1739_s1, %s1240_s24 }
  0x16   : > { %s70_s6 = ssub.s32 %s1462_s22, %s1755_s17  ;;  %s287_s8 = sshll.u32 %s286_s30, 4  ;;  %s288_s8 = int_to_ptr.hbm [resolvable:$true] %s287_s8 }
  0x17   : > { %p73_p0 = scmp.eq.s32.totalorder %s70_s6, 0  ;;  %s289_s10 = sshll.u32 %s278_s9, 4  ;;  %s290_s10 = int_to_ptr.vmem [resolvable:$true] %s289_s10 }
  0x18   : > { %s1470_s14 = smov 128   ;;  %s1471_s15 = smov 8  }
  0x19   : > { %s1587_s11 = scalar_select %p73_p0, %s1454_s20, %s75_s25  }
  0x1a   : > { %1263 = dma.hbm_to_vmem [thread:$0]  (!%p1570_p12), %s288_s8, 6144, %s290_s10, %s275_s12, %s1470_s14, %s1470_s14, %s1471_s15  }
  0x1b   : > { %301 = sbr.rel (%p1556_p8) target bundleno = 262 (0x106), region = 40  ;;  %s303_s24 = sand.u32 (!%p1556_p8), 1, %s1450_s19  }
  0x1c   : > { %s1242_s27 = smul.u32 (!%p1556_p8), 384, %s303_s24  ;;  %s304_s29 = scalar_lea.sflag (!%p1556_p8), [#allocation4], %s303_s24 }
  0x1e   : > { %s1594_s30 = scalar_lea.vmem (!%p1556_p8), [#allocation3], %s1242_s27 }
  0x20   : > { %1437 = dma.done.wait (%p1548_p6), %s304_s29, 6144  }
  0x21   : > { %1439 = vsyncadd (%p1548_p6), %s304_s29, 4294961152 }
  0x22   : > { %1441 = dma.done.wait (%p1537_p3), [#allocation6], 64  }
  0x23   : > { %1443 = vsyncadd (%p1537_p3), [#allocation6], 4294967232  ;;  %s367_s25 = smul.u32 3, %s1458_s21  ;;  %p992_p2 = scmp.ne.s32.totalorder %s1458_s21, 0 }
  0x25   : > { %p370_p1 = scmp.lt.s32.totalorder %s367_s25, 17  ;;  %404 = sbr.rel (%p992_p2) target bundleno = 45 (0x2d), region = 56 }
  0x27   : > { %s1757_s25 = smov (!%p370_p1, %s367_s25), 17 }
  0x28   : > { %s991_s7 = sshll.u32 %s1757_s25, 2 }
  0x29   : > { %s1608_s18 = scalar_lea.vmem %s1738_s0, %s991_s7 }
  0x2a   : > { %v1472_v0 = vmov 0.0  }
  0x2b   : > { %405 = vst [vmem:[#allocation2] sm:$0xff] %v1472_v0 }
  0x2c   : > { %406 = vst [vmem:[#allocation2 + $0x8] sm:$0xff] %v1472_v0 }
  0x2d PF: > { %v1051_v1 = vld [vmem:[%s1594_s30 + $0x70] sm:$0xf]  ;;  %v1207_v2 = vld [vmem:[%s1594_s30 + $0x74] sm:$0xf0]  ;;  %v1043_v6 = vld [vmem:[%s1594_s30 + $0x60] sm:$0xf] }
  0x2e   : > { %v1115_v3 = vld [vmem:[%s1594_s30 + $0xf0] sm:$0xf]  ;;  %v1052_v4 = vor.u32 %v1207_v2, %v1051_v1  ;;  %v1223_v5 = vld [vmem:[%s1594_s30 + $0xf4] sm:$0xf0]  ;;  %v1205_v7 = vld [vmem:[%s1594_s30 + $0x64] sm:$0xf0] }
  0x2f   : > { %v1116_v8 = vor.u32 %v1223_v5, %v1115_v3  ;;  %v1107_v9 = vld [vmem:[%s1594_s30 + $0xe0] sm:$0xf]  ;;  %v1221_v10 = vld [vmem:[%s1594_s30 + $0xe4] sm:$0xf0]  ;;  %v1044_v11 = vor.u32 %v1205_v7, %v1043_v6  ;;  %v1035_v12 = vld [vmem:[%s1594_s30 + $0x50] sm:$0xf] }
  0x30   : > { %710 = vmatpush.bf16.msra.mxu0 %v1052_v4  ;;  %v1108_v13 = vor.u32 %v1221_v10, %v1107_v9  ;;  %v1203_v14 = vld [vmem:[%s1594_s30 + $0x54] sm:$0xf0]  ;;  %v1179_v15 = vld [vmem:[%s1594_s30 + $0x170] sm:$0xf]  ;;  %v1171_v20 = vld [vmem:[%s1594_s30 + $0x160] sm:$0xf] }
  0x31   : > { %723 = vmatpush.bf16.msra.mxu1 %v1116_v8  ;;  %v1239_v16 = vld [vmem:[%s1594_s30 + $0x174] sm:$0xf0]  ;;  %v1099_v17 = vld [vmem:[%s1594_s30 + $0xd0] sm:$0xf]  ;;  %v1237_v21 = vld [vmem:[%s1594_s30 + $0x164] sm:$0xf0]  ;;  %v1036_v23 = vor.u32 %v1203_v14, %v1035_v12 }
  0x32   : > { %v1219_v18 = vld [vmem:[%s1594_s30 + $0xd4] sm:$0xf0]  ;;  %v1180_v19 = vor.u32 %v1239_v16, %v1179_v15  ;;  %v1206_v22 = vld [vmem:[%s1594_s30 + $0x74] sm:$0xf]  ;;  %v1027_v24 = vld [vmem:[%s1594_s30 + $0x40] sm:$0xf]  ;;  %v1172_v26 = vor.u32 %v1237_v21, %v1171_v20 }
  0x33   : > { %v1201_v25 = vld [vmem:[%s1594_s30 + $0x44] sm:$0xf0]  ;;  %v1053_v27 = vld [vmem:[%s1594_s30 + $0x78] sm:$0xf0]  ;;  %v1100_v28 = vor.u32 %v1219_v18, %v1099_v17  ;;  %v1091_v29 = vld [vmem:[%s1594_s30 + $0xc0] sm:$0xf] }
  0x34   : > { %711 = vmatpush.bf16.msra.mxu0 %v1044_v11  ;;  %736 = vmatpush.bf16.msra.mxu2 %v1180_v19  ;;  %v1217_v30 = vld [vmem:[%s1594_s30 + $0xc4] sm:$0xf0]  ;;  %v1056_v31 = vor.u32 %v1206_v22, %v1053_v27  ;;  %v1163_v32 = vld [vmem:[%s1594_s30 + $0x150] sm:$0xf]  ;;  %v1235_v33 = vld [vmem:[%s1594_s30 + $0x154] sm:$0xf0]  ;;  %v1028_v37 = vor.u32 %v1201_v25, %v1027_v24 }
  0x35   : > { %724 = vmatpush.bf16.msra.mxu1 %v1108_v13  ;;  %v1204_v34 = vld [vmem:[%s1594_s30 + $0x64] sm:$0xf]  ;;  %v1045_v35 = vld [vmem:[%s1594_s30 + $0x68] sm:$0xf0]  ;;  %v1019_v38 = vld [vmem:[%s1594_s30 + $0x30] sm:$0xf]  ;;  %v1164_v40 = vor.u32 %v1235_v33, %v1163_v32  ;;  %v1092_v42 = vor.u32 %v1217_v30, %v1091_v29 }
  0x36   : > { %749 = vmatpush.bf16.msra.mxu3 %v1056_v31  ;;  %v1048_v36 = vor.u32 %v1204_v34, %v1045_v35  ;;  %v1199_v39 = vld [vmem:[%s1594_s30 + $0x34] sm:$0xf0]  ;;  %v1155_v41 = vld [vmem:[%s1594_s30 + $0x140] sm:$0xf]  ;;  %v1233_v43 = vld [vmem:[%s1594_s30 + $0x144] sm:$0xf0] }
  0x37   : > { %v1202_v44 = vld [vmem:[%s1594_s30 + $0x54] sm:$0xf]  ;;  %v1037_v45 = vld [vmem:[%s1594_s30 + $0x58] sm:$0xf0]  ;;  %v1083_v46 = vld [vmem:[%s1594_s30 + $0xb0] sm:$0xf]  ;;  %v1020_v49 = vor.u32 %v1199_v39, %v1019_v38  ;;  %v1156_v51 = vor.u32 %v1233_v43, %v1155_v41 }
  0x38   : > { %712 = vmatpush.bf16.msra.mxu0 %v1036_v23  ;;  %737 = vmatpush.bf16.msra.mxu2 %v1172_v26  ;;  %v1215_v47 = vld [vmem:[%s1594_s30 + $0xb4] sm:$0xf0]  ;;  %v1040_v48 = vor.u32 %v1202_v44, %v1037_v45  ;;  %v1011_v50 = vld [vmem:[%s1594_s30 + $0x20] sm:$0xf]  ;;  %v1200_v52 = vld [vmem:[%s1594_s30 + $0x44] sm:$0xf] }
  0x39   : > { %725 = vmatpush.bf16.msra.mxu1 %v1100_v28  ;;  %v1029_v53 = vld [vmem:[%s1594_s30 + $0x48] sm:$0xf0]  ;;  %v1084_v54 = vor.u32 %v1215_v47, %v1083_v46  ;;  %v1197_v55 = vld [vmem:[%s1594_s30 + $0x24] sm:$0xf0]  ;;  %v1147_v56 = vld [vmem:[%s1594_s30 + $0x130] sm:$0xf] }
  0x3a   : > { %750 = vmatpush.bf16.msra.mxu3 %v1048_v36  ;;  %v1231_v57 = vld [vmem:[%s1594_s30 + $0x134] sm:$0xf0]  ;;  %v1075_v58 = vld [vmem:[%s1594_s30 + $0xa0] sm:$0xf]  ;;  %v1213_v59 = vld [vmem:[%s1594_s30 + $0xa4] sm:$0xf0]  ;;  %v1032_v60 = vor.u32 %v1200_v52, %v1029_v53  ;;  %v1012_v61 = vor.u32 %v1197_v55, %v1011_v50 }
  0x3b   : > { %v1003_v62 = vld [vmem:[%s1594_s30 + $0x10] sm:$0xf]  ;;  %v1148_v63 = vor.u32 %v1231_v57, %v1147_v56  ;;  %v1198_v0 = vld [vmem:[%s1594_s30 + $0x34] sm:$0xf]  ;;  %v1021_v1 = vld [vmem:[%s1594_s30 + $0x38] sm:$0xf0]  ;;  %v1076_v2 = vor.u32 %v1213_v59, %v1075_v58 }
  0x3c   : > { %713 = vmatpush.bf16.msra.mxu0 %v1028_v37  ;;  %738 = vmatpush.bf16.msra.mxu2 %v1164_v40  ;;  %v1195_v3 = vld [vmem:[%s1594_s30 + $0x14] sm:$0xf0]  ;;  %v1139_v4 = vld [vmem:[%s1594_s30 + $0x120] sm:$0xf]  ;;  %v1229_v5 = vld [vmem:[%s1594_s30 + $0x124] sm:$0xf0]  ;;  %v1024_v10 = vor.u32 %v1198_v0, %v1021_v1 }
  0x3d   : > { %726 = vmatpush.bf16.msra.mxu1 %v1092_v42  ;;  %v1067_v6 = vld [vmem:[%s1594_s30 + $0x90] sm:$0xf]  ;;  %v1211_v7 = vld [vmem:[%s1594_s30 + $0x94] sm:$0xf0]  ;;  %v995_v8 = vld [vmem:[%s1594_s30] sm:$0xf]  ;;  %v1004_v11 = vor.u32 %v1195_v3, %v1003_v62  ;;  %v1140_v12 = vor.u32 %v1229_v5, %v1139_v4 }
  0x3e   : > { %751 = vmatpush.bf16.msra.mxu3 %v1040_v48  ;;  %v1193_v9 = vld [vmem:[%s1594_s30 + $0x4] sm:$0xf0]  ;;  %v1196_v13 = vld [vmem:[%s1594_s30 + $0x24] sm:$0xf]  ;;  %v1013_v14 = vld [vmem:[%s1594_s30 + $0x28] sm:$0xf0]  ;;  %v1068_v16 = vor.u32 %v1211_v7, %v1067_v6 }
  0x3f   : > { %v409_v15 = vld [vmem:[%s1608_s18] sm:$0xff]  ;;  %v1059_v17 = vld [vmem:[%s1594_s30 + $0x80] sm:$0xf]  ;;  %v1227_v19 = vld [vmem:[%s1594_s30 + $0x114] sm:$0xf0]  ;;  %v1016_v25 = vor.u32 %v1196_v13, %v1013_v14  ;;  %v996_v27 = vor.u32 %v1193_v9, %v995_v8  ;;  %p1185_p3 = scmp.ne.s32.totalorder %s1458_s21, 5 }
  0x40   : > { %714 = vmatpush.bf16.msra.mxu0 %v1020_v49  ;;  %739 = vmatpush.bf16.msra.mxu2 %v1156_v51  ;;  %v1131_v18 = vld [vmem:[%s1594_s30 + $0x110] sm:$0xf]  ;;  %v1209_v20 = vld [vmem:[%s1594_s30 + $0x84] sm:$0xf0]  ;;  %v1222_v21 = vld [vmem:[%s1594_s30 + $0xf4] sm:$0xf]  ;;  %v461_v26 = vunpack.c.l.b16 %v409_v15  ;;  %v462_v29 = vunpack.c.h.b16 %v409_v15 }
  0x41   : > { %727 = vmatpush.bf16.msra.mxu1 %v1084_v54  ;;  %v1117_v22 = vld [vmem:[%s1594_s30 + $0xf8] sm:$0xf0]  ;;  %v1238_v23 = vld [vmem:[%s1594_s30 + $0x174] sm:$0xf]  ;;  %v1132_v28 = vor.u32 %v1227_v19, %v1131_v18  ;;  %v410_v32 = vld [vmem:[%s1608_s18 + $0x8] sm:$0xf]  ;;  %v1060_v33 = vor.u32 %v1209_v20, %v1059_v17 }
  0x42   : > { %752 = vmatpush.bf16.msra.mxu3 %v1032_v60  ;;  %v1181_v24 = vld [vmem:[%s1594_s30 + $0x178] sm:$0xf0]  ;;  %v1194_v30 = vld [vmem:[%s1594_s30 + $0x14] sm:$0xf]  ;;  %v1120_v34 = vor.u32 %v1222_v21, %v1117_v22  ;;  %v1123_v35 = vld [vmem:[%s1594_s30 + $0x100] sm:$0xf]  ;;  %v464_v42 = vpack.c.b16 %v461_v26, %v461_v26  ;;  %v463_v44 = vunpack.c.l.b16 %v410_v32  ;;  %v1683_v45 = vpack.c.b16 %v462_v29, %v462_v29 }
  0x43   : > { %v1005_v31 = vld [vmem:[%s1594_s30 + $0x18] sm:$0xf0]  ;;  %v1225_v36 = vld [vmem:[%s1594_s30 + $0x104] sm:$0xf0]  ;;  %v1184_v37 = vor.u32 %v1238_v23, %v1181_v24  ;;  %v1220_v38 = vld [vmem:[%s1594_s30 + $0xe4] sm:$0xf] }
  0x44   : > { %715 = vmatpush.bf16.msra.mxu0 %v1012_v61  ;;  %740 = vmatpush.bf16.msra.mxu2 %v1148_v63  ;;  %v1109_v39 = vld [vmem:[%s1594_s30 + $0xe8] sm:$0xf0]  ;;  %v1236_v40 = vld [vmem:[%s1594_s30 + $0x164] sm:$0xf]  ;;  %v1008_v43 = vor.u32 %v1194_v30, %v1005_v31  ;;  %v1124_v46 = vor.u32 %v1225_v36, %v1123_v35  ;;  %v1218_v51 = vld [vmem:[%s1594_s30 + $0xd4] sm:$0xf]  ;;  %v466_v55 = vpack.c.b16 %v463_v44, %v463_v44 }
  0x45   : > { %728 = vmatpush.bf16.msra.mxu1 %v1076_v2  ;;  %v1173_v41 = vld [vmem:[%s1594_s30 + $0x168] sm:$0xf0]  ;;  %v1192_v47 = vld [vmem:[%s1594_s30 + $0x4] sm:$0xf]  ;;  %v1112_v49 = vor.u32 %v1220_v38, %v1109_v39  ;;  %v1101_v52 = vld [vmem:[%s1594_s30 + $0xd8] sm:$0xf0] }
  0x46   : > { %753 = vmatpush.bf16.msra.mxu3 %v1024_v10  ;;  %v997_v48 = vld [vmem:[%s1594_s30 + $0x8] sm:$0xf0]  ;;  %v1176_v50 = vor.u32 %v1236_v40, %v1173_v41  ;;  %v1234_v53 = vld [vmem:[%s1594_s30 + $0x154] sm:$0xf]  ;;  %v1165_v54 = vld [vmem:[%s1594_s30 + $0x158] sm:$0xf0]  ;;  %v1104_v57 = vor.u32 %v1218_v51, %v1101_v52 }
  0x47   : > { %v1000_v56 = vor.u32 %v1192_v47, %v997_v48  ;;  %v1168_v58 = vor.u32 %v1234_v53, %v1165_v54  ;;  %v1216_v59 = vld [vmem:[%s1594_s30 + $0xc4] sm:$0xf]  ;;  %v1093_v60 = vld [vmem:[%s1594_s30 + $0xc8] sm:$0xf0]  ;;  %v1214_v1 = vld [vmem:[%s1594_s30 + $0xb4] sm:$0xf] }
  0x48   : > { %716 = vmatpush.bf16.msra.mxu0 %v1004_v11  ;;  %741 = vmatpush.bf16.msra.mxu2 %v1140_v12  ;;  %v1232_v61 = vld [vmem:[%s1594_s30 + $0x144] sm:$0xf]  ;;  %v1157_v62 = vld [vmem:[%s1594_s30 + $0x148] sm:$0xf0]  ;;  %v1096_v63 = vor.u32 %v1216_v59, %v1093_v60  ;;  %v1085_v2 = vld [vmem:[%s1594_s30 + $0xb8] sm:$0xf0] }
  0x49   : > { %729 = vmatpush.bf16.msra.mxu1 %v1068_v16  ;;  %v1160_v0 = vor.u32 %v1232_v61, %v1157_v62  ;;  %v1230_v3 = vld [vmem:[%s1594_s30 + $0x134] sm:$0xf]  ;;  %v1149_v4 = vld [vmem:[%s1594_s30 + $0x138] sm:$0xf0]  ;;  %v1088_v5 = vor.u32 %v1214_v1, %v1085_v2  ;;  %v1212_v7 = vld [vmem:[%s1594_s30 + $0xa4] sm:$0xf] }
  0x4a   : > { %754 = vmatpush.bf16.msra.mxu3 %v1016_v25  ;;  %v1152_v6 = vor.u32 %v1230_v3, %v1149_v4  ;;  %v1077_v8 = vld [vmem:[%s1594_s30 + $0xa8] sm:$0xf0]  ;;  %v1228_v9 = vld [vmem:[%s1594_s30 + $0x124] sm:$0xf]  ;;  %v1210_v13 = vld [vmem:[%s1594_s30 + $0x94] sm:$0xf] }
  0x4b   : > { %v1141_v10 = vld [vmem:[%s1594_s30 + $0x128] sm:$0xf0]  ;;  %v1080_v11 = vor.u32 %v1212_v7, %v1077_v8  ;;  %v1069_v14 = vld [vmem:[%s1594_s30 + $0x98] sm:$0xf0]  ;;  %v1226_v15 = vld [vmem:[%s1594_s30 + $0x114] sm:$0xf] }
  0x4c   : > { %717 = vmatpush.bf16.msra.mxu0 %v996_v27  ;;  %742 = vmatpush.bf16.msra.mxu2 %v1132_v28  ;;  %v1144_v12 = vor.u32 %v1228_v9, %v1141_v10  ;;  %v1133_v16 = vld [vmem:[%s1594_s30 + $0x118] sm:$0xf0]  ;;  %v1072_v17 = vor.u32 %v1210_v13, %v1069_v14  ;;  %v1208_v19 = vld [vmem:[%s1594_s30 + $0x84] sm:$0xf]  ;;  %v1061_v20 = vld [vmem:[%s1594_s30 + $0x88] sm:$0xf0] }
  0x4d   : > { %730 = vmatpush.bf16.msra.mxu1 %v1060_v33  ;;  %v1136_v18 = vor.u32 %v1226_v15, %v1133_v16  ;;  %v1224_v21 = vld [vmem:[%s1594_s30 + $0x104] sm:$0xf]  ;;  %v1125_v22 = vld [vmem:[%s1594_s30 + $0x108] sm:$0xf0]  ;;  %v1064_v23 = vor.u32 %v1208_v19, %v1061_v20  ;;  %v407_v30 = vld [vmem:[#allocation2] sm:$0xff] }
  0x4e   : > { %755 = vmatpush.bf16.msra.mxu3 %v1008_v43  ;;  %v1128_v24 = vor.u32 %v1224_v21, %v1125_v22  ;;  %v408_v40 = vld [vmem:[#allocation2 + $0x8] sm:$0xff] }
  0x4f   : > { %718 = vmatmul.bf16.vlgmr.msra.gmra.mxu0 %v464_v42 }
  0x50   : > { %762 = vmatpush.bf16.msrb.mxu0 %v1120_v34  ;;  %731 = vmatmul.bf16.vlgmr.msra.gmra.mxu1 %v1683_v45 }
  0x51   : > { %775 = vmatpush.bf16.msrb.mxu1 %v1184_v37  ;;  %743 = vmatpush.bf16.msra.mxu2 %v1124_v46 }
  0x52   : > { %756 = vmatpush.bf16.msra.mxu3 %v1000_v56 }
  0x54   : > { %763 = vmatpush.bf16.msrb.mxu0 %v1112_v49  ;;  %744 = vmatmul.bf16.vlgmr.msra.gmra.mxu2 %v466_v55 }
  0x55   : > { %776 = vmatpush.bf16.msrb.mxu1 %v1176_v50  ;;  %757 = vmatmul.bf16.vlgmr.msra.gmra.mxu3 %v464_v42 }
  0x58   : > { %764 = vmatpush.bf16.msrb.mxu0 %v1104_v57 }
  0x59   : > { %777 = vmatpush.bf16.msrb.mxu1 %v1168_v58 }
  0x5c   : > { %765 = vmatpush.bf16.msrb.mxu0 %v1096_v63 }
  0x5d   : > { %778 = vmatpush.bf16.msrb.mxu1 %v1160_v0 }
  0x60   : > { %766 = vmatpush.bf16.msrb.mxu0 %v1088_v5 }
  0x61   : > { %779 = vmatpush.bf16.msrb.mxu1 %v1152_v6 }
  0x64   : > { %767 = vmatpush.bf16.msrb.mxu0 %v1080_v11 }
  0x65   : > { %780 = vmatpush.bf16.msrb.mxu1 %v1144_v12 }
  0x68   : > { %768 = vmatpush.bf16.msrb.mxu0 %v1072_v17 }
  0x69   : > { %781 = vmatpush.bf16.msrb.mxu1 %v1136_v18 }
  0x6c   : > { %769 = vmatpush.bf16.msrb.mxu0 %v1064_v23 }
  0x6d   : > { %782 = vmatpush.bf16.msrb.mxu1 %v1128_v24 }
  0x6f   : > { %770 = vmatmul.bf16.vlgmr.msrb.gmra.mxu0 %v1683_v45 }
  0x70   : > { %783 = vmatmul.bf16.vlgmr.msrb.gmra.mxu1 %v466_v55 }
  0xcc   : > { %v719_v25 = vpop.f32.mrf.mxu0 }
  0xcd   : > { %v732_v26 = vpop.f32.mrf.mxu1 }
  0xce   : > { %v733_v27 = vadd.f32 %v732_v26, %v719_v25 }
  0xd4   : > { %v721_v28 = vpop.f32.mrf.mxu0 }
  0xd5   : > { %v734_v29 = vpop.f32.mrf.mxu1 }
  0xd7   : > { %v745_v31 = vpop.f32.mrf.mxu2 }
  0xd8   : > { %v746_v32 = vadd.f32 %v745_v31, %v733_v27  ;;  %v758_v34 = vpop.f32.mrf.mxu3 }
  0xda   : > { %v788_v33 = vadd.f32 %v746_v32, %v407_v30 }
  0xdc   : > { %790 = vst [vmem:[#allocation2] sm:$0xff] %v788_v33 }
  0xdf   : > { %v747_v35 = vpop.f32.mrf.mxu2 }
  0xe0   : > { %v760_v36 = vpop.f32.mrf.mxu3 }
  0xec   : > { %v771_v37 = vpop.f32.mrf.mxu0 }
  0xed   : > { %v772_v38 = vadd.f32 %v771_v37, %v758_v34  ;;  %v784_v39 = vpop.f32.mrf.mxu1 }
  0xef   : > { %v785_v41 = vadd.f32 %v784_v39, %v772_v38 }
  0xf1   : > { %v789_v42 = vadd.f32 %v785_v41, %v408_v40  ;;  %795 = sbr.rel (%p1185_p3) target bundleno = 262 (0x106), region = 60 }
  0xf3   : > { %791 = vst [vmem:[#allocation2 + $0x8] sm:$0xff] %v789_v42 }
  0xf4   : > { %v773_v43 = vpop.f32.mrf.mxu0 }
  0xf5   : > { %v786_v44 = vpop.f32.mrf.mxu1 }
  0xf6   : > { %v796_v45 = vld [vmem:[#allocation2] sm:$0xff]  ;;  %v798_v47 = vld [vmem:[#allocation5] sm:$0x3]  ;;  %v806_v50 = vld [vmem:[#allocation7] sm:$0x3] }
  0xf7   : > { %v800_v48 = vperm.slane %v798_v47, 0  ;;  %v801_v49 = vperm.slane %v798_v47, 1  ;;  %v814_v51 = vld [vmem:[%s1742_s4] sm:$0xff]  ;;  %v808_v52 = vperm.slane %v806_v50, 0  ;;  %v809_v53 = vperm.slane %v806_v50, 1 }
  0xf8   : > { %v815_v56 = vunpack.c.l.bf16 %v814_v51  ;;  %v816_v57 = vunpack.c.h.bf16 %v814_v51 }
  0xf9   : > { %v804_v54 = vmul.f32 %v800_v48, %v796_v45 }
  0xfa   : > { %v797_v46 = vld [vmem:[#allocation2 + $0x8] sm:$0xff] }
  0xfb   : > { %v805_v55 = vmul.f32 %v801_v49, %v797_v46  ;;  %v812_v58 = vadd.f32 %v808_v52, %v804_v54 }
  0xfd   : > { %v813_v59 = vadd.f32 %v809_v53, %v805_v55  ;;  %v817_v60 = vadd.f32 %v815_v56, %v812_v58 }
  0xff   : > { %v818_v61 = vadd.f32 %v816_v57, %v813_v59  ;;  %v819_v62 = vmax.f32 %v817_v60, 0.0 }
 0x101   : > { %v820_v63 = vmax.f32 %v818_v61, 0.0 }
 0x103   : > { %v821_v0 = vpack.c.bf16 %v820_v63, %v819_v62 }
 0x105   : > { %822 = vst [vmem:[%s1743_s5] sm:$0xff] %v821_v0 }
 0x106 PF: > { %s19_s23 = sadd.s32 1, %s1466_s23   ;;  %s1749_s18 = smov %s1450_s19 }
 0x107   : > { %p16_p4 = scmp.ge.s32.totalorder %s19_s23, 8   ;;  %s1750_s19 = smov %s1454_s20 }
 0x108   : > { %s1751_s20 = smov %s1587_s11  ;;  %s1752_s21 = smov %s1462_s22 }
 0x109   : > { %s1753_s22 = smov %s1755_s17  ;;  %18 = sbr.rel (!%p16_p4) target bundleno = 5 (0x5), region = 104 }
 0x10e   :  { %853 = vsyncpa [#allocation4], 1 }
 0x10f   :  { %855 = vsyncpa [#allocation4 + $0x1], 1 }
 0x110   :  { %856 = vsyncpa [#allocation6], 1 }

// kernel: resnet18_forward.36
= control target key start
LH: loop header
LB: loop body
LE: loop exit
PB: predicated region body
PF: predicated region fallthrough
CT: control target
= control target key end

     0   :  { %9 = vsyncpa [#allocation4], 0  ;;  %s1640_s0 = inlined_call_operand.vmem [shape: bf16[8,2304], index: 0, kind: input, shape index: {}]   ;;  %s1641_s1 = inlined_call_operand.hbm [shape: bf16[2304,256], index: 1, kind: input, shape index: {}]   ;;  %s1642_s2 = inlined_call_operand.hbm [shape: f32[1,256], index: 2, kind: input, shape index: {}]   ;;  %s1643_s3 = inlined_call_operand.hbm [shape: f32[1,256], index: 3, kind: input, shape index: {}]   ;;  %s1644_s4 = inlined_call_operand.vmem [shape: bf16[8,256], index: 4, kind: output, shape index: {}]  }
   0x1   :  { %11 = vsyncpa [#allocation4 + $0x1], 0 }
   0x2   :  { %12 = vsyncpa [#allocation6], 0  ;;  %s1408_s15 = smov 0   ;;  %s1410_s16 = smov 0  }
   0x3   :  { %s1412_s17 = smov 0   ;;  %s1414_s18 = smov 0  }
   0x4   :  { %s1416_s19 = smov 0   ;;  %s1418_s20 = smov 0  }
   0x5 LB: > { %s891_s21 = sadd.s32 4294967295, %s1376_s20   ;;  %s74_s22 = sadd.s32 1, %s1364_s17  ;;  %s1376_s20 = sphi %s1418_s20, %s18_s20   ;;  %s1372_s19 = sphi %s1416_s19, %s1654_s19   ;;  %s1368_s18 = sphi %s1414_s18, %s1653_s18   ;;  %s1364_s17 = sphi %s1412_s17, %s1652_s17   ;;  %s1360_s16 = sphi %s1410_s16, %s1651_s16   ;;  %s1356_s15 = sphi %s1408_s15, %s1650_s15  }
   0x6   : > { %p81_p0 = scmp.ne.s32.totalorder %s1364_s17, %s1360_s16  ;;  %p82_p1 = scmp.eq.s32.totalorder %s1376_s20, 0 }
   0x7   : > { %p87_p2 = scmp.ne.s32.totalorder %s1360_s16, %s1356_s15  ;;  %p1442_p3 = scmp.eq.s32.totalorder %s891_s21, 0 }
   0x8   : > { %p1446_p4 = por %p82_p1, %p81_p0  ;;  %p892_p5 = scmp.ge.s32.totalorder %s1376_s20, 1 }
   0x9   : > { %p1453_p6 = por %p1442_p3, %p87_p2  ;;  %p178_p7 = scmp.lt.s32.totalorder %s1376_s20, 7 }
   0xa   : > { %s192_s28 = sshll.u32 %s1642_s2, 4  ;;  %s1378_s30 = smov [#allocation5]   ;;  %s193_s28 = int_to_ptr.hbm [resolvable:$true] %s192_s28 }
   0xb   : > { %p1461_p8 = pnand %p892_p5, %p178_p7  ;;  %s194_s5 = sshll.u32 %s1378_s30, 4  ;;  %s195_s5 = int_to_ptr.vmem [resolvable:$true] %s194_s5 }
   0xc   : > { %p1176_p10 = scmp.lt.s32.totalorder %s1376_s20, 6  ;;  %s206_s8 = sshll.u32 %s1643_s3, 4  ;;  %s207_s8 = int_to_ptr.hbm [resolvable:$true] %s206_s8 }
   0xd   : > { %p1163_p9 = pneg %p1461_p8  ;;  %s1379_s10 = smov [#allocation7]  }
   0xe   : > { %p1475_p12 = pnand %p1176_p10, %p1446_p4  ;;  %s208_s11 = sshll.u32 %s1379_s10, 4  ;;  %s209_s11 = int_to_ptr.vmem [resolvable:$true] %s208_s11 }
   0xf   : > { %p1164_p11 = pnand %p1163_p9, %p1442_p3  ;;  %s232_s12 = sand.u32 1, %s1364_s17  }
  0x10   : > { %s30_s13 = sadd.s32 1, %s1372_s19  ;;  %s1151_s14 = smul.u32 384, %s232_s12 }
  0x11   : > { %1166 = dma.hbm_to_vmem [thread:$0]  (!%p1164_p11), %s193_s28, 32, %s195_s5, [#allocation6]  }
  0x12   : > { %1169 = dma.hbm_to_vmem [thread:$0]  (!%p1164_p11), %s207_s8, 32, %s209_s11, [#allocation6]  }
  0x13   : > { %p31_p13 = scmp.ge.s32.totalorder %s30_s13, 6  ;;  %s1150_s15 = smul.u32 384, %s1372_s19 }
  0x14   : > { %s236_s30 = scalar_lea.vmem [#allocation3], %s1151_s14  ;;  %s233_s7 = scalar_lea.sflag [#allocation4], %s232_s12 }
  0x15   : > { %s1656_s13 = smov (%p31_p13, %s30_s13), 0  ;;  %s244_s26 = scalar_lea.hbm %s1641_s1, %s1150_s15 }
  0x16   : > { %s69_s27 = ssub.s32 %s1372_s19, %s1656_s13  ;;  %s245_s28 = sshll.u32 %s244_s26, 4  ;;  %s246_s28 = int_to_ptr.hbm [resolvable:$true] %s245_s28 }
  0x17   : > { %p72_p0 = scmp.eq.s32.totalorder %s69_s27, 0  ;;  %s247_s5 = sshll.u32 %s236_s30, 4  ;;  %s248_s5 = int_to_ptr.vmem [resolvable:$true] %s247_s5 }
  0x18   : > { %s1380_s8 = smov 128   ;;  %s1381_s10 = smov 8  }
  0x19   : > { %s1492_s6 = scalar_select %p72_p0, %s1364_s17, %s74_s22  }
  0x1a   : > { %1173 = dma.hbm_to_vmem [thread:$0]  (!%p1475_p12), %s246_s28, 6144, %s248_s5, %s233_s7, %s1380_s8, %s1380_s8, %s1381_s10  }
  0x1b   : > { %259 = sbr.rel (%p1461_p8) target bundleno = 260 (0x104), region = 36  ;;  %s261_s11 = sand.u32 (!%p1461_p8), 1, %s1360_s16  }
  0x1c   : > { %s1152_s15 = smul.u32 (!%p1461_p8), 384, %s261_s11  ;;  %s262_s21 = scalar_lea.sflag (!%p1461_p8), [#allocation4], %s261_s11 }
  0x1e   : > { %s1499_s24 = scalar_lea.vmem (!%p1461_p8), [#allocation3], %s1152_s15 }
  0x20   : > { %1347 = dma.done.wait (%p1453_p6), %s262_s21, 6144  }
  0x21   : > { %1349 = vsyncadd (%p1453_p6), %s262_s21, 4294961152 }
  0x22   : > { %1351 = dma.done.wait (%p1442_p3), [#allocation6], 64  }
  0x23   : > { %1353 = vsyncadd (%p1442_p3), [#allocation6], 4294967232  ;;  %s314_s22 = smul.u32 3, %s1368_s18  ;;  %p902_p2 = scmp.ne.s32.totalorder %s1368_s18, 0 }
  0x25   : > { %p317_p1 = scmp.lt.s32.totalorder %s314_s22, 17  ;;  %341 = sbr.rel (%p902_p2) target bundleno = 45 (0x2d), region = 52 }
  0x27   : > { %s1658_s22 = smov (!%p317_p1, %s314_s22), 17 }
  0x28   : > { %s901_s29 = sshll.u32 %s1658_s22, 2 }
  0x29   : > { %s1513_s14 = scalar_lea.vmem %s1640_s0, %s901_s29 }
  0x2a   : > { %v1382_v0 = vmov 0.0  }
  0x2b   : > { %342 = vst [vmem:[#allocation2] sm:$0xff] %v1382_v0 }
  0x2c   : > { %343 = vst [vmem:[#allocation2 + $0x8] sm:$0xff] %v1382_v0 }
  0x2d PF: > { %v961_v1 = vld [vmem:[%s1499_s24 + $0x70] sm:$0xf]  ;;  %v1117_v2 = vld [vmem:[%s1499_s24 + $0x74] sm:$0xf0]  ;;  %v953_v6 = vld [vmem:[%s1499_s24 + $0x60] sm:$0xf] }
  0x2e   : > { %v1025_v3 = vld [vmem:[%s1499_s24 + $0xf0] sm:$0xf]  ;;  %v962_v4 = vor.u32 %v1117_v2, %v961_v1  ;;  %v1133_v5 = vld [vmem:[%s1499_s24 + $0xf4] sm:$0xf0]  ;;  %v1115_v7 = vld [vmem:[%s1499_s24 + $0x64] sm:$0xf0] }
  0x2f   : > { %v1026_v8 = vor.u32 %v1133_v5, %v1025_v3  ;;  %v1017_v9 = vld [vmem:[%s1499_s24 + $0xe0] sm:$0xf]  ;;  %v1131_v10 = vld [vmem:[%s1499_s24 + $0xe4] sm:$0xf0]  ;;  %v954_v11 = vor.u32 %v1115_v7, %v953_v6  ;;  %v945_v12 = vld [vmem:[%s1499_s24 + $0x50] sm:$0xf] }
  0x30   : > { %647 = vmatpush.bf16.msra.mxu0 %v962_v4  ;;  %v1018_v13 = vor.u32 %v1131_v10, %v1017_v9  ;;  %v1113_v14 = vld [vmem:[%s1499_s24 + $0x54] sm:$0xf0]  ;;  %v1089_v15 = vld [vmem:[%s1499_s24 + $0x170] sm:$0xf]  ;;  %v1081_v20 = vld [vmem:[%s1499_s24 + $0x160] sm:$0xf] }
  0x31   : > { %660 = vmatpush.bf16.msra.mxu1 %v1026_v8  ;;  %v1149_v16 = vld [vmem:[%s1499_s24 + $0x174] sm:$0xf0]  ;;  %v1009_v17 = vld [vmem:[%s1499_s24 + $0xd0] sm:$0xf]  ;;  %v1147_v21 = vld [vmem:[%s1499_s24 + $0x164] sm:$0xf0]  ;;  %v946_v23 = vor.u32 %v1113_v14, %v945_v12 }
  0x32   : > { %v1129_v18 = vld [vmem:[%s1499_s24 + $0xd4] sm:$0xf0]  ;;  %v1090_v19 = vor.u32 %v1149_v16, %v1089_v15  ;;  %v1116_v22 = vld [vmem:[%s1499_s24 + $0x74] sm:$0xf]  ;;  %v937_v24 = vld [vmem:[%s1499_s24 + $0x40] sm:$0xf]  ;;  %v1082_v26 = vor.u32 %v1147_v21, %v1081_v20 }
  0x33   : > { %v1111_v25 = vld [vmem:[%s1499_s24 + $0x44] sm:$0xf0]  ;;  %v963_v27 = vld [vmem:[%s1499_s24 + $0x78] sm:$0xf0]  ;;  %v1010_v28 = vor.u32 %v1129_v18, %v1009_v17  ;;  %v1001_v29 = vld [vmem:[%s1499_s24 + $0xc0] sm:$0xf] }
  0x34   : > { %648 = vmatpush.bf16.msra.mxu0 %v954_v11  ;;  %673 = vmatpush.bf16.msra.mxu2 %v1090_v19  ;;  %v1127_v30 = vld [vmem:[%s1499_s24 + $0xc4] sm:$0xf0]  ;;  %v966_v31 = vor.u32 %v1116_v22, %v963_v27  ;;  %v1073_v32 = vld [vmem:[%s1499_s24 + $0x150] sm:$0xf]  ;;  %v1145_v33 = vld [vmem:[%s1499_s24 + $0x154] sm:$0xf0]  ;;  %v938_v37 = vor.u32 %v1111_v25, %v937_v24 }
  0x35   : > { %661 = vmatpush.bf16.msra.mxu1 %v1018_v13  ;;  %v1114_v34 = vld [vmem:[%s1499_s24 + $0x64] sm:$0xf]  ;;  %v955_v35 = vld [vmem:[%s1499_s24 + $0x68] sm:$0xf0]  ;;  %v929_v38 = vld [vmem:[%s1499_s24 + $0x30] sm:$0xf]  ;;  %v1074_v40 = vor.u32 %v1145_v33, %v1073_v32  ;;  %v1002_v42 = vor.u32 %v1127_v30, %v1001_v29 }
  0x36   : > { %686 = vmatpush.bf16.msra.mxu3 %v966_v31  ;;  %v958_v36 = vor.u32 %v1114_v34, %v955_v35  ;;  %v1109_v39 = vld [vmem:[%s1499_s24 + $0x34] sm:$0xf0]  ;;  %v1065_v41 = vld [vmem:[%s1499_s24 + $0x140] sm:$0xf]  ;;  %v1143_v43 = vld [vmem:[%s1499_s24 + $0x144] sm:$0xf0] }
  0x37   : > { %v1112_v44 = vld [vmem:[%s1499_s24 + $0x54] sm:$0xf]  ;;  %v947_v45 = vld [vmem:[%s1499_s24 + $0x58] sm:$0xf0]  ;;  %v993_v46 = vld [vmem:[%s1499_s24 + $0xb0] sm:$0xf]  ;;  %v930_v49 = vor.u32 %v1109_v39, %v929_v38  ;;  %v1066_v51 = vor.u32 %v1143_v43, %v1065_v41 }
  0x38   : > { %649 = vmatpush.bf16.msra.mxu0 %v946_v23  ;;  %674 = vmatpush.bf16.msra.mxu2 %v1082_v26  ;;  %v1125_v47 = vld [vmem:[%s1499_s24 + $0xb4] sm:$0xf0]  ;;  %v950_v48 = vor.u32 %v1112_v44, %v947_v45  ;;  %v921_v50 = vld [vmem:[%s1499_s24 + $0x20] sm:$0xf]  ;;  %v1110_v52 = vld [vmem:[%s1499_s24 + $0x44] sm:$0xf] }
  0x39   : > { %662 = vmatpush.bf16.msra.mxu1 %v1010_v28  ;;  %v939_v53 = vld [vmem:[%s1499_s24 + $0x48] sm:$0xf0]  ;;  %v994_v54 = vor.u32 %v1125_v47, %v993_v46  ;;  %v1107_v55 = vld [vmem:[%s1499_s24 + $0x24] sm:$0xf0]  ;;  %v1057_v56 = vld [vmem:[%s1499_s24 + $0x130] sm:$0xf] }
  0x3a   : > { %687 = vmatpush.bf16.msra.mxu3 %v958_v36  ;;  %v1141_v57 = vld [vmem:[%s1499_s24 + $0x134] sm:$0xf0]  ;;  %v985_v58 = vld [vmem:[%s1499_s24 + $0xa0] sm:$0xf]  ;;  %v1123_v59 = vld [vmem:[%s1499_s24 + $0xa4] sm:$0xf0]  ;;  %v942_v60 = vor.u32 %v1110_v52, %v939_v53  ;;  %v922_v61 = vor.u32 %v1107_v55, %v921_v50 }
  0x3b   : > { %v913_v62 = vld [vmem:[%s1499_s24 + $0x10] sm:$0xf]  ;;  %v1058_v63 = vor.u32 %v1141_v57, %v1057_v56  ;;  %v1108_v0 = vld [vmem:[%s1499_s24 + $0x34] sm:$0xf]  ;;  %v931_v1 = vld [vmem:[%s1499_s24 + $0x38] sm:$0xf0]  ;;  %v986_v2 = vor.u32 %v1123_v59, %v985_v58 }
  0x3c   : > { %650 = vmatpush.bf16.msra.mxu0 %v938_v37  ;;  %675 = vmatpush.bf16.msra.mxu2 %v1074_v40  ;;  %v1105_v3 = vld [vmem:[%s1499_s24 + $0x14] sm:$0xf0]  ;;  %v1049_v4 = vld [vmem:[%s1499_s24 + $0x120] sm:$0xf]  ;;  %v1139_v5 = vld [vmem:[%s1499_s24 + $0x124] sm:$0xf0]  ;;  %v934_v10 = vor.u32 %v1108_v0, %v931_v1 }
  0x3d   : > { %663 = vmatpush.bf16.msra.mxu1 %v1002_v42  ;;  %v977_v6 = vld [vmem:[%s1499_s24 + $0x90] sm:$0xf]  ;;  %v1121_v7 = vld [vmem:[%s1499_s24 + $0x94] sm:$0xf0]  ;;  %v905_v8 = vld [vmem:[%s1499_s24] sm:$0xf]  ;;  %v914_v11 = vor.u32 %v1105_v3, %v913_v62  ;;  %v1050_v12 = vor.u32 %v1139_v5, %v1049_v4 }
  0x3e   : > { %688 = vmatpush.bf16.msra.mxu3 %v950_v48  ;;  %v1103_v9 = vld [vmem:[%s1499_s24 + $0x4] sm:$0xf0]  ;;  %v1106_v13 = vld [vmem:[%s1499_s24 + $0x24] sm:$0xf]  ;;  %v923_v14 = vld [vmem:[%s1499_s24 + $0x28] sm:$0xf0]  ;;  %v978_v16 = vor.u32 %v1121_v7, %v977_v6 }
  0x3f   : > { %v346_v15 = vld [vmem:[%s1513_s14] sm:$0xff]  ;;  %v969_v17 = vld [vmem:[%s1499_s24 + $0x80] sm:$0xf]  ;;  %v1137_v19 = vld [vmem:[%s1499_s24 + $0x114] sm:$0xf0]  ;;  %v926_v25 = vor.u32 %v1106_v13, %v923_v14  ;;  %v906_v27 = vor.u32 %v1103_v9, %v905_v8  ;;  %p1095_p3 = scmp.ne.s32.totalorder %s1368_s18, 5 }
  0x40   : > { %651 = vmatpush.bf16.msra.mxu0 %v930_v49  ;;  %676 = vmatpush.bf16.msra.mxu2 %v1066_v51  ;;  %v1041_v18 = vld [vmem:[%s1499_s24 + $0x110] sm:$0xf]  ;;  %v1119_v20 = vld [vmem:[%s1499_s24 + $0x84] sm:$0xf0]  ;;  %v1132_v21 = vld [vmem:[%s1499_s24 + $0xf4] sm:$0xf]  ;;  %v398_v26 = vunpack.c.l.b16 %v346_v15  ;;  %v399_v29 = vunpack.c.h.b16 %v346_v15 }
  0x41   : > { %664 = vmatpush.bf16.msra.mxu1 %v994_v54  ;;  %v1027_v22 = vld [vmem:[%s1499_s24 + $0xf8] sm:$0xf0]  ;;  %v1148_v23 = vld [vmem:[%s1499_s24 + $0x174] sm:$0xf]  ;;  %v1042_v28 = vor.u32 %v1137_v19, %v1041_v18  ;;  %v347_v32 = vld [vmem:[%s1513_s14 + $0x8] sm:$0xf]  ;;  %v970_v33 = vor.u32 %v1119_v20, %v969_v17 }
  0x42   : > { %689 = vmatpush.bf16.msra.mxu3 %v942_v60  ;;  %v1091_v24 = vld [vmem:[%s1499_s24 + $0x178] sm:$0xf0]  ;;  %v1104_v30 = vld [vmem:[%s1499_s24 + $0x14] sm:$0xf]  ;;  %v1030_v34 = vor.u32 %v1132_v21, %v1027_v22  ;;  %v1033_v35 = vld [vmem:[%s1499_s24 + $0x100] sm:$0xf]  ;;  %v401_v42 = vpack.c.b16 %v398_v26, %v398_v26  ;;  %v400_v44 = vunpack.c.l.b16 %v347_v32  ;;  %v1588_v45 = vpack.c.b16 %v399_v29, %v399_v29 }
  0x43   : > { %v915_v31 = vld [vmem:[%s1499_s24 + $0x18] sm:$0xf0]  ;;  %v1135_v36 = vld [vmem:[%s1499_s24 + $0x104] sm:$0xf0]  ;;  %v1094_v37 = vor.u32 %v1148_v23, %v1091_v24  ;;  %v1130_v38 = vld [vmem:[%s1499_s24 + $0xe4] sm:$0xf] }
  0x44   : > { %652 = vmatpush.bf16.msra.mxu0 %v922_v61  ;;  %677 = vmatpush.bf16.msra.mxu2 %v1058_v63  ;;  %v1019_v39 = vld [vmem:[%s1499_s24 + $0xe8] sm:$0xf0]  ;;  %v1146_v40 = vld [vmem:[%s1499_s24 + $0x164] sm:$0xf]  ;;  %v918_v43 = vor.u32 %v1104_v30, %v915_v31  ;;  %v1034_v46 = vor.u32 %v1135_v36, %v1033_v35  ;;  %v1128_v51 = vld [vmem:[%s1499_s24 + $0xd4] sm:$0xf]  ;;  %v403_v55 = vpack.c.b16 %v400_v44, %v400_v44 }
  0x45   : > { %665 = vmatpush.bf16.msra.mxu1 %v986_v2  ;;  %v1083_v41 = vld [vmem:[%s1499_s24 + $0x168] sm:$0xf0]  ;;  %v1102_v47 = vld [vmem:[%s1499_s24 + $0x4] sm:$0xf]  ;;  %v1022_v49 = vor.u32 %v1130_v38, %v1019_v39  ;;  %v1011_v52 = vld [vmem:[%s1499_s24 + $0xd8] sm:$0xf0] }
  0x46   : > { %690 = vmatpush.bf16.msra.mxu3 %v934_v10  ;;  %v907_v48 = vld [vmem:[%s1499_s24 + $0x8] sm:$0xf0]  ;;  %v1086_v50 = vor.u32 %v1146_v40, %v1083_v41  ;;  %v1144_v53 = vld [vmem:[%s1499_s24 + $0x154] sm:$0xf]  ;;  %v1075_v54 = vld [vmem:[%s1499_s24 + $0x158] sm:$0xf0]  ;;  %v1014_v57 = vor.u32 %v1128_v51, %v1011_v52 }
  0x47   : > { %v910_v56 = vor.u32 %v1102_v47, %v907_v48  ;;  %v1078_v58 = vor.u32 %v1144_v53, %v1075_v54  ;;  %v1126_v59 = vld [vmem:[%s1499_s24 + $0xc4] sm:$0xf]  ;;  %v1003_v60 = vld [vmem:[%s1499_s24 + $0xc8] sm:$0xf0]  ;;  %v1124_v1 = vld [vmem:[%s1499_s24 + $0xb4] sm:$0xf] }
  0x48   : > { %653 = vmatpush.bf16.msra.mxu0 %v914_v11  ;;  %678 = vmatpush.bf16.msra.mxu2 %v1050_v12  ;;  %v1142_v61 = vld [vmem:[%s1499_s24 + $0x144] sm:$0xf]  ;;  %v1067_v62 = vld [vmem:[%s1499_s24 + $0x148] sm:$0xf0]  ;;  %v1006_v63 = vor.u32 %v1126_v59, %v1003_v60  ;;  %v995_v2 = vld [vmem:[%s1499_s24 + $0xb8] sm:$0xf0] }
  0x49   : > { %666 = vmatpush.bf16.msra.mxu1 %v978_v16  ;;  %v1070_v0 = vor.u32 %v1142_v61, %v1067_v62  ;;  %v1140_v3 = vld [vmem:[%s1499_s24 + $0x134] sm:$0xf]  ;;  %v1059_v4 = vld [vmem:[%s1499_s24 + $0x138] sm:$0xf0]  ;;  %v998_v5 = vor.u32 %v1124_v1, %v995_v2  ;;  %v1122_v7 = vld [vmem:[%s1499_s24 + $0xa4] sm:$0xf] }
  0x4a   : > { %691 = vmatpush.bf16.msra.mxu3 %v926_v25  ;;  %v1062_v6 = vor.u32 %v1140_v3, %v1059_v4  ;;  %v987_v8 = vld [vmem:[%s1499_s24 + $0xa8] sm:$0xf0]  ;;  %v1138_v9 = vld [vmem:[%s1499_s24 + $0x124] sm:$0xf]  ;;  %v1120_v13 = vld [vmem:[%s1499_s24 + $0x94] sm:$0xf] }
  0x4b   : > { %v1051_v10 = vld [vmem:[%s1499_s24 + $0x128] sm:$0xf0]  ;;  %v990_v11 = vor.u32 %v1122_v7, %v987_v8  ;;  %v979_v14 = vld [vmem:[%s1499_s24 + $0x98] sm:$0xf0]  ;;  %v1136_v15 = vld [vmem:[%s1499_s24 + $0x114] sm:$0xf] }
  0x4c   : > { %654 = vmatpush.bf16.msra.mxu0 %v906_v27  ;;  %679 = vmatpush.bf16.msra.mxu2 %v1042_v28  ;;  %v1054_v12 = vor.u32 %v1138_v9, %v1051_v10  ;;  %v1043_v16 = vld [vmem:[%s1499_s24 + $0x118] sm:$0xf0]  ;;  %v982_v17 = vor.u32 %v1120_v13, %v979_v14  ;;  %v1118_v19 = vld [vmem:[%s1499_s24 + $0x84] sm:$0xf]  ;;  %v971_v20 = vld [vmem:[%s1499_s24 + $0x88] sm:$0xf0] }
  0x4d   : > { %667 = vmatpush.bf16.msra.mxu1 %v970_v33  ;;  %v1046_v18 = vor.u32 %v1136_v15, %v1043_v16  ;;  %v1134_v21 = vld [vmem:[%s1499_s24 + $0x104] sm:$0xf]  ;;  %v1035_v22 = vld [vmem:[%s1499_s24 + $0x108] sm:$0xf0]  ;;  %v974_v23 = vor.u32 %v1118_v19, %v971_v20  ;;  %v344_v30 = vld [vmem:[#allocation2] sm:$0xff] }
  0x4e   : > { %692 = vmatpush.bf16.msra.mxu3 %v918_v43  ;;  %v1038_v24 = vor.u32 %v1134_v21, %v1035_v22  ;;  %v345_v40 = vld [vmem:[#allocation2 + $0x8] sm:$0xff] }
  0x4f   : > { %655 = vmatmul.bf16.vlgmr.msra.gmra.mxu0 %v401_v42 }
  0x50   : > { %699 = vmatpush.bf16.msrb.mxu0 %v1030_v34  ;;  %668 = vmatmul.bf16.vlgmr.msra.gmra.mxu1 %v1588_v45 }
  0x51   : > { %712 = vmatpush.bf16.msrb.mxu1 %v1094_v37  ;;  %680 = vmatpush.bf16.msra.mxu2 %v1034_v46 }
  0x52   : > { %693 = vmatpush.bf16.msra.mxu3 %v910_v56 }
  0x54   : > { %700 = vmatpush.bf16.msrb.mxu0 %v1022_v49  ;;  %681 = vmatmul.bf16.vlgmr.msra.gmra.mxu2 %v403_v55 }
  0x55   : > { %713 = vmatpush.bf16.msrb.mxu1 %v1086_v50  ;;  %694 = vmatmul.bf16.vlgmr.msra.gmra.mxu3 %v401_v42 }
  0x58   : > { %701 = vmatpush.bf16.msrb.mxu0 %v1014_v57 }
  0x59   : > { %714 = vmatpush.bf16.msrb.mxu1 %v1078_v58 }
  0x5c   : > { %702 = vmatpush.bf16.msrb.mxu0 %v1006_v63 }
  0x5d   : > { %715 = vmatpush.bf16.msrb.mxu1 %v1070_v0 }
  0x60   : > { %703 = vmatpush.bf16.msrb.mxu0 %v998_v5 }
  0x61   : > { %716 = vmatpush.bf16.msrb.mxu1 %v1062_v6 }
  0x64   : > { %704 = vmatpush.bf16.msrb.mxu0 %v990_v11 }
  0x65   : > { %717 = vmatpush.bf16.msrb.mxu1 %v1054_v12 }
  0x68   : > { %705 = vmatpush.bf16.msrb.mxu0 %v982_v17 }
  0x69   : > { %718 = vmatpush.bf16.msrb.mxu1 %v1046_v18 }
  0x6c   : > { %706 = vmatpush.bf16.msrb.mxu0 %v974_v23 }
  0x6d   : > { %719 = vmatpush.bf16.msrb.mxu1 %v1038_v24 }
  0x6f   : > { %707 = vmatmul.bf16.vlgmr.msrb.gmra.mxu0 %v1588_v45 }
  0x70   : > { %720 = vmatmul.bf16.vlgmr.msrb.gmra.mxu1 %v403_v55 }
  0xcc   : > { %v656_v25 = vpop.f32.mrf.mxu0 }
  0xcd   : > { %v669_v26 = vpop.f32.mrf.mxu1 }
  0xce   : > { %v670_v27 = vadd.f32 %v669_v26, %v656_v25 }
  0xd4   : > { %v658_v28 = vpop.f32.mrf.mxu0 }
  0xd5   : > { %v671_v29 = vpop.f32.mrf.mxu1 }
  0xd7   : > { %v682_v31 = vpop.f32.mrf.mxu2 }
  0xd8   : > { %v683_v32 = vadd.f32 %v682_v31, %v670_v27  ;;  %v695_v34 = vpop.f32.mrf.mxu3 }
  0xda   : > { %v725_v33 = vadd.f32 %v683_v32, %v344_v30 }
  0xdc   : > { %727 = vst [vmem:[#allocation2] sm:$0xff] %v725_v33 }
  0xdf   : > { %v684_v35 = vpop.f32.mrf.mxu2 }
  0xe0   : > { %v697_v36 = vpop.f32.mrf.mxu3 }
  0xec   : > { %v708_v37 = vpop.f32.mrf.mxu0 }
  0xed   : > { %v709_v38 = vadd.f32 %v708_v37, %v695_v34  ;;  %v721_v39 = vpop.f32.mrf.mxu1 }
  0xef   : > { %v722_v41 = vadd.f32 %v721_v39, %v709_v38 }
  0xf1   : > { %v726_v42 = vadd.f32 %v722_v41, %v345_v40  ;;  %732 = sbr.rel (%p1095_p3) target bundleno = 260 (0x104), region = 56 }
  0xf3   : > { %728 = vst [vmem:[#allocation2 + $0x8] sm:$0xff] %v726_v42 }
  0xf4   : > { %v710_v43 = vpop.f32.mrf.mxu0 }
  0xf5   : > { %v723_v44 = vpop.f32.mrf.mxu1 }
  0xf6   : > { %v733_v45 = vld [vmem:[#allocation2] sm:$0xff]  ;;  %v735_v47 = vld [vmem:[#allocation5] sm:$0x3]  ;;  %v743_v50 = vld [vmem:[#allocation7] sm:$0x3] }
  0xf7   : > { %v737_v48 = vperm.slane %v735_v47, 0  ;;  %v738_v49 = vperm.slane %v735_v47, 1  ;;  %v745_v51 = vperm.slane %v743_v50, 0  ;;  %v746_v52 = vperm.slane %v743_v50, 1 }
  0xf9   : > { %v741_v53 = vmul.f32 %v737_v48, %v733_v45 }
  0xfa   : > { %v734_v46 = vld [vmem:[#allocation2 + $0x8] sm:$0xff] }
  0xfb   : > { %v742_v54 = vmul.f32 %v738_v49, %v734_v46  ;;  %v749_v55 = vadd.f32 %v745_v51, %v741_v53 }
  0xfd   : > { %v750_v56 = vadd.f32 %v746_v52, %v742_v54  ;;  %v751_v57 = vmax.f32 %v749_v55, 0.0 }
  0xff   : > { %v752_v58 = vmax.f32 %v750_v56, 0.0 }
 0x101   : > { %v753_v59 = vpack.c.bf16 %v752_v58, %v751_v57 }
 0x103   : > { %754 = vst [vmem:[%s1644_s4] sm:$0xff] %v753_v59 }
 0x104 PF: > { %s18_s20 = sadd.s32 1, %s1376_s20   ;;  %s1650_s15 = smov %s1360_s16 }
 0x105   : > { %p15_p4 = scmp.ge.s32.totalorder %s18_s20, 8   ;;  %s1651_s16 = smov %s1364_s17 }
 0x106   : > { %s1652_s17 = smov %s1492_s6  ;;  %s1653_s18 = smov %s1372_s19 }
 0x107   : > { %s1654_s19 = smov %s1656_s13  ;;  %17 = sbr.rel (!%p15_p4) target bundleno = 5 (0x5), region = 97 }
 0x10c   :  { %785 = vsyncpa [#allocation4], 1 }
 0x10d   :  { %787 = vsyncpa [#allocation4 + $0x1], 1 }
 0x10e   :  { %788 = vsyncpa [#allocation6], 1 }

// kernel: resnet18_forward.35
= control target key start
LH: loop header
LB: loop body
LE: loop exit
PB: predicated region body
PF: predicated region fallthrough
CT: control target
= control target key end

     0   :  { %10 = vsyncpa [#allocation4], 0  ;;  %s1578_s0 = inlined_call_operand.vmem [shape: bf16[8,2304], index: 0, kind: input, shape index: {}]   ;;  %s1579_s1 = inlined_call_operand.vmem [shape: bf16[2304,256], index: 1, kind: input, shape index: {}]   ;;  %s1580_s2 = inlined_call_operand.hbm [shape: f32[1,256], index: 2, kind: input, shape index: {}]   ;;  %s1581_s3 = inlined_call_operand.hbm [shape: f32[1,256], index: 3, kind: input, shape index: {}]   ;;  %s1582_s4 = inlined_call_operand.vmem [shape: bf16[8,256], index: 4, kind: input, shape index: {}]   ;;  %s1583_s5 = inlined_call_operand.vmem [shape: bf16[8,256], index: 5, kind: output, shape index: {}]  }
   0x1   :  { %11 = vsyncpa [#allocation6], 0  ;;  %s1398_s18 = smov 0   ;;  %s1400_s19 = smov 0  }
   0x2   :  { %s1402_s20 = smov 0  }
   0x3 LB: > { %s968_s21 = sadd.s32 4294967295, %s1363_s20   ;;  %s29_s22 = sadd.s32 1, %s1359_s19  ;;  %s1363_s20 = sphi %s1402_s20, %s17_s20   ;;  %s1359_s19 = sphi %s1400_s19, %s1587_s19   ;;  %s1355_s18 = sphi %s1398_s18, %s1586_s18  }
   0x4   : > { %p30_p0 = scmp.ge.s32.totalorder %s29_s22, 6  ;;  %p969_p1 = scmp.ge.s32.totalorder %s1363_s20, 1 }
   0x5   : > { %p205_p2 = scmp.lt.s32.totalorder %s1363_s20, 7  ;;  %p1423_p4 = scmp.eq.s32.totalorder %s968_s21, 0 }
   0x6   : > { %s1589_s22 = smov (%p30_p0, %s29_s22), 0  ;;  %s219_s27 = sshll.u32 %s1580_s2, 4  ;;  %s220_s27 = int_to_ptr.hbm [resolvable:$true] %s219_s27 }
   0x7   : > { %p1419_p3 = pnand %p969_p1, %p205_p2  ;;  %s1365_s28 = smov [#allocation3]  }
   0x8   : > { %s221_s29 = sshll.u32 %s1365_s28, 4  ;;  %s233_s7 = sshll.u32 %s1581_s3, 4  ;;  %s222_s29 = int_to_ptr.vmem [resolvable:$true] %s221_s29  ;;  %s234_s7 = int_to_ptr.hbm [resolvable:$true] %s233_s7 }
   0x9   : > { %p1235_p5 = pneg %p1419_p3  ;;  %s1366_s8 = smov [#allocation5]  }
   0xa   : > { %s235_s9 = sshll.u32 %s1366_s8, 4  ;;  %289 = sbr.rel (%p1419_p3) target bundleno = 246 (0xf6), region = 40  ;;  %s236_s9 = int_to_ptr.vmem [resolvable:$true] %s235_s9 }
   0xb   : > { %p1236_p6 = pnand %p1423_p4, %p1235_p5 }
   0xd   : > { %1238 = dma.hbm_to_vmem [thread:$0]  (!%p1236_p6), %s220_s27, 32, %s222_s29, [#allocation4]  }
   0xe   : > { %1241 = dma.hbm_to_vmem [thread:$0]  (!%p1236_p6), %s234_s7, 32, %s236_s9, [#allocation6]  }
   0xf   : > { %1346 = dma.done.wait (%p1423_p4), [#allocation4], 32  }
  0x10   : > { %1348 = vsyncadd (%p1423_p4), [#allocation4], 4294967264 }
  0x11   : > { %1350 = dma.done.wait (%p1423_p4), [#allocation6], 32  }
  0x12   : > { %1352 = vsyncadd (%p1423_p4), [#allocation6], 4294967264  ;;  %s350_s10 = smul.u32 3, %s1355_s18  ;;  %p980_p9 = scmp.ne.s32.totalorder %s1355_s18, 0 }
  0x13   : > { %s360_s11 = smul.u32 48, %s1355_s18 }
  0x14   : > { %p353_p7 = scmp.lt.s32.totalorder %s350_s10, 17 }
  0x15   : > { %p362_p8 = scmp.lt.s32.totalorder %s360_s11, 287  ;;  %397 = sbr.rel (%p980_p9) target bundleno = 29 (0x1d), region = 52 }
  0x16   : > { %s1591_s10 = smov (!%p353_p7, %s350_s10), 17 }
  0x17   : > { %s1593_s11 = smov (!%p362_p8, %s360_s11), 287  ;;  %s977_s12 = sshll.u32 %s1591_s10, 2 }
  0x18   : > { %s1452_s15 = scalar_lea.vmem %s1578_s0, %s977_s12  ;;  %s1178_s16 = sshll.u32 %s1593_s11, 3 }
  0x19   : > { %s1457_s23 = scalar_lea.vmem %s1579_s1, %s1178_s16 }
  0x1a   : > { %v1367_v0 = vmov 0.0  }
  0x1b   : > { %398 = vst [vmem:[#allocation2] sm:$0xff] %v1367_v0 }
  0x1c   : > { %399 = vst [vmem:[#allocation2 + $0x8] sm:$0xff] %v1367_v0 }
  0x1d PF: > { %v1039_v1 = vld [vmem:[%s1457_s23 + $0x70] sm:$0xf]  ;;  %v1194_v2 = vld [vmem:[%s1457_s23 + $0x74] sm:$0xf0]  ;;  %v1031_v6 = vld [vmem:[%s1457_s23 + $0x60] sm:$0xf] }
  0x1e   : > { %v1103_v3 = vld [vmem:[%s1457_s23 + $0xf0] sm:$0xf]  ;;  %v1040_v4 = vor.u32 %v1194_v2, %v1039_v1  ;;  %v1210_v5 = vld [vmem:[%s1457_s23 + $0xf4] sm:$0xf0]  ;;  %v1192_v7 = vld [vmem:[%s1457_s23 + $0x64] sm:$0xf0] }
  0x1f   : > { %v1104_v8 = vor.u32 %v1210_v5, %v1103_v3  ;;  %v1095_v9 = vld [vmem:[%s1457_s23 + $0xe0] sm:$0xf]  ;;  %v1208_v10 = vld [vmem:[%s1457_s23 + $0xe4] sm:$0xf0]  ;;  %v1032_v11 = vor.u32 %v1192_v7, %v1031_v6  ;;  %v1023_v12 = vld [vmem:[%s1457_s23 + $0x50] sm:$0xf] }
  0x20   : > { %703 = vmatpush.bf16.msra.mxu0 %v1040_v4  ;;  %v1096_v13 = vor.u32 %v1208_v10, %v1095_v9  ;;  %v1190_v14 = vld [vmem:[%s1457_s23 + $0x54] sm:$0xf0]  ;;  %v1167_v15 = vld [vmem:[%s1457_s23 + $0x170] sm:$0xf]  ;;  %v1159_v20 = vld [vmem:[%s1457_s23 + $0x160] sm:$0xf] }
  0x21   : > { %716 = vmatpush.bf16.msra.mxu1 %v1104_v8  ;;  %v1226_v16 = vld [vmem:[%s1457_s23 + $0x174] sm:$0xf0]  ;;  %v1087_v17 = vld [vmem:[%s1457_s23 + $0xd0] sm:$0xf]  ;;  %v1224_v21 = vld [vmem:[%s1457_s23 + $0x164] sm:$0xf0]  ;;  %v1024_v23 = vor.u32 %v1190_v14, %v1023_v12 }
  0x22   : > { %v1206_v18 = vld [vmem:[%s1457_s23 + $0xd4] sm:$0xf0]  ;;  %v1168_v19 = vor.u32 %v1226_v16, %v1167_v15  ;;  %v1193_v22 = vld [vmem:[%s1457_s23 + $0x74] sm:$0xf]  ;;  %v1015_v24 = vld [vmem:[%s1457_s23 + $0x40] sm:$0xf]  ;;  %v1160_v26 = vor.u32 %v1224_v21, %v1159_v20 }
  0x23   : > { %v1188_v25 = vld [vmem:[%s1457_s23 + $0x44] sm:$0xf0]  ;;  %v1041_v27 = vld [vmem:[%s1457_s23 + $0x78] sm:$0xf0]  ;;  %v1088_v28 = vor.u32 %v1206_v18, %v1087_v17  ;;  %v1079_v29 = vld [vmem:[%s1457_s23 + $0xc0] sm:$0xf] }
  0x24   : > { %704 = vmatpush.bf16.msra.mxu0 %v1032_v11  ;;  %729 = vmatpush.bf16.msra.mxu2 %v1168_v19  ;;  %v1204_v30 = vld [vmem:[%s1457_s23 + $0xc4] sm:$0xf0]  ;;  %v1044_v31 = vor.u32 %v1193_v22, %v1041_v27  ;;  %v1151_v32 = vld [vmem:[%s1457_s23 + $0x150] sm:$0xf]  ;;  %v1222_v33 = vld [vmem:[%s1457_s23 + $0x154] sm:$0xf0]  ;;  %v1016_v37 = vor.u32 %v1188_v25, %v1015_v24 }
  0x25   : > { %717 = vmatpush.bf16.msra.mxu1 %v1096_v13  ;;  %v1191_v34 = vld [vmem:[%s1457_s23 + $0x64] sm:$0xf]  ;;  %v1033_v35 = vld [vmem:[%s1457_s23 + $0x68] sm:$0xf0]  ;;  %v1007_v38 = vld [vmem:[%s1457_s23 + $0x30] sm:$0xf]  ;;  %v1152_v40 = vor.u32 %v1222_v33, %v1151_v32  ;;  %v1080_v42 = vor.u32 %v1204_v30, %v1079_v29 }
  0x26   : > { %742 = vmatpush.bf16.msra.mxu3 %v1044_v31  ;;  %v1036_v36 = vor.u32 %v1191_v34, %v1033_v35  ;;  %v1186_v39 = vld [vmem:[%s1457_s23 + $0x34] sm:$0xf0]  ;;  %v1143_v41 = vld [vmem:[%s1457_s23 + $0x140] sm:$0xf]  ;;  %v1220_v43 = vld [vmem:[%s1457_s23 + $0x144] sm:$0xf0] }
  0x27   : > { %v1189_v44 = vld [vmem:[%s1457_s23 + $0x54] sm:$0xf]  ;;  %v1025_v45 = vld [vmem:[%s1457_s23 + $0x58] sm:$0xf0]  ;;  %v1071_v46 = vld [vmem:[%s1457_s23 + $0xb0] sm:$0xf]  ;;  %v1008_v49 = vor.u32 %v1186_v39, %v1007_v38  ;;  %v1144_v51 = vor.u32 %v1220_v43, %v1143_v41 }
  0x28   : > { %705 = vmatpush.bf16.msra.mxu0 %v1024_v23  ;;  %730 = vmatpush.bf16.msra.mxu2 %v1160_v26  ;;  %v1202_v47 = vld [vmem:[%s1457_s23 + $0xb4] sm:$0xf0]  ;;  %v1028_v48 = vor.u32 %v1189_v44, %v1025_v45  ;;  %v999_v50 = vld [vmem:[%s1457_s23 + $0x20] sm:$0xf]  ;;  %v1187_v52 = vld [vmem:[%s1457_s23 + $0x44] sm:$0xf] }
  0x29   : > { %718 = vmatpush.bf16.msra.mxu1 %v1088_v28  ;;  %v1017_v53 = vld [vmem:[%s1457_s23 + $0x48] sm:$0xf0]  ;;  %v1072_v54 = vor.u32 %v1202_v47, %v1071_v46  ;;  %v1184_v55 = vld [vmem:[%s1457_s23 + $0x24] sm:$0xf0]  ;;  %v1135_v56 = vld [vmem:[%s1457_s23 + $0x130] sm:$0xf] }
  0x2a   : > { %743 = vmatpush.bf16.msra.mxu3 %v1036_v36  ;;  %v1218_v57 = vld [vmem:[%s1457_s23 + $0x134] sm:$0xf0]  ;;  %v1063_v58 = vld [vmem:[%s1457_s23 + $0xa0] sm:$0xf]  ;;  %v1200_v59 = vld [vmem:[%s1457_s23 + $0xa4] sm:$0xf0]  ;;  %v1020_v60 = vor.u32 %v1187_v52, %v1017_v53  ;;  %v1000_v61 = vor.u32 %v1184_v55, %v999_v50 }
  0x2b   : > { %v991_v62 = vld [vmem:[%s1457_s23 + $0x10] sm:$0xf]  ;;  %v1136_v63 = vor.u32 %v1218_v57, %v1135_v56  ;;  %v1185_v0 = vld [vmem:[%s1457_s23 + $0x34] sm:$0xf]  ;;  %v1009_v1 = vld [vmem:[%s1457_s23 + $0x38] sm:$0xf0]  ;;  %v1064_v2 = vor.u32 %v1200_v59, %v1063_v58 }
  0x2c   : > { %706 = vmatpush.bf16.msra.mxu0 %v1016_v37  ;;  %731 = vmatpush.bf16.msra.mxu2 %v1152_v40  ;;  %v1182_v3 = vld [vmem:[%s1457_s23 + $0x14] sm:$0xf0]  ;;  %v1127_v4 = vld [vmem:[%s1457_s23 + $0x120] sm:$0xf]  ;;  %v1216_v5 = vld [vmem:[%s1457_s23 + $0x124] sm:$0xf0]  ;;  %v1012_v10 = vor.u32 %v1185_v0, %v1009_v1 }
  0x2d   : > { %719 = vmatpush.bf16.msra.mxu1 %v1080_v42  ;;  %v1055_v6 = vld [vmem:[%s1457_s23 + $0x90] sm:$0xf]  ;;  %v1198_v7 = vld [vmem:[%s1457_s23 + $0x94] sm:$0xf0]  ;;  %v983_v8 = vld [vmem:[%s1457_s23] sm:$0xf]  ;;  %v992_v11 = vor.u32 %v1182_v3, %v991_v62  ;;  %v1128_v12 = vor.u32 %v1216_v5, %v1127_v4 }
  0x2e   : > { %744 = vmatpush.bf16.msra.mxu3 %v1028_v48  ;;  %v1180_v9 = vld [vmem:[%s1457_s23 + $0x4] sm:$0xf0]  ;;  %v1183_v13 = vld [vmem:[%s1457_s23 + $0x24] sm:$0xf]  ;;  %v1001_v14 = vld [vmem:[%s1457_s23 + $0x28] sm:$0xf0]  ;;  %v1056_v16 = vor.u32 %v1198_v7, %v1055_v6 }
  0x2f   : > { %v402_v15 = vld [vmem:[%s1452_s15] sm:$0xff]  ;;  %v1119_v18 = vld [vmem:[%s1457_s23 + $0x110] sm:$0xf]  ;;  %v1214_v19 = vld [vmem:[%s1457_s23 + $0x114] sm:$0xf0]  ;;  %v1004_v25 = vor.u32 %v1183_v13, %v1001_v14  ;;  %v984_v27 = vor.u32 %v1180_v9, %v983_v8  ;;  %p1173_p10 = scmp.ne.s32.totalorder %s1355_s18, 5 }
  0x30   : > { %707 = vmatpush.bf16.msra.mxu0 %v1008_v49  ;;  %732 = vmatpush.bf16.msra.mxu2 %v1144_v51  ;;  %v1047_v17 = vld [vmem:[%s1457_s23 + $0x80] sm:$0xf]  ;;  %v1196_v20 = vld [vmem:[%s1457_s23 + $0x84] sm:$0xf0]  ;;  %v1209_v21 = vld [vmem:[%s1457_s23 + $0xf4] sm:$0xf]  ;;  %v454_v26 = vunpack.c.l.b16 %v402_v15  ;;  %v1120_v28 = vor.u32 %v1214_v19, %v1119_v18  ;;  %v455_v29 = vunpack.c.h.b16 %v402_v15 }
  0x31   : > { %720 = vmatpush.bf16.msra.mxu1 %v1072_v54  ;;  %v1105_v22 = vld [vmem:[%s1457_s23 + $0xf8] sm:$0xf0]  ;;  %v1225_v23 = vld [vmem:[%s1457_s23 + $0x174] sm:$0xf]  ;;  %v403_v32 = vld [vmem:[%s1452_s15 + $0x8] sm:$0xf]  ;;  %v1048_v33 = vor.u32 %v1196_v20, %v1047_v17 }
  0x32   : > { %745 = vmatpush.bf16.msra.mxu3 %v1020_v60  ;;  %v1169_v24 = vld [vmem:[%s1457_s23 + $0x178] sm:$0xf0]  ;;  %v1181_v30 = vld [vmem:[%s1457_s23 + $0x14] sm:$0xf]  ;;  %v1108_v34 = vor.u32 %v1209_v21, %v1105_v22  ;;  %v1111_v35 = vld [vmem:[%s1457_s23 + $0x100] sm:$0xf]  ;;  %v457_v42 = vpack.c.b16 %v454_v26, %v454_v26  ;;  %v456_v44 = vunpack.c.l.b16 %v403_v32  ;;  %v1532_v45 = vpack.c.b16 %v455_v29, %v455_v29 }
  0x33   : > { %v993_v31 = vld [vmem:[%s1457_s23 + $0x18] sm:$0xf0]  ;;  %v1212_v36 = vld [vmem:[%s1457_s23 + $0x104] sm:$0xf0]  ;;  %v1172_v37 = vor.u32 %v1225_v23, %v1169_v24  ;;  %v1207_v38 = vld [vmem:[%s1457_s23 + $0xe4] sm:$0xf] }
  0x34   : > { %708 = vmatpush.bf16.msra.mxu0 %v1000_v61  ;;  %733 = vmatpush.bf16.msra.mxu2 %v1136_v63  ;;  %v1097_v39 = vld [vmem:[%s1457_s23 + $0xe8] sm:$0xf0]  ;;  %v1223_v40 = vld [vmem:[%s1457_s23 + $0x164] sm:$0xf]  ;;  %v996_v43 = vor.u32 %v1181_v30, %v993_v31  ;;  %v1112_v46 = vor.u32 %v1212_v36, %v1111_v35  ;;  %v1205_v51 = vld [vmem:[%s1457_s23 + $0xd4] sm:$0xf]  ;;  %v459_v55 = vpack.c.b16 %v456_v44, %v456_v44 }
  0x35   : > { %721 = vmatpush.bf16.msra.mxu1 %v1064_v2  ;;  %v1161_v41 = vld [vmem:[%s1457_s23 + $0x168] sm:$0xf0]  ;;  %v1179_v47 = vld [vmem:[%s1457_s23 + $0x4] sm:$0xf]  ;;  %v1100_v49 = vor.u32 %v1207_v38, %v1097_v39  ;;  %v1089_v52 = vld [vmem:[%s1457_s23 + $0xd8] sm:$0xf0] }
  0x36   : > { %746 = vmatpush.bf16.msra.mxu3 %v1012_v10  ;;  %v985_v48 = vld [vmem:[%s1457_s23 + $0x8] sm:$0xf0]  ;;  %v1164_v50 = vor.u32 %v1223_v40, %v1161_v41  ;;  %v1221_v53 = vld [vmem:[%s1457_s23 + $0x154] sm:$0xf]  ;;  %v1153_v54 = vld [vmem:[%s1457_s23 + $0x158] sm:$0xf0]  ;;  %v1092_v57 = vor.u32 %v1205_v51, %v1089_v52 }
  0x37   : > { %v988_v56 = vor.u32 %v1179_v47, %v985_v48  ;;  %v1156_v58 = vor.u32 %v1221_v53, %v1153_v54  ;;  %v1203_v59 = vld [vmem:[%s1457_s23 + $0xc4] sm:$0xf]  ;;  %v1081_v60 = vld [vmem:[%s1457_s23 + $0xc8] sm:$0xf0]  ;;  %v1201_v1 = vld [vmem:[%s1457_s23 + $0xb4] sm:$0xf] }
  0x38   : > { %709 = vmatpush.bf16.msra.mxu0 %v992_v11  ;;  %734 = vmatpush.bf16.msra.mxu2 %v1128_v12  ;;  %v1219_v61 = vld [vmem:[%s1457_s23 + $0x144] sm:$0xf]  ;;  %v1145_v62 = vld [vmem:[%s1457_s23 + $0x148] sm:$0xf0]  ;;  %v1084_v63 = vor.u32 %v1203_v59, %v1081_v60  ;;  %v1073_v2 = vld [vmem:[%s1457_s23 + $0xb8] sm:$0xf0] }
  0x39   : > { %722 = vmatpush.bf16.msra.mxu1 %v1056_v16  ;;  %v1148_v0 = vor.u32 %v1219_v61, %v1145_v62  ;;  %v1217_v3 = vld [vmem:[%s1457_s23 + $0x134] sm:$0xf]  ;;  %v1137_v4 = vld [vmem:[%s1457_s23 + $0x138] sm:$0xf0]  ;;  %v1076_v5 = vor.u32 %v1201_v1, %v1073_v2  ;;  %v1199_v7 = vld [vmem:[%s1457_s23 + $0xa4] sm:$0xf] }
  0x3a   : > { %747 = vmatpush.bf16.msra.mxu3 %v1004_v25  ;;  %v1140_v6 = vor.u32 %v1217_v3, %v1137_v4  ;;  %v1065_v8 = vld [vmem:[%s1457_s23 + $0xa8] sm:$0xf0]  ;;  %v1215_v9 = vld [vmem:[%s1457_s23 + $0x124] sm:$0xf]  ;;  %v1197_v13 = vld [vmem:[%s1457_s23 + $0x94] sm:$0xf] }
  0x3b   : > { %v1129_v10 = vld [vmem:[%s1457_s23 + $0x128] sm:$0xf0]  ;;  %v1068_v11 = vor.u32 %v1199_v7, %v1065_v8  ;;  %v1057_v14 = vld [vmem:[%s1457_s23 + $0x98] sm:$0xf0]  ;;  %v1213_v15 = vld [vmem:[%s1457_s23 + $0x114] sm:$0xf] }
  0x3c   : > { %710 = vmatpush.bf16.msra.mxu0 %v984_v27  ;;  %735 = vmatpush.bf16.msra.mxu2 %v1120_v28  ;;  %v1132_v12 = vor.u32 %v1215_v9, %v1129_v10  ;;  %v1121_v16 = vld [vmem:[%s1457_s23 + $0x118] sm:$0xf0]  ;;  %v1060_v17 = vor.u32 %v1197_v13, %v1057_v14  ;;  %v1195_v19 = vld [vmem:[%s1457_s23 + $0x84] sm:$0xf]  ;;  %v1049_v20 = vld [vmem:[%s1457_s23 + $0x88] sm:$0xf0] }
  0x3d   : > { %723 = vmatpush.bf16.msra.mxu1 %v1048_v33  ;;  %v1124_v18 = vor.u32 %v1213_v15, %v1121_v16  ;;  %v1211_v21 = vld [vmem:[%s1457_s23 + $0x104] sm:$0xf]  ;;  %v1113_v22 = vld [vmem:[%s1457_s23 + $0x108] sm:$0xf0]  ;;  %v1052_v23 = vor.u32 %v1195_v19, %v1049_v20 }
  0x3e   : > { %748 = vmatpush.bf16.msra.mxu3 %v996_v43  ;;  %v1116_v24 = vor.u32 %v1211_v21, %v1113_v22  ;;  %v400_v30 = vld [vmem:[#allocation2] sm:$0xff]  ;;  %v401_v40 = vld [vmem:[#allocation2 + $0x8] sm:$0xff] }
  0x3f   : > { %711 = vmatmul.bf16.vlgmr.msra.gmra.mxu0 %v457_v42 }
  0x40   : > { %755 = vmatpush.bf16.msrb.mxu0 %v1108_v34  ;;  %724 = vmatmul.bf16.vlgmr.msra.gmra.mxu1 %v1532_v45 }
  0x41   : > { %768 = vmatpush.bf16.msrb.mxu1 %v1172_v37  ;;  %736 = vmatpush.bf16.msra.mxu2 %v1112_v46 }
  0x42   : > { %749 = vmatpush.bf16.msra.mxu3 %v988_v56 }
  0x44   : > { %756 = vmatpush.bf16.msrb.mxu0 %v1100_v49  ;;  %737 = vmatmul.bf16.vlgmr.msra.gmra.mxu2 %v459_v55 }
  0x45   : > { %769 = vmatpush.bf16.msrb.mxu1 %v1164_v50  ;;  %750 = vmatmul.bf16.vlgmr.msra.gmra.mxu3 %v457_v42 }
  0x48   : > { %757 = vmatpush.bf16.msrb.mxu0 %v1092_v57 }
  0x49   : > { %770 = vmatpush.bf16.msrb.mxu1 %v1156_v58 }
  0x4c   : > { %758 = vmatpush.bf16.msrb.mxu0 %v1084_v63 }
  0x4d   : > { %771 = vmatpush.bf16.msrb.mxu1 %v1148_v0 }
  0x50   : > { %759 = vmatpush.bf16.msrb.mxu0 %v1076_v5 }
  0x51   : > { %772 = vmatpush.bf16.msrb.mxu1 %v1140_v6 }
  0x54   : > { %760 = vmatpush.bf16.msrb.mxu0 %v1068_v11 }
  0x55   : > { %773 = vmatpush.bf16.msrb.mxu1 %v1132_v12 }
  0x58   : > { %761 = vmatpush.bf16.msrb.mxu0 %v1060_v17 }
  0x59   : > { %774 = vmatpush.bf16.msrb.mxu1 %v1124_v18 }
  0x5c   : > { %762 = vmatpush.bf16.msrb.mxu0 %v1052_v23 }
  0x5d   : > { %775 = vmatpush.bf16.msrb.mxu1 %v1116_v24 }
  0x5f   : > { %763 = vmatmul.bf16.vlgmr.msrb.gmra.mxu0 %v1532_v45 }
  0x60   : > { %776 = vmatmul.bf16.vlgmr.msrb.gmra.mxu1 %v459_v55 }
  0xbc   : > { %v712_v25 = vpop.f32.mrf.mxu0 }
  0xbd   : > { %v725_v26 = vpop.f32.mrf.mxu1 }
  0xbe   : > { %v726_v27 = vadd.f32 %v725_v26, %v712_v25 }
  0xc4   : > { %v714_v28 = vpop.f32.mrf.mxu0 }
  0xc5   : > { %v727_v29 = vpop.f32.mrf.mxu1 }
  0xc7   : > { %v738_v31 = vpop.f32.mrf.mxu2 }
  0xc8   : > { %v739_v32 = vadd.f32 %v738_v31, %v726_v27  ;;  %v751_v34 = vpop.f32.mrf.mxu3 }
  0xca   : > { %v781_v33 = vadd.f32 %v739_v32, %v400_v30 }
  0xcc   : > { %783 = vst [vmem:[#allocation2] sm:$0xff] %v781_v33 }
  0xcf   : > { %v740_v35 = vpop.f32.mrf.mxu2 }
  0xd0   : > { %v753_v36 = vpop.f32.mrf.mxu3 }
  0xdc   : > { %v764_v37 = vpop.f32.mrf.mxu0 }
  0xdd   : > { %v765_v38 = vadd.f32 %v764_v37, %v751_v34  ;;  %v777_v39 = vpop.f32.mrf.mxu1 }
  0xdf   : > { %v778_v41 = vadd.f32 %v777_v39, %v765_v38 }
  0xe1   : > { %v782_v42 = vadd.f32 %v778_v41, %v401_v40  ;;  %788 = sbr.rel (%p1173_p10) target bundleno = 246 (0xf6), region = 56 }
  0xe3   : > { %784 = vst [vmem:[#allocation2 + $0x8] sm:$0xff] %v782_v42 }
  0xe4   : > { %v766_v43 = vpop.f32.mrf.mxu0 }
  0xe5   : > { %v779_v44 = vpop.f32.mrf.mxu1 }
  0xe6   : > { %v789_v45 = vld [vmem:[#allocation2] sm:$0xff]  ;;  %v791_v47 = vld [vmem:[#allocation3] sm:$0x3]  ;;  %v799_v50 = vld [vmem:[#allocation5] sm:$0x3] }
  0xe7   : > { %v793_v48 = vperm.slane %v791_v47, 0  ;;  %v794_v49 = vperm.slane %v791_v47, 1  ;;  %v807_v51 = vld [vmem:[%s1582_s4] sm:$0xff]  ;;  %v801_v52 = vperm.slane %v799_v50, 0  ;;  %v802_v53 = vperm.slane %v799_v50, 1 }
  0xe8   : > { %v808_v56 = vunpack.c.l.bf16 %v807_v51  ;;  %v809_v57 = vunpack.c.h.bf16 %v807_v51 }
  0xe9   : > { %v797_v54 = vmul.f32 %v793_v48, %v789_v45 }
  0xea   : > { %v790_v46 = vld [vmem:[#allocation2 + $0x8] sm:$0xff] }
  0xeb   : > { %v798_v55 = vmul.f32 %v794_v49, %v790_v46  ;;  %v805_v58 = vadd.f32 %v801_v52, %v797_v54 }
  0xed   : > { %v806_v59 = vadd.f32 %v802_v53, %v798_v55  ;;  %v810_v60 = vadd.f32 %v808_v56, %v805_v58 }
  0xef   : > { %v811_v61 = vadd.f32 %v809_v57, %v806_v59  ;;  %v812_v62 = vmax.f32 %v810_v60, 0.0 }
  0xf1   : > { %v813_v63 = vmax.f32 %v811_v61, 0.0 }
  0xf3   : > { %v814_v0 = vpack.c.bf16 %v813_v63, %v812_v62 }
  0xf5   : > { %815 = vst [vmem:[%s1583_s5] sm:$0xff] %v814_v0 }
  0xf6 PF: > { %s17_s20 = sadd.s32 1, %s1363_s20   ;;  %s1586_s18 = smov %s1359_s19 }
  0xf7   : > { %p14_p11 = scmp.ge.s32.totalorder %s17_s20, 8   ;;  %s1587_s19 = smov %s1589_s22 }
  0xf9   :  { %16 = sbr.rel (!%p14_p11) target bundleno = 3 (0x3), region = 95 }
  0xfe   :  { %846 = vsyncpa [#allocation4], 1 }
  0xff   :  { %848 = vsyncpa [#allocation4 + $0x1], 1 }
 0x100   :  { %849 = vsyncpa [#allocation6], 1 }

// kernel: resnet18_forward.38
= control target key start
LH: loop header
LB: loop body
LE: loop exit
PB: predicated region body
PF: predicated region fallthrough
CT: control target
= control target key end

     0   :  { %9 = vsyncpa [#allocation4], 0  ;;  %s1593_s0 = inlined_call_operand.vmem [shape: bf16[8,2304], index: 0, kind: input, shape index: {}]   ;;  %s1594_s1 = inlined_call_operand.hbm [shape: bf16[2304,512], index: 1, kind: input, shape index: {}]   ;;  %s1595_s2 = inlined_call_operand.vmem [shape: f32[1,512], index: 2, kind: input, shape index: {}]   ;;  %s1596_s3 = inlined_call_operand.vmem [shape: f32[1,512], index: 3, kind: input, shape index: {}]   ;;  %s1597_s4 = inlined_call_operand.vmem [shape: bf16[8,512], index: 4, kind: output, shape index: {}]  }
   0x1   :  { %11 = vsyncpa [#allocation4 + $0x1], 0  ;;  %s1347_s15 = smov 0   ;;  %s1349_s16 = smov 0  }
   0x2   :  { %s1351_s17 = smov 0   ;;  %s1353_s18 = smov 0  }
   0x3   :  { %s1355_s19 = smov 0   ;;  %s1357_s20 = smov 0  }
   0x4   :  { %s1359_s21 = smov 0   ;;  %s1361_s22 = smov 0  }
   0x5 LB: > { %s885_s23 = sadd.s32 4294967295, %s1316_s22   ;;  %s29_s24 = sadd.s32 1, %s1308_s20  ;;  %s1316_s22 = sphi %s1361_s22, %s17_s22   ;;  %s1312_s21 = sphi %s1359_s21, %s1612_s21   ;;  %s1308_s20 = sphi %s1357_s20, %s1611_s20   ;;  %s1304_s19 = sphi %s1355_s19, %s1610_s19   ;;  %s1300_s18 = sphi %s1353_s18, %s1609_s18   ;;  %s1296_s17 = sphi %s1351_s17, %s1608_s17   ;;  %s1292_s16 = sphi %s1349_s16, %s1607_s16   ;;  %s1288_s15 = sphi %s1347_s15, %s1606_s15  }
   0x6   : > { %p30_p0 = scmp.ge.s32.totalorder %s29_s24, 6  ;;  %s32_s25 = sadd.s32 1, %s1312_s21 }
   0x7   : > { %s73_s26 = sadd.s32 1, %s1296_s17  ;;  %p80_p1 = scmp.ne.s32.totalorder %s1296_s17, %s1292_s16 }
   0x8   : > { %s1614_s24 = smov (%p30_p0, %s29_s24), 0  ;;  %s1616_s25 = smov (!%p30_p0, %s32_s25), %s1312_s21 }
   0x9   : > { %1600 = sst [smem:[#allocation6_spill]] %s1614_s24  ;;  %s68_s27 = ssub.s32 %s1308_s20, %s1614_s24 }
   0xa   : > { %p81_p2 = scmp.eq.s32.totalorder %s1316_s22, 0  ;;  %p34_p3 = scmp.ge.s32.totalorder %s1616_s25, 2 }
   0xb   : > { %p86_p4 = scmp.ne.s32.totalorder %s1292_s16, %s1288_s15  ;;  %p87_p6 = scmp.eq.s32.totalorder %s885_s23, 0 }
   0xc   : > { %p1398_p5 = por %p81_p2, %p80_p1  ;;  %s1618_s25 = smov (%p34_p3, %s1616_s25), 0 }
   0xd   : > { %1602 = sst [smem:[#allocation7_spill]] %s1618_s25  ;;  %p1404_p7 = por %p87_p6, %p86_p4 }
   0xe   : > { %s69_s30 = ssub.s32 %s1312_s21, %s1618_s25  ;;  %p1151_p8 = scmp.lt.s32.totalorder %s1316_s22, 12 }
   0xf   : > { %s70_s5 = sor.u32 %s69_s30, %s68_s27  ;;  %s203_s6 = sand.u32 1, %s1296_s17  }
  0x10   : > { %p71_p9 = scmp.eq.s32.totalorder %s70_s5, 0  ;;  %s1143_s7 = smul.u32 384, %s203_s6 }
  0x11   : > { %s889_s8 = sshll.u32 %s1312_s21, 1  ;;  %s1094_s10 = smul.u32 192, %s1308_s20 }
  0x12   : > { %s1414_s9 = scalar_select %p71_p9, %s1296_s17, %s73_s26  }
  0x13   : > { %s207_s11 = scalar_lea.vmem [#allocation3], %s1143_s7  ;;  %p1148_p10 = pnand %p1151_p8, %p1398_p5 }
  0x14   : > { %s218_s12 = sshll.u32 %s207_s11, 4  ;;  %s213_s13 = sadd.s32 %s1094_s10, %s889_s8  ;;  %s219_s12 = int_to_ptr.vmem [resolvable:$true] %s218_s12 }
  0x15   : > { %s891_s14 = sshll.u32 %s213_s13, 2  ;;  %s204_s5 = scalar_lea.sflag [#allocation4], %s203_s6 }
  0x16   : > { %s215_s27 = scalar_lea.hbm %s1594_s1, %s891_s14  ;;  %s1318_s25 = smov 256  }
  0x17   : > { %s216_s30 = sshll.u32 %s215_s27, 4  ;;  %s1319_s26 = smov 128   ;;  %s217_s30 = int_to_ptr.hbm [resolvable:$true] %s216_s30 }
  0x18   : > { %s1320_s24 = smov 8   ;;  %p892_p11 = scmp.ge.s32.totalorder %s1316_s22, 1 }
  0x19   : > { %1150 = dma.hbm_to_vmem [thread:$0]  (!%p1148_p10), %s217_s30, 6144, %s219_s12, %s204_s5, %s1318_s25, %s1319_s26, %s1320_s24  }
  0x1a   : > { %p242_p12 = scmp.lt.s32.totalorder %s1316_s22, 13 }
  0x1c   : > { %p243_p13 = pnand %p892_p11, %p242_p12 }
  0x1d   : > { %s248_s28 = sand.u32 (!%p243_p13), 1, %s1292_s16  }
  0x1e   : > { %246 = sbr.rel (%p243_p13) target bundleno = 262 (0x106), region = 36  ;;  %s249_s8 = scalar_lea.sflag (!%p243_p13), [#allocation4], %s248_s28 }
  0x1f   : > { %s1144_s7 = smul.u32 (!%p243_p13), 384, %s248_s28 }
  0x21   : > { %s1425_s10 = scalar_lea.vmem (!%p243_p13), [#allocation3], %s1144_s7 }
  0x23   : > { %1283 = dma.done.wait (%p1404_p7), %s249_s8, 6144  }
  0x24   : > { %1285 = vsyncadd (%p1404_p7), %s249_s8, 4294961152  ;;  %s299_s6 = smul.u32 3, %s1300_s18  ;;  %s894_s24 = sshll.u32 %s1304_s19, 1 }
  0x25   : > { %p312_p0 = scmp.lt.s32.totalorder %s894_s24, 3  ;;  %p898_p2 = scmp.ne.s32.totalorder %s1300_s18, 0 }
  0x26   : > { %p302_p1 = scmp.lt.s32.totalorder %s299_s6, 17 }
  0x27   : > { %s1620_s24 = smov (!%p312_p0, %s894_s24), 3  ;;  %334 = sbr.rel (%p898_p2) target bundleno = 47 (0x2f), region = 44 }
  0x28   : > { %s1622_s6 = smov (!%p302_p1, %s299_s6), 17  ;;  %s314_s12 = scalar_lea.vmem %s1595_s2, %s1620_s24 }
  0x29   : > { %s319_s29 = scalar_lea.vmem %s1596_s3, %s1620_s24  ;;  %s893_s15 = sshll.u32 %s1622_s6, 2 }
  0x2a   : > { %s897_s23 = sshll.u32 %s1620_s24, 2  ;;  %s1447_s30 = scalar_lea.vmem %s1593_s0, %s893_s15 }
  0x2b   : > { %s1452_s28 = scalar_lea.vmem %s1597_s4, %s897_s23 }
  0x2c   : > { %v1321_v0 = vmov 0.0  }
  0x2d   : > { %335 = vst [vmem:[#allocation2] sm:$0xff] %v1321_v0 }
  0x2e   : > { %336 = vst [vmem:[#allocation2 + $0x8] sm:$0xff] %v1321_v0 }
  0x2f PF: > { %v957_v1 = vld [vmem:[%s1425_s10 + $0x70] sm:$0xf]  ;;  %v1110_v2 = vld [vmem:[%s1425_s10 + $0x74] sm:$0xf0]  ;;  %v949_v6 = vld [vmem:[%s1425_s10 + $0x60] sm:$0xf] }
  0x30   : > { %v1021_v3 = vld [vmem:[%s1425_s10 + $0xf0] sm:$0xf]  ;;  %v958_v4 = vor.u32 %v1110_v2, %v957_v1  ;;  %v1126_v5 = vld [vmem:[%s1425_s10 + $0xf4] sm:$0xf0]  ;;  %v1108_v7 = vld [vmem:[%s1425_s10 + $0x64] sm:$0xf0] }
  0x31   : > { %v1022_v8 = vor.u32 %v1126_v5, %v1021_v3  ;;  %v1013_v9 = vld [vmem:[%s1425_s10 + $0xe0] sm:$0xf]  ;;  %v1124_v10 = vld [vmem:[%s1425_s10 + $0xe4] sm:$0xf0]  ;;  %v950_v11 = vor.u32 %v1108_v7, %v949_v6  ;;  %v941_v12 = vld [vmem:[%s1425_s10 + $0x50] sm:$0xf] }
  0x32   : > { %640 = vmatpush.bf16.msra.mxu0 %v958_v4  ;;  %v1014_v13 = vor.u32 %v1124_v10, %v1013_v9  ;;  %v1106_v14 = vld [vmem:[%s1425_s10 + $0x54] sm:$0xf0]  ;;  %v1085_v15 = vld [vmem:[%s1425_s10 + $0x170] sm:$0xf]  ;;  %v1077_v20 = vld [vmem:[%s1425_s10 + $0x160] sm:$0xf] }
  0x33   : > { %653 = vmatpush.bf16.msra.mxu1 %v1022_v8  ;;  %v1142_v16 = vld [vmem:[%s1425_s10 + $0x174] sm:$0xf0]  ;;  %v1005_v17 = vld [vmem:[%s1425_s10 + $0xd0] sm:$0xf]  ;;  %v1140_v21 = vld [vmem:[%s1425_s10 + $0x164] sm:$0xf0]  ;;  %v942_v23 = vor.u32 %v1106_v14, %v941_v12 }
  0x34   : > { %v1122_v18 = vld [vmem:[%s1425_s10 + $0xd4] sm:$0xf0]  ;;  %v1086_v19 = vor.u32 %v1142_v16, %v1085_v15  ;;  %v1109_v22 = vld [vmem:[%s1425_s10 + $0x74] sm:$0xf]  ;;  %v933_v24 = vld [vmem:[%s1425_s10 + $0x40] sm:$0xf]  ;;  %v1078_v26 = vor.u32 %v1140_v21, %v1077_v20 }
  0x35   : > { %v1104_v25 = vld [vmem:[%s1425_s10 + $0x44] sm:$0xf0]  ;;  %v959_v27 = vld [vmem:[%s1425_s10 + $0x78] sm:$0xf0]  ;;  %v1006_v28 = vor.u32 %v1122_v18, %v1005_v17  ;;  %v997_v29 = vld [vmem:[%s1425_s10 + $0xc0] sm:$0xf] }
  0x36   : > { %641 = vmatpush.bf16.msra.mxu0 %v950_v11  ;;  %666 = vmatpush.bf16.msra.mxu2 %v1086_v19  ;;  %v1120_v30 = vld [vmem:[%s1425_s10 + $0xc4] sm:$0xf0]  ;;  %v962_v31 = vor.u32 %v1109_v22, %v959_v27  ;;  %v1069_v32 = vld [vmem:[%s1425_s10 + $0x150] sm:$0xf]  ;;  %v1138_v33 = vld [vmem:[%s1425_s10 + $0x154] sm:$0xf0]  ;;  %v934_v37 = vor.u32 %v1104_v25, %v933_v24 }
  0x37   : > { %654 = vmatpush.bf16.msra.mxu1 %v1014_v13  ;;  %v1107_v34 = vld [vmem:[%s1425_s10 + $0x64] sm:$0xf]  ;;  %v951_v35 = vld [vmem:[%s1425_s10 + $0x68] sm:$0xf0]  ;;  %v925_v38 = vld [vmem:[%s1425_s10 + $0x30] sm:$0xf]  ;;  %v1070_v40 = vor.u32 %v1138_v33, %v1069_v32  ;;  %v998_v42 = vor.u32 %v1120_v30, %v997_v29 }
  0x38   : > { %679 = vmatpush.bf16.msra.mxu3 %v962_v31  ;;  %v954_v36 = vor.u32 %v1107_v34, %v951_v35  ;;  %v1102_v39 = vld [vmem:[%s1425_s10 + $0x34] sm:$0xf0]  ;;  %v1061_v41 = vld [vmem:[%s1425_s10 + $0x140] sm:$0xf]  ;;  %v1136_v43 = vld [vmem:[%s1425_s10 + $0x144] sm:$0xf0] }
  0x39   : > { %v1105_v44 = vld [vmem:[%s1425_s10 + $0x54] sm:$0xf]  ;;  %v943_v45 = vld [vmem:[%s1425_s10 + $0x58] sm:$0xf0]  ;;  %v989_v46 = vld [vmem:[%s1425_s10 + $0xb0] sm:$0xf]  ;;  %v926_v49 = vor.u32 %v1102_v39, %v925_v38  ;;  %v1062_v51 = vor.u32 %v1136_v43, %v1061_v41 }
  0x3a   : > { %642 = vmatpush.bf16.msra.mxu0 %v942_v23  ;;  %667 = vmatpush.bf16.msra.mxu2 %v1078_v26  ;;  %v1118_v47 = vld [vmem:[%s1425_s10 + $0xb4] sm:$0xf0]  ;;  %v946_v48 = vor.u32 %v1105_v44, %v943_v45  ;;  %v917_v50 = vld [vmem:[%s1425_s10 + $0x20] sm:$0xf]  ;;  %v1103_v52 = vld [vmem:[%s1425_s10 + $0x44] sm:$0xf] }
  0x3b   : > { %655 = vmatpush.bf16.msra.mxu1 %v1006_v28  ;;  %v935_v53 = vld [vmem:[%s1425_s10 + $0x48] sm:$0xf0]  ;;  %v990_v54 = vor.u32 %v1118_v47, %v989_v46  ;;  %v1100_v55 = vld [vmem:[%s1425_s10 + $0x24] sm:$0xf0]  ;;  %v1053_v56 = vld [vmem:[%s1425_s10 + $0x130] sm:$0xf] }
  0x3c   : > { %680 = vmatpush.bf16.msra.mxu3 %v954_v36  ;;  %v1134_v57 = vld [vmem:[%s1425_s10 + $0x134] sm:$0xf0]  ;;  %v981_v58 = vld [vmem:[%s1425_s10 + $0xa0] sm:$0xf]  ;;  %v1116_v59 = vld [vmem:[%s1425_s10 + $0xa4] sm:$0xf0]  ;;  %v938_v60 = vor.u32 %v1103_v52, %v935_v53  ;;  %v918_v61 = vor.u32 %v1100_v55, %v917_v50 }
  0x3d   : > { %v909_v62 = vld [vmem:[%s1425_s10 + $0x10] sm:$0xf]  ;;  %v1054_v63 = vor.u32 %v1134_v57, %v1053_v56  ;;  %v1101_v0 = vld [vmem:[%s1425_s10 + $0x34] sm:$0xf]  ;;  %v927_v1 = vld [vmem:[%s1425_s10 + $0x38] sm:$0xf0]  ;;  %v982_v2 = vor.u32 %v1116_v59, %v981_v58 }
  0x3e   : > { %643 = vmatpush.bf16.msra.mxu0 %v934_v37  ;;  %668 = vmatpush.bf16.msra.mxu2 %v1070_v40  ;;  %v1098_v3 = vld [vmem:[%s1425_s10 + $0x14] sm:$0xf0]  ;;  %v1045_v4 = vld [vmem:[%s1425_s10 + $0x120] sm:$0xf]  ;;  %v1132_v5 = vld [vmem:[%s1425_s10 + $0x124] sm:$0xf0]  ;;  %v930_v10 = vor.u32 %v1101_v0, %v927_v1 }
  0x3f   : > { %656 = vmatpush.bf16.msra.mxu1 %v998_v42  ;;  %v973_v6 = vld [vmem:[%s1425_s10 + $0x90] sm:$0xf]  ;;  %v1114_v7 = vld [vmem:[%s1425_s10 + $0x94] sm:$0xf0]  ;;  %v901_v8 = vld [vmem:[%s1425_s10] sm:$0xf]  ;;  %v910_v11 = vor.u32 %v1098_v3, %v909_v62  ;;  %v1046_v12 = vor.u32 %v1132_v5, %v1045_v4 }
  0x40   : > { %681 = vmatpush.bf16.msra.mxu3 %v946_v48  ;;  %v1096_v9 = vld [vmem:[%s1425_s10 + $0x4] sm:$0xf0]  ;;  %v1099_v13 = vld [vmem:[%s1425_s10 + $0x24] sm:$0xf]  ;;  %v919_v14 = vld [vmem:[%s1425_s10 + $0x28] sm:$0xf0]  ;;  %v974_v16 = vor.u32 %v1114_v7, %v973_v6 }
  0x41   : > { %v339_v15 = vld [vmem:[%s1447_s30] sm:$0xff]  ;;  %v965_v17 = vld [vmem:[%s1425_s10 + $0x80] sm:$0xf]  ;;  %v1130_v19 = vld [vmem:[%s1425_s10 + $0x114] sm:$0xf0]  ;;  %v922_v25 = vor.u32 %v1099_v13, %v919_v14  ;;  %v902_v27 = vor.u32 %v1096_v9, %v901_v8  ;;  %p1091_p3 = scmp.ne.s32.totalorder %s1300_s18, 5 }
  0x42   : > { %644 = vmatpush.bf16.msra.mxu0 %v926_v49  ;;  %669 = vmatpush.bf16.msra.mxu2 %v1062_v51  ;;  %v1037_v18 = vld [vmem:[%s1425_s10 + $0x110] sm:$0xf]  ;;  %v1112_v20 = vld [vmem:[%s1425_s10 + $0x84] sm:$0xf0]  ;;  %v1125_v21 = vld [vmem:[%s1425_s10 + $0xf4] sm:$0xf]  ;;  %v391_v26 = vunpack.c.l.b16 %v339_v15  ;;  %v392_v29 = vunpack.c.h.b16 %v339_v15 }
  0x43   : > { %657 = vmatpush.bf16.msra.mxu1 %v990_v54  ;;  %v1023_v22 = vld [vmem:[%s1425_s10 + $0xf8] sm:$0xf0]  ;;  %v1141_v23 = vld [vmem:[%s1425_s10 + $0x174] sm:$0xf]  ;;  %v1038_v28 = vor.u32 %v1130_v19, %v1037_v18  ;;  %v340_v32 = vld [vmem:[%s1447_s30 + $0x8] sm:$0xf]  ;;  %v966_v33 = vor.u32 %v1112_v20, %v965_v17 }
  0x44   : > { %682 = vmatpush.bf16.msra.mxu3 %v938_v60  ;;  %v1087_v24 = vld [vmem:[%s1425_s10 + $0x178] sm:$0xf0]  ;;  %v1097_v30 = vld [vmem:[%s1425_s10 + $0x14] sm:$0xf]  ;;  %v1026_v34 = vor.u32 %v1125_v21, %v1023_v22  ;;  %v1029_v35 = vld [vmem:[%s1425_s10 + $0x100] sm:$0xf]  ;;  %v394_v42 = vpack.c.b16 %v391_v26, %v391_v26  ;;  %v393_v44 = vunpack.c.l.b16 %v340_v32  ;;  %v1527_v45 = vpack.c.b16 %v392_v29, %v392_v29 }
  0x45   : > { %v911_v31 = vld [vmem:[%s1425_s10 + $0x18] sm:$0xf0]  ;;  %v1128_v36 = vld [vmem:[%s1425_s10 + $0x104] sm:$0xf0]  ;;  %v1090_v37 = vor.u32 %v1141_v23, %v1087_v24  ;;  %v1123_v38 = vld [vmem:[%s1425_s10 + $0xe4] sm:$0xf] }
  0x46   : > { %645 = vmatpush.bf16.msra.mxu0 %v918_v61  ;;  %670 = vmatpush.bf16.msra.mxu2 %v1054_v63  ;;  %v1015_v39 = vld [vmem:[%s1425_s10 + $0xe8] sm:$0xf0]  ;;  %v1139_v40 = vld [vmem:[%s1425_s10 + $0x164] sm:$0xf]  ;;  %v914_v43 = vor.u32 %v1097_v30, %v911_v31  ;;  %v1030_v46 = vor.u32 %v1128_v36, %v1029_v35  ;;  %v1121_v51 = vld [vmem:[%s1425_s10 + $0xd4] sm:$0xf]  ;;  %v396_v55 = vpack.c.b16 %v393_v44, %v393_v44 }
  0x47   : > { %658 = vmatpush.bf16.msra.mxu1 %v982_v2  ;;  %v1079_v41 = vld [vmem:[%s1425_s10 + $0x168] sm:$0xf0]  ;;  %v1095_v47 = vld [vmem:[%s1425_s10 + $0x4] sm:$0xf]  ;;  %v1018_v49 = vor.u32 %v1123_v38, %v1015_v39  ;;  %v1007_v52 = vld [vmem:[%s1425_s10 + $0xd8] sm:$0xf0] }
  0x48   : > { %683 = vmatpush.bf16.msra.mxu3 %v930_v10  ;;  %v903_v48 = vld [vmem:[%s1425_s10 + $0x8] sm:$0xf0]  ;;  %v1082_v50 = vor.u32 %v1139_v40, %v1079_v41  ;;  %v1137_v53 = vld [vmem:[%s1425_s10 + $0x154] sm:$0xf]  ;;  %v1071_v54 = vld [vmem:[%s1425_s10 + $0x158] sm:$0xf0]  ;;  %v1010_v57 = vor.u32 %v1121_v51, %v1007_v52 }
  0x49   : > { %v906_v56 = vor.u32 %v1095_v47, %v903_v48  ;;  %v1074_v58 = vor.u32 %v1137_v53, %v1071_v54  ;;  %v1119_v59 = vld [vmem:[%s1425_s10 + $0xc4] sm:$0xf]  ;;  %v999_v60 = vld [vmem:[%s1425_s10 + $0xc8] sm:$0xf0]  ;;  %v1117_v1 = vld [vmem:[%s1425_s10 + $0xb4] sm:$0xf] }
  0x4a   : > { %646 = vmatpush.bf16.msra.mxu0 %v910_v11  ;;  %671 = vmatpush.bf16.msra.mxu2 %v1046_v12  ;;  %v1135_v61 = vld [vmem:[%s1425_s10 + $0x144] sm:$0xf]  ;;  %v1063_v62 = vld [vmem:[%s1425_s10 + $0x148] sm:$0xf0]  ;;  %v1002_v63 = vor.u32 %v1119_v59, %v999_v60  ;;  %v991_v2 = vld [vmem:[%s1425_s10 + $0xb8] sm:$0xf0] }
  0x4b   : > { %659 = vmatpush.bf16.msra.mxu1 %v974_v16  ;;  %v1066_v0 = vor.u32 %v1135_v61, %v1063_v62  ;;  %v1133_v3 = vld [vmem:[%s1425_s10 + $0x134] sm:$0xf]  ;;  %v1055_v4 = vld [vmem:[%s1425_s10 + $0x138] sm:$0xf0]  ;;  %v994_v5 = vor.u32 %v1117_v1, %v991_v2  ;;  %v1115_v7 = vld [vmem:[%s1425_s10 + $0xa4] sm:$0xf] }
  0x4c   : > { %684 = vmatpush.bf16.msra.mxu3 %v922_v25  ;;  %v1058_v6 = vor.u32 %v1133_v3, %v1055_v4  ;;  %v983_v8 = vld [vmem:[%s1425_s10 + $0xa8] sm:$0xf0]  ;;  %v1131_v9 = vld [vmem:[%s1425_s10 + $0x124] sm:$0xf]  ;;  %v1113_v13 = vld [vmem:[%s1425_s10 + $0x94] sm:$0xf] }
  0x4d   : > { %v1047_v10 = vld [vmem:[%s1425_s10 + $0x128] sm:$0xf0]  ;;  %v986_v11 = vor.u32 %v1115_v7, %v983_v8  ;;  %v975_v14 = vld [vmem:[%s1425_s10 + $0x98] sm:$0xf0]  ;;  %v1129_v15 = vld [vmem:[%s1425_s10 + $0x114] sm:$0xf] }
  0x4e   : > { %647 = vmatpush.bf16.msra.mxu0 %v902_v27  ;;  %672 = vmatpush.bf16.msra.mxu2 %v1038_v28  ;;  %v1050_v12 = vor.u32 %v1131_v9, %v1047_v10  ;;  %v1039_v16 = vld [vmem:[%s1425_s10 + $0x118] sm:$0xf0]  ;;  %v978_v17 = vor.u32 %v1113_v13, %v975_v14  ;;  %v1111_v19 = vld [vmem:[%s1425_s10 + $0x84] sm:$0xf]  ;;  %v967_v20 = vld [vmem:[%s1425_s10 + $0x88] sm:$0xf0] }
  0x4f   : > { %660 = vmatpush.bf16.msra.mxu1 %v966_v33  ;;  %v1042_v18 = vor.u32 %v1129_v15, %v1039_v16  ;;  %v1127_v21 = vld [vmem:[%s1425_s10 + $0x104] sm:$0xf]  ;;  %v1031_v22 = vld [vmem:[%s1425_s10 + $0x108] sm:$0xf0]  ;;  %v970_v23 = vor.u32 %v1111_v19, %v967_v20  ;;  %v337_v30 = vld [vmem:[#allocation2] sm:$0xff] }
  0x50   : > { %685 = vmatpush.bf16.msra.mxu3 %v914_v43  ;;  %v1034_v24 = vor.u32 %v1127_v21, %v1031_v22  ;;  %v338_v40 = vld [vmem:[#allocation2 + $0x8] sm:$0xff] }
  0x51   : > { %648 = vmatmul.bf16.vlgmr.msra.gmra.mxu0 %v394_v42 }
  0x52   : > { %692 = vmatpush.bf16.msrb.mxu0 %v1026_v34  ;;  %661 = vmatmul.bf16.vlgmr.msra.gmra.mxu1 %v1527_v45 }
  0x53   : > { %705 = vmatpush.bf16.msrb.mxu1 %v1090_v37  ;;  %673 = vmatpush.bf16.msra.mxu2 %v1030_v46 }
  0x54   : > { %686 = vmatpush.bf16.msra.mxu3 %v906_v56 }
  0x56   : > { %693 = vmatpush.bf16.msrb.mxu0 %v1018_v49  ;;  %674 = vmatmul.bf16.vlgmr.msra.gmra.mxu2 %v396_v55 }
  0x57   : > { %706 = vmatpush.bf16.msrb.mxu1 %v1082_v50  ;;  %687 = vmatmul.bf16.vlgmr.msra.gmra.mxu3 %v394_v42 }
  0x5a   : > { %694 = vmatpush.bf16.msrb.mxu0 %v1010_v57 }
  0x5b   : > { %707 = vmatpush.bf16.msrb.mxu1 %v1074_v58 }
  0x5e   : > { %695 = vmatpush.bf16.msrb.mxu0 %v1002_v63 }
  0x5f   : > { %708 = vmatpush.bf16.msrb.mxu1 %v1066_v0 }
  0x62   : > { %696 = vmatpush.bf16.msrb.mxu0 %v994_v5 }
  0x63   : > { %709 = vmatpush.bf16.msrb.mxu1 %v1058_v6 }
  0x66   : > { %697 = vmatpush.bf16.msrb.mxu0 %v986_v11 }
  0x67   : > { %710 = vmatpush.bf16.msrb.mxu1 %v1050_v12 }
  0x6a   : > { %698 = vmatpush.bf16.msrb.mxu0 %v978_v17 }
  0x6b   : > { %711 = vmatpush.bf16.msrb.mxu1 %v1042_v18 }
  0x6e   : > { %699 = vmatpush.bf16.msrb.mxu0 %v970_v23 }
  0x6f   : > { %712 = vmatpush.bf16.msrb.mxu1 %v1034_v24 }
  0x71   : > { %700 = vmatmul.bf16.vlgmr.msrb.gmra.mxu0 %v1527_v45 }
  0x72   : > { %713 = vmatmul.bf16.vlgmr.msrb.gmra.mxu1 %v396_v55 }
  0xce   : > { %v649_v25 = vpop.f32.mrf.mxu0 }
  0xcf   : > { %v662_v26 = vpop.f32.mrf.mxu1 }
  0xd0   : > { %v663_v27 = vadd.f32 %v662_v26, %v649_v25 }
  0xd6   : > { %v651_v28 = vpop.f32.mrf.mxu0 }
  0xd7   : > { %v664_v29 = vpop.f32.mrf.mxu1 }
  0xd9   : > { %v675_v31 = vpop.f32.mrf.mxu2 }
  0xda   : > { %v676_v32 = vadd.f32 %v675_v31, %v663_v27  ;;  %v688_v34 = vpop.f32.mrf.mxu3 }
  0xdc   : > { %v718_v33 = vadd.f32 %v676_v32, %v337_v30 }
  0xde   : > { %720 = vst [vmem:[#allocation2] sm:$0xff] %v718_v33 }
  0xe1   : > { %v677_v35 = vpop.f32.mrf.mxu2 }
  0xe2   : > { %v690_v36 = vpop.f32.mrf.mxu3 }
  0xee   : > { %v701_v37 = vpop.f32.mrf.mxu0 }
  0xef   : > { %v702_v38 = vadd.f32 %v701_v37, %v688_v34  ;;  %v714_v39 = vpop.f32.mrf.mxu1 }
  0xf1   : > { %v715_v41 = vadd.f32 %v714_v39, %v702_v38 }
  0xf3   : > { %v719_v42 = vadd.f32 %v715_v41, %v338_v40  ;;  %725 = sbr.rel (%p1091_p3) target bundleno = 262 (0x106), region = 48 }
  0xf5   : > { %721 = vst [vmem:[#allocation2 + $0x8] sm:$0xff] %v719_v42 }
  0xf6   : > { %v703_v43 = vpop.f32.mrf.mxu0 }
  0xf7   : > { %v716_v44 = vpop.f32.mrf.mxu1 }
  0xf8   : > { %v726_v45 = vld [vmem:[#allocation2] sm:$0xff] }
  0xf9   : > { %v728_v47 = vld [vmem:[%s314_s12] sm:$0x3] }
  0xfa   : > { %v730_v48 = vperm.slane %v728_v47, 0  ;;  %v731_v49 = vperm.slane %v728_v47, 1  ;;  %v736_v50 = vld [vmem:[%s319_s29] sm:$0x3] }
  0xfb   : > { %v738_v51 = vperm.slane %v736_v50, 0  ;;  %v739_v52 = vperm.slane %v736_v50, 1 }
  0xfc   : > { %v727_v46 = vld [vmem:[#allocation2 + $0x8] sm:$0xff]  ;;  %v734_v53 = vmul.f32 %v730_v48, %v726_v45 }
  0xfd   : > { %v735_v54 = vmul.f32 %v731_v49, %v727_v46 }
  0xfe   : > { %v742_v55 = vadd.f32 %v738_v51, %v734_v53 }
  0xff   : > { %v743_v56 = vadd.f32 %v739_v52, %v735_v54 }
 0x100   : > { %v744_v57 = vmax.f32 %v742_v55, 0.0 }
 0x101   : > { %v745_v58 = vmax.f32 %v743_v56, 0.0 }
 0x103   : > { %v746_v59 = vpack.c.bf16 %v745_v58, %v744_v57 }
 0x105   : > { %747 = vst [vmem:[%s1452_s28] sm:$0xff] %v746_v59 }
 0x106 PF: > { %s17_s22 = sadd.s32 1, %s1316_s22   ;;  %s1604_s24 = sld [smem:[#allocation6_spill]] }
 0x107   : > { %p14_p4 = scmp.ge.s32.totalorder %s17_s22, 14   ;;  %s1605_s25 = sld [smem:[#allocation7_spill]] }
 0x108   : > { %s1606_s15 = smov %s1292_s16  ;;  %s1607_s16 = smov %s1296_s17 }
 0x109   : > { %s1608_s17 = smov %s1414_s9  ;;  %s1609_s18 = smov %s1308_s20 }
 0x10a   : > { %s1610_s19 = smov %s1312_s21  ;;  %16 = sbr.rel (!%p14_p4) target bundleno = 5 (0x5), region = 93 }
 0x10c   : > { %s1611_s20 = smov %s1604_s24 }
 0x10d   : > { %s1612_s21 = smov %s1605_s25 }
 0x10f   :  { %778 = vsyncpa [#allocation4], 1 }
 0x110   :  { %780 = vsyncpa [#allocation4 + $0x1], 1 }

// kernel: resnet18_forward.40
= control target key start
LH: loop header
LB: loop body
LE: loop exit
PB: predicated region body
PF: predicated region fallthrough
CT: control target
= control target key end

     0   :  { %s2494_s0 = inlined_call_operand.vmem [shape: bf16[8,4608], index: 0, kind: input, shape index: {}]   ;;  %s2495_s1 = inlined_call_operand.vmem [shape: bf16[4608,512], index: 1, kind: input, shape index: {}]   ;;  %s2496_s2 = inlined_call_operand.hbm [shape: f32[1,512], index: 2, kind: input, shape index: {}]   ;;  %s2497_s3 = inlined_call_operand.hbm [shape: f32[1,512], index: 3, kind: input, shape index: {}]   ;;  %s2498_s4 = inlined_call_operand.vmem [shape: bf16[8,512], index: 4, kind: input, shape index: {}]   ;;  %s2499_s5 = inlined_call_operand.vmem [shape: bf16[8,512], index: 5, kind: output, shape index: {}]  }
   0x1   :  { %2504 = sst [smem:[#allocation15_spill]] %s2495_s1 }
   0x2   :  { %10 = vsyncpa [#allocation5], 0 }
   0x3   :  { %12 = vsyncpa [#allocation5 + $0x1], 0 }
   0x4   :  { %13 = vsyncpa [#allocation7], 0 }
   0x5   :  { %15 = vsyncpa [#allocation7 + $0x1], 0  ;;  %s2035_s18 = smov 0   ;;  %s2037_s19 = smov 0  }
   0x6   :  { %s2039_s20 = smov 0   ;;  %s2041_s21 = smov 0  }
   0x7   :  { %s2043_s22 = smov 0   ;;  %s2045_s23 = smov 0  }
   0x8   :  { %s2047_s24 = smov 0   ;;  %s2049_s25 = smov 0  }
   0x9   :  { %s2051_s26 = smov 0   ;;  %s2053_s27 = smov 0  }
   0xa LB: > { %2505 = sst [smem:[#allocation10_spill]] %s1994_s25  ;;  %s1427_s28 = sadd.s32 4294967295, %s2002_s27   ;;  %s2002_s27 = sphi %s2053_s27, %s21_s27   ;;  %s1998_s26 = sphi %s2051_s26, %s2518_s26   ;;  %s1994_s25 = sphi %s2049_s25, %s2517_s25   ;;  %s1990_s24 = sphi %s2047_s24, %s2516_s24   ;;  %s1986_s23 = sphi %s2045_s23, %s2524_s23   ;;  %s1982_s22 = sphi %s2043_s22, %s2523_s22   ;;  %s1978_s21 = sphi %s2041_s21, %s2522_s21   ;;  %s1974_s20 = sphi %s2039_s20, %s2521_s20   ;;  %s1970_s19 = sphi %s2037_s19, %s2520_s19   ;;  %s1966_s18 = sphi %s2035_s18, %s2519_s18  }
   0xb   : > { %2506 = sst [smem:[#allocation11_spill]] %s1998_s26  ;;  %s33_s29 = sadd.s32 1, %s1994_s25 }
   0xc   : > { %p34_p0 = scmp.ge.s32.totalorder %s33_s29, 9  ;;  %s36_s30 = sadd.s32 1, %s1998_s26 }
   0xd   : > { %s77_s6 = sadd.s32 1, %s1982_s22  ;;  %p84_p1 = scmp.ne.s32.totalorder %s1982_s22, %s1978_s21 }
   0xe   : > { %s2526_s29 = smov (%p34_p0, %s33_s29), 0  ;;  %s2528_s30 = smov (!%p34_p0, %s36_s30), %s1998_s26 }
   0xf   : > { %2507 = sst [smem:[#allocation12_spill]] %s2526_s29  ;;  %s72_s7 = ssub.s32 %s1994_s25, %s2526_s29 }
  0x10   : > { %p85_p2 = scmp.eq.s32.totalorder %s2002_s27, 0  ;;  %p38_p3 = scmp.ge.s32.totalorder %s2528_s30, 2 }
  0x11   : > { %s103_s8 = sadd.s32 1, %s1974_s20  ;;  %p110_p5 = scmp.ne.s32.totalorder %s1974_s20, %s1970_s19 }
  0x12   : > { %p2098_p4 = por %p85_p2, %p84_p1  ;;  %s2530_s30 = smov (%p38_p3, %s2528_s30), 0 }
  0x13   : > { %2509 = sst [smem:[#allocation13_spill]] %s2530_s30  ;;  %p2106_p6 = por %p110_p5, %p85_p2 }
  0x14   : > { %p116_p7 = scmp.ne.s32.totalorder %s1970_s19, %s1966_s18  ;;  %s73_s11 = ssub.s32 %s1998_s26, %s2530_s30 }
  0x15   : > { %p117_p8 = scmp.eq.s32.totalorder %s1427_s28, 0  ;;  %s74_s12 = sor.u32 %s73_s11, %s72_s7 }
  0x16   : > { %p101_p9 = scmp.eq.s32.totalorder %s73_s11, 0  ;;  %p75_p10 = scmp.eq.s32.totalorder %s74_s12, 0 }
  0x17   : > { %p2114_p11 = por %p117_p8, %p116_p7  ;;  %p1430_p12 = scmp.ge.s32.totalorder %s2002_s27, 18 }
  0x18   : > { %s2119_s14 = scalar_select %p101_p9, %s1974_s20, %s103_s8  }
  0x19   : > { %s2122_s15 = scalar_select %p75_p10, %s1982_s22, %s77_s6  }
  0x1a   : > { %218 = sbr.rel (%p1430_p12) target bundleno = 114 (0x72), region = 16 }
  0x1b   : > { %2512 = sst [smem:[#allocation14_spill]] %s2122_s15 }
  0x1f   : > { %234 = sbr.rel (!%p2098_p4) target bundleno = 105 (0x69), region = 24  ;;  %s236_s16 = sand.u32 (%p2098_p4), 1, %s1982_s22  }
  0x20   : > { %s1433_s17 = sshll.u32 (%p2098_p4), %s1998_s26, 1  ;;  %s1431_s18 = sshll.u32 (%p2098_p4), %s236_s16, 9 }
  0x21   : > { %s1710_s28 = sshll.u32 (%p2098_p4), %s1994_s25, 8  ;;  %s2513_s1 = sld [smem:[#allocation15_spill]] (%p2098_p4) }
  0x22   : > { %s242_s7 = sadd.s32 (%p2098_p4), %s1710_s28, %s1433_s17  ;;  %s2138_s9 = scalar_lea.vmem (%p2098_p4), [#allocation3], %s1431_s18 }
  0x23   : > { %s1435_s11 = sshll.u32 (%p2098_p4), %s242_s7, 2 }
  0x27   : > { %s2133_s6 = scalar_lea.vmem %s2513_s1, %s1435_s11 }
  0x28   : > { %v399_v0 = vld [vmem:[%s2133_s6] sm:$0xff]  ;;  %v401_v1 = vld [vmem:[%s2133_s6 + $0x10] sm:$0xff] }
  0x29   : > { %v403_v2 = vld [vmem:[%s2133_s6 + $0x20] sm:$0xff]  ;;  %400 = vst [vmem:[%s2138_s9] sm:$0xff] %v399_v0  ;;  %v405_v3 = vld [vmem:[%s2133_s6 + $0x30] sm:$0xff] }
  0x2a   : > { %402 = vst [vmem:[%s2138_s9 + $0x8] sm:$0xff] %v401_v1  ;;  %v407_v4 = vld [vmem:[%s2133_s6 + $0x40] sm:$0xff]  ;;  %v409_v5 = vld [vmem:[%s2133_s6 + $0x50] sm:$0xff] }
  0x2b   : > { %404 = vst [vmem:[%s2138_s9 + $0x10] sm:$0xff] %v403_v2  ;;  %v411_v6 = vld [vmem:[%s2133_s6 + $0x60] sm:$0xff]  ;;  %v413_v7 = vld [vmem:[%s2133_s6 + $0x70] sm:$0xff] }
  0x2c   : > { %406 = vst [vmem:[%s2138_s9 + $0x18] sm:$0xff] %v405_v3  ;;  %v415_v8 = vld [vmem:[%s2133_s6 + $0x80] sm:$0xff]  ;;  %v417_v9 = vld [vmem:[%s2133_s6 + $0x90] sm:$0xff] }
  0x2d   : > { %408 = vst [vmem:[%s2138_s9 + $0x20] sm:$0xff] %v407_v4  ;;  %v419_v10 = vld [vmem:[%s2133_s6 + $0xa0] sm:$0xff]  ;;  %v421_v11 = vld [vmem:[%s2133_s6 + $0xb0] sm:$0xff] }
  0x2e   : > { %410 = vst [vmem:[%s2138_s9 + $0x28] sm:$0xff] %v409_v5  ;;  %v423_v12 = vld [vmem:[%s2133_s6 + $0xc0] sm:$0xff]  ;;  %v425_v13 = vld [vmem:[%s2133_s6 + $0xd0] sm:$0xff] }
  0x2f   : > { %412 = vst [vmem:[%s2138_s9 + $0x30] sm:$0xff] %v411_v6  ;;  %v427_v14 = vld [vmem:[%s2133_s6 + $0xe0] sm:$0xff]  ;;  %v429_v15 = vld [vmem:[%s2133_s6 + $0xf0] sm:$0xff] }
  0x30   : > { %414 = vst [vmem:[%s2138_s9 + $0x38] sm:$0xff] %v413_v7  ;;  %v431_v16 = vld [vmem:[%s2133_s6 + $0x100] sm:$0xff]  ;;  %v433_v17 = vld [vmem:[%s2133_s6 + $0x110] sm:$0xff] }
  0x31   : > { %416 = vst [vmem:[%s2138_s9 + $0x40] sm:$0xff] %v415_v8  ;;  %v435_v18 = vld [vmem:[%s2133_s6 + $0x120] sm:$0xff]  ;;  %v437_v19 = vld [vmem:[%s2133_s6 + $0x130] sm:$0xff] }
  0x32   : > { %418 = vst [vmem:[%s2138_s9 + $0x48] sm:$0xff] %v417_v9  ;;  %v439_v20 = vld [vmem:[%s2133_s6 + $0x140] sm:$0xff]  ;;  %v441_v21 = vld [vmem:[%s2133_s6 + $0x150] sm:$0xff] }
  0x33   : > { %420 = vst [vmem:[%s2138_s9 + $0x50] sm:$0xff] %v419_v10  ;;  %v443_v22 = vld [vmem:[%s2133_s6 + $0x160] sm:$0xff]  ;;  %v445_v23 = vld [vmem:[%s2133_s6 + $0x170] sm:$0xff] }
  0x34   : > { %422 = vst [vmem:[%s2138_s9 + $0x58] sm:$0xff] %v421_v11  ;;  %v447_v24 = vld [vmem:[%s2133_s6 + $0x180] sm:$0xff]  ;;  %v449_v25 = vld [vmem:[%s2133_s6 + $0x190] sm:$0xff] }
  0x35   : > { %424 = vst [vmem:[%s2138_s9 + $0x60] sm:$0xff] %v423_v12  ;;  %v451_v26 = vld [vmem:[%s2133_s6 + $0x1a0] sm:$0xff]  ;;  %v453_v27 = vld [vmem:[%s2133_s6 + $0x1b0] sm:$0xff] }
  0x36   : > { %426 = vst [vmem:[%s2138_s9 + $0x68] sm:$0xff] %v425_v13  ;;  %v455_v28 = vld [vmem:[%s2133_s6 + $0x1c0] sm:$0xff]  ;;  %v457_v29 = vld [vmem:[%s2133_s6 + $0x1d0] sm:$0xff] }
  0x37   : > { %428 = vst [vmem:[%s2138_s9 + $0x70] sm:$0xff] %v427_v14  ;;  %v459_v30 = vld [vmem:[%s2133_s6 + $0x1e0] sm:$0xff]  ;;  %v461_v31 = vld [vmem:[%s2133_s6 + $0x1f0] sm:$0xff] }
  0x38   : > { %430 = vst [vmem:[%s2138_s9 + $0x78] sm:$0xff] %v429_v15  ;;  %v463_v32 = vld [vmem:[%s2133_s6 + $0x200] sm:$0xff]  ;;  %v465_v33 = vld [vmem:[%s2133_s6 + $0x210] sm:$0xff] }
  0x39   : > { %432 = vst [vmem:[%s2138_s9 + $0x80] sm:$0xff] %v431_v16  ;;  %v467_v34 = vld [vmem:[%s2133_s6 + $0x220] sm:$0xff]  ;;  %v469_v35 = vld [vmem:[%s2133_s6 + $0x230] sm:$0xff] }
  0x3a   : > { %434 = vst [vmem:[%s2138_s9 + $0x88] sm:$0xff] %v433_v17  ;;  %v471_v36 = vld [vmem:[%s2133_s6 + $0x240] sm:$0xff]  ;;  %v473_v37 = vld [vmem:[%s2133_s6 + $0x250] sm:$0xff] }
  0x3b   : > { %436 = vst [vmem:[%s2138_s9 + $0x90] sm:$0xff] %v435_v18  ;;  %v475_v38 = vld [vmem:[%s2133_s6 + $0x260] sm:$0xff]  ;;  %v477_v39 = vld [vmem:[%s2133_s6 + $0x270] sm:$0xff] }
  0x3c   : > { %438 = vst [vmem:[%s2138_s9 + $0x98] sm:$0xff] %v437_v19  ;;  %v479_v40 = vld [vmem:[%s2133_s6 + $0x280] sm:$0xff]  ;;  %v481_v41 = vld [vmem:[%s2133_s6 + $0x290] sm:$0xff] }
  0x3d   : > { %440 = vst [vmem:[%s2138_s9 + $0xa0] sm:$0xff] %v439_v20  ;;  %v483_v42 = vld [vmem:[%s2133_s6 + $0x2a0] sm:$0xff]  ;;  %v485_v43 = vld [vmem:[%s2133_s6 + $0x2b0] sm:$0xff] }
  0x3e   : > { %442 = vst [vmem:[%s2138_s9 + $0xa8] sm:$0xff] %v441_v21  ;;  %v487_v44 = vld [vmem:[%s2133_s6 + $0x2c0] sm:$0xff]  ;;  %v489_v45 = vld [vmem:[%s2133_s6 + $0x2d0] sm:$0xff] }
  0x3f   : > { %444 = vst [vmem:[%s2138_s9 + $0xb0] sm:$0xff] %v443_v22  ;;  %v491_v46 = vld [vmem:[%s2133_s6 + $0x2e0] sm:$0xff]  ;;  %v493_v47 = vld [vmem:[%s2133_s6 + $0x2f0] sm:$0xff] }
  0x40   : > { %446 = vst [vmem:[%s2138_s9 + $0xb8] sm:$0xff] %v445_v23  ;;  %v495_v48 = vld [vmem:[%s2133_s6 + $0x300] sm:$0xff]  ;;  %v497_v49 = vld [vmem:[%s2133_s6 + $0x310] sm:$0xff] }
  0x41   : > { %448 = vst [vmem:[%s2138_s9 + $0xc0] sm:$0xff] %v447_v24  ;;  %v499_v50 = vld [vmem:[%s2133_s6 + $0x320] sm:$0xff]  ;;  %v501_v51 = vld [vmem:[%s2133_s6 + $0x330] sm:$0xff] }
  0x42   : > { %450 = vst [vmem:[%s2138_s9 + $0xc8] sm:$0xff] %v449_v25  ;;  %v503_v52 = vld [vmem:[%s2133_s6 + $0x340] sm:$0xff]  ;;  %v505_v53 = vld [vmem:[%s2133_s6 + $0x350] sm:$0xff] }
  0x43   : > { %452 = vst [vmem:[%s2138_s9 + $0xd0] sm:$0xff] %v451_v26  ;;  %v507_v54 = vld [vmem:[%s2133_s6 + $0x360] sm:$0xff]  ;;  %v509_v55 = vld [vmem:[%s2133_s6 + $0x370] sm:$0xff] }
  0x44   : > { %454 = vst [vmem:[%s2138_s9 + $0xd8] sm:$0xff] %v453_v27  ;;  %v511_v56 = vld [vmem:[%s2133_s6 + $0x380] sm:$0xff]  ;;  %v513_v57 = vld [vmem:[%s2133_s6 + $0x390] sm:$0xff] }
  0x45   : > { %456 = vst [vmem:[%s2138_s9 + $0xe0] sm:$0xff] %v455_v28  ;;  %v515_v58 = vld [vmem:[%s2133_s6 + $0x3a0] sm:$0xff]  ;;  %v517_v59 = vld [vmem:[%s2133_s6 + $0x3b0] sm:$0xff] }
  0x46   : > { %458 = vst [vmem:[%s2138_s9 + $0xe8] sm:$0xff] %v457_v29  ;;  %v519_v60 = vld [vmem:[%s2133_s6 + $0x3c0] sm:$0xff]  ;;  %v521_v61 = vld [vmem:[%s2133_s6 + $0x3d0] sm:$0xff] }
  0x47   : > { %460 = vst [vmem:[%s2138_s9 + $0xf0] sm:$0xff] %v459_v30  ;;  %v523_v62 = vld [vmem:[%s2133_s6 + $0x3e0] sm:$0xff]  ;;  %v525_v63 = vld [vmem:[%s2133_s6 + $0x3f0] sm:$0xff] }
  0x48   : > { %462 = vst [vmem:[%s2138_s9 + $0xf8] sm:$0xff] %v461_v31 }
  0x49   : > { %464 = vst [vmem:[%s2138_s9 + $0x100] sm:$0xff] %v463_v32 }
  0x4a   : > { %466 = vst [vmem:[%s2138_s9 + $0x108] sm:$0xff] %v465_v33 }
  0x4b   : > { %468 = vst [vmem:[%s2138_s9 + $0x110] sm:$0xff] %v467_v34 }
  0x4c   : > { %470 = vst [vmem:[%s2138_s9 + $0x118] sm:$0xff] %v469_v35 }
  0x4d   : > { %472 = vst [vmem:[%s2138_s9 + $0x120] sm:$0xff] %v471_v36 }
  0x4e   : > { %474 = vst [vmem:[%s2138_s9 + $0x128] sm:$0xff] %v473_v37 }
  0x4f   : > { %476 = vst [vmem:[%s2138_s9 + $0x130] sm:$0xff] %v475_v38 }
  0x50   : > { %478 = vst [vmem:[%s2138_s9 + $0x138] sm:$0xff] %v477_v39 }
  0x51   : > { %480 = vst [vmem:[%s2138_s9 + $0x140] sm:$0xff] %v479_v40 }
  0x52   : > { %482 = vst [vmem:[%s2138_s9 + $0x148] sm:$0xff] %v481_v41 }
  0x53   : > { %484 = vst [vmem:[%s2138_s9 + $0x150] sm:$0xff] %v483_v42 }
  0x54   : > { %486 = vst [vmem:[%s2138_s9 + $0x158] sm:$0xff] %v485_v43 }
  0x55   : > { %488 = vst [vmem:[%s2138_s9 + $0x160] sm:$0xff] %v487_v44 }
  0x56   : > { %490 = vst [vmem:[%s2138_s9 + $0x168] sm:$0xff] %v489_v45 }
  0x57   : > { %492 = vst [vmem:[%s2138_s9 + $0x170] sm:$0xff] %v491_v46 }
  0x58   : > { %494 = vst [vmem:[%s2138_s9 + $0x178] sm:$0xff] %v493_v47 }
  0x59   : > { %496 = vst [vmem:[%s2138_s9 + $0x180] sm:$0xff] %v495_v48 }
  0x5a   : > { %498 = vst [vmem:[%s2138_s9 + $0x188] sm:$0xff] %v497_v49 }
  0x5b   : > { %500 = vst [vmem:[%s2138_s9 + $0x190] sm:$0xff] %v499_v50 }
  0x5c   : > { %502 = vst [vmem:[%s2138_s9 + $0x198] sm:$0xff] %v501_v51 }
  0x5d   : > { %504 = vst [vmem:[%s2138_s9 + $0x1a0] sm:$0xff] %v503_v52 }
  0x5e   : > { %506 = vst [vmem:[%s2138_s9 + $0x1a8] sm:$0xff] %v505_v53 }
  0x5f   : > { %508 = vst [vmem:[%s2138_s9 + $0x1b0] sm:$0xff] %v507_v54 }
  0x60   : > { %510 = vst [vmem:[%s2138_s9 + $0x1b8] sm:$0xff] %v509_v55 }
  0x61   : > { %512 = vst [vmem:[%s2138_s9 + $0x1c0] sm:$0xff] %v511_v56 }
  0x62   : > { %514 = vst [vmem:[%s2138_s9 + $0x1c8] sm:$0xff] %v513_v57 }
  0x63   : > { %516 = vst [vmem:[%s2138_s9 + $0x1d0] sm:$0xff] %v515_v58 }
  0x64   : > { %518 = vst [vmem:[%s2138_s9 + $0x1d8] sm:$0xff] %v517_v59 }
  0x65   : > { %520 = vst [vmem:[%s2138_s9 + $0x1e0] sm:$0xff] %v519_v60 }
  0x66   : > { %522 = vst [vmem:[%s2138_s9 + $0x1e8] sm:$0xff] %v521_v61 }
  0x67   : > { %524 = vst [vmem:[%s2138_s9 + $0x1f0] sm:$0xff] %v523_v62 }
  0x68   : > { %526 = vst [vmem:[%s2138_s9 + $0x1f8] sm:$0xff] %v525_v63 }
  0x69 PF: > { %s533_s16 = sand.u32 1, %s1974_s20   ;;  %s1437_s17 = sshll.u32 %s1998_s26, 1 }
  0x6a   : > { %s1436_s18 = sshll.u32 %s533_s16, 1  ;;  %s541_s11 = scalar_lea.hbm %s2496_s2, %s1437_s17 }
  0x6b   : > { %s543_s12 = sshll.u32 %s541_s11, 4  ;;  %s537_s8 = scalar_lea.vmem [#allocation4], %s1436_s18  ;;  %s544_s12 = int_to_ptr.hbm [resolvable:$true] %s543_s12 }
  0x6c   : > { %s545_s1 = sshll.u32 %s537_s8, 4  ;;  %s534_s6 = scalar_lea.sflag [#allocation5], %s533_s16  ;;  %s546_s1 = int_to_ptr.vmem [resolvable:$true] %s545_s1 }
  0x6d   : > { %1775 = dma.hbm_to_vmem [thread:$0]  (%p2106_p6), %s544_s12, 32, %s546_s1, %s534_s6  }
  0x6e   : > { %s560_s29 = scalar_lea.hbm %s2497_s3, %s1437_s17  ;;  %s556_s25 = scalar_lea.vmem [#allocation6], %s1436_s18 }
  0x6f   : > { %s564_s26 = sshll.u32 %s556_s25, 4  ;;  %s562_s15 = sshll.u32 %s560_s29, 4  ;;  %s565_s26 = int_to_ptr.vmem [resolvable:$true] %s564_s26  ;;  %s563_s15 = int_to_ptr.hbm [resolvable:$true] %s562_s15 }
  0x70   : > { %s553_s28 = scalar_lea.sflag [#allocation7], %s533_s16 }
  0x71   : > { %1776 = dma.hbm_to_vmem [thread:$0]  (%p2106_p6), %s563_s15, 32, %s565_s26, %s553_s28  }
  0x72 PF: > { %p1440_p13 = scmp.ge.s32.totalorder %s2002_s27, 1  ;;  %p582_p0 = scmp.lt.s32.totalorder %s2002_s27, 19 }
  0x74   : > { %p583_p1 = pnand %p1440_p13, %p582_p0 }
  0x75   : > { %s589_s1 = sand.u32 (!%p583_p1), 1, %s1978_s21   ;;  %s595_s30 = sand.u32 (!%p583_p1), 1, %s1970_s19  }
  0x76   : > { %586 = sbr.rel (%p583_p1) target bundleno = 365 (0x16d), region = 74  ;;  %s1441_s17 = sshll.u32 (!%p583_p1), %s589_s1, 9 }
  0x77   : > { %s1442_s25 = sshll.u32 (!%p583_p1), %s595_s30, 1  ;;  %s2281_s29 = scalar_lea.vmem (!%p583_p1), [#allocation3], %s1441_s17 }
  0x78   : > { %s596_s18 = scalar_lea.sflag (!%p583_p1), [#allocation5], %s595_s30  ;;  %s2283_s16 = scalar_lea.vmem (!%p583_p1), [#allocation4], %s1442_s25 }
  0x7b   : > { %1957 = dma.done.wait (%p2114_p11), %s596_s18, 32  }
  0x7c   : > { %1959 = vsyncadd (%p2114_p11), %s596_s18, 4294967264  ;;  %s606_s26 = scalar_lea.sflag [#allocation7], %s595_s30  ;;  %s2289_s10 = scalar_lea.vmem [#allocation6], %s1442_s25 }
  0x7d   : > { %1961 = dma.done.wait (%p2114_p11), %s606_s26, 32  }
  0x7e   : > { %1963 = vsyncadd (%p2114_p11), %s606_s26, 4294967264  ;;  %s1444_s21 = sshll.u32 %s1986_s23, 2  ;;  %s1446_s15 = sshll.u32 %s1990_s24, 1 }
  0x7f   : > { %p671_p2 = scmp.lt.s32.totalorder %s1444_s21, 35  ;;  %p685_p3 = scmp.lt.s32.totalorder %s1446_s15, 3 }
  0x80   : > { %p1450_p4 = scmp.ne.s32.totalorder %s1986_s23, 0 }
  0x81   : > { %s2532_s21 = smov (!%p671_p2, %s1444_s21), 35  ;;  %s2534_s15 = smov (!%p685_p3, %s1446_s15), 3 }
  0x82   : > { %s1445_s7 = sshll.u32 %s2532_s21, 2  ;;  %s1447_s6 = sshll.u32 %s2534_s15, 2 }
  0x83   : > { %s2300_s8 = scalar_lea.vmem %s2494_s0, %s1445_s7  ;;  %s2305_s13 = scalar_lea.vmem %s2498_s4, %s1447_s6 }
  0x84   : > { %s2310_s24 = scalar_lea.vmem %s2499_s5, %s1447_s6  ;;  %705 = sbr.rel (%p1450_p4) target bundleno = 140 (0x8c), region = 90 }
  0x89   : > { %v2004_v0 = vmov 0.0  }
  0x8a   : > { %706 = vst [vmem:[#allocation2] sm:$0xff] %v2004_v0 }
  0x8b   : > { %707 = vst [vmem:[#allocation2 + $0x8] sm:$0xff] %v2004_v0 }
  0x8c PF: > { %v1509_v1 = vld [vmem:[%s2281_s29 + $0x70] sm:$0xf]  ;;  %v1726_v2 = vld [vmem:[%s2281_s29 + $0x74] sm:$0xf0]  ;;  %v1501_v12 = vld [vmem:[%s2281_s29 + $0x60] sm:$0xf] }
  0x8d   : > { %v1573_v3 = vld [vmem:[%s2281_s29 + $0xf0] sm:$0xf]  ;;  %v1510_v4 = vor.u32 %v1726_v2, %v1509_v1  ;;  %v1742_v5 = vld [vmem:[%s2281_s29 + $0xf4] sm:$0xf0]  ;;  %v1724_v14 = vld [vmem:[%s2281_s29 + $0x64] sm:$0xf0] }
  0x8e   : > { %v1637_v6 = vld [vmem:[%s2281_s29 + $0x170] sm:$0xf]  ;;  %v1758_v7 = vld [vmem:[%s2281_s29 + $0x174] sm:$0xf0]  ;;  %v1574_v8 = vor.u32 %v1742_v5, %v1573_v3  ;;  %v1565_v15 = vld [vmem:[%s2281_s29 + $0xe0] sm:$0xf]  ;;  %v1502_v17 = vor.u32 %v1724_v14, %v1501_v12 }
  0x8f   : > { %v1638_v9 = vor.u32 %v1758_v7, %v1637_v6  ;;  %v1701_v10 = vld [vmem:[%s2281_s29 + $0x1f0] sm:$0xf]  ;;  %v1774_v11 = vld [vmem:[%s2281_s29 + $0x1f4] sm:$0xf0]  ;;  %1110 = vmatpush.bf16.msra.mxu0 %v1510_v4  ;;  %v1740_v16 = vld [vmem:[%s2281_s29 + $0xe4] sm:$0xf0] }
  0x90   : > { %v1702_v13 = vor.u32 %v1774_v11, %v1701_v10  ;;  %1123 = vmatpush.bf16.msra.mxu1 %v1574_v8  ;;  %v1566_v18 = vor.u32 %v1740_v16, %v1565_v15  ;;  %v1629_v19 = vld [vmem:[%s2281_s29 + $0x160] sm:$0xf]  ;;  %v1756_v20 = vld [vmem:[%s2281_s29 + $0x164] sm:$0xf0]  ;;  %v1493_v24 = vld [vmem:[%s2281_s29 + $0x50] sm:$0xf] }
  0x91   : > { %1136 = vmatpush.bf16.msra.mxu2 %v1638_v9  ;;  %v1693_v21 = vld [vmem:[%s2281_s29 + $0x1e0] sm:$0xf]  ;;  %v1630_v22 = vor.u32 %v1756_v20, %v1629_v19  ;;  %v1772_v23 = vld [vmem:[%s2281_s29 + $0x1e4] sm:$0xf0]  ;;  %v1722_v25 = vld [vmem:[%s2281_s29 + $0x54] sm:$0xf0] }
  0x92   : > { %1149 = vmatpush.bf16.msra.mxu3 %v1702_v13  ;;  %v1694_v26 = vor.u32 %v1772_v23, %v1693_v21  ;;  %v1557_v27 = vld [vmem:[%s2281_s29 + $0xd0] sm:$0xf]  ;;  %v1738_v28 = vld [vmem:[%s2281_s29 + $0xd4] sm:$0xf0]  ;;  %v1494_v30 = vor.u32 %v1722_v25, %v1493_v24  ;;  %v1485_v36 = vld [vmem:[%s2281_s29 + $0x40] sm:$0xf] }
  0x93   : > { %v1621_v29 = vld [vmem:[%s2281_s29 + $0x150] sm:$0xf]  ;;  %1111 = vmatpush.bf16.msra.mxu0 %v1502_v17  ;;  %v1754_v31 = vld [vmem:[%s2281_s29 + $0x154] sm:$0xf0]  ;;  %v1558_v34 = vor.u32 %v1738_v28, %v1557_v27  ;;  %v1720_v37 = vld [vmem:[%s2281_s29 + $0x44] sm:$0xf0] }
  0x94   : > { %v1685_v32 = vld [vmem:[%s2281_s29 + $0x1d0] sm:$0xf]  ;;  %v1770_v33 = vld [vmem:[%s2281_s29 + $0x1d4] sm:$0xf0]  ;;  %1124 = vmatpush.bf16.msra.mxu1 %v1566_v18  ;;  %v1622_v35 = vor.u32 %v1754_v31, %v1621_v29  ;;  %v1549_v38 = vld [vmem:[%s2281_s29 + $0xc0] sm:$0xf]  ;;  %v1486_v45 = vor.u32 %v1720_v37, %v1485_v36 }
  0x95   : > { %1137 = vmatpush.bf16.msra.mxu2 %v1630_v22  ;;  %v1686_v39 = vor.u32 %v1770_v33, %v1685_v32  ;;  %v1736_v40 = vld [vmem:[%s2281_s29 + $0xc4] sm:$0xf0]  ;;  %v1613_v41 = vld [vmem:[%s2281_s29 + $0x140] sm:$0xf]  ;;  %v1477_v48 = vld [vmem:[%s2281_s29 + $0x30] sm:$0xf] }
  0x96   : > { %1150 = vmatpush.bf16.msra.mxu3 %v1694_v26  ;;  %v1752_v42 = vld [vmem:[%s2281_s29 + $0x144] sm:$0xf0]  ;;  %v1677_v43 = vld [vmem:[%s2281_s29 + $0x1c0] sm:$0xf]  ;;  %v1550_v46 = vor.u32 %v1736_v40, %v1549_v38  ;;  %v1718_v49 = vld [vmem:[%s2281_s29 + $0x34] sm:$0xf0] }
  0x97   : > { %v1768_v44 = vld [vmem:[%s2281_s29 + $0x1c4] sm:$0xf0]  ;;  %1112 = vmatpush.bf16.msra.mxu0 %v1494_v30  ;;  %v1614_v47 = vor.u32 %v1752_v42, %v1613_v41  ;;  %v1541_v50 = vld [vmem:[%s2281_s29 + $0xb0] sm:$0xf]  ;;  %v1734_v52 = vld [vmem:[%s2281_s29 + $0xb4] sm:$0xf0]  ;;  %v1478_v57 = vor.u32 %v1718_v49, %v1477_v48 }
  0x98   : > { %1125 = vmatpush.bf16.msra.mxu1 %v1558_v34  ;;  %v1678_v51 = vor.u32 %v1768_v44, %v1677_v43  ;;  %v1605_v53 = vld [vmem:[%s2281_s29 + $0x130] sm:$0xf]  ;;  %v1750_v54 = vld [vmem:[%s2281_s29 + $0x134] sm:$0xf0]  ;;  %v1542_v58 = vor.u32 %v1734_v52, %v1541_v50  ;;  %v1469_v60 = vld [vmem:[%s2281_s29 + $0x20] sm:$0xf] }
  0x99   : > { %1138 = vmatpush.bf16.msra.mxu2 %v1622_v35  ;;  %v1669_v55 = vld [vmem:[%s2281_s29 + $0x1b0] sm:$0xf]  ;;  %v1766_v56 = vld [vmem:[%s2281_s29 + $0x1b4] sm:$0xf0]  ;;  %v1606_v59 = vor.u32 %v1750_v54, %v1605_v53  ;;  %v1716_v61 = vld [vmem:[%s2281_s29 + $0x24] sm:$0xf0] }
  0x9a   : > { %1151 = vmatpush.bf16.msra.mxu3 %v1686_v39  ;;  %v1533_v62 = vld [vmem:[%s2281_s29 + $0xa0] sm:$0xf]  ;;  %v1670_v63 = vor.u32 %v1766_v56, %v1669_v55  ;;  %v1732_v0 = vld [vmem:[%s2281_s29 + $0xa4] sm:$0xf0]  ;;  %v1470_v5 = vor.u32 %v1716_v61, %v1469_v60  ;;  %v1461_v8 = vld [vmem:[%s2281_s29 + $0x10] sm:$0xf] }
  0x9b   : > { %1113 = vmatpush.bf16.msra.mxu0 %v1486_v45  ;;  %v1597_v1 = vld [vmem:[%s2281_s29 + $0x120] sm:$0xf]  ;;  %v1748_v2 = vld [vmem:[%s2281_s29 + $0x124] sm:$0xf0]  ;;  %v1534_v6 = vor.u32 %v1732_v0, %v1533_v62  ;;  %v1714_v9 = vld [vmem:[%s2281_s29 + $0x14] sm:$0xf0] }
  0x9c   : > { %1126 = vmatpush.bf16.msra.mxu1 %v1550_v46  ;;  %v1661_v3 = vld [vmem:[%s2281_s29 + $0x1a0] sm:$0xf]  ;;  %v1764_v4 = vld [vmem:[%s2281_s29 + $0x1a4] sm:$0xf0]  ;;  %v1598_v7 = vor.u32 %v1748_v2, %v1597_v1  ;;  %v1525_v10 = vld [vmem:[%s2281_s29 + $0x90] sm:$0xf]  ;;  %v1462_v17 = vor.u32 %v1714_v9, %v1461_v8 }
  0x9d   : > { %1139 = vmatpush.bf16.msra.mxu2 %v1614_v47  ;;  %v1662_v11 = vor.u32 %v1764_v4, %v1661_v3  ;;  %v1730_v12 = vld [vmem:[%s2281_s29 + $0x94] sm:$0xf0]  ;;  %v1589_v13 = vld [vmem:[%s2281_s29 + $0x110] sm:$0xf]  ;;  %v1453_v18 = vld [vmem:[%s2281_s29] sm:$0xf] }
  0x9e   : > { %1152 = vmatpush.bf16.msra.mxu3 %v1678_v51  ;;  %v1746_v14 = vld [vmem:[%s2281_s29 + $0x114] sm:$0xf0]  ;;  %v1653_v15 = vld [vmem:[%s2281_s29 + $0x190] sm:$0xf]  ;;  %v1712_v19 = vld [vmem:[%s2281_s29 + $0x4] sm:$0xf0]  ;;  %v1526_v21 = vor.u32 %v1730_v12, %v1525_v10 }
  0x9f   : > { %1114 = vmatpush.bf16.msra.mxu0 %v1478_v57  ;;  %v1762_v16 = vld [vmem:[%s2281_s29 + $0x194] sm:$0xf0]  ;;  %v1517_v20 = vld [vmem:[%s2281_s29 + $0x80] sm:$0xf]  ;;  %v1590_v22 = vor.u32 %v1746_v14, %v1589_v13  ;;  %v1728_v23 = vld [vmem:[%s2281_s29 + $0x84] sm:$0xf0]  ;;  %v1454_v33 = vor.u32 %v1712_v19, %v1453_v18 }
  0xa0   : > { %1127 = vmatpush.bf16.msra.mxu1 %v1542_v58  ;;  %v1581_v24 = vld [vmem:[%s2281_s29 + $0x100] sm:$0xf]  ;;  %v1744_v25 = vld [vmem:[%s2281_s29 + $0x104] sm:$0xf0]  ;;  %v1654_v26 = vor.u32 %v1762_v16, %v1653_v15  ;;  %v1725_v29 = vld [vmem:[%s2281_s29 + $0x74] sm:$0xf]  ;;  %v1518_v38 = vor.u32 %v1728_v23, %v1517_v20 }
  0xa1   : > { %1140 = vmatpush.bf16.msra.mxu2 %v1606_v59  ;;  %v1645_v27 = vld [vmem:[%s2281_s29 + $0x180] sm:$0xf]  ;;  %v1760_v28 = vld [vmem:[%s2281_s29 + $0x184] sm:$0xf0]  ;;  %v1511_v30 = vld [vmem:[%s2281_s29 + $0x78] sm:$0xf0]  ;;  %v1582_v39 = vor.u32 %v1744_v25, %v1581_v24 }
  0xa2   : > { %1153 = vmatpush.bf16.msra.mxu3 %v1670_v63  ;;  %v1741_v31 = vld [vmem:[%s2281_s29 + $0xf4] sm:$0xf]  ;;  %v711_v32 = vld [vmem:[%s2300_s8 + $0x8] sm:$0xff]  ;;  %v1646_v43 = vor.u32 %v1760_v28, %v1645_v27  ;;  %v1514_v44 = vor.u32 %v1725_v29, %v1511_v30  ;;  %v1723_v48 = vld [vmem:[%s2281_s29 + $0x64] sm:$0xf]  ;;  %p1707_p5 = scmp.ne.s32.totalorder %s1986_s23, 8 }
  0xa3   : > { %1115 = vmatpush.bf16.msra.mxu0 %v1470_v5  ;;  %v1575_v34 = vld [vmem:[%s2281_s29 + $0xf8] sm:$0xf0]  ;;  %v1757_v35 = vld [vmem:[%s2281_s29 + $0x174] sm:$0xf]  ;;  %v780_v37 = vunpack.c.l.b16 %v711_v32  ;;  %v781_v42 = vunpack.c.h.b16 %v711_v32  ;;  %v1503_v49 = vld [vmem:[%s2281_s29 + $0x68] sm:$0xf0] }
  0xa4   : > { %1128 = vmatpush.bf16.msra.mxu1 %v1534_v6  ;;  %v1639_v36 = vld [vmem:[%s2281_s29 + $0x178] sm:$0xf0]  ;;  %v1773_v40 = vld [vmem:[%s2281_s29 + $0x1f4] sm:$0xf]  ;;  %v1578_v46 = vor.u32 %v1741_v31, %v1575_v34  ;;  %v1739_v50 = vld [vmem:[%s2281_s29 + $0xe4] sm:$0xf]  ;;  %v1506_v62 = vor.u32 %v1723_v48, %v1503_v49 }
  0xa5   : > { %1141 = vmatpush.bf16.msra.mxu2 %v1598_v7  ;;  %v1703_v41 = vld [vmem:[%s2281_s29 + $0x1f8] sm:$0xf0]  ;;  %v710_v45 = vld [vmem:[%s2300_s8] sm:$0xff]  ;;  %v1642_v47 = vor.u32 %v1757_v35, %v1639_v36  ;;  %v1567_v54 = vld [vmem:[%s2281_s29 + $0xe8] sm:$0xf0]  ;;  %v2393_v57 = vpack.c.b16 %v780_v37, %v780_v37  ;;  %v2397_v60 = vpack.c.b16 %v781_v42, %v781_v42 }
  0xa6   : > { %1154 = vmatpush.bf16.msra.mxu3 %v1662_v11  ;;  %v778_v51 = vunpack.c.l.b16 %v710_v45  ;;  %v779_v52 = vunpack.c.h.b16 %v710_v45  ;;  %v1706_v53 = vor.u32 %v1773_v40, %v1703_v41  ;;  %v1755_v55 = vld [vmem:[%s2281_s29 + $0x164] sm:$0xf]  ;;  %v1631_v56 = vld [vmem:[%s2281_s29 + $0x168] sm:$0xf0]  ;;  %v1570_v0 = vor.u32 %v1739_v50, %v1567_v54  ;;  %v1721_v2 = vld [vmem:[%s2281_s29 + $0x54] sm:$0xf] }
  0xa7   : > { %1116 = vmatpush.bf16.msra.mxu0 %v1462_v17  ;;  %v1771_v58 = vld [vmem:[%s2281_s29 + $0x1e4] sm:$0xf]  ;;  %v1695_v59 = vld [vmem:[%s2281_s29 + $0x1e8] sm:$0xf0]  ;;  %v1634_v1 = vor.u32 %v1755_v55, %v1631_v56  ;;  %v1495_v3 = vld [vmem:[%s2281_s29 + $0x58] sm:$0xf0] }
  0xa8   : > { %1129 = vmatpush.bf16.msra.mxu1 %v1526_v21  ;;  %v2399_v61 = vpack.c.b16 %v778_v51, %v778_v51  ;;  %v2401_v63 = vpack.c.b16 %v779_v52, %v779_v52  ;;  %v1737_v4 = vld [vmem:[%s2281_s29 + $0xd4] sm:$0xf]  ;;  %v1698_v5 = vor.u32 %v1771_v58, %v1695_v59  ;;  %v1559_v6 = vld [vmem:[%s2281_s29 + $0xd8] sm:$0xf0]  ;;  %v1498_v11 = vor.u32 %v1721_v2, %v1495_v3  ;;  %v1719_v14 = vld [vmem:[%s2281_s29 + $0x44] sm:$0xf] }
  0xa9   : > { %1142 = vmatpush.bf16.msra.mxu2 %v1590_v22  ;;  %v1753_v7 = vld [vmem:[%s2281_s29 + $0x154] sm:$0xf]  ;;  %v1623_v8 = vld [vmem:[%s2281_s29 + $0x158] sm:$0xf0]  ;;  %v1562_v12 = vor.u32 %v1737_v4, %v1559_v6  ;;  %v1487_v15 = vld [vmem:[%s2281_s29 + $0x48] sm:$0xf0] }
  0xaa   : > { %1155 = vmatpush.bf16.msra.mxu3 %v1654_v26  ;;  %v1769_v9 = vld [vmem:[%s2281_s29 + $0x1d4] sm:$0xf]  ;;  %v1687_v10 = vld [vmem:[%s2281_s29 + $0x1d8] sm:$0xf0]  ;;  %v1626_v13 = vor.u32 %v1753_v7, %v1623_v8  ;;  %v1735_v16 = vld [vmem:[%s2281_s29 + $0xc4] sm:$0xf]  ;;  %v1490_v23 = vor.u32 %v1719_v14, %v1487_v15 }
  0xab   : > { %1117 = vmatpush.bf16.msra.mxu0 %v1454_v33  ;;  %v1690_v17 = vor.u32 %v1769_v9, %v1687_v10  ;;  %v1551_v18 = vld [vmem:[%s2281_s29 + $0xc8] sm:$0xf0]  ;;  %v1751_v19 = vld [vmem:[%s2281_s29 + $0x144] sm:$0xf]  ;;  %v1717_v26 = vld [vmem:[%s2281_s29 + $0x34] sm:$0xf] }
  0xac   : > { %1130 = vmatpush.bf16.msra.mxu1 %v1518_v38  ;;  %v1615_v20 = vld [vmem:[%s2281_s29 + $0x148] sm:$0xf0]  ;;  %v1767_v21 = vld [vmem:[%s2281_s29 + $0x1c4] sm:$0xf]  ;;  %v1554_v24 = vor.u32 %v1735_v16, %v1551_v18  ;;  %v1479_v27 = vld [vmem:[%s2281_s29 + $0x38] sm:$0xf0] }
  0xad   : > { %1143 = vmatpush.bf16.msra.mxu2 %v1582_v39  ;;  %v1679_v22 = vld [vmem:[%s2281_s29 + $0x1c8] sm:$0xf0]  ;;  %v1618_v25 = vor.u32 %v1751_v19, %v1615_v20  ;;  %v1733_v28 = vld [vmem:[%s2281_s29 + $0xb4] sm:$0xf]  ;;  %v1543_v30 = vld [vmem:[%s2281_s29 + $0xb8] sm:$0xf0]  ;;  %v1482_v35 = vor.u32 %v1717_v26, %v1479_v27 }
  0xae   : > { %1156 = vmatpush.bf16.msra.mxu3 %v1646_v43  ;;  %1118 = vmatmul.bf16.vlgmr.msra.gmra.mxu0 %v2399_v61  ;;  %v1682_v29 = vor.u32 %v1767_v21, %v1679_v22  ;;  %v1749_v31 = vld [vmem:[%s2281_s29 + $0x134] sm:$0xf]  ;;  %v1607_v32 = vld [vmem:[%s2281_s29 + $0x138] sm:$0xf0]  ;;  %v1546_v36 = vor.u32 %v1733_v28, %v1543_v30  ;;  %v1715_v38 = vld [vmem:[%s2281_s29 + $0x24] sm:$0xf] }
  0xaf   : > { %1162 = vmatpush.bf16.msrb.mxu0 %v1514_v44  ;;  %1131 = vmatmul.bf16.vlgmr.msra.gmra.mxu1 %v2401_v63  ;;  %v1765_v33 = vld [vmem:[%s2281_s29 + $0x1b4] sm:$0xf]  ;;  %v1671_v34 = vld [vmem:[%s2281_s29 + $0x1b8] sm:$0xf0]  ;;  %v1610_v37 = vor.u32 %v1749_v31, %v1607_v32  ;;  %v1471_v39 = vld [vmem:[%s2281_s29 + $0x28] sm:$0xf0] }
  0xb0   : > { %1175 = vmatpush.bf16.msrb.mxu1 %v1578_v46  ;;  %1144 = vmatmul.bf16.vlgmr.msra.gmra.mxu2 %v2393_v57  ;;  %v1731_v40 = vld [vmem:[%s2281_s29 + $0xa4] sm:$0xf]  ;;  %v1674_v41 = vor.u32 %v1765_v33, %v1671_v34  ;;  %v1535_v42 = vld [vmem:[%s2281_s29 + $0xa8] sm:$0xf0]  ;;  %v1713_v50 = vld [vmem:[%s2281_s29 + $0x14] sm:$0xf] }
  0xb1   : > { %1188 = vmatpush.bf16.msrb.mxu2 %v1642_v47  ;;  %1157 = vmatmul.bf16.vlgmr.msra.gmra.mxu3 %v2397_v60  ;;  %v1747_v43 = vld [vmem:[%s2281_s29 + $0x124] sm:$0xf]  ;;  %v1599_v44 = vld [vmem:[%s2281_s29 + $0x128] sm:$0xf0]  ;;  %v1474_v47 = vor.u32 %v1715_v38, %v1471_v39  ;;  %v1538_v48 = vor.u32 %v1731_v40, %v1535_v42  ;;  %v1463_v51 = vld [vmem:[%s2281_s29 + $0x18] sm:$0xf0] }
  0xb2   : > { %1201 = vmatpush.bf16.msrb.mxu3 %v1706_v53  ;;  %v1763_v45 = vld [vmem:[%s2281_s29 + $0x1a4] sm:$0xf]  ;;  %v1663_v46 = vld [vmem:[%s2281_s29 + $0x1a8] sm:$0xf0]  ;;  %v1602_v49 = vor.u32 %v1747_v43, %v1599_v44  ;;  %v1729_v52 = vld [vmem:[%s2281_s29 + $0x94] sm:$0xf] }
  0xb3   : > { %1163 = vmatpush.bf16.msrb.mxu0 %v1506_v62  ;;  %v1666_v53 = vor.u32 %v1763_v45, %v1663_v46  ;;  %v1527_v54 = vld [vmem:[%s2281_s29 + $0x98] sm:$0xf0]  ;;  %v1745_v55 = vld [vmem:[%s2281_s29 + $0x114] sm:$0xf]  ;;  %v1466_v62 = vor.u32 %v1713_v50, %v1463_v51  ;;  %v1711_v2 = vld [vmem:[%s2281_s29 + $0x4] sm:$0xf] }
  0xb4   : > { %1176 = vmatpush.bf16.msrb.mxu1 %v1570_v0  ;;  %v1591_v56 = vld [vmem:[%s2281_s29 + $0x118] sm:$0xf0]  ;;  %v1761_v58 = vld [vmem:[%s2281_s29 + $0x194] sm:$0xf]  ;;  %v1530_v0 = vor.u32 %v1729_v52, %v1527_v54  ;;  %v1455_v3 = vld [vmem:[%s2281_s29 + $0x8] sm:$0xf0] }
  0xb5   : > { %1189 = vmatpush.bf16.msrb.mxu2 %v1634_v1  ;;  %v1655_v59 = vld [vmem:[%s2281_s29 + $0x198] sm:$0xf0]  ;;  %v1594_v1 = vor.u32 %v1745_v55, %v1591_v56  ;;  %v1727_v4 = vld [vmem:[%s2281_s29 + $0x84] sm:$0xf]  ;;  %v1519_v6 = vld [vmem:[%s2281_s29 + $0x88] sm:$0xf0] }
  0xb6   : > { %1202 = vmatpush.bf16.msrb.mxu3 %v1698_v5  ;;  %v1658_v5 = vor.u32 %v1761_v58, %v1655_v59  ;;  %v1743_v7 = vld [vmem:[%s2281_s29 + $0x104] sm:$0xf]  ;;  %v1583_v8 = vld [vmem:[%s2281_s29 + $0x108] sm:$0xf0]  ;;  %v708_v21 = vld [vmem:[#allocation2] sm:$0xff] }
  0xb7   : > { %1164 = vmatpush.bf16.msrb.mxu0 %v1498_v11  ;;  %v1759_v9 = vld [vmem:[%s2281_s29 + $0x184] sm:$0xf]  ;;  %v1647_v10 = vld [vmem:[%s2281_s29 + $0x188] sm:$0xf0]  ;;  %v1458_v11 = vor.u32 %v1711_v2, %v1455_v3  ;;  %v709_v31 = vld [vmem:[#allocation2 + $0x8] sm:$0xff] }
  0xb8   : > { %1177 = vmatpush.bf16.msrb.mxu1 %v1562_v12  ;;  %v1522_v12 = vor.u32 %v1727_v4, %v1519_v6  ;;  %v1650_v14 = vor.u32 %v1759_v9, %v1647_v10 }
  0xb9   : > { %1190 = vmatpush.bf16.msrb.mxu2 %v1626_v13  ;;  %v1586_v13 = vor.u32 %v1743_v7, %v1583_v8 }
  0xba   : > { %1203 = vmatpush.bf16.msrb.mxu3 %v1690_v17 }
  0xbb   : > { %1165 = vmatpush.bf16.msrb.mxu0 %v1490_v23 }
  0xbc   : > { %1178 = vmatpush.bf16.msrb.mxu1 %v1554_v24 }
  0xbd   : > { %1191 = vmatpush.bf16.msrb.mxu2 %v1618_v25 }
  0xbe   : > { %1204 = vmatpush.bf16.msrb.mxu3 %v1682_v29 }
  0xbf   : > { %1166 = vmatpush.bf16.msrb.mxu0 %v1482_v35 }
  0xc0   : > { %1179 = vmatpush.bf16.msrb.mxu1 %v1546_v36 }
  0xc1   : > { %1192 = vmatpush.bf16.msrb.mxu2 %v1610_v37 }
  0xc2   : > { %1205 = vmatpush.bf16.msrb.mxu3 %v1674_v41 }
  0xc3   : > { %1167 = vmatpush.bf16.msrb.mxu0 %v1474_v47 }
  0xc4   : > { %1180 = vmatpush.bf16.msrb.mxu1 %v1538_v48 }
  0xc5   : > { %1193 = vmatpush.bf16.msrb.mxu2 %v1602_v49 }
  0xc6   : > { %1206 = vmatpush.bf16.msrb.mxu3 %v1666_v53 }
  0xc7   : > { %1168 = vmatpush.bf16.msrb.mxu0 %v1466_v62 }
  0xc8   : > { %1181 = vmatpush.bf16.msrb.mxu1 %v1530_v0 }
  0xc9   : > { %1194 = vmatpush.bf16.msrb.mxu2 %v1594_v1 }
  0xca   : > { %1207 = vmatpush.bf16.msrb.mxu3 %v1658_v5 }
  0xcb   : > { %1169 = vmatpush.bf16.msrb.mxu0 %v1458_v11 }
  0xcc   : > { %1182 = vmatpush.bf16.msrb.mxu1 %v1522_v12 }
  0xcd   : > { %1195 = vmatpush.bf16.msrb.mxu2 %v1586_v13 }
  0xce   : > { %1208 = vmatpush.bf16.msrb.mxu3 %v1650_v14  ;;  %1170 = vmatmul.bf16.vlgmr.msrb.gmra.mxu0 %v2399_v61 }
  0xcf   : > { %1183 = vmatmul.bf16.vlgmr.msrb.gmra.mxu1 %v2401_v63 }
  0xd0   : > { %1196 = vmatmul.bf16.vlgmr.msrb.gmra.mxu2 %v2393_v57 }
  0xd1   : > { %1209 = vmatmul.bf16.vlgmr.msrb.gmra.mxu3 %v2397_v60 }
 0x12b   : > { %v1119_v15 = vpop.f32.mrf.mxu0 }
 0x12c   : > { %v1132_v16 = vpop.f32.mrf.mxu1 }
 0x12d   : > { %v1133_v17 = vadd.f32 %v1132_v16, %v1119_v15 }
 0x133   : > { %v1145_v18 = vpop.f32.mrf.mxu2  ;;  %v1121_v23 = vpop.f32.mrf.mxu0 }
 0x134   : > { %v1146_v19 = vadd.f32 %v1145_v18, %v1133_v17  ;;  %v1158_v20 = vpop.f32.mrf.mxu3  ;;  %v1134_v24 = vpop.f32.mrf.mxu1 }
 0x136   : > { %v1159_v22 = vadd.f32 %v1158_v20, %v1146_v19 }
 0x138   : > { %v1214_v25 = vadd.f32 %v1159_v22, %v708_v21 }
 0x13a   : > { %1216 = vst [vmem:[#allocation2] sm:$0xff] %v1214_v25 }
 0x13b   : > { %v1147_v26 = vpop.f32.mrf.mxu2 }
 0x13c   : > { %v1160_v61 = vpop.f32.mrf.mxu3 }
 0x14b   : > { %v1171_v27 = vpop.f32.mrf.mxu0 }
 0x14c   : > { %v1184_v63 = vpop.f32.mrf.mxu1 }
 0x14d   : > { %v1185_v28 = vadd.f32 %v1184_v63, %v1171_v27 }
 0x153   : > { %v1197_v57 = vpop.f32.mrf.mxu2  ;;  %v1173_v30 = vpop.f32.mrf.mxu0 }
 0x154   : > { %v1198_v29 = vadd.f32 %v1197_v57, %v1185_v28  ;;  %v1210_v60 = vpop.f32.mrf.mxu3  ;;  %v1186_v32 = vpop.f32.mrf.mxu1 }
 0x156   : > { %v1211_v33 = vadd.f32 %v1210_v60, %v1198_v29 }
 0x158   : > { %v1215_v34 = vadd.f32 %v1211_v33, %v709_v31  ;;  %1221 = sbr.rel (%p1707_p5) target bundleno = 365 (0x16d), region = 94 }
 0x15a   : > { %1217 = vst [vmem:[#allocation2 + $0x8] sm:$0xff] %v1215_v34 }
 0x15b   : > { %v1199_v35 = vpop.f32.mrf.mxu2 }
 0x15c   : > { %v1212_v36 = vpop.f32.mrf.mxu3 }
 0x15d   : > { %v1222_v37 = vld [vmem:[#allocation2] sm:$0xff]  ;;  %v1224_v39 = vld [vmem:[%s2283_s16] sm:$0x3]  ;;  %v1232_v42 = vld [vmem:[%s2289_s10] sm:$0x3] }
 0x15e   : > { %v1226_v40 = vperm.slane %v1224_v39, 0  ;;  %v1227_v41 = vperm.slane %v1224_v39, 1  ;;  %v1240_v43 = vld [vmem:[%s2305_s13] sm:$0xff]  ;;  %v1234_v44 = vperm.slane %v1232_v42, 0  ;;  %v1235_v45 = vperm.slane %v1232_v42, 1 }
 0x15f   : > { %v1241_v48 = vunpack.c.l.bf16 %v1240_v43  ;;  %v1242_v49 = vunpack.c.h.bf16 %v1240_v43 }
 0x160   : > { %v1230_v46 = vmul.f32 %v1226_v40, %v1222_v37 }
 0x161   : > { %v1223_v38 = vld [vmem:[#allocation2 + $0x8] sm:$0xff] }
 0x162   : > { %v1231_v47 = vmul.f32 %v1227_v41, %v1223_v38  ;;  %v1238_v50 = vadd.f32 %v1234_v44, %v1230_v46 }
 0x164   : > { %v1239_v51 = vadd.f32 %v1235_v45, %v1231_v47  ;;  %v1243_v52 = vadd.f32 %v1241_v48, %v1238_v50 }
 0x166   : > { %v1244_v53 = vadd.f32 %v1242_v49, %v1239_v51  ;;  %v1245_v54 = vmax.f32 %v1243_v52, 0.0 }
 0x168   : > { %v1246_v55 = vmax.f32 %v1244_v53, 0.0 }
 0x16a   : > { %v1247_v56 = vpack.c.bf16 %v1246_v55, %v1245_v54 }
 0x16c   : > { %1248 = vst [vmem:[%s2310_s24] sm:$0xff] %v1247_v56 }
 0x16d PF: > { %s21_s27 = sadd.s32 1, %s2002_s27   ;;  %s2514_s23 = sld [smem:[#allocation14_spill]] }
 0x16e   : > { %p18_p6 = scmp.ge.s32.totalorder %s21_s27, 20   ;;  %s2515_s17 = sld [smem:[#allocation10_spill]] }
 0x16f   : > { %s2516_s24 = sld [smem:[#allocation11_spill]]  ;;  %s2519_s18 = smov %s1970_s19 }
 0x170   : > { %s2517_s25 = sld [smem:[#allocation12_spill]]  ;;  %s2520_s19 = smov %s1974_s20 }
 0x171   : > { %s2518_s26 = sld [smem:[#allocation13_spill]]  ;;  %s2521_s20 = smov %s2119_s14 }
 0x172   : > { %s2522_s21 = smov %s1982_s22  ;;  %20 = sbr.rel (!%p18_p6) target bundleno = 10 (0xa), region = 153 }
 0x173   : > { %s2523_s22 = smov %s2514_s23 }
 0x174   : > { %s2524_s23 = smov %s2515_s17 }
 0x177   :  { %1279 = vsyncpa [#allocation5], 1 }
 0x178   :  { %1281 = vsyncpa [#allocation5 + $0x1], 1 }
 0x179   :  { %1282 = vsyncpa [#allocation7], 1 }
 0x17a   :  { %1284 = vsyncpa [#allocation7 + $0x1], 1 }

// kernel: resnet18_forward.39
= control target key start
LH: loop header
LB: loop body
LE: loop exit
PB: predicated region body
PF: predicated region fallthrough
CT: control target
= control target key end

     0   :  { %s1441_s0 = inlined_call_operand.vmem [shape: bf16[8,256], index: 0, kind: input, shape index: {}]   ;;  %s1442_s1 = inlined_call_operand.hbm [shape: bf16[256,512], index: 1, kind: input, shape index: {}]   ;;  %s1443_s2 = inlined_call_operand.hbm [shape: f32[1,512], index: 2, kind: input, shape index: {}]   ;;  %s1444_s3 = inlined_call_operand.hbm [shape: f32[1,512], index: 3, kind: input, shape index: {}]   ;;  %s1445_s4 = inlined_call_operand.vmem [shape: bf16[8,512], index: 4, kind: output, shape index: {}]  }
   0x1   :  { %1447 = sst [smem:[#allocation10_spill]] %s1443_s2 }
   0x2   :  { %9 = vsyncpa [#allocation4], 0 }
   0x3   :  { %11 = vsyncpa [#allocation4 + $0x1], 0 }
   0x4   :  { %12 = vsyncpa [#allocation6], 0 }
   0x5   :  { %14 = vsyncpa [#allocation6 + $0x1], 0  ;;  %s1242_s15 = smov 0   ;;  %s1244_s16 = smov 0  }
   0x6   :  { %s1246_s17 = smov 0   ;;  %s1248_s18 = smov 0  }
   0x7   :  { %s1250_s19 = smov 0   ;;  %s1252_s20 = smov 0  }
   0x8 LB: > { %s1446_s21 = sadd.s32 4294967295, %s1212_s20   ;;  %s35_s22 = sadd.s32 1, %s1208_s19  ;;  %s1212_s20 = sphi %s1252_s20, %s20_s20   ;;  %s1208_s19 = sphi %s1250_s19, %s1457_s19   ;;  %s1204_s18 = sphi %s1248_s18, %s1456_s18   ;;  %s1200_s17 = sphi %s1246_s17, %s1455_s17   ;;  %s1196_s16 = sphi %s1244_s16, %s1454_s16   ;;  %s1192_s15 = sphi %s1242_s15, %s1453_s15  }
   0x9   : > { %p37_p0 = scmp.ge.s32.totalorder %s35_s22, 2  ;;  %s76_s23 = sadd.s32 1, %s1200_s17 }
   0xa   : > { %p83_p1 = scmp.ne.s32.totalorder %s1200_s17, %s1196_s16  ;;  %p84_p2 = scmp.eq.s32.totalorder %s1212_s20, 0 }
   0xb   : > { %s1459_s22 = smov (%p37_p0, %s35_s22), 0  ;;  %p89_p4 = scmp.ne.s32.totalorder %s1196_s16, %s1192_s15 }
   0xc   : > { %p85_p3 = por %p84_p2, %p83_p1  ;;  %s72_s24 = ssub.s32 %s1208_s19, %s1459_s22 }
   0xd   : > { %p90_p5 = scmp.eq.s32.totalorder %s1446_s21, 0  ;;  %p74_p6 = scmp.eq.s32.totalorder %s72_s24, 0 }
   0xe   : > { %p1016_p8 = scmp.lt.s32.totalorder %s1212_s20, 2  ;;  %s1292_s27 = sand.u32 1, %s1200_s17  }
   0xf   : > { %p1283_p7 = por %p90_p5, %p89_p4  ;;  %s824_s29 = sshll.u32 %s1292_s27, 8 }
  0x10   : > { %s1289_s26 = scalar_select %p74_p6, %s1200_s17, %s76_s23  }
  0x11   : > { %p1294_p9 = pnand %p1016_p8, %p85_p3  ;;  %s210_s30 = scalar_lea.vmem [#allocation3], %s824_s29 }
  0x12   : > { %s221_s5 = sshll.u32 %s210_s30, 4  ;;  %s231_s6 = sand.u32 1, %s1212_s20   ;;  %s222_s5 = int_to_ptr.vmem [resolvable:$true] %s221_s5 }
  0x13   : > { %s827_s7 = sshll.u32 %s1292_s27, 1  ;;  %s828_s8 = sshll.u32 %s1208_s19, 1 }
  0x14   : > { %s1450_s2 = sld [smem:[#allocation10_spill]]  ;;  %s235_s13 = scalar_lea.vmem [#allocation5], %s827_s7 }
  0x15   : > { %s243_s14 = sshll.u32 %s235_s13, 4  ;;  %s232_s15 = scalar_lea.sflag [#allocation6], %s231_s6  ;;  %s244_s14 = int_to_ptr.vmem [resolvable:$true] %s243_s14 }
  0x16   : > { %s258_s29 = scalar_lea.hbm %s1444_s3, %s828_s8  ;;  %p831_p10 = scmp.ge.s32.totalorder %s1212_s20, 1 }
  0x17   : > { %p267_p11 = scmp.lt.s32.totalorder %s1212_s20, 3  ;;  %s967_s30 = sshll.u32 %s1208_s19, 3 }
  0x18   : > { %s218_s13 = scalar_lea.hbm %s1442_s1, %s967_s30  ;;  %s207_s6 = scalar_lea.sflag [#allocation4], %s1292_s27 }
  0x19   : > { %p1313_p12 = pnand %p831_p10, %p267_p11  ;;  %s219_s21 = sshll.u32 %s218_s13, 4  ;;  %s220_s21 = int_to_ptr.hbm [resolvable:$true] %s219_s21 }
  0x1a   : > { %s239_s11 = scalar_lea.hbm %s1450_s2, %s828_s8  ;;  %s1216_s2 = smov 8  }
  0x1b   : > { %s241_s12 = sshll.u32 %s239_s11, 4  ;;  %s260_s8 = sshll.u32 %s258_s29, 4  ;;  %s242_s12 = int_to_ptr.hbm [resolvable:$true] %s241_s12  ;;  %s261_s8 = int_to_ptr.hbm [resolvable:$true] %s260_s8 }
  0x1c   : > { %1012 = dma.hbm_to_vmem [thread:$0]  (!%p1294_p9), %s242_s12, 32, %s244_s14, %s232_s15  }
  0x1d   : > { %s1214_s12 = smov 256   ;;  %s1215_s14 = smov 128  }
  0x1e   : > { %1009 = dma.hbm_to_vmem [thread:$0]  (!%p1294_p9), %s220_s21, 4096, %s222_s5, %s207_s6, %s1214_s12, %s1215_s14, %s1216_s2  }
  0x1f   : > { %s254_s23 = scalar_lea.vmem [#allocation7], %s827_s7  ;;  %271 = sbr.rel (%p1313_p12) target bundleno = 219 (0xdb), region = 36 }
  0x20   : > { %s262_s24 = sshll.u32 %s254_s23, 4  ;;  %s1328_s30 = sand.u32 (!%p1313_p12), 1, %s1196_s16   ;;  %s263_s24 = int_to_ptr.vmem [resolvable:$true] %s262_s24 }
  0x21   : > { %1015 = dma.hbm_to_vmem [thread:$0]  (!%p1294_p9), %s261_s8, 32, %s263_s24, %s232_s15  }
  0x22   : > { %s832_s27 = sshll.u32 (!%p1313_p12), %s1328_s30, 8  ;;  %s274_s10 = scalar_lea.sflag (!%p1313_p12), [#allocation4], %s1328_s30 }
  0x23   : > { %s1332_s11 = scalar_lea.vmem (!%p1313_p12), [#allocation3], %s832_s27 }
  0x24   : > { %1183 = dma.done.wait (%p1283_p7), %s274_s10, 4096  }
  0x25   : > { %1185 = vsyncadd (%p1283_p7), %s274_s10, 4294963200  ;;  %s1452_s2 = sadd.s32 4294967295, %s1212_s20   ;;  %s833_s28 = sshll.u32 %s1328_s30, 1 }
  0x26   : > { %s283_s21 = sand.u32 1, %s1452_s2   ;;  %s1343_s7 = scalar_lea.vmem [#allocation5], %s833_s28 }
  0x27   : > { %s284_s5 = scalar_lea.sflag [#allocation6], %s283_s21 }
  0x28   : > { %1187 = dma.done.wait (%p1283_p7), %s284_s5, 64  }
  0x29   : > { %1189 = vsyncadd (%p1283_p7), %s284_s5, 4294967232  ;;  %v895_v0 = vld [vmem:[%s1332_s11 + $0x70] sm:$0xf]  ;;  %v983_v1 = vld [vmem:[%s1332_s11 + $0x74] sm:$0xf0]  ;;  %s835_s29 = sshll.u32 %s1204_s18, 1 }
  0x2a   : > { %v959_v2 = vld [vmem:[%s1332_s11 + $0xf0] sm:$0xf]  ;;  %v896_v3 = vor.u32 %v983_v1, %v895_v0  ;;  %v999_v4 = vld [vmem:[%s1332_s11 + $0xf4] sm:$0xf0]  ;;  %v982_v5 = vld [vmem:[%s1332_s11 + $0x74] sm:$0xf] }
  0x2b   : > { %v897_v6 = vld [vmem:[%s1332_s11 + $0x78] sm:$0xf0]  ;;  %v960_v7 = vor.u32 %v999_v4, %v959_v2  ;;  %v998_v9 = vld [vmem:[%s1332_s11 + $0xf4] sm:$0xf]  ;;  %v887_v11 = vld [vmem:[%s1332_s11 + $0x60] sm:$0xf] }
  0x2c   : > { %v900_v8 = vor.u32 %v982_v5, %v897_v6  ;;  %v961_v10 = vld [vmem:[%s1332_s11 + $0xf8] sm:$0xf0]  ;;  %578 = vmatpush.bf16.msra.mxu0 %v896_v3  ;;  %v981_v13 = vld [vmem:[%s1332_s11 + $0x64] sm:$0xf0]  ;;  %v951_v14 = vld [vmem:[%s1332_s11 + $0xe0] sm:$0xf] }
  0x2d   : > { %v964_v12 = vor.u32 %v998_v9, %v961_v10  ;;  %v997_v15 = vld [vmem:[%s1332_s11 + $0xe4] sm:$0xf0]  ;;  %591 = vmatpush.bf16.msra.mxu1 %v960_v7  ;;  %v888_v16 = vor.u32 %v981_v13, %v887_v11  ;;  %v980_v18 = vld [vmem:[%s1332_s11 + $0x64] sm:$0xf]  ;;  %v889_v19 = vld [vmem:[%s1332_s11 + $0x68] sm:$0xf0] }
  0x2e   : > { %604 = vmatpush.bf16.msra.mxu2 %v900_v8  ;;  %v952_v17 = vor.u32 %v997_v15, %v951_v14  ;;  %v996_v20 = vld [vmem:[%s1332_s11 + $0xe4] sm:$0xf]  ;;  %v892_v21 = vor.u32 %v980_v18, %v889_v19  ;;  %v953_v22 = vld [vmem:[%s1332_s11 + $0xe8] sm:$0xf0]  ;;  %v879_v23 = vld [vmem:[%s1332_s11 + $0x50] sm:$0xf] }
  0x2f   : > { %617 = vmatpush.bf16.msra.mxu3 %v964_v12  ;;  %v979_v24 = vld [vmem:[%s1332_s11 + $0x54] sm:$0xf0]  ;;  %v956_v25 = vor.u32 %v996_v20, %v953_v22  ;;  %v943_v26 = vld [vmem:[%s1332_s11 + $0xd0] sm:$0xf]  ;;  %v978_v28 = vld [vmem:[%s1332_s11 + $0x54] sm:$0xf] }
  0x30   : > { %v995_v27 = vld [vmem:[%s1332_s11 + $0xd4] sm:$0xf0]  ;;  %579 = vmatpush.bf16.msra.mxu0 %v888_v16  ;;  %v880_v29 = vor.u32 %v979_v24, %v879_v23  ;;  %v881_v30 = vld [vmem:[%s1332_s11 + $0x58] sm:$0xf0]  ;;  %v994_v31 = vld [vmem:[%s1332_s11 + $0xd4] sm:$0xf] }
  0x31   : > { %v945_v32 = vld [vmem:[%s1332_s11 + $0xd8] sm:$0xf0]  ;;  %592 = vmatpush.bf16.msra.mxu1 %v952_v17  ;;  %v944_v33 = vor.u32 %v995_v27, %v943_v26  ;;  %v884_v34 = vor.u32 %v978_v28, %v881_v30  ;;  %v871_v35 = vld [vmem:[%s1332_s11 + $0x40] sm:$0xf]  ;;  %v977_v36 = vld [vmem:[%s1332_s11 + $0x44] sm:$0xf0] }
  0x32   : > { %605 = vmatpush.bf16.msra.mxu2 %v892_v21  ;;  %v935_v37 = vld [vmem:[%s1332_s11 + $0xc0] sm:$0xf]  ;;  %v948_v38 = vor.u32 %v994_v31, %v945_v32  ;;  %v993_v39 = vld [vmem:[%s1332_s11 + $0xc4] sm:$0xf0]  ;;  %v976_v40 = vld [vmem:[%s1332_s11 + $0x44] sm:$0xf]  ;;  %v872_v44 = vor.u32 %v977_v36, %v871_v35 }
  0x33   : > { %618 = vmatpush.bf16.msra.mxu3 %v956_v25  ;;  %v873_v41 = vld [vmem:[%s1332_s11 + $0x48] sm:$0xf0]  ;;  %v992_v42 = vld [vmem:[%s1332_s11 + $0xc4] sm:$0xf]  ;;  %v936_v45 = vor.u32 %v993_v39, %v935_v37  ;;  %v863_v47 = vld [vmem:[%s1332_s11 + $0x30] sm:$0xf] }
  0x34   : > { %v937_v43 = vld [vmem:[%s1332_s11 + $0xc8] sm:$0xf0]  ;;  %580 = vmatpush.bf16.msra.mxu0 %v880_v29  ;;  %v876_v46 = vor.u32 %v976_v40, %v873_v41  ;;  %v975_v48 = vld [vmem:[%s1332_s11 + $0x34] sm:$0xf0]  ;;  %v927_v49 = vld [vmem:[%s1332_s11 + $0xb0] sm:$0xf] }
  0x35   : > { %593 = vmatpush.bf16.msra.mxu1 %v944_v33  ;;  %v940_v50 = vor.u32 %v992_v42, %v937_v43  ;;  %v991_v51 = vld [vmem:[%s1332_s11 + $0xb4] sm:$0xf0]  ;;  %v974_v52 = vld [vmem:[%s1332_s11 + $0x34] sm:$0xf]  ;;  %v865_v53 = vld [vmem:[%s1332_s11 + $0x38] sm:$0xf0]  ;;  %v864_v56 = vor.u32 %v975_v48, %v863_v47 }
  0x36   : > { %606 = vmatpush.bf16.msra.mxu2 %v884_v34  ;;  %v990_v54 = vld [vmem:[%s1332_s11 + $0xb4] sm:$0xf]  ;;  %v929_v55 = vld [vmem:[%s1332_s11 + $0xb8] sm:$0xf0]  ;;  %v928_v57 = vor.u32 %v991_v51, %v927_v49  ;;  %v868_v58 = vor.u32 %v974_v52, %v865_v53  ;;  %v855_v59 = vld [vmem:[%s1332_s11 + $0x20] sm:$0xf] }
  0x37   : > { %619 = vmatpush.bf16.msra.mxu3 %v948_v38  ;;  %v973_v60 = vld [vmem:[%s1332_s11 + $0x24] sm:$0xf0]  ;;  %v919_v61 = vld [vmem:[%s1332_s11 + $0xa0] sm:$0xf]  ;;  %v932_v62 = vor.u32 %v990_v54, %v929_v55  ;;  %v972_v0 = vld [vmem:[%s1332_s11 + $0x24] sm:$0xf] }
  0x38   : > { %581 = vmatpush.bf16.msra.mxu0 %v872_v44  ;;  %v989_v63 = vld [vmem:[%s1332_s11 + $0xa4] sm:$0xf0]  ;;  %v857_v1 = vld [vmem:[%s1332_s11 + $0x28] sm:$0xf0]  ;;  %v988_v2 = vld [vmem:[%s1332_s11 + $0xa4] sm:$0xf]  ;;  %v856_v4 = vor.u32 %v973_v60, %v855_v59 }
  0x39   : > { %594 = vmatpush.bf16.msra.mxu1 %v936_v45  ;;  %v921_v3 = vld [vmem:[%s1332_s11 + $0xa8] sm:$0xf0]  ;;  %v920_v5 = vor.u32 %v989_v63, %v919_v61  ;;  %v860_v6 = vor.u32 %v972_v0, %v857_v1  ;;  %v847_v7 = vld [vmem:[%s1332_s11 + $0x10] sm:$0xf]  ;;  %v971_v8 = vld [vmem:[%s1332_s11 + $0x14] sm:$0xf0] }
  0x3a   : > { %607 = vmatpush.bf16.msra.mxu2 %v876_v46  ;;  %v911_v9 = vld [vmem:[%s1332_s11 + $0x90] sm:$0xf]  ;;  %v924_v10 = vor.u32 %v988_v2, %v921_v3  ;;  %v987_v11 = vld [vmem:[%s1332_s11 + $0x94] sm:$0xf0]  ;;  %v970_v12 = vld [vmem:[%s1332_s11 + $0x14] sm:$0xf]  ;;  %v848_v16 = vor.u32 %v971_v8, %v847_v7 }
  0x3b   : > { %620 = vmatpush.bf16.msra.mxu3 %v940_v50  ;;  %v849_v13 = vld [vmem:[%s1332_s11 + $0x18] sm:$0xf0]  ;;  %v986_v14 = vld [vmem:[%s1332_s11 + $0x94] sm:$0xf]  ;;  %v378_v17 = vld [vmem:[%s1441_s0] sm:$0xff]  ;;  %v912_v18 = vor.u32 %v987_v11, %v911_v9  ;;  %p363_p13 = scmp.lt.s32.totalorder %s835_s29, 3 }
  0x3c   : > { %582 = vmatpush.bf16.msra.mxu0 %v864_v56  ;;  %v913_v15 = vld [vmem:[%s1332_s11 + $0x98] sm:$0xf0]  ;;  %v852_v19 = vor.u32 %v970_v12, %v849_v13  ;;  %v839_v20 = vld [vmem:[%s1332_s11] sm:$0xf]  ;;  %v969_v21 = vld [vmem:[%s1332_s11 + $0x4] sm:$0xf0]  ;;  %v412_v29 = vunpack.c.l.b16 %v378_v17  ;;  %v413_v31 = vunpack.c.h.b16 %v378_v17 }
  0x3d   : > { %595 = vmatpush.bf16.msra.mxu1 %v928_v57  ;;  %v903_v22 = vld [vmem:[%s1332_s11 + $0x80] sm:$0xf]  ;;  %v916_v23 = vor.u32 %v986_v14, %v913_v15  ;;  %v985_v24 = vld [vmem:[%s1332_s11 + $0x84] sm:$0xf0]  ;;  %v968_v25 = vld [vmem:[%s1332_s11 + $0x4] sm:$0xf]  ;;  %v840_v30 = vor.u32 %v969_v21, %v839_v20 }
  0x3e   : > { %608 = vmatpush.bf16.msra.mxu2 %v868_v58  ;;  %v841_v26 = vld [vmem:[%s1332_s11 + $0x8] sm:$0xf0]  ;;  %v984_v27 = vld [vmem:[%s1332_s11 + $0x84] sm:$0xf]  ;;  %v904_v32 = vor.u32 %v985_v24, %v903_v22  ;;  %v414_v35 = vpack.c.b16 %v412_v29, %v412_v29  ;;  %v415_v36 = vpack.c.b16 %v413_v31, %v413_v31  ;;  %v639_v38 = vld [vmem:[%s1343_s7] sm:$0x3] }
  0x3f   : > { %621 = vmatpush.bf16.msra.mxu3 %v932_v62  ;;  %v905_v28 = vld [vmem:[%s1332_s11 + $0x88] sm:$0xf0]  ;;  %v844_v33 = vor.u32 %v968_v25, %v841_v26  ;;  %v641_v41 = vperm.slane %v639_v38, 0  ;;  %s297_s9 = scalar_lea.vmem [#allocation7], %s833_s28  ;;  %s1461_s29 = smov (!%p363_p13, %s835_s29), 3  ;;  %v642_v46 = vperm.slane %v639_v38, 1 }
  0x40   : > { %583 = vmatpush.bf16.msra.mxu0 %v856_v4  ;;  %v908_v34 = vor.u32 %v984_v27, %v905_v28  ;;  %v647_v42 = vld [vmem:[%s297_s9] sm:$0x3]  ;;  %s836_s13 = sshll.u32 %s1461_s29, 2 }
  0x41   : > { %596 = vmatpush.bf16.msra.mxu1 %v920_v5  ;;  %v649_v44 = vperm.slane %v647_v42, 0  ;;  %v650_v50 = vperm.slane %v647_v42, 1  ;;  %s368_s12 = scalar_lea.vmem %s1445_s4, %s836_s13 }
  0x42   : > { %609 = vmatpush.bf16.msra.mxu2 %v860_v6 }
  0x43   : > { %622 = vmatpush.bf16.msra.mxu3 %v924_v10 }
  0x44   : > { %584 = vmatpush.bf16.msra.mxu0 %v848_v16 }
  0x45   : > { %597 = vmatpush.bf16.msra.mxu1 %v912_v18 }
  0x46   : > { %610 = vmatpush.bf16.msra.mxu2 %v852_v19 }
  0x47   : > { %623 = vmatpush.bf16.msra.mxu3 %v916_v23 }
  0x48   : > { %585 = vmatpush.bf16.msra.mxu0 %v840_v30 }
  0x49   : > { %598 = vmatpush.bf16.msra.mxu1 %v904_v32 }
  0x4a   : > { %611 = vmatpush.bf16.msra.mxu2 %v844_v33 }
  0x4b   : > { %624 = vmatpush.bf16.msra.mxu3 %v908_v34  ;;  %586 = vmatmul.bf16.vlgmr.msra.gmra.mxu0 %v414_v35 }
  0x4c   : > { %599 = vmatmul.bf16.vlgmr.msra.gmra.mxu1 %v415_v36 }
  0x4d   : > { %612 = vmatmul.bf16.vlgmr.msra.gmra.mxu2 %v414_v35 }
  0x4e   : > { %625 = vmatmul.bf16.vlgmr.msra.gmra.mxu3 %v415_v36 }
  0xc8   : > { %v587_v37 = vpop.f32.mrf.mxu0 }
  0xc9   : > { %v600_v39 = vpop.f32.mrf.mxu1 }
  0xca   : > { %v601_v40 = vadd.f32 %v600_v39, %v587_v37 }
  0xcc   : > { %v645_v43 = vmul.f32 %v641_v41, %v601_v40 }
  0xce   : > { %v653_v52 = vadd.f32 %v649_v44, %v645_v43 }
  0xd0   : > { %v613_v45 = vpop.f32.mrf.mxu2  ;;  %v589_v48 = vpop.f32.mrf.mxu0 }
  0xd1   : > { %v626_v47 = vpop.f32.mrf.mxu3  ;;  %v602_v51 = vpop.f32.mrf.mxu1 }
  0xd2   : > { %v627_v49 = vadd.f32 %v626_v47, %v613_v45 }
  0xd4   : > { %v646_v53 = vmul.f32 %v642_v46, %v627_v49 }
  0xd6   : > { %v654_v54 = vadd.f32 %v650_v50, %v646_v53 }
  0xd8   : > { %v655_v55 = vpack.c.bf16 %v654_v54, %v653_v52  ;;  %v615_v56 = vpop.f32.mrf.mxu2 }
  0xd9   : > { %v628_v57 = vpop.f32.mrf.mxu3 }
  0xda   : > { %656 = vst [vmem:[%s368_s12] sm:$0xff] %v655_v55 }
  0xdb PF: > { %s20_s20 = sadd.s32 1, %s1212_s20   ;;  %s1453_s15 = smov %s1196_s16 }
  0xdc   : > { %p17_p0 = scmp.ge.s32.totalorder %s20_s20, 4   ;;  %s1454_s16 = smov %s1200_s17 }
  0xdd   : > { %s1455_s17 = smov %s1289_s26  ;;  %s1456_s18 = smov %s1208_s19 }
  0xde   : > { %s1457_s19 = smov %s1459_s22  ;;  %19 = sbr.rel (!%p17_p0) target bundleno = 8 (0x8), region = 111 }
  0xe3   :  { %687 = vsyncpa [#allocation4], 1 }
  0xe4   :  { %689 = vsyncpa [#allocation4 + $0x1], 1 }
  0xe5   :  { %690 = vsyncpa [#allocation6], 1 }
  0xe6   :  { %692 = vsyncpa [#allocation6 + $0x1], 1 }

// kernel: resnet18_forward.42
= control target key start
LH: loop header
LB: loop body
LE: loop exit
PB: predicated region body
PF: predicated region fallthrough
CT: control target
= control target key end

     0   :  { %10 = vsyncpa [#allocation4], 0  ;;  %s1945_s0 = inlined_call_operand.vmem [shape: bf16[8,4608], index: 0, kind: input, shape index: {}]   ;;  %s1946_s1 = inlined_call_operand.hbm [shape: bf16[4608,512], index: 1, kind: input, shape index: {}]   ;;  %s1947_s2 = inlined_call_operand.vmem [shape: f32[1,512], index: 2, kind: input, shape index: {}]   ;;  %s1948_s3 = inlined_call_operand.vmem [shape: f32[1,512], index: 3, kind: input, shape index: {}]   ;;  %s1949_s4 = inlined_call_operand.vmem [shape: bf16[8,512], index: 4, kind: input, shape index: {}]   ;;  %s1950_s5 = inlined_call_operand.vmem [shape: bf16[8,512], index: 5, kind: output, shape index: {}]  }
   0x1   :  { %12 = vsyncpa [#allocation4 + $0x1], 0  ;;  %s1647_s18 = smov 0   ;;  %s1649_s19 = smov 0  }
   0x2   :  { %s1651_s20 = smov 0   ;;  %s1653_s21 = smov 0  }
   0x3   :  { %s1655_s22 = smov 0   ;;  %s1657_s23 = smov 0  }
   0x4   :  { %s1659_s24 = smov 0   ;;  %s1661_s25 = smov 0  }
   0x5 LB: > { %1954 = sst [smem:[#allocation6_spill]] %s1607_s24  ;;  %s1096_s26 = sadd.s32 4294967295, %s1611_s25   ;;  %s1611_s25 = sphi %s1661_s25, %s18_s25   ;;  %s1607_s24 = sphi %s1659_s24, %s1967_s24   ;;  %s1603_s23 = sphi %s1657_s23, %s1966_s23   ;;  %s1599_s22 = sphi %s1655_s22, %s1959_s22   ;;  %s1595_s21 = sphi %s1653_s21, %s1965_s21   ;;  %s1591_s20 = sphi %s1651_s20, %s1964_s20   ;;  %s1587_s19 = sphi %s1649_s19, %s1963_s19   ;;  %s1583_s18 = sphi %s1647_s18, %s1962_s18  }
   0x6   : > { %s30_s27 = sadd.s32 1, %s1603_s23  ;;  %s33_s28 = sadd.s32 1, %s1607_s24 }
   0x7   : > { %p31_p0 = scmp.ge.s32.totalorder %s30_s27, 9  ;;  %s74_s29 = sadd.s32 1, %s1591_s20 }
   0x8   : > { %p81_p1 = scmp.ne.s32.totalorder %s1591_s20, %s1587_s19  ;;  %p82_p2 = scmp.eq.s32.totalorder %s1611_s25, 0 }
   0x9   : > { %s1969_s27 = smov (%p31_p0, %s30_s27), 0  ;;  %s1971_s28 = smov (!%p31_p0, %s33_s28), %s1607_s24 }
   0xa   : > { %1955 = sst [smem:[#allocation7_spill]] %s1969_s27  ;;  %s69_s30 = ssub.s32 %s1603_s23, %s1969_s27 }
   0xb   : > { %p35_p3 = scmp.ge.s32.totalorder %s1971_s28, 2  ;;  %p87_p4 = scmp.ne.s32.totalorder %s1587_s19, %s1583_s18 }
   0xc   : > { %p1698_p5 = por %p82_p2, %p81_p1  ;;  %p88_p6 = scmp.eq.s32.totalorder %s1096_s26, 0 }
   0xd   : > { %s1973_s28 = smov (%p35_p3, %s1971_s28), 0  ;;  %p1446_p8 = scmp.lt.s32.totalorder %s1611_s25, 18 }
   0xe   : > { %1957 = sst [smem:[#allocation8_spill]] %s1973_s28  ;;  %p1704_p7 = por %p88_p6, %p87_p4 }
   0xf   : > { %s70_s8 = ssub.s32 %s1607_s24, %s1973_s28  ;;  %s232_s10 = sand.u32 1, %s1591_s20  }
  0x10   : > { %s71_s9 = sor.u32 %s70_s8, %s69_s30  ;;  %s1100_s11 = sshll.u32 %s232_s10, 9 }
  0x11   : > { %p72_p9 = scmp.eq.s32.totalorder %s71_s9, 0  ;;  %s1102_s12 = sshll.u32 %s1607_s24, 1 }
  0x12   : > { %s1375_s14 = sshll.u32 %s1603_s23, 8  ;;  %s236_s16 = scalar_lea.vmem [#allocation3], %s1100_s11 }
  0x13   : > { %s1714_s13 = scalar_select %p72_p9, %s1591_s20, %s74_s29  }
  0x14   : > { %s242_s15 = sadd.s32 %s1375_s14, %s1102_s12  ;;  %s247_s17 = sshll.u32 %s236_s16, 4  ;;  %s248_s17 = int_to_ptr.vmem [resolvable:$true] %s247_s17 }
  0x15   : > { %s1104_s18 = sshll.u32 %s242_s15, 2  ;;  %p1443_p10 = pnand %p1446_p8, %p1698_p5 }
  0x16   : > { %s244_s28 = scalar_lea.hbm %s1946_s1, %s1104_s18  ;;  %s233_s8 = scalar_lea.sflag [#allocation4], %s232_s10 }
  0x17   : > { %s245_s30 = sshll.u32 %s244_s28, 4  ;;  %s1613_s29 = smov 256   ;;  %s246_s30 = int_to_ptr.hbm [resolvable:$true] %s245_s30 }
  0x18   : > { %s1614_s9 = smov 128   ;;  %s1615_s24 = smov 8  }
  0x19   : > { %1445 = dma.hbm_to_vmem [thread:$0]  (!%p1443_p10), %s246_s30, 8192, %s248_s17, %s233_s8, %s1613_s29, %s1614_s9, %s1615_s24  }
  0x1a   : > { %p1105_p11 = scmp.ge.s32.totalorder %s1611_s25, 1  ;;  %p284_p12 = scmp.lt.s32.totalorder %s1611_s25, 19 }
  0x1c   : > { %p285_p13 = pnand %p1105_p11, %p284_p12 }
  0x1d   : > { %s290_s11 = sand.u32 (!%p285_p13), 1, %s1587_s19  }
  0x1e   : > { %288 = sbr.rel (%p285_p13) target bundleno = 275 (0x113), region = 40  ;;  %s1106_s12 = sshll.u32 (!%p285_p13), %s290_s11, 9 }
  0x1f   : > { %s291_s27 = scalar_lea.sflag (!%p285_p13), [#allocation4], %s290_s11  ;;  %s1727_s14 = scalar_lea.vmem (!%p285_p13), [#allocation3], %s1106_s12 }
  0x23   : > { %1578 = dma.done.wait (%p1704_p7), %s291_s27, 8192  }
  0x24   : > { %1580 = vsyncadd (%p1704_p7), %s291_s27, 4294959104  ;;  %s1107_s28 = sshll.u32 %s1595_s21, 2  ;;  %s1109_s24 = sshll.u32 %s1599_s22, 1 }
  0x25   : > { %p355_p0 = scmp.lt.s32.totalorder %s1107_s28, 35  ;;  %p365_p1 = scmp.lt.s32.totalorder %s1109_s24, 3 }
  0x26   : > { %p1115_p2 = scmp.ne.s32.totalorder %s1595_s21, 0 }
  0x27   : > { %s1975_s28 = smov (!%p355_p0, %s1107_s28), 35  ;;  %s1977_s24 = smov (!%p365_p1, %s1109_s24), 3 }
  0x28   : > { %s1108_s6 = sshll.u32 %s1975_s28, 2  ;;  %s367_s18 = scalar_lea.vmem %s1947_s2, %s1977_s24 }
  0x29   : > { %s1740_s16 = scalar_lea.vmem %s1945_s0, %s1108_s6  ;;  %s372_s30 = scalar_lea.vmem %s1948_s3, %s1977_s24 }
  0x2a   : > { %s1112_s8 = sshll.u32 %s1977_s24, 2  ;;  %397 = sbr.rel (%p1115_p2) target bundleno = 50 (0x32), region = 48 }
  0x2b   : > { %s1754_s11 = scalar_lea.vmem %s1949_s4, %s1112_s8  ;;  %s1759_s28 = scalar_lea.vmem %s1950_s5, %s1112_s8 }
  0x2f   : > { %v1616_v0 = vmov 0.0  }
  0x30   : > { %398 = vst [vmem:[#allocation2] sm:$0xff] %v1616_v0 }
  0x31   : > { %399 = vst [vmem:[#allocation2 + $0x8] sm:$0xff] %v1616_v0 }
  0x32 PF: > { %v1174_v1 = vld [vmem:[%s1727_s14 + $0x70] sm:$0xf]  ;;  %v1391_v2 = vld [vmem:[%s1727_s14 + $0x74] sm:$0xf0]  ;;  %v1166_v12 = vld [vmem:[%s1727_s14 + $0x60] sm:$0xf] }
  0x33   : > { %v1238_v3 = vld [vmem:[%s1727_s14 + $0xf0] sm:$0xf]  ;;  %v1175_v4 = vor.u32 %v1391_v2, %v1174_v1  ;;  %v1407_v5 = vld [vmem:[%s1727_s14 + $0xf4] sm:$0xf0]  ;;  %v1389_v14 = vld [vmem:[%s1727_s14 + $0x64] sm:$0xf0] }
  0x34   : > { %v1302_v6 = vld [vmem:[%s1727_s14 + $0x170] sm:$0xf]  ;;  %v1423_v7 = vld [vmem:[%s1727_s14 + $0x174] sm:$0xf0]  ;;  %v1239_v8 = vor.u32 %v1407_v5, %v1238_v3  ;;  %v1230_v15 = vld [vmem:[%s1727_s14 + $0xe0] sm:$0xf]  ;;  %v1167_v17 = vor.u32 %v1389_v14, %v1166_v12 }
  0x35   : > { %v1303_v9 = vor.u32 %v1423_v7, %v1302_v6  ;;  %v1366_v10 = vld [vmem:[%s1727_s14 + $0x1f0] sm:$0xf]  ;;  %v1439_v11 = vld [vmem:[%s1727_s14 + $0x1f4] sm:$0xf0]  ;;  %802 = vmatpush.bf16.msra.mxu0 %v1175_v4  ;;  %v1405_v16 = vld [vmem:[%s1727_s14 + $0xe4] sm:$0xf0] }
  0x36   : > { %v1367_v13 = vor.u32 %v1439_v11, %v1366_v10  ;;  %815 = vmatpush.bf16.msra.mxu1 %v1239_v8  ;;  %v1231_v18 = vor.u32 %v1405_v16, %v1230_v15  ;;  %v1294_v19 = vld [vmem:[%s1727_s14 + $0x160] sm:$0xf]  ;;  %v1421_v20 = vld [vmem:[%s1727_s14 + $0x164] sm:$0xf0]  ;;  %v1158_v24 = vld [vmem:[%s1727_s14 + $0x50] sm:$0xf] }
  0x37   : > { %828 = vmatpush.bf16.msra.mxu2 %v1303_v9  ;;  %v1358_v21 = vld [vmem:[%s1727_s14 + $0x1e0] sm:$0xf]  ;;  %v1295_v22 = vor.u32 %v1421_v20, %v1294_v19  ;;  %v1437_v23 = vld [vmem:[%s1727_s14 + $0x1e4] sm:$0xf0]  ;;  %v1387_v25 = vld [vmem:[%s1727_s14 + $0x54] sm:$0xf0] }
  0x38   : > { %841 = vmatpush.bf16.msra.mxu3 %v1367_v13  ;;  %v1359_v26 = vor.u32 %v1437_v23, %v1358_v21  ;;  %v1222_v27 = vld [vmem:[%s1727_s14 + $0xd0] sm:$0xf]  ;;  %v1403_v28 = vld [vmem:[%s1727_s14 + $0xd4] sm:$0xf0]  ;;  %v1159_v30 = vor.u32 %v1387_v25, %v1158_v24  ;;  %v1150_v36 = vld [vmem:[%s1727_s14 + $0x40] sm:$0xf] }
  0x39   : > { %v1286_v29 = vld [vmem:[%s1727_s14 + $0x150] sm:$0xf]  ;;  %803 = vmatpush.bf16.msra.mxu0 %v1167_v17  ;;  %v1419_v31 = vld [vmem:[%s1727_s14 + $0x154] sm:$0xf0]  ;;  %v1223_v34 = vor.u32 %v1403_v28, %v1222_v27  ;;  %v1385_v37 = vld [vmem:[%s1727_s14 + $0x44] sm:$0xf0] }
  0x3a   : > { %v1350_v32 = vld [vmem:[%s1727_s14 + $0x1d0] sm:$0xf]  ;;  %v1435_v33 = vld [vmem:[%s1727_s14 + $0x1d4] sm:$0xf0]  ;;  %816 = vmatpush.bf16.msra.mxu1 %v1231_v18  ;;  %v1287_v35 = vor.u32 %v1419_v31, %v1286_v29  ;;  %v1214_v38 = vld [vmem:[%s1727_s14 + $0xc0] sm:$0xf]  ;;  %v1151_v45 = vor.u32 %v1385_v37, %v1150_v36 }
  0x3b   : > { %829 = vmatpush.bf16.msra.mxu2 %v1295_v22  ;;  %v1351_v39 = vor.u32 %v1435_v33, %v1350_v32  ;;  %v1401_v40 = vld [vmem:[%s1727_s14 + $0xc4] sm:$0xf0]  ;;  %v1278_v41 = vld [vmem:[%s1727_s14 + $0x140] sm:$0xf]  ;;  %v1142_v48 = vld [vmem:[%s1727_s14 + $0x30] sm:$0xf] }
  0x3c   : > { %842 = vmatpush.bf16.msra.mxu3 %v1359_v26  ;;  %v1417_v42 = vld [vmem:[%s1727_s14 + $0x144] sm:$0xf0]  ;;  %v1342_v43 = vld [vmem:[%s1727_s14 + $0x1c0] sm:$0xf]  ;;  %v1215_v46 = vor.u32 %v1401_v40, %v1214_v38  ;;  %v1383_v49 = vld [vmem:[%s1727_s14 + $0x34] sm:$0xf0] }
  0x3d   : > { %v1433_v44 = vld [vmem:[%s1727_s14 + $0x1c4] sm:$0xf0]  ;;  %804 = vmatpush.bf16.msra.mxu0 %v1159_v30  ;;  %v1279_v47 = vor.u32 %v1417_v42, %v1278_v41  ;;  %v1206_v50 = vld [vmem:[%s1727_s14 + $0xb0] sm:$0xf]  ;;  %v1399_v52 = vld [vmem:[%s1727_s14 + $0xb4] sm:$0xf0]  ;;  %v1143_v57 = vor.u32 %v1383_v49, %v1142_v48 }
  0x3e   : > { %817 = vmatpush.bf16.msra.mxu1 %v1223_v34  ;;  %v1343_v51 = vor.u32 %v1433_v44, %v1342_v43  ;;  %v1270_v53 = vld [vmem:[%s1727_s14 + $0x130] sm:$0xf]  ;;  %v1415_v54 = vld [vmem:[%s1727_s14 + $0x134] sm:$0xf0]  ;;  %v1207_v58 = vor.u32 %v1399_v52, %v1206_v50  ;;  %v1134_v60 = vld [vmem:[%s1727_s14 + $0x20] sm:$0xf] }
  0x3f   : > { %830 = vmatpush.bf16.msra.mxu2 %v1287_v35  ;;  %v1334_v55 = vld [vmem:[%s1727_s14 + $0x1b0] sm:$0xf]  ;;  %v1431_v56 = vld [vmem:[%s1727_s14 + $0x1b4] sm:$0xf0]  ;;  %v1271_v59 = vor.u32 %v1415_v54, %v1270_v53  ;;  %v1381_v61 = vld [vmem:[%s1727_s14 + $0x24] sm:$0xf0] }
  0x40   : > { %843 = vmatpush.bf16.msra.mxu3 %v1351_v39  ;;  %v1198_v62 = vld [vmem:[%s1727_s14 + $0xa0] sm:$0xf]  ;;  %v1335_v63 = vor.u32 %v1431_v56, %v1334_v55  ;;  %v1397_v0 = vld [vmem:[%s1727_s14 + $0xa4] sm:$0xf0]  ;;  %v1135_v5 = vor.u32 %v1381_v61, %v1134_v60  ;;  %v1126_v8 = vld [vmem:[%s1727_s14 + $0x10] sm:$0xf] }
  0x41   : > { %805 = vmatpush.bf16.msra.mxu0 %v1151_v45  ;;  %v1262_v1 = vld [vmem:[%s1727_s14 + $0x120] sm:$0xf]  ;;  %v1413_v2 = vld [vmem:[%s1727_s14 + $0x124] sm:$0xf0]  ;;  %v1199_v6 = vor.u32 %v1397_v0, %v1198_v62  ;;  %v1379_v9 = vld [vmem:[%s1727_s14 + $0x14] sm:$0xf0] }
  0x42   : > { %818 = vmatpush.bf16.msra.mxu1 %v1215_v46  ;;  %v1326_v3 = vld [vmem:[%s1727_s14 + $0x1a0] sm:$0xf]  ;;  %v1429_v4 = vld [vmem:[%s1727_s14 + $0x1a4] sm:$0xf0]  ;;  %v1263_v7 = vor.u32 %v1413_v2, %v1262_v1  ;;  %v1190_v10 = vld [vmem:[%s1727_s14 + $0x90] sm:$0xf]  ;;  %v1127_v17 = vor.u32 %v1379_v9, %v1126_v8 }
  0x43   : > { %831 = vmatpush.bf16.msra.mxu2 %v1279_v47  ;;  %v1327_v11 = vor.u32 %v1429_v4, %v1326_v3  ;;  %v1395_v12 = vld [vmem:[%s1727_s14 + $0x94] sm:$0xf0]  ;;  %v1254_v13 = vld [vmem:[%s1727_s14 + $0x110] sm:$0xf]  ;;  %v1118_v18 = vld [vmem:[%s1727_s14] sm:$0xf] }
  0x44   : > { %844 = vmatpush.bf16.msra.mxu3 %v1343_v51  ;;  %v1411_v14 = vld [vmem:[%s1727_s14 + $0x114] sm:$0xf0]  ;;  %v1318_v15 = vld [vmem:[%s1727_s14 + $0x190] sm:$0xf]  ;;  %v1377_v19 = vld [vmem:[%s1727_s14 + $0x4] sm:$0xf0]  ;;  %v1191_v21 = vor.u32 %v1395_v12, %v1190_v10 }
  0x45   : > { %806 = vmatpush.bf16.msra.mxu0 %v1143_v57  ;;  %v1427_v16 = vld [vmem:[%s1727_s14 + $0x194] sm:$0xf0]  ;;  %v1182_v20 = vld [vmem:[%s1727_s14 + $0x80] sm:$0xf]  ;;  %v1255_v22 = vor.u32 %v1411_v14, %v1254_v13  ;;  %v1393_v23 = vld [vmem:[%s1727_s14 + $0x84] sm:$0xf0]  ;;  %v1119_v33 = vor.u32 %v1377_v19, %v1118_v18 }
  0x46   : > { %819 = vmatpush.bf16.msra.mxu1 %v1207_v58  ;;  %v1246_v24 = vld [vmem:[%s1727_s14 + $0x100] sm:$0xf]  ;;  %v1409_v25 = vld [vmem:[%s1727_s14 + $0x104] sm:$0xf0]  ;;  %v1319_v26 = vor.u32 %v1427_v16, %v1318_v15  ;;  %v1390_v29 = vld [vmem:[%s1727_s14 + $0x74] sm:$0xf]  ;;  %v1183_v38 = vor.u32 %v1393_v23, %v1182_v20 }
  0x47   : > { %832 = vmatpush.bf16.msra.mxu2 %v1271_v59  ;;  %v1310_v27 = vld [vmem:[%s1727_s14 + $0x180] sm:$0xf]  ;;  %v1425_v28 = vld [vmem:[%s1727_s14 + $0x184] sm:$0xf0]  ;;  %v1176_v30 = vld [vmem:[%s1727_s14 + $0x78] sm:$0xf0]  ;;  %v1247_v39 = vor.u32 %v1409_v25, %v1246_v24 }
  0x48   : > { %845 = vmatpush.bf16.msra.mxu3 %v1335_v63  ;;  %v1406_v31 = vld [vmem:[%s1727_s14 + $0xf4] sm:$0xf]  ;;  %v403_v32 = vld [vmem:[%s1740_s16 + $0x8] sm:$0xff]  ;;  %v1311_v43 = vor.u32 %v1425_v28, %v1310_v27  ;;  %v1179_v44 = vor.u32 %v1390_v29, %v1176_v30  ;;  %v1388_v48 = vld [vmem:[%s1727_s14 + $0x64] sm:$0xf]  ;;  %p1372_p3 = scmp.ne.s32.totalorder %s1595_s21, 8 }
  0x49   : > { %807 = vmatpush.bf16.msra.mxu0 %v1135_v5  ;;  %v1240_v34 = vld [vmem:[%s1727_s14 + $0xf8] sm:$0xf0]  ;;  %v1422_v35 = vld [vmem:[%s1727_s14 + $0x174] sm:$0xf]  ;;  %v472_v37 = vunpack.c.l.b16 %v403_v32  ;;  %v473_v42 = vunpack.c.h.b16 %v403_v32  ;;  %v1168_v49 = vld [vmem:[%s1727_s14 + $0x68] sm:$0xf0] }
  0x4a   : > { %820 = vmatpush.bf16.msra.mxu1 %v1199_v6  ;;  %v1304_v36 = vld [vmem:[%s1727_s14 + $0x178] sm:$0xf0]  ;;  %v1438_v40 = vld [vmem:[%s1727_s14 + $0x1f4] sm:$0xf]  ;;  %v1243_v46 = vor.u32 %v1406_v31, %v1240_v34  ;;  %v1404_v50 = vld [vmem:[%s1727_s14 + $0xe4] sm:$0xf]  ;;  %v1171_v62 = vor.u32 %v1388_v48, %v1168_v49 }
  0x4b   : > { %833 = vmatpush.bf16.msra.mxu2 %v1263_v7  ;;  %v1368_v41 = vld [vmem:[%s1727_s14 + $0x1f8] sm:$0xf0]  ;;  %v402_v45 = vld [vmem:[%s1740_s16] sm:$0xff]  ;;  %v1307_v47 = vor.u32 %v1422_v35, %v1304_v36  ;;  %v1232_v54 = vld [vmem:[%s1727_s14 + $0xe8] sm:$0xf0]  ;;  %v1842_v57 = vpack.c.b16 %v472_v37, %v472_v37  ;;  %v1846_v60 = vpack.c.b16 %v473_v42, %v473_v42 }
  0x4c   : > { %846 = vmatpush.bf16.msra.mxu3 %v1327_v11  ;;  %v470_v51 = vunpack.c.l.b16 %v402_v45  ;;  %v471_v52 = vunpack.c.h.b16 %v402_v45  ;;  %v1371_v53 = vor.u32 %v1438_v40, %v1368_v41  ;;  %v1420_v55 = vld [vmem:[%s1727_s14 + $0x164] sm:$0xf]  ;;  %v1296_v56 = vld [vmem:[%s1727_s14 + $0x168] sm:$0xf0]  ;;  %v1235_v0 = vor.u32 %v1404_v50, %v1232_v54  ;;  %v1386_v2 = vld [vmem:[%s1727_s14 + $0x54] sm:$0xf] }
  0x4d   : > { %808 = vmatpush.bf16.msra.mxu0 %v1127_v17  ;;  %v1436_v58 = vld [vmem:[%s1727_s14 + $0x1e4] sm:$0xf]  ;;  %v1360_v59 = vld [vmem:[%s1727_s14 + $0x1e8] sm:$0xf0]  ;;  %v1299_v1 = vor.u32 %v1420_v55, %v1296_v56  ;;  %v1160_v3 = vld [vmem:[%s1727_s14 + $0x58] sm:$0xf0] }
  0x4e   : > { %821 = vmatpush.bf16.msra.mxu1 %v1191_v21  ;;  %v1848_v61 = vpack.c.b16 %v470_v51, %v470_v51  ;;  %v1850_v63 = vpack.c.b16 %v471_v52, %v471_v52  ;;  %v1402_v4 = vld [vmem:[%s1727_s14 + $0xd4] sm:$0xf]  ;;  %v1363_v5 = vor.u32 %v1436_v58, %v1360_v59  ;;  %v1224_v6 = vld [vmem:[%s1727_s14 + $0xd8] sm:$0xf0]  ;;  %v1163_v11 = vor.u32 %v1386_v2, %v1160_v3  ;;  %v1384_v14 = vld [vmem:[%s1727_s14 + $0x44] sm:$0xf] }
  0x4f   : > { %834 = vmatpush.bf16.msra.mxu2 %v1255_v22  ;;  %v1418_v7 = vld [vmem:[%s1727_s14 + $0x154] sm:$0xf]  ;;  %v1288_v8 = vld [vmem:[%s1727_s14 + $0x158] sm:$0xf0]  ;;  %v1227_v12 = vor.u32 %v1402_v4, %v1224_v6  ;;  %v1152_v15 = vld [vmem:[%s1727_s14 + $0x48] sm:$0xf0] }
  0x50   : > { %847 = vmatpush.bf16.msra.mxu3 %v1319_v26  ;;  %v1434_v9 = vld [vmem:[%s1727_s14 + $0x1d4] sm:$0xf]  ;;  %v1352_v10 = vld [vmem:[%s1727_s14 + $0x1d8] sm:$0xf0]  ;;  %v1291_v13 = vor.u32 %v1418_v7, %v1288_v8  ;;  %v1400_v16 = vld [vmem:[%s1727_s14 + $0xc4] sm:$0xf]  ;;  %v1155_v23 = vor.u32 %v1384_v14, %v1152_v15 }
  0x51   : > { %809 = vmatpush.bf16.msra.mxu0 %v1119_v33  ;;  %v1355_v17 = vor.u32 %v1434_v9, %v1352_v10  ;;  %v1216_v18 = vld [vmem:[%s1727_s14 + $0xc8] sm:$0xf0]  ;;  %v1416_v19 = vld [vmem:[%s1727_s14 + $0x144] sm:$0xf]  ;;  %v1382_v26 = vld [vmem:[%s1727_s14 + $0x34] sm:$0xf] }
  0x52   : > { %822 = vmatpush.bf16.msra.mxu1 %v1183_v38  ;;  %v1280_v20 = vld [vmem:[%s1727_s14 + $0x148] sm:$0xf0]  ;;  %v1432_v21 = vld [vmem:[%s1727_s14 + $0x1c4] sm:$0xf]  ;;  %v1219_v24 = vor.u32 %v1400_v16, %v1216_v18  ;;  %v1144_v27 = vld [vmem:[%s1727_s14 + $0x38] sm:$0xf0] }
  0x53   : > { %835 = vmatpush.bf16.msra.mxu2 %v1247_v39  ;;  %v1344_v22 = vld [vmem:[%s1727_s14 + $0x1c8] sm:$0xf0]  ;;  %v1283_v25 = vor.u32 %v1416_v19, %v1280_v20  ;;  %v1398_v28 = vld [vmem:[%s1727_s14 + $0xb4] sm:$0xf]  ;;  %v1208_v30 = vld [vmem:[%s1727_s14 + $0xb8] sm:$0xf0]  ;;  %v1147_v35 = vor.u32 %v1382_v26, %v1144_v27 }
  0x54   : > { %848 = vmatpush.bf16.msra.mxu3 %v1311_v43  ;;  %810 = vmatmul.bf16.vlgmr.msra.gmra.mxu0 %v1848_v61  ;;  %v1347_v29 = vor.u32 %v1432_v21, %v1344_v22  ;;  %v1414_v31 = vld [vmem:[%s1727_s14 + $0x134] sm:$0xf]  ;;  %v1272_v32 = vld [vmem:[%s1727_s14 + $0x138] sm:$0xf0]  ;;  %v1211_v36 = vor.u32 %v1398_v28, %v1208_v30  ;;  %v1380_v38 = vld [vmem:[%s1727_s14 + $0x24] sm:$0xf] }
  0x55   : > { %854 = vmatpush.bf16.msrb.mxu0 %v1179_v44  ;;  %823 = vmatmul.bf16.vlgmr.msra.gmra.mxu1 %v1850_v63  ;;  %v1430_v33 = vld [vmem:[%s1727_s14 + $0x1b4] sm:$0xf]  ;;  %v1336_v34 = vld [vmem:[%s1727_s14 + $0x1b8] sm:$0xf0]  ;;  %v1275_v37 = vor.u32 %v1414_v31, %v1272_v32  ;;  %v1136_v39 = vld [vmem:[%s1727_s14 + $0x28] sm:$0xf0] }
  0x56   : > { %867 = vmatpush.bf16.msrb.mxu1 %v1243_v46  ;;  %836 = vmatmul.bf16.vlgmr.msra.gmra.mxu2 %v1842_v57  ;;  %v1396_v40 = vld [vmem:[%s1727_s14 + $0xa4] sm:$0xf]  ;;  %v1339_v41 = vor.u32 %v1430_v33, %v1336_v34  ;;  %v1200_v42 = vld [vmem:[%s1727_s14 + $0xa8] sm:$0xf0]  ;;  %v1378_v50 = vld [vmem:[%s1727_s14 + $0x14] sm:$0xf] }
  0x57   : > { %880 = vmatpush.bf16.msrb.mxu2 %v1307_v47  ;;  %849 = vmatmul.bf16.vlgmr.msra.gmra.mxu3 %v1846_v60  ;;  %v1412_v43 = vld [vmem:[%s1727_s14 + $0x124] sm:$0xf]  ;;  %v1264_v44 = vld [vmem:[%s1727_s14 + $0x128] sm:$0xf0]  ;;  %v1139_v47 = vor.u32 %v1380_v38, %v1136_v39  ;;  %v1203_v48 = vor.u32 %v1396_v40, %v1200_v42  ;;  %v1128_v51 = vld [vmem:[%s1727_s14 + $0x18] sm:$0xf0] }
  0x58   : > { %893 = vmatpush.bf16.msrb.mxu3 %v1371_v53  ;;  %v1428_v45 = vld [vmem:[%s1727_s14 + $0x1a4] sm:$0xf]  ;;  %v1328_v46 = vld [vmem:[%s1727_s14 + $0x1a8] sm:$0xf0]  ;;  %v1267_v49 = vor.u32 %v1412_v43, %v1264_v44  ;;  %v1394_v52 = vld [vmem:[%s1727_s14 + $0x94] sm:$0xf] }
  0x59   : > { %855 = vmatpush.bf16.msrb.mxu0 %v1171_v62  ;;  %v1331_v53 = vor.u32 %v1428_v45, %v1328_v46  ;;  %v1192_v54 = vld [vmem:[%s1727_s14 + $0x98] sm:$0xf0]  ;;  %v1410_v55 = vld [vmem:[%s1727_s14 + $0x114] sm:$0xf]  ;;  %v1131_v62 = vor.u32 %v1378_v50, %v1128_v51  ;;  %v1376_v2 = vld [vmem:[%s1727_s14 + $0x4] sm:$0xf] }
  0x5a   : > { %868 = vmatpush.bf16.msrb.mxu1 %v1235_v0  ;;  %v1256_v56 = vld [vmem:[%s1727_s14 + $0x118] sm:$0xf0]  ;;  %v1426_v58 = vld [vmem:[%s1727_s14 + $0x194] sm:$0xf]  ;;  %v1195_v0 = vor.u32 %v1394_v52, %v1192_v54  ;;  %v1120_v3 = vld [vmem:[%s1727_s14 + $0x8] sm:$0xf0] }
  0x5b   : > { %881 = vmatpush.bf16.msrb.mxu2 %v1299_v1  ;;  %v1320_v59 = vld [vmem:[%s1727_s14 + $0x198] sm:$0xf0]  ;;  %v1259_v1 = vor.u32 %v1410_v55, %v1256_v56  ;;  %v1392_v4 = vld [vmem:[%s1727_s14 + $0x84] sm:$0xf]  ;;  %v1184_v6 = vld [vmem:[%s1727_s14 + $0x88] sm:$0xf0] }
  0x5c   : > { %894 = vmatpush.bf16.msrb.mxu3 %v1363_v5  ;;  %v1323_v5 = vor.u32 %v1426_v58, %v1320_v59  ;;  %v1408_v7 = vld [vmem:[%s1727_s14 + $0x104] sm:$0xf]  ;;  %v1248_v8 = vld [vmem:[%s1727_s14 + $0x108] sm:$0xf0]  ;;  %v400_v21 = vld [vmem:[#allocation2] sm:$0xff] }
  0x5d   : > { %856 = vmatpush.bf16.msrb.mxu0 %v1163_v11  ;;  %v1424_v9 = vld [vmem:[%s1727_s14 + $0x184] sm:$0xf]  ;;  %v1312_v10 = vld [vmem:[%s1727_s14 + $0x188] sm:$0xf0]  ;;  %v1123_v11 = vor.u32 %v1376_v2, %v1120_v3  ;;  %v401_v31 = vld [vmem:[#allocation2 + $0x8] sm:$0xff] }
  0x5e   : > { %869 = vmatpush.bf16.msrb.mxu1 %v1227_v12  ;;  %v1187_v12 = vor.u32 %v1392_v4, %v1184_v6  ;;  %v1315_v14 = vor.u32 %v1424_v9, %v1312_v10 }
  0x5f   : > { %882 = vmatpush.bf16.msrb.mxu2 %v1291_v13  ;;  %v1251_v13 = vor.u32 %v1408_v7, %v1248_v8 }
  0x60   : > { %895 = vmatpush.bf16.msrb.mxu3 %v1355_v17 }
  0x61   : > { %857 = vmatpush.bf16.msrb.mxu0 %v1155_v23 }
  0x62   : > { %870 = vmatpush.bf16.msrb.mxu1 %v1219_v24 }
  0x63   : > { %883 = vmatpush.bf16.msrb.mxu2 %v1283_v25 }
  0x64   : > { %896 = vmatpush.bf16.msrb.mxu3 %v1347_v29 }
  0x65   : > { %858 = vmatpush.bf16.msrb.mxu0 %v1147_v35 }
  0x66   : > { %871 = vmatpush.bf16.msrb.mxu1 %v1211_v36 }
  0x67   : > { %884 = vmatpush.bf16.msrb.mxu2 %v1275_v37 }
  0x68   : > { %897 = vmatpush.bf16.msrb.mxu3 %v1339_v41 }
  0x69   : > { %859 = vmatpush.bf16.msrb.mxu0 %v1139_v47 }
  0x6a   : > { %872 = vmatpush.bf16.msrb.mxu1 %v1203_v48 }
  0x6b   : > { %885 = vmatpush.bf16.msrb.mxu2 %v1267_v49 }
  0x6c   : > { %898 = vmatpush.bf16.msrb.mxu3 %v1331_v53 }
  0x6d   : > { %860 = vmatpush.bf16.msrb.mxu0 %v1131_v62 }
  0x6e   : > { %873 = vmatpush.bf16.msrb.mxu1 %v1195_v0 }
  0x6f   : > { %886 = vmatpush.bf16.msrb.mxu2 %v1259_v1 }
  0x70   : > { %899 = vmatpush.bf16.msrb.mxu3 %v1323_v5 }
  0x71   : > { %861 = vmatpush.bf16.msrb.mxu0 %v1123_v11 }
  0x72   : > { %874 = vmatpush.bf16.msrb.mxu1 %v1187_v12 }
  0x73   : > { %887 = vmatpush.bf16.msrb.mxu2 %v1251_v13 }
  0x74   : > { %900 = vmatpush.bf16.msrb.mxu3 %v1315_v14  ;;  %862 = vmatmul.bf16.vlgmr.msrb.gmra.mxu0 %v1848_v61 }
  0x75   : > { %875 = vmatmul.bf16.vlgmr.msrb.gmra.mxu1 %v1850_v63 }
  0x76   : > { %888 = vmatmul.bf16.vlgmr.msrb.gmra.mxu2 %v1842_v57 }
  0x77   : > { %901 = vmatmul.bf16.vlgmr.msrb.gmra.mxu3 %v1846_v60 }
  0xd1   : > { %v811_v15 = vpop.f32.mrf.mxu0 }
  0xd2   : > { %v824_v16 = vpop.f32.mrf.mxu1 }
  0xd3   : > { %v825_v17 = vadd.f32 %v824_v16, %v811_v15 }
  0xd9   : > { %v837_v18 = vpop.f32.mrf.mxu2  ;;  %v813_v23 = vpop.f32.mrf.mxu0 }
  0xda   : > { %v838_v19 = vadd.f32 %v837_v18, %v825_v17  ;;  %v850_v20 = vpop.f32.mrf.mxu3  ;;  %v826_v24 = vpop.f32.mrf.mxu1 }
  0xdc   : > { %v851_v22 = vadd.f32 %v850_v20, %v838_v19 }
  0xde   : > { %v906_v25 = vadd.f32 %v851_v22, %v400_v21 }
  0xe0   : > { %908 = vst [vmem:[#allocation2] sm:$0xff] %v906_v25 }
  0xe1   : > { %v839_v26 = vpop.f32.mrf.mxu2 }
  0xe2   : > { %v852_v61 = vpop.f32.mrf.mxu3 }
  0xf1   : > { %v863_v27 = vpop.f32.mrf.mxu0 }
  0xf2   : > { %v876_v63 = vpop.f32.mrf.mxu1 }
  0xf3   : > { %v877_v28 = vadd.f32 %v876_v63, %v863_v27 }
  0xf9   : > { %v889_v57 = vpop.f32.mrf.mxu2  ;;  %v865_v30 = vpop.f32.mrf.mxu0 }
  0xfa   : > { %v890_v29 = vadd.f32 %v889_v57, %v877_v28  ;;  %v902_v60 = vpop.f32.mrf.mxu3  ;;  %v878_v32 = vpop.f32.mrf.mxu1 }
  0xfc   : > { %v903_v33 = vadd.f32 %v902_v60, %v890_v29 }
  0xfe   : > { %v907_v34 = vadd.f32 %v903_v33, %v401_v31  ;;  %913 = sbr.rel (%p1372_p3) target bundleno = 275 (0x113), region = 52 }
 0x100   : > { %909 = vst [vmem:[#allocation2 + $0x8] sm:$0xff] %v907_v34 }
 0x101   : > { %v891_v35 = vpop.f32.mrf.mxu2 }
 0x102   : > { %v904_v36 = vpop.f32.mrf.mxu3 }
 0x103   : > { %v914_v37 = vld [vmem:[#allocation2] sm:$0xff] }
 0x104   : > { %v916_v39 = vld [vmem:[%s367_s18] sm:$0x3] }
 0x105   : > { %v918_v40 = vperm.slane %v916_v39, 0  ;;  %v919_v41 = vperm.slane %v916_v39, 1  ;;  %v924_v42 = vld [vmem:[%s372_s30] sm:$0x3] }
 0x106   : > { %v932_v43 = vld [vmem:[%s1754_s11] sm:$0xff]  ;;  %v926_v44 = vperm.slane %v924_v42, 0  ;;  %v927_v45 = vperm.slane %v924_v42, 1 }
 0x107   : > { %v915_v38 = vld [vmem:[#allocation2 + $0x8] sm:$0xff]  ;;  %v922_v46 = vmul.f32 %v918_v40, %v914_v37  ;;  %v933_v48 = vunpack.c.l.bf16 %v932_v43  ;;  %v934_v49 = vunpack.c.h.bf16 %v932_v43 }
 0x108   : > { %v923_v47 = vmul.f32 %v919_v41, %v915_v38 }
 0x109   : > { %v930_v50 = vadd.f32 %v926_v44, %v922_v46 }
 0x10a   : > { %v931_v51 = vadd.f32 %v927_v45, %v923_v47 }
 0x10b   : > { %v935_v52 = vadd.f32 %v933_v48, %v930_v50 }
 0x10c   : > { %v936_v53 = vadd.f32 %v934_v49, %v931_v51 }
 0x10d   : > { %v937_v54 = vmax.f32 %v935_v52, 0.0 }
 0x10e   : > { %v938_v55 = vmax.f32 %v936_v53, 0.0 }
 0x110   : > { %v939_v56 = vpack.c.bf16 %v938_v55, %v937_v54 }
 0x112   : > { %940 = vst [vmem:[%s1759_s28] sm:$0xff] %v939_v56 }
 0x113 PF: > { %s18_s25 = sadd.s32 1, %s1611_s25   ;;  %s1959_s22 = sld [smem:[#allocation6_spill]] }
 0x114   : > { %p15_p4 = scmp.ge.s32.totalorder %s18_s25, 20   ;;  %s1960_s24 = sld [smem:[#allocation7_spill]] }
 0x115   : > { %s1961_s16 = sld [smem:[#allocation8_spill]]  ;;  %s1962_s18 = smov %s1587_s19 }
 0x116   : > { %s1963_s19 = smov %s1591_s20  ;;  %s1964_s20 = smov %s1714_s13 }
 0x117   : > { %s1965_s21 = smov %s1603_s23  ;;  %17 = sbr.rel (!%p15_p4) target bundleno = 5 (0x5), region = 100 }
 0x11a   : > { %s1966_s23 = smov %s1960_s24 }
 0x11b   : > { %s1967_s24 = smov %s1961_s16 }
 0x11c   :  { %971 = vsyncpa [#allocation4], 1 }
 0x11d   :  { %973 = vsyncpa [#allocation4 + $0x1], 1 }

// kernel: resnet18_forward.41
= control target key start
LH: loop header
LB: loop body
LE: loop exit
PB: predicated region body
PF: predicated region fallthrough
CT: control target
= control target key end

     0   :  { %s1752_s15 = smov 0   ;;  %s1754_s16 = smov 0   ;;  %s2152_s0 = inlined_call_operand.vmem [shape: bf16[8,4608], index: 0, kind: input, shape index: {}]   ;;  %s2153_s1 = inlined_call_operand.vmem [shape: bf16[4608,512], index: 1, kind: input, shape index: {}]   ;;  %s2154_s2 = inlined_call_operand.vmem [shape: f32[1,512], index: 2, kind: input, shape index: {}]   ;;  %s2155_s3 = inlined_call_operand.vmem [shape: f32[1,512], index: 3, kind: input, shape index: {}]   ;;  %s2156_s4 = inlined_call_operand.vmem [shape: bf16[8,512], index: 4, kind: output, shape index: {}]  }
   0x1   :  { %s1756_s17 = smov 0   ;;  %s1758_s18 = smov 0  }
   0x2   :  { %s1760_s19 = smov 0   ;;  %s1762_s20 = smov 0  }
   0x3   :  { %s1764_s21 = smov 0  }
   0x4 LB: > { %s26_s22 = sadd.s32 1, %s1716_s19  ;;  %s29_s23 = sadd.s32 1, %s1720_s20  ;;  %s1724_s21 = sphi %s1764_s21, %s14_s21   ;;  %s1720_s20 = sphi %s1762_s20, %s2162_s20   ;;  %s1716_s19 = sphi %s1760_s19, %s2161_s19   ;;  %s1712_s18 = sphi %s1758_s18, %s2160_s18   ;;  %s1708_s17 = sphi %s1756_s17, %s2159_s17   ;;  %s1704_s16 = sphi %s1754_s16, %s2158_s16   ;;  %s1700_s15 = sphi %s1752_s15, %s2157_s15  }
   0x5   : > { %p27_p0 = scmp.ge.s32.totalorder %s26_s22, 9  ;;  %p77_p1 = scmp.ne.s32.totalorder %s1704_s16, %s1700_s15 }
   0x6   : > { %p78_p2 = scmp.eq.s32.totalorder %s1724_s21, 0  ;;  %s70_s27 = sadd.s32 1, %s1704_s16 }
   0x7   : > { %s2164_s22 = smov (%p27_p0, %s26_s22), 0  ;;  %s2166_s23 = smov (!%p27_p0, %s29_s23), %s1720_s20 }
   0x8   : > { %p79_p3 = por %p78_p2, %p77_p1  ;;  %p31_p4 = scmp.ge.s32.totalorder %s2166_s23, 2 }
   0x9   : > { %s65_s24 = ssub.s32 %s1716_s19, %s2164_s22  ;;  %p1274_p6 = scmp.ge.s32.totalorder %s1724_s21, 18 }
   0xa   : > { %s2168_s23 = smov (%p31_p4, %s2166_s23), 0 }
   0xb   : > { %s66_s25 = ssub.s32 %s1720_s20, %s2168_s23  ;;  %183 = sbr.rel (%p1274_p6) target bundleno = 87 (0x57), region = 16 }
   0xc   : > { %s67_s26 = sor.u32 %s66_s25, %s65_s24 }
   0xd   : > { %p68_p5 = scmp.eq.s32.totalorder %s67_s26, 0 }
   0xf   : > { %s1803_s28 = scalar_select %p68_p5, %s1704_s16, %s70_s27  }
  0x10   : > { %199 = sbr.rel (!%p79_p3) target bundleno = 87 (0x57), region = 24  ;;  %s201_s29 = sand.u32 (%p79_p3), 1, %s1704_s16  }
  0x11   : > { %s1277_s30 = sshll.u32 (%p79_p3), %s1720_s20, 1  ;;  %s1275_s5 = sshll.u32 (%p79_p3), %s201_s29, 9 }
  0x12   : > { %s1548_s6 = sshll.u32 (%p79_p3), %s1716_s19, 8  ;;  %s1817_s12 = scalar_lea.vmem (%p79_p3), [#allocation3], %s1275_s5 }
  0x13   : > { %s207_s7 = sadd.s32 (%p79_p3), %s1548_s6, %s1277_s30 }
  0x14   : > { %s1279_s8 = sshll.u32 (%p79_p3), %s207_s7, 2 }
  0x15   : > { %s1812_s11 = scalar_lea.vmem %s2153_s1, %s1279_s8 }
  0x16   : > { %v364_v0 = vld [vmem:[%s1812_s11] sm:$0xff]  ;;  %v366_v1 = vld [vmem:[%s1812_s11 + $0x10] sm:$0xff] }
  0x17   : > { %v368_v2 = vld [vmem:[%s1812_s11 + $0x20] sm:$0xff]  ;;  %365 = vst [vmem:[%s1817_s12] sm:$0xff] %v364_v0  ;;  %v370_v3 = vld [vmem:[%s1812_s11 + $0x30] sm:$0xff] }
  0x18   : > { %367 = vst [vmem:[%s1817_s12 + $0x8] sm:$0xff] %v366_v1  ;;  %v372_v4 = vld [vmem:[%s1812_s11 + $0x40] sm:$0xff]  ;;  %v374_v5 = vld [vmem:[%s1812_s11 + $0x50] sm:$0xff] }
  0x19   : > { %369 = vst [vmem:[%s1817_s12 + $0x10] sm:$0xff] %v368_v2  ;;  %v376_v6 = vld [vmem:[%s1812_s11 + $0x60] sm:$0xff]  ;;  %v378_v7 = vld [vmem:[%s1812_s11 + $0x70] sm:$0xff] }
  0x1a   : > { %371 = vst [vmem:[%s1817_s12 + $0x18] sm:$0xff] %v370_v3  ;;  %v380_v8 = vld [vmem:[%s1812_s11 + $0x80] sm:$0xff]  ;;  %v382_v9 = vld [vmem:[%s1812_s11 + $0x90] sm:$0xff] }
  0x1b   : > { %373 = vst [vmem:[%s1817_s12 + $0x20] sm:$0xff] %v372_v4  ;;  %v384_v10 = vld [vmem:[%s1812_s11 + $0xa0] sm:$0xff]  ;;  %v386_v11 = vld [vmem:[%s1812_s11 + $0xb0] sm:$0xff] }
  0x1c   : > { %375 = vst [vmem:[%s1817_s12 + $0x28] sm:$0xff] %v374_v5  ;;  %v388_v12 = vld [vmem:[%s1812_s11 + $0xc0] sm:$0xff]  ;;  %v390_v13 = vld [vmem:[%s1812_s11 + $0xd0] sm:$0xff] }
  0x1d   : > { %377 = vst [vmem:[%s1817_s12 + $0x30] sm:$0xff] %v376_v6  ;;  %v392_v14 = vld [vmem:[%s1812_s11 + $0xe0] sm:$0xff]  ;;  %v394_v15 = vld [vmem:[%s1812_s11 + $0xf0] sm:$0xff] }
  0x1e   : > { %379 = vst [vmem:[%s1817_s12 + $0x38] sm:$0xff] %v378_v7  ;;  %v396_v16 = vld [vmem:[%s1812_s11 + $0x100] sm:$0xff]  ;;  %v398_v17 = vld [vmem:[%s1812_s11 + $0x110] sm:$0xff] }
  0x1f   : > { %381 = vst [vmem:[%s1817_s12 + $0x40] sm:$0xff] %v380_v8  ;;  %v400_v18 = vld [vmem:[%s1812_s11 + $0x120] sm:$0xff]  ;;  %v402_v19 = vld [vmem:[%s1812_s11 + $0x130] sm:$0xff] }
  0x20   : > { %383 = vst [vmem:[%s1817_s12 + $0x48] sm:$0xff] %v382_v9  ;;  %v404_v20 = vld [vmem:[%s1812_s11 + $0x140] sm:$0xff]  ;;  %v406_v21 = vld [vmem:[%s1812_s11 + $0x150] sm:$0xff] }
  0x21   : > { %385 = vst [vmem:[%s1817_s12 + $0x50] sm:$0xff] %v384_v10  ;;  %v408_v22 = vld [vmem:[%s1812_s11 + $0x160] sm:$0xff]  ;;  %v410_v23 = vld [vmem:[%s1812_s11 + $0x170] sm:$0xff] }
  0x22   : > { %387 = vst [vmem:[%s1817_s12 + $0x58] sm:$0xff] %v386_v11  ;;  %v412_v24 = vld [vmem:[%s1812_s11 + $0x180] sm:$0xff]  ;;  %v414_v25 = vld [vmem:[%s1812_s11 + $0x190] sm:$0xff] }
  0x23   : > { %389 = vst [vmem:[%s1817_s12 + $0x60] sm:$0xff] %v388_v12  ;;  %v416_v26 = vld [vmem:[%s1812_s11 + $0x1a0] sm:$0xff]  ;;  %v418_v27 = vld [vmem:[%s1812_s11 + $0x1b0] sm:$0xff] }
  0x24   : > { %391 = vst [vmem:[%s1817_s12 + $0x68] sm:$0xff] %v390_v13  ;;  %v420_v28 = vld [vmem:[%s1812_s11 + $0x1c0] sm:$0xff]  ;;  %v422_v29 = vld [vmem:[%s1812_s11 + $0x1d0] sm:$0xff] }
  0x25   : > { %393 = vst [vmem:[%s1817_s12 + $0x70] sm:$0xff] %v392_v14  ;;  %v424_v30 = vld [vmem:[%s1812_s11 + $0x1e0] sm:$0xff]  ;;  %v426_v31 = vld [vmem:[%s1812_s11 + $0x1f0] sm:$0xff] }
  0x26   : > { %395 = vst [vmem:[%s1817_s12 + $0x78] sm:$0xff] %v394_v15  ;;  %v428_v32 = vld [vmem:[%s1812_s11 + $0x200] sm:$0xff]  ;;  %v430_v33 = vld [vmem:[%s1812_s11 + $0x210] sm:$0xff] }
  0x27   : > { %397 = vst [vmem:[%s1817_s12 + $0x80] sm:$0xff] %v396_v16  ;;  %v432_v34 = vld [vmem:[%s1812_s11 + $0x220] sm:$0xff]  ;;  %v434_v35 = vld [vmem:[%s1812_s11 + $0x230] sm:$0xff] }
  0x28   : > { %399 = vst [vmem:[%s1817_s12 + $0x88] sm:$0xff] %v398_v17  ;;  %v436_v36 = vld [vmem:[%s1812_s11 + $0x240] sm:$0xff]  ;;  %v438_v37 = vld [vmem:[%s1812_s11 + $0x250] sm:$0xff] }
  0x29   : > { %401 = vst [vmem:[%s1817_s12 + $0x90] sm:$0xff] %v400_v18  ;;  %v440_v38 = vld [vmem:[%s1812_s11 + $0x260] sm:$0xff]  ;;  %v442_v39 = vld [vmem:[%s1812_s11 + $0x270] sm:$0xff] }
  0x2a   : > { %403 = vst [vmem:[%s1817_s12 + $0x98] sm:$0xff] %v402_v19  ;;  %v444_v40 = vld [vmem:[%s1812_s11 + $0x280] sm:$0xff]  ;;  %v446_v41 = vld [vmem:[%s1812_s11 + $0x290] sm:$0xff] }
  0x2b   : > { %405 = vst [vmem:[%s1817_s12 + $0xa0] sm:$0xff] %v404_v20  ;;  %v448_v42 = vld [vmem:[%s1812_s11 + $0x2a0] sm:$0xff]  ;;  %v450_v43 = vld [vmem:[%s1812_s11 + $0x2b0] sm:$0xff] }
  0x2c   : > { %407 = vst [vmem:[%s1817_s12 + $0xa8] sm:$0xff] %v406_v21  ;;  %v452_v44 = vld [vmem:[%s1812_s11 + $0x2c0] sm:$0xff]  ;;  %v454_v45 = vld [vmem:[%s1812_s11 + $0x2d0] sm:$0xff] }
  0x2d   : > { %409 = vst [vmem:[%s1817_s12 + $0xb0] sm:$0xff] %v408_v22  ;;  %v456_v46 = vld [vmem:[%s1812_s11 + $0x2e0] sm:$0xff]  ;;  %v458_v47 = vld [vmem:[%s1812_s11 + $0x2f0] sm:$0xff] }
  0x2e   : > { %411 = vst [vmem:[%s1817_s12 + $0xb8] sm:$0xff] %v410_v23  ;;  %v460_v48 = vld [vmem:[%s1812_s11 + $0x300] sm:$0xff]  ;;  %v462_v49 = vld [vmem:[%s1812_s11 + $0x310] sm:$0xff] }
  0x2f   : > { %413 = vst [vmem:[%s1817_s12 + $0xc0] sm:$0xff] %v412_v24  ;;  %v464_v50 = vld [vmem:[%s1812_s11 + $0x320] sm:$0xff]  ;;  %v466_v51 = vld [vmem:[%s1812_s11 + $0x330] sm:$0xff] }
  0x30   : > { %415 = vst [vmem:[%s1817_s12 + $0xc8] sm:$0xff] %v414_v25  ;;  %v468_v52 = vld [vmem:[%s1812_s11 + $0x340] sm:$0xff]  ;;  %v470_v53 = vld [vmem:[%s1812_s11 + $0x350] sm:$0xff] }
  0x31   : > { %417 = vst [vmem:[%s1817_s12 + $0xd0] sm:$0xff] %v416_v26  ;;  %v472_v54 = vld [vmem:[%s1812_s11 + $0x360] sm:$0xff]  ;;  %v474_v55 = vld [vmem:[%s1812_s11 + $0x370] sm:$0xff] }
  0x32   : > { %419 = vst [vmem:[%s1817_s12 + $0xd8] sm:$0xff] %v418_v27  ;;  %v476_v56 = vld [vmem:[%s1812_s11 + $0x380] sm:$0xff]  ;;  %v478_v57 = vld [vmem:[%s1812_s11 + $0x390] sm:$0xff] }
  0x33   : > { %421 = vst [vmem:[%s1817_s12 + $0xe0] sm:$0xff] %v420_v28  ;;  %v480_v58 = vld [vmem:[%s1812_s11 + $0x3a0] sm:$0xff]  ;;  %v482_v59 = vld [vmem:[%s1812_s11 + $0x3b0] sm:$0xff] }
  0x34   : > { %423 = vst [vmem:[%s1817_s12 + $0xe8] sm:$0xff] %v422_v29  ;;  %v484_v60 = vld [vmem:[%s1812_s11 + $0x3c0] sm:$0xff]  ;;  %v486_v61 = vld [vmem:[%s1812_s11 + $0x3d0] sm:$0xff] }
  0x35   : > { %425 = vst [vmem:[%s1817_s12 + $0xf0] sm:$0xff] %v424_v30  ;;  %v488_v62 = vld [vmem:[%s1812_s11 + $0x3e0] sm:$0xff]  ;;  %v490_v63 = vld [vmem:[%s1812_s11 + $0x3f0] sm:$0xff] }
  0x36   : > { %427 = vst [vmem:[%s1817_s12 + $0xf8] sm:$0xff] %v426_v31 }
  0x37   : > { %429 = vst [vmem:[%s1817_s12 + $0x100] sm:$0xff] %v428_v32 }
  0x38   : > { %431 = vst [vmem:[%s1817_s12 + $0x108] sm:$0xff] %v430_v33 }
  0x39   : > { %433 = vst [vmem:[%s1817_s12 + $0x110] sm:$0xff] %v432_v34 }
  0x3a   : > { %435 = vst [vmem:[%s1817_s12 + $0x118] sm:$0xff] %v434_v35 }
  0x3b   : > { %437 = vst [vmem:[%s1817_s12 + $0x120] sm:$0xff] %v436_v36 }
  0x3c   : > { %439 = vst [vmem:[%s1817_s12 + $0x128] sm:$0xff] %v438_v37 }
  0x3d   : > { %441 = vst [vmem:[%s1817_s12 + $0x130] sm:$0xff] %v440_v38 }
  0x3e   : > { %443 = vst [vmem:[%s1817_s12 + $0x138] sm:$0xff] %v442_v39 }
  0x3f   : > { %445 = vst [vmem:[%s1817_s12 + $0x140] sm:$0xff] %v444_v40 }
  0x40   : > { %447 = vst [vmem:[%s1817_s12 + $0x148] sm:$0xff] %v446_v41 }
  0x41   : > { %449 = vst [vmem:[%s1817_s12 + $0x150] sm:$0xff] %v448_v42 }
  0x42   : > { %451 = vst [vmem:[%s1817_s12 + $0x158] sm:$0xff] %v450_v43 }
  0x43   : > { %453 = vst [vmem:[%s1817_s12 + $0x160] sm:$0xff] %v452_v44 }
  0x44   : > { %455 = vst [vmem:[%s1817_s12 + $0x168] sm:$0xff] %v454_v45 }
  0x45   : > { %457 = vst [vmem:[%s1817_s12 + $0x170] sm:$0xff] %v456_v46 }
  0x46   : > { %459 = vst [vmem:[%s1817_s12 + $0x178] sm:$0xff] %v458_v47 }
  0x47   : > { %461 = vst [vmem:[%s1817_s12 + $0x180] sm:$0xff] %v460_v48 }
  0x48   : > { %463 = vst [vmem:[%s1817_s12 + $0x188] sm:$0xff] %v462_v49 }
  0x49   : > { %465 = vst [vmem:[%s1817_s12 + $0x190] sm:$0xff] %v464_v50 }
  0x4a   : > { %467 = vst [vmem:[%s1817_s12 + $0x198] sm:$0xff] %v466_v51 }
  0x4b   : > { %469 = vst [vmem:[%s1817_s12 + $0x1a0] sm:$0xff] %v468_v52 }
  0x4c   : > { %471 = vst [vmem:[%s1817_s12 + $0x1a8] sm:$0xff] %v470_v53 }
  0x4d   : > { %473 = vst [vmem:[%s1817_s12 + $0x1b0] sm:$0xff] %v472_v54 }
  0x4e   : > { %475 = vst [vmem:[%s1817_s12 + $0x1b8] sm:$0xff] %v474_v55 }
  0x4f   : > { %477 = vst [vmem:[%s1817_s12 + $0x1c0] sm:$0xff] %v476_v56 }
  0x50   : > { %479 = vst [vmem:[%s1817_s12 + $0x1c8] sm:$0xff] %v478_v57 }
  0x51   : > { %481 = vst [vmem:[%s1817_s12 + $0x1d0] sm:$0xff] %v480_v58 }
  0x52   : > { %483 = vst [vmem:[%s1817_s12 + $0x1d8] sm:$0xff] %v482_v59 }
  0x53   : > { %485 = vst [vmem:[%s1817_s12 + $0x1e0] sm:$0xff] %v484_v60 }
  0x54   : > { %487 = vst [vmem:[%s1817_s12 + $0x1e8] sm:$0xff] %v486_v61 }
  0x55   : > { %489 = vst [vmem:[%s1817_s12 + $0x1f0] sm:$0xff] %v488_v62 }
  0x56   : > { %491 = vst [vmem:[%s1817_s12 + $0x1f8] sm:$0xff] %v490_v63 }
  0x57 PF: > { %p1280_p7 = scmp.ge.s32.totalorder %s1724_s21, 1  ;;  %p512_p8 = scmp.lt.s32.totalorder %s1724_s21, 19 }
  0x59   : > { %p513_p9 = pnand %p1280_p7, %p512_p8 }
  0x5a   : > { %s519_s13 = sand.u32 (!%p513_p9), 1, %s1700_s15   ;;  %s1282_s14 = sshll.u32 (!%p513_p9), %s1708_s17, 2 }
  0x5b   : > { %516 = sbr.rel (%p513_p9) target bundleno = 330 (0x14a), region = 70  ;;  %s1281_s24 = sshll.u32 (!%p513_p9), %s519_s13, 9 }
  0x5c   : > { %p568_p10 = scmp.lt.s32.totalorder (!%p513_p9), %s1282_s14, 35  ;;  %s1284_s25 = sshll.u32 (!%p513_p9), %s1712_s18, 1 }
  0x5d   : > { %p578_p11 = scmp.lt.s32.totalorder (!%p513_p9), %s1284_s25, 3  ;;  %s1970_s13 = scalar_lea.vmem (!%p513_p9), [#allocation3], %s1281_s24 }
  0x5e   : > { %p1288_p12 = scmp.ne.s32.totalorder (!%p513_p9), %s1708_s17, 0 }
  0x60   : > { %s2170_s14 = smov (!%p568_p10, %s1282_s14), 35  ;;  %s2172_s25 = smov (!%p578_p11, %s1284_s25), 3 }
  0x61   : > { %s1283_s26 = sshll.u32 %s2170_s14, 2  ;;  %s580_s15 = scalar_lea.vmem %s2154_s2, %s2172_s25 }
  0x62   : > { %s1952_s30 = scalar_lea.vmem %s2152_s0, %s1283_s26  ;;  %s585_s18 = scalar_lea.vmem %s2155_s3, %s2172_s25 }
  0x63   : > { %s1287_s9 = sshll.u32 %s2172_s25, 2  ;;  %600 = sbr.rel (%p1288_p12) target bundleno = 107 (0x6b), region = 78 }
  0x64   : > { %s1968_s12 = scalar_lea.vmem %s2156_s4, %s1287_s9 }
  0x68   : > { %v1726_v0 = vmov 0.0  }
  0x69   : > { %601 = vst [vmem:[#allocation2] sm:$0xff] %v1726_v0 }
  0x6a   : > { %602 = vst [vmem:[#allocation2 + $0x8] sm:$0xff] %v1726_v0 }
  0x6b PF: > { %v1347_v1 = vld [vmem:[%s1970_s13 + $0x70] sm:$0xf]  ;;  %v1564_v2 = vld [vmem:[%s1970_s13 + $0x74] sm:$0xf0]  ;;  %v1339_v12 = vld [vmem:[%s1970_s13 + $0x60] sm:$0xf] }
  0x6c   : > { %v1411_v3 = vld [vmem:[%s1970_s13 + $0xf0] sm:$0xf]  ;;  %v1348_v4 = vor.u32 %v1564_v2, %v1347_v1  ;;  %v1580_v5 = vld [vmem:[%s1970_s13 + $0xf4] sm:$0xf0]  ;;  %v1562_v14 = vld [vmem:[%s1970_s13 + $0x64] sm:$0xf0] }
  0x6d   : > { %v1475_v6 = vld [vmem:[%s1970_s13 + $0x170] sm:$0xf]  ;;  %v1596_v7 = vld [vmem:[%s1970_s13 + $0x174] sm:$0xf0]  ;;  %v1412_v8 = vor.u32 %v1580_v5, %v1411_v3  ;;  %v1403_v15 = vld [vmem:[%s1970_s13 + $0xe0] sm:$0xf]  ;;  %v1340_v17 = vor.u32 %v1562_v14, %v1339_v12 }
  0x6e   : > { %v1476_v9 = vor.u32 %v1596_v7, %v1475_v6  ;;  %v1539_v10 = vld [vmem:[%s1970_s13 + $0x1f0] sm:$0xf]  ;;  %v1612_v11 = vld [vmem:[%s1970_s13 + $0x1f4] sm:$0xf0]  ;;  %1005 = vmatpush.bf16.msra.mxu0 %v1348_v4  ;;  %v1578_v16 = vld [vmem:[%s1970_s13 + $0xe4] sm:$0xf0] }
  0x6f   : > { %v1540_v13 = vor.u32 %v1612_v11, %v1539_v10  ;;  %1018 = vmatpush.bf16.msra.mxu1 %v1412_v8  ;;  %v1404_v18 = vor.u32 %v1578_v16, %v1403_v15  ;;  %v1467_v19 = vld [vmem:[%s1970_s13 + $0x160] sm:$0xf]  ;;  %v1594_v20 = vld [vmem:[%s1970_s13 + $0x164] sm:$0xf0]  ;;  %v1331_v24 = vld [vmem:[%s1970_s13 + $0x50] sm:$0xf] }
  0x70   : > { %1031 = vmatpush.bf16.msra.mxu2 %v1476_v9  ;;  %v1531_v21 = vld [vmem:[%s1970_s13 + $0x1e0] sm:$0xf]  ;;  %v1468_v22 = vor.u32 %v1594_v20, %v1467_v19  ;;  %v1610_v23 = vld [vmem:[%s1970_s13 + $0x1e4] sm:$0xf0]  ;;  %v1560_v25 = vld [vmem:[%s1970_s13 + $0x54] sm:$0xf0] }
  0x71   : > { %1044 = vmatpush.bf16.msra.mxu3 %v1540_v13  ;;  %v1532_v26 = vor.u32 %v1610_v23, %v1531_v21  ;;  %v1395_v27 = vld [vmem:[%s1970_s13 + $0xd0] sm:$0xf]  ;;  %v1576_v28 = vld [vmem:[%s1970_s13 + $0xd4] sm:$0xf0]  ;;  %v1332_v30 = vor.u32 %v1560_v25, %v1331_v24  ;;  %v1323_v36 = vld [vmem:[%s1970_s13 + $0x40] sm:$0xf] }
  0x72   : > { %v1459_v29 = vld [vmem:[%s1970_s13 + $0x150] sm:$0xf]  ;;  %1006 = vmatpush.bf16.msra.mxu0 %v1340_v17  ;;  %v1592_v31 = vld [vmem:[%s1970_s13 + $0x154] sm:$0xf0]  ;;  %v1396_v34 = vor.u32 %v1576_v28, %v1395_v27  ;;  %v1558_v37 = vld [vmem:[%s1970_s13 + $0x44] sm:$0xf0] }
  0x73   : > { %v1523_v32 = vld [vmem:[%s1970_s13 + $0x1d0] sm:$0xf]  ;;  %v1608_v33 = vld [vmem:[%s1970_s13 + $0x1d4] sm:$0xf0]  ;;  %1019 = vmatpush.bf16.msra.mxu1 %v1404_v18  ;;  %v1460_v35 = vor.u32 %v1592_v31, %v1459_v29  ;;  %v1387_v38 = vld [vmem:[%s1970_s13 + $0xc0] sm:$0xf]  ;;  %v1324_v45 = vor.u32 %v1558_v37, %v1323_v36 }
  0x74   : > { %1032 = vmatpush.bf16.msra.mxu2 %v1468_v22  ;;  %v1524_v39 = vor.u32 %v1608_v33, %v1523_v32  ;;  %v1574_v40 = vld [vmem:[%s1970_s13 + $0xc4] sm:$0xf0]  ;;  %v1451_v41 = vld [vmem:[%s1970_s13 + $0x140] sm:$0xf]  ;;  %v1315_v48 = vld [vmem:[%s1970_s13 + $0x30] sm:$0xf] }
  0x75   : > { %1045 = vmatpush.bf16.msra.mxu3 %v1532_v26  ;;  %v1590_v42 = vld [vmem:[%s1970_s13 + $0x144] sm:$0xf0]  ;;  %v1515_v43 = vld [vmem:[%s1970_s13 + $0x1c0] sm:$0xf]  ;;  %v1388_v46 = vor.u32 %v1574_v40, %v1387_v38  ;;  %v1556_v49 = vld [vmem:[%s1970_s13 + $0x34] sm:$0xf0] }
  0x76   : > { %v1606_v44 = vld [vmem:[%s1970_s13 + $0x1c4] sm:$0xf0]  ;;  %1007 = vmatpush.bf16.msra.mxu0 %v1332_v30  ;;  %v1452_v47 = vor.u32 %v1590_v42, %v1451_v41  ;;  %v1379_v50 = vld [vmem:[%s1970_s13 + $0xb0] sm:$0xf]  ;;  %v1572_v52 = vld [vmem:[%s1970_s13 + $0xb4] sm:$0xf0]  ;;  %v1316_v57 = vor.u32 %v1556_v49, %v1315_v48 }
  0x77   : > { %1020 = vmatpush.bf16.msra.mxu1 %v1396_v34  ;;  %v1516_v51 = vor.u32 %v1606_v44, %v1515_v43  ;;  %v1443_v53 = vld [vmem:[%s1970_s13 + $0x130] sm:$0xf]  ;;  %v1588_v54 = vld [vmem:[%s1970_s13 + $0x134] sm:$0xf0]  ;;  %v1380_v58 = vor.u32 %v1572_v52, %v1379_v50  ;;  %v1307_v60 = vld [vmem:[%s1970_s13 + $0x20] sm:$0xf] }
  0x78   : > { %1033 = vmatpush.bf16.msra.mxu2 %v1460_v35  ;;  %v1507_v55 = vld [vmem:[%s1970_s13 + $0x1b0] sm:$0xf]  ;;  %v1604_v56 = vld [vmem:[%s1970_s13 + $0x1b4] sm:$0xf0]  ;;  %v1444_v59 = vor.u32 %v1588_v54, %v1443_v53  ;;  %v1554_v61 = vld [vmem:[%s1970_s13 + $0x24] sm:$0xf0] }
  0x79   : > { %1046 = vmatpush.bf16.msra.mxu3 %v1524_v39  ;;  %v1371_v62 = vld [vmem:[%s1970_s13 + $0xa0] sm:$0xf]  ;;  %v1508_v63 = vor.u32 %v1604_v56, %v1507_v55  ;;  %v1570_v0 = vld [vmem:[%s1970_s13 + $0xa4] sm:$0xf0]  ;;  %v1308_v5 = vor.u32 %v1554_v61, %v1307_v60  ;;  %v1299_v8 = vld [vmem:[%s1970_s13 + $0x10] sm:$0xf] }
  0x7a   : > { %1008 = vmatpush.bf16.msra.mxu0 %v1324_v45  ;;  %v1435_v1 = vld [vmem:[%s1970_s13 + $0x120] sm:$0xf]  ;;  %v1586_v2 = vld [vmem:[%s1970_s13 + $0x124] sm:$0xf0]  ;;  %v1372_v6 = vor.u32 %v1570_v0, %v1371_v62  ;;  %v1552_v9 = vld [vmem:[%s1970_s13 + $0x14] sm:$0xf0] }
  0x7b   : > { %1021 = vmatpush.bf16.msra.mxu1 %v1388_v46  ;;  %v1499_v3 = vld [vmem:[%s1970_s13 + $0x1a0] sm:$0xf]  ;;  %v1602_v4 = vld [vmem:[%s1970_s13 + $0x1a4] sm:$0xf0]  ;;  %v1436_v7 = vor.u32 %v1586_v2, %v1435_v1  ;;  %v1363_v10 = vld [vmem:[%s1970_s13 + $0x90] sm:$0xf]  ;;  %v1300_v17 = vor.u32 %v1552_v9, %v1299_v8 }
  0x7c   : > { %1034 = vmatpush.bf16.msra.mxu2 %v1452_v47  ;;  %v1500_v11 = vor.u32 %v1602_v4, %v1499_v3  ;;  %v1568_v12 = vld [vmem:[%s1970_s13 + $0x94] sm:$0xf0]  ;;  %v1427_v13 = vld [vmem:[%s1970_s13 + $0x110] sm:$0xf]  ;;  %v1291_v18 = vld [vmem:[%s1970_s13] sm:$0xf] }
  0x7d   : > { %1047 = vmatpush.bf16.msra.mxu3 %v1516_v51  ;;  %v1584_v14 = vld [vmem:[%s1970_s13 + $0x114] sm:$0xf0]  ;;  %v1491_v15 = vld [vmem:[%s1970_s13 + $0x190] sm:$0xf]  ;;  %v1550_v19 = vld [vmem:[%s1970_s13 + $0x4] sm:$0xf0]  ;;  %v1364_v21 = vor.u32 %v1568_v12, %v1363_v10 }
  0x7e   : > { %1009 = vmatpush.bf16.msra.mxu0 %v1316_v57  ;;  %v1600_v16 = vld [vmem:[%s1970_s13 + $0x194] sm:$0xf0]  ;;  %v1355_v20 = vld [vmem:[%s1970_s13 + $0x80] sm:$0xf]  ;;  %v1428_v22 = vor.u32 %v1584_v14, %v1427_v13  ;;  %v1566_v23 = vld [vmem:[%s1970_s13 + $0x84] sm:$0xf0]  ;;  %v1292_v33 = vor.u32 %v1550_v19, %v1291_v18 }
  0x7f   : > { %1022 = vmatpush.bf16.msra.mxu1 %v1380_v58  ;;  %v1419_v24 = vld [vmem:[%s1970_s13 + $0x100] sm:$0xf]  ;;  %v1582_v25 = vld [vmem:[%s1970_s13 + $0x104] sm:$0xf0]  ;;  %v1492_v26 = vor.u32 %v1600_v16, %v1491_v15  ;;  %v1563_v29 = vld [vmem:[%s1970_s13 + $0x74] sm:$0xf]  ;;  %v1356_v38 = vor.u32 %v1566_v23, %v1355_v20 }
  0x80   : > { %1035 = vmatpush.bf16.msra.mxu2 %v1444_v59  ;;  %v1483_v27 = vld [vmem:[%s1970_s13 + $0x180] sm:$0xf]  ;;  %v1598_v28 = vld [vmem:[%s1970_s13 + $0x184] sm:$0xf0]  ;;  %v1349_v30 = vld [vmem:[%s1970_s13 + $0x78] sm:$0xf0]  ;;  %v1420_v39 = vor.u32 %v1582_v25, %v1419_v24 }
  0x81   : > { %1048 = vmatpush.bf16.msra.mxu3 %v1508_v63  ;;  %v1579_v31 = vld [vmem:[%s1970_s13 + $0xf4] sm:$0xf]  ;;  %v606_v32 = vld [vmem:[%s1952_s30 + $0x8] sm:$0xff]  ;;  %v1484_v43 = vor.u32 %v1598_v28, %v1483_v27  ;;  %v1352_v44 = vor.u32 %v1563_v29, %v1349_v30  ;;  %v1561_v48 = vld [vmem:[%s1970_s13 + $0x64] sm:$0xf]  ;;  %p1545_p13 = scmp.ne.s32.totalorder %s1708_s17, 8 }
  0x82   : > { %1010 = vmatpush.bf16.msra.mxu0 %v1308_v5  ;;  %v1413_v34 = vld [vmem:[%s1970_s13 + $0xf8] sm:$0xf0]  ;;  %v1595_v35 = vld [vmem:[%s1970_s13 + $0x174] sm:$0xf]  ;;  %v675_v37 = vunpack.c.l.b16 %v606_v32  ;;  %v676_v42 = vunpack.c.h.b16 %v606_v32  ;;  %v1341_v49 = vld [vmem:[%s1970_s13 + $0x68] sm:$0xf0] }
  0x83   : > { %1023 = vmatpush.bf16.msra.mxu1 %v1372_v6  ;;  %v1477_v36 = vld [vmem:[%s1970_s13 + $0x178] sm:$0xf0]  ;;  %v1611_v40 = vld [vmem:[%s1970_s13 + $0x1f4] sm:$0xf]  ;;  %v1416_v46 = vor.u32 %v1579_v31, %v1413_v34  ;;  %v1577_v50 = vld [vmem:[%s1970_s13 + $0xe4] sm:$0xf]  ;;  %v1344_v62 = vor.u32 %v1561_v48, %v1341_v49 }
  0x84   : > { %1036 = vmatpush.bf16.msra.mxu2 %v1436_v7  ;;  %v1541_v41 = vld [vmem:[%s1970_s13 + $0x1f8] sm:$0xf0]  ;;  %v605_v45 = vld [vmem:[%s1952_s30] sm:$0xff]  ;;  %v1480_v47 = vor.u32 %v1595_v35, %v1477_v36  ;;  %v1405_v54 = vld [vmem:[%s1970_s13 + $0xe8] sm:$0xf0]  ;;  %v2053_v57 = vpack.c.b16 %v675_v37, %v675_v37  ;;  %v2057_v60 = vpack.c.b16 %v676_v42, %v676_v42 }
  0x85   : > { %1049 = vmatpush.bf16.msra.mxu3 %v1500_v11  ;;  %v673_v51 = vunpack.c.l.b16 %v605_v45  ;;  %v674_v52 = vunpack.c.h.b16 %v605_v45  ;;  %v1544_v53 = vor.u32 %v1611_v40, %v1541_v41  ;;  %v1593_v55 = vld [vmem:[%s1970_s13 + $0x164] sm:$0xf]  ;;  %v1469_v56 = vld [vmem:[%s1970_s13 + $0x168] sm:$0xf0]  ;;  %v1408_v0 = vor.u32 %v1577_v50, %v1405_v54  ;;  %v1559_v2 = vld [vmem:[%s1970_s13 + $0x54] sm:$0xf] }
  0x86   : > { %1011 = vmatpush.bf16.msra.mxu0 %v1300_v17  ;;  %v1609_v58 = vld [vmem:[%s1970_s13 + $0x1e4] sm:$0xf]  ;;  %v1533_v59 = vld [vmem:[%s1970_s13 + $0x1e8] sm:$0xf0]  ;;  %v1472_v1 = vor.u32 %v1593_v55, %v1469_v56  ;;  %v1333_v3 = vld [vmem:[%s1970_s13 + $0x58] sm:$0xf0] }
  0x87   : > { %1024 = vmatpush.bf16.msra.mxu1 %v1364_v21  ;;  %v2059_v61 = vpack.c.b16 %v673_v51, %v673_v51  ;;  %v2061_v63 = vpack.c.b16 %v674_v52, %v674_v52  ;;  %v1575_v4 = vld [vmem:[%s1970_s13 + $0xd4] sm:$0xf]  ;;  %v1536_v5 = vor.u32 %v1609_v58, %v1533_v59  ;;  %v1397_v6 = vld [vmem:[%s1970_s13 + $0xd8] sm:$0xf0]  ;;  %v1336_v11 = vor.u32 %v1559_v2, %v1333_v3  ;;  %v1557_v14 = vld [vmem:[%s1970_s13 + $0x44] sm:$0xf] }
  0x88   : > { %1037 = vmatpush.bf16.msra.mxu2 %v1428_v22  ;;  %v1591_v7 = vld [vmem:[%s1970_s13 + $0x154] sm:$0xf]  ;;  %v1461_v8 = vld [vmem:[%s1970_s13 + $0x158] sm:$0xf0]  ;;  %v1400_v12 = vor.u32 %v1575_v4, %v1397_v6  ;;  %v1325_v15 = vld [vmem:[%s1970_s13 + $0x48] sm:$0xf0] }
  0x89   : > { %1050 = vmatpush.bf16.msra.mxu3 %v1492_v26  ;;  %v1607_v9 = vld [vmem:[%s1970_s13 + $0x1d4] sm:$0xf]  ;;  %v1525_v10 = vld [vmem:[%s1970_s13 + $0x1d8] sm:$0xf0]  ;;  %v1464_v13 = vor.u32 %v1591_v7, %v1461_v8  ;;  %v1573_v16 = vld [vmem:[%s1970_s13 + $0xc4] sm:$0xf]  ;;  %v1328_v23 = vor.u32 %v1557_v14, %v1325_v15 }
  0x8a   : > { %1012 = vmatpush.bf16.msra.mxu0 %v1292_v33  ;;  %v1528_v17 = vor.u32 %v1607_v9, %v1525_v10  ;;  %v1389_v18 = vld [vmem:[%s1970_s13 + $0xc8] sm:$0xf0]  ;;  %v1589_v19 = vld [vmem:[%s1970_s13 + $0x144] sm:$0xf]  ;;  %v1555_v26 = vld [vmem:[%s1970_s13 + $0x34] sm:$0xf] }
  0x8b   : > { %1025 = vmatpush.bf16.msra.mxu1 %v1356_v38  ;;  %v1453_v20 = vld [vmem:[%s1970_s13 + $0x148] sm:$0xf0]  ;;  %v1605_v21 = vld [vmem:[%s1970_s13 + $0x1c4] sm:$0xf]  ;;  %v1392_v24 = vor.u32 %v1573_v16, %v1389_v18  ;;  %v1317_v27 = vld [vmem:[%s1970_s13 + $0x38] sm:$0xf0] }
  0x8c   : > { %1038 = vmatpush.bf16.msra.mxu2 %v1420_v39  ;;  %v1517_v22 = vld [vmem:[%s1970_s13 + $0x1c8] sm:$0xf0]  ;;  %v1456_v25 = vor.u32 %v1589_v19, %v1453_v20  ;;  %v1571_v28 = vld [vmem:[%s1970_s13 + $0xb4] sm:$0xf]  ;;  %v1381_v30 = vld [vmem:[%s1970_s13 + $0xb8] sm:$0xf0]  ;;  %v1320_v35 = vor.u32 %v1555_v26, %v1317_v27 }
  0x8d   : > { %1051 = vmatpush.bf16.msra.mxu3 %v1484_v43  ;;  %1013 = vmatmul.bf16.vlgmr.msra.gmra.mxu0 %v2059_v61  ;;  %v1520_v29 = vor.u32 %v1605_v21, %v1517_v22  ;;  %v1587_v31 = vld [vmem:[%s1970_s13 + $0x134] sm:$0xf]  ;;  %v1445_v32 = vld [vmem:[%s1970_s13 + $0x138] sm:$0xf0]  ;;  %v1384_v36 = vor.u32 %v1571_v28, %v1381_v30  ;;  %v1553_v38 = vld [vmem:[%s1970_s13 + $0x24] sm:$0xf] }
  0x8e   : > { %1057 = vmatpush.bf16.msrb.mxu0 %v1352_v44  ;;  %1026 = vmatmul.bf16.vlgmr.msra.gmra.mxu1 %v2061_v63  ;;  %v1603_v33 = vld [vmem:[%s1970_s13 + $0x1b4] sm:$0xf]  ;;  %v1509_v34 = vld [vmem:[%s1970_s13 + $0x1b8] sm:$0xf0]  ;;  %v1448_v37 = vor.u32 %v1587_v31, %v1445_v32  ;;  %v1309_v39 = vld [vmem:[%s1970_s13 + $0x28] sm:$0xf0] }
  0x8f   : > { %1070 = vmatpush.bf16.msrb.mxu1 %v1416_v46  ;;  %1039 = vmatmul.bf16.vlgmr.msra.gmra.mxu2 %v2053_v57  ;;  %v1569_v40 = vld [vmem:[%s1970_s13 + $0xa4] sm:$0xf]  ;;  %v1512_v41 = vor.u32 %v1603_v33, %v1509_v34  ;;  %v1373_v42 = vld [vmem:[%s1970_s13 + $0xa8] sm:$0xf0]  ;;  %v1551_v50 = vld [vmem:[%s1970_s13 + $0x14] sm:$0xf] }
  0x90   : > { %1083 = vmatpush.bf16.msrb.mxu2 %v1480_v47  ;;  %1052 = vmatmul.bf16.vlgmr.msra.gmra.mxu3 %v2057_v60  ;;  %v1585_v43 = vld [vmem:[%s1970_s13 + $0x124] sm:$0xf]  ;;  %v1437_v44 = vld [vmem:[%s1970_s13 + $0x128] sm:$0xf0]  ;;  %v1312_v47 = vor.u32 %v1553_v38, %v1309_v39  ;;  %v1376_v48 = vor.u32 %v1569_v40, %v1373_v42  ;;  %v1301_v51 = vld [vmem:[%s1970_s13 + $0x18] sm:$0xf0] }
  0x91   : > { %1096 = vmatpush.bf16.msrb.mxu3 %v1544_v53  ;;  %v1601_v45 = vld [vmem:[%s1970_s13 + $0x1a4] sm:$0xf]  ;;  %v1501_v46 = vld [vmem:[%s1970_s13 + $0x1a8] sm:$0xf0]  ;;  %v1440_v49 = vor.u32 %v1585_v43, %v1437_v44  ;;  %v1567_v52 = vld [vmem:[%s1970_s13 + $0x94] sm:$0xf] }
  0x92   : > { %1058 = vmatpush.bf16.msrb.mxu0 %v1344_v62  ;;  %v1504_v53 = vor.u32 %v1601_v45, %v1501_v46  ;;  %v1365_v54 = vld [vmem:[%s1970_s13 + $0x98] sm:$0xf0]  ;;  %v1583_v55 = vld [vmem:[%s1970_s13 + $0x114] sm:$0xf]  ;;  %v1304_v62 = vor.u32 %v1551_v50, %v1301_v51  ;;  %v1549_v2 = vld [vmem:[%s1970_s13 + $0x4] sm:$0xf] }
  0x93   : > { %1071 = vmatpush.bf16.msrb.mxu1 %v1408_v0  ;;  %v1429_v56 = vld [vmem:[%s1970_s13 + $0x118] sm:$0xf0]  ;;  %v1599_v58 = vld [vmem:[%s1970_s13 + $0x194] sm:$0xf]  ;;  %v1368_v0 = vor.u32 %v1567_v52, %v1365_v54  ;;  %v1293_v3 = vld [vmem:[%s1970_s13 + $0x8] sm:$0xf0] }
  0x94   : > { %1084 = vmatpush.bf16.msrb.mxu2 %v1472_v1  ;;  %v1493_v59 = vld [vmem:[%s1970_s13 + $0x198] sm:$0xf0]  ;;  %v1432_v1 = vor.u32 %v1583_v55, %v1429_v56  ;;  %v1565_v4 = vld [vmem:[%s1970_s13 + $0x84] sm:$0xf]  ;;  %v1357_v6 = vld [vmem:[%s1970_s13 + $0x88] sm:$0xf0] }
  0x95   : > { %1097 = vmatpush.bf16.msrb.mxu3 %v1536_v5  ;;  %v1496_v5 = vor.u32 %v1599_v58, %v1493_v59  ;;  %v1581_v7 = vld [vmem:[%s1970_s13 + $0x104] sm:$0xf]  ;;  %v1421_v8 = vld [vmem:[%s1970_s13 + $0x108] sm:$0xf0]  ;;  %v603_v21 = vld [vmem:[#allocation2] sm:$0xff] }
  0x96   : > { %1059 = vmatpush.bf16.msrb.mxu0 %v1336_v11  ;;  %v1597_v9 = vld [vmem:[%s1970_s13 + $0x184] sm:$0xf]  ;;  %v1485_v10 = vld [vmem:[%s1970_s13 + $0x188] sm:$0xf0]  ;;  %v1296_v11 = vor.u32 %v1549_v2, %v1293_v3  ;;  %v604_v31 = vld [vmem:[#allocation2 + $0x8] sm:$0xff] }
  0x97   : > { %1072 = vmatpush.bf16.msrb.mxu1 %v1400_v12  ;;  %v1360_v12 = vor.u32 %v1565_v4, %v1357_v6  ;;  %v1488_v14 = vor.u32 %v1597_v9, %v1485_v10 }
  0x98   : > { %1085 = vmatpush.bf16.msrb.mxu2 %v1464_v13  ;;  %v1424_v13 = vor.u32 %v1581_v7, %v1421_v8 }
  0x99   : > { %1098 = vmatpush.bf16.msrb.mxu3 %v1528_v17 }
  0x9a   : > { %1060 = vmatpush.bf16.msrb.mxu0 %v1328_v23 }
  0x9b   : > { %1073 = vmatpush.bf16.msrb.mxu1 %v1392_v24 }
  0x9c   : > { %1086 = vmatpush.bf16.msrb.mxu2 %v1456_v25 }
  0x9d   : > { %1099 = vmatpush.bf16.msrb.mxu3 %v1520_v29 }
  0x9e   : > { %1061 = vmatpush.bf16.msrb.mxu0 %v1320_v35 }
  0x9f   : > { %1074 = vmatpush.bf16.msrb.mxu1 %v1384_v36 }
  0xa0   : > { %1087 = vmatpush.bf16.msrb.mxu2 %v1448_v37 }
  0xa1   : > { %1100 = vmatpush.bf16.msrb.mxu3 %v1512_v41 }
  0xa2   : > { %1062 = vmatpush.bf16.msrb.mxu0 %v1312_v47 }
  0xa3   : > { %1075 = vmatpush.bf16.msrb.mxu1 %v1376_v48 }
  0xa4   : > { %1088 = vmatpush.bf16.msrb.mxu2 %v1440_v49 }
  0xa5   : > { %1101 = vmatpush.bf16.msrb.mxu3 %v1504_v53 }
  0xa6   : > { %1063 = vmatpush.bf16.msrb.mxu0 %v1304_v62 }
  0xa7   : > { %1076 = vmatpush.bf16.msrb.mxu1 %v1368_v0 }
  0xa8   : > { %1089 = vmatpush.bf16.msrb.mxu2 %v1432_v1 }
  0xa9   : > { %1102 = vmatpush.bf16.msrb.mxu3 %v1496_v5 }
  0xaa   : > { %1064 = vmatpush.bf16.msrb.mxu0 %v1296_v11 }
  0xab   : > { %1077 = vmatpush.bf16.msrb.mxu1 %v1360_v12 }
  0xac   : > { %1090 = vmatpush.bf16.msrb.mxu2 %v1424_v13 }
  0xad   : > { %1103 = vmatpush.bf16.msrb.mxu3 %v1488_v14  ;;  %1065 = vmatmul.bf16.vlgmr.msrb.gmra.mxu0 %v2059_v61 }
  0xae   : > { %1078 = vmatmul.bf16.vlgmr.msrb.gmra.mxu1 %v2061_v63 }
  0xaf   : > { %1091 = vmatmul.bf16.vlgmr.msrb.gmra.mxu2 %v2053_v57 }
  0xb0   : > { %1104 = vmatmul.bf16.vlgmr.msrb.gmra.mxu3 %v2057_v60 }
 0x10a   : > { %v1014_v15 = vpop.f32.mrf.mxu0 }
 0x10b   : > { %v1027_v16 = vpop.f32.mrf.mxu1 }
 0x10c   : > { %v1028_v17 = vadd.f32 %v1027_v16, %v1014_v15 }
 0x112   : > { %v1040_v18 = vpop.f32.mrf.mxu2  ;;  %v1016_v23 = vpop.f32.mrf.mxu0 }
 0x113   : > { %v1041_v19 = vadd.f32 %v1040_v18, %v1028_v17  ;;  %v1053_v20 = vpop.f32.mrf.mxu3  ;;  %v1029_v24 = vpop.f32.mrf.mxu1 }
 0x115   : > { %v1054_v22 = vadd.f32 %v1053_v20, %v1041_v19 }
 0x117   : > { %v1109_v25 = vadd.f32 %v1054_v22, %v603_v21 }
 0x119   : > { %1111 = vst [vmem:[#allocation2] sm:$0xff] %v1109_v25 }
 0x11a   : > { %v1042_v26 = vpop.f32.mrf.mxu2 }
 0x11b   : > { %v1055_v61 = vpop.f32.mrf.mxu3 }
 0x12a   : > { %v1066_v27 = vpop.f32.mrf.mxu0 }
 0x12b   : > { %v1079_v63 = vpop.f32.mrf.mxu1 }
 0x12c   : > { %v1080_v28 = vadd.f32 %v1079_v63, %v1066_v27 }
 0x132   : > { %v1092_v57 = vpop.f32.mrf.mxu2  ;;  %v1068_v30 = vpop.f32.mrf.mxu0 }
 0x133   : > { %v1093_v29 = vadd.f32 %v1092_v57, %v1080_v28  ;;  %v1105_v60 = vpop.f32.mrf.mxu3  ;;  %v1081_v32 = vpop.f32.mrf.mxu1 }
 0x135   : > { %v1106_v33 = vadd.f32 %v1105_v60, %v1093_v29 }
 0x137   : > { %v1110_v34 = vadd.f32 %v1106_v33, %v604_v31  ;;  %1116 = sbr.rel (%p1545_p13) target bundleno = 330 (0x14a), region = 82 }
 0x139   : > { %1112 = vst [vmem:[#allocation2 + $0x8] sm:$0xff] %v1110_v34 }
 0x13a   : > { %v1094_v35 = vpop.f32.mrf.mxu2 }
 0x13b   : > { %v1107_v36 = vpop.f32.mrf.mxu3 }
 0x13c   : > { %v1117_v37 = vld [vmem:[#allocation2] sm:$0xff] }
 0x13d   : > { %v1119_v39 = vld [vmem:[%s580_s15] sm:$0x3] }
 0x13e   : > { %v1121_v40 = vperm.slane %v1119_v39, 0  ;;  %v1122_v41 = vperm.slane %v1119_v39, 1  ;;  %v1127_v42 = vld [vmem:[%s585_s18] sm:$0x3] }
 0x13f   : > { %v1129_v43 = vperm.slane %v1127_v42, 0  ;;  %v1130_v44 = vperm.slane %v1127_v42, 1 }
 0x140   : > { %v1118_v38 = vld [vmem:[#allocation2 + $0x8] sm:$0xff]  ;;  %v1125_v45 = vmul.f32 %v1121_v40, %v1117_v37 }
 0x141   : > { %v1126_v46 = vmul.f32 %v1122_v41, %v1118_v38 }
 0x142   : > { %v1133_v47 = vadd.f32 %v1129_v43, %v1125_v45 }
 0x143   : > { %v1134_v48 = vadd.f32 %v1130_v44, %v1126_v46 }
 0x144   : > { %v1135_v49 = vmax.f32 %v1133_v47, 0.0 }
 0x145   : > { %v1136_v50 = vmax.f32 %v1134_v48, 0.0 }
 0x147   : > { %v1137_v51 = vpack.c.bf16 %v1136_v50, %v1135_v49 }
 0x149   : > { %1138 = vst [vmem:[%s1968_s12] sm:$0xff] %v1137_v51 }
 0x14a PF: > { %s14_s21 = sadd.s32 1, %s1724_s21   ;;  %s2157_s15 = smov %s1704_s16 }
 0x14b   : > { %p11_p0 = scmp.ge.s32.totalorder %s14_s21, 20   ;;  %s2158_s16 = smov %s1803_s28 }
 0x14c   : > { %s2159_s17 = smov %s1716_s19  ;;  %s2160_s18 = smov %s1720_s20 }
 0x14d   : > { %s2161_s19 = smov %s2164_s22  ;;  %s2162_s20 = smov %s2168_s23 }
 0x14e   :  { %13 = sbr.rel (!%p11_p0) target bundleno = 4 (0x4), region = 126 }

// kernel: resnet18_forward.43
= control target key start
LH: loop header
LB: loop body
LE: loop exit
PB: predicated region body
PF: predicated region fallthrough
CT: control target
= control target key end

     0   :  { %s731_s0 = inlined_call_operand.vmem [shape: bf16[2,1,512], index: 0, kind: input, shape index: {}]   ;;  %s732_s1 = inlined_call_operand.vmem [shape: bf16[512,128], index: 1, kind: input, shape index: {}]   ;;  %s733_s2 = inlined_call_operand.vmem [shape: f32[1,128], index: 2, kind: input, shape index: {}]   ;;  %s734_s3 = inlined_call_operand.hbm [shape: f32[2,128], index: 3, kind: output, shape index: {}]  }
   0x1   :  { %v544_v0 = vld [vmem:[%s732_s1 + $0x38] sm:$0xff]  ;;  %v543_v4 = vld [vmem:[%s732_s1 + $0x30] sm:$0xff]  ;;  %v542_v8 = vld [vmem:[%s732_s1 + $0x28] sm:$0xff] }
   0x2   :  { %v552_v1 = vld [vmem:[%s732_s1 + $0x78] sm:$0xff]  ;;  %340 = vmatpush.bf16.msra.mxu0 %v544_v0  ;;  %v551_v5 = vld [vmem:[%s732_s1 + $0x70] sm:$0xff]  ;;  %v550_v9 = vld [vmem:[%s732_s1 + $0x68] sm:$0xff] }
   0x3   :  { %v560_v2 = vld [vmem:[%s732_s1 + $0xb8] sm:$0xff]  ;;  %353 = vmatpush.bf16.msra.mxu1 %v552_v1  ;;  %v559_v6 = vld [vmem:[%s732_s1 + $0xb0] sm:$0xff]  ;;  %v558_v10 = vld [vmem:[%s732_s1 + $0xa8] sm:$0xff] }
   0x4   :  { %v568_v3 = vld [vmem:[%s732_s1 + $0xf8] sm:$0xff]  ;;  %366 = vmatpush.bf16.msra.mxu2 %v560_v2  ;;  %v567_v7 = vld [vmem:[%s732_s1 + $0xf0] sm:$0xff]  ;;  %v566_v11 = vld [vmem:[%s732_s1 + $0xe8] sm:$0xff] }
   0x5   :  { %379 = vmatpush.bf16.msra.mxu3 %v568_v3  ;;  %v541_v12 = vld [vmem:[%s732_s1 + $0x20] sm:$0xff] }
   0x6   :  { %341 = vmatpush.bf16.msra.mxu0 %v543_v4  ;;  %v549_v13 = vld [vmem:[%s732_s1 + $0x60] sm:$0xff] }
   0x7   :  { %354 = vmatpush.bf16.msra.mxu1 %v551_v5  ;;  %v557_v14 = vld [vmem:[%s732_s1 + $0xa0] sm:$0xff] }
   0x8   :  { %367 = vmatpush.bf16.msra.mxu2 %v559_v6  ;;  %v570_v15 = vld [vmem:[%s731_s0] sm:$0xff]  }
   0x9   :  { %380 = vmatpush.bf16.msra.mxu3 %v567_v7  ;;  %v565_v16 = vld [vmem:[%s732_s1 + $0xe0] sm:$0xff]  ;;  %v571_v17 = vunpack.c.l.bf16 %v570_v15  ;;  %v572_v18 = vunpack.c.h.bf16 %v570_v15 }
   0xa   :  { %342 = vmatpush.bf16.msra.mxu0 %v542_v8 }
   0xb   :  { %355 = vmatpush.bf16.msra.mxu1 %v550_v9 }
   0xc   :  { %368 = vmatpush.bf16.msra.mxu2 %v558_v10 }
   0xd   :  { %381 = vmatpush.bf16.msra.mxu3 %v566_v11 }
   0xe   :  { %8 = vsyncpa [#allocation3], 0  ;;  %v27_v19 = vperm.slane %v572_v18, 0  ;;  %v28_v20 = vperm.slane %v572_v18, 2  ;;  %343 = vmatpush.bf16.msra.mxu0 %v541_v12  ;;  %v540_v21 = vld [vmem:[%s732_s1 + $0x18] sm:$0xff]  ;;  %v23_v23 = vperm.slane %v571_v17, 0 }
   0xf   :  { %356 = vmatpush.bf16.msra.mxu1 %v549_v13  ;;  %v548_v22 = vld [vmem:[%s732_s1 + $0x58] sm:$0xff]  ;;  %v24_v24 = vperm.slane %v571_v17, 2  ;;  %v29_v25 = vperm.slane %v572_v18, 4  ;;  %v30_v26 = vperm.slane %v572_v18, 6  ;;  %v25_v30 = vperm.slane %v571_v17, 4  ;;  %v539_v35 = vld [vmem:[%s732_s1 + $0x10] sm:$0xff] }
  0x10   :  { %369 = vmatpush.bf16.msra.mxu2 %v557_v14  ;;  %v556_v27 = vld [vmem:[%s732_s1 + $0x98] sm:$0xff]  ;;  %v43_v29 = vpack.c.bf16 %v27_v19, %v27_v19  ;;  %v26_v31 = vperm.slane %v571_v17, 6  ;;  %v44_v32 = vpack.c.bf16 %v28_v20, %v28_v20  ;;  %v547_v36 = vld [vmem:[%s732_s1 + $0x50] sm:$0xff]  ;;  %v39_v37 = vpack.c.bf16 %v23_v23, %v23_v23  ;;  %v538_v47 = vld [vmem:[%s732_s1 + $0x8] sm:$0xff]  ;;  %s400_s27 = sshll.u32 %s734_s3, 4  ;;  %s401_s27 = int_to_ptr.hbm [resolvable:$true] %s400_s27 }
  0x11   :  { %382 = vmatpush.bf16.msra.mxu3 %v565_v16  ;;  %v564_v28 = vld [vmem:[%s732_s1 + $0xd8] sm:$0xff]  ;;  %v45_v33 = vpack.c.bf16 %v29_v25, %v29_v25  ;;  %v46_v34 = vpack.c.bf16 %v30_v26, %v30_v26  ;;  %v40_v39 = vpack.c.bf16 %v24_v24, %v24_v24  ;;  %v555_v41 = vld [vmem:[%s732_s1 + $0x90] sm:$0xff]  ;;  %v41_v43 = vpack.c.bf16 %v25_v30, %v25_v30  ;;  %v546_v48 = vld [vmem:[%s732_s1 + $0x48] sm:$0xff] }
  0x12   :  { %344 = vmatpush.bf16.msra.mxu0 %v540_v21  ;;  %v127_v38 = vunpack.c.l.b16 %v43_v29  ;;  %v128_v40 = vunpack.c.l.b16 %v44_v32  ;;  %v563_v42 = vld [vmem:[%s732_s1 + $0xd0] sm:$0xff]  ;;  %v42_v45 = vpack.c.bf16 %v26_v31, %v26_v31  ;;  %vm132_vm0 = vcmask 1041409   ;;  %v554_v53 = vld [vmem:[%s732_s1 + $0x88] sm:$0xff]  ;;  %v537_v59 = vld [vmem:[%s732_s1] sm:$0xff] }
  0x13   :  { %357 = vmatpush.bf16.msra.mxu1 %v548_v22  ;;  %v129_v44 = vunpack.c.l.b16 %v45_v33  ;;  %v130_v46 = vunpack.c.l.b16 %v46_v34  ;;  %v123_v49 = vunpack.c.l.b16 %v39_v37  ;;  %v124_v51 = vunpack.c.l.b16 %v40_v39  ;;  %v562_v54 = vld [vmem:[%s732_s1 + $0xc8] sm:$0xff]  ;;  %v545_v60 = vld [vmem:[%s732_s1 + $0x40] sm:$0xff] }
  0x14   :  { %370 = vmatpush.bf16.msra.mxu2 %v556_v27  ;;  %v131_v50 = vrot.slane %v127_v38, 7  ;;  %v134_v52 = vrot.slane %v128_v40, 7  ;;  %v125_v55 = vunpack.c.l.b16 %v41_v43  ;;  %v126_v57 = vunpack.c.l.b16 %v42_v45  ;;  %v553_v63 = vld [vmem:[%s732_s1 + $0x80] sm:$0xff] }
  0x15   :  { %383 = vmatpush.bf16.msra.mxu3 %v564_v28  ;;  %v136_v56 = vrot.slane %v129_v44, 7  ;;  %v138_v58 = vrot.slane %v130_v46, 7  ;;  %v561_v0 = vld [vmem:[%s732_s1 + $0xc0] sm:$0xff]  ;;  %s601_s1 = smov [#allocation2]  }
  0x16   :  { %345 = vmatpush.bf16.msra.mxu0 %v539_v35  ;;  %v133_v61 = vsel %vm132_vm0, %v131_v50, %v123_v49  ;;  %v135_v62 = vsel %vm132_vm0, %v134_v52, %v124_v51  ;;  %v574_v7 = vld [vmem:[%s733_s2] ss:$0 sm:$0xff]  ;;  %s398_s24 = sshll.u32 %s601_s1, 4  ;;  %s399_s24 = int_to_ptr.vmem [resolvable:$true] %s398_s24 }
  0x17   :  { %358 = vmatpush.bf16.msra.mxu1 %v547_v36  ;;  %v137_v1 = vsel %vm132_vm0, %v136_v56, %v125_v55  ;;  %v139_v2 = vsel %vm132_vm0, %v138_v58, %v126_v57  ;;  %v140_v3 = vpack.c.b16 %v133_v61, %v133_v61  ;;  %v141_v4 = vpack.c.b16 %v135_v62, %v135_v62 }
  0x18   :  { %371 = vmatpush.bf16.msra.mxu2 %v555_v41  ;;  %v142_v5 = vpack.c.b16 %v137_v1, %v137_v1  ;;  %v143_v6 = vpack.c.b16 %v139_v2, %v139_v2 }
  0x19   :  { %384 = vmatpush.bf16.msra.mxu3 %v563_v42 }
  0x1a   :  { %346 = vmatpush.bf16.msra.mxu0 %v538_v47 }
  0x1b   :  { %359 = vmatpush.bf16.msra.mxu1 %v546_v48 }
  0x1c   :  { %372 = vmatpush.bf16.msra.mxu2 %v554_v53 }
  0x1d   :  { %385 = vmatpush.bf16.msra.mxu3 %v562_v54 }
  0x1e   :  { %347 = vmatpush.bf16.msra.mxu0 %v537_v59 }
  0x1f   :  { %360 = vmatpush.bf16.msra.mxu1 %v545_v60 }
  0x20   :  { %373 = vmatpush.bf16.msra.mxu2 %v553_v63 }
  0x21   :  { %386 = vmatpush.bf16.msra.mxu3 %v561_v0  ;;  %348 = vmatmul.bf16.vlgmr.msra.gmra.mxu0 %v140_v3 }
  0x22   :  { %361 = vmatmul.bf16.vlgmr.msra.gmra.mxu1 %v141_v4 }
  0x23   :  { %374 = vmatmul.bf16.vlgmr.msra.gmra.mxu2 %v142_v5 }
  0x24   :  { %387 = vmatmul.bf16.vlgmr.msra.gmra.mxu3 %v143_v6 }
  0x9e   :  { %v349_v8 = vpop.f32.mrf.mxu0 }
  0x9f   :  { %v362_v9 = vpop.f32.mrf.mxu1  ;;  %v350_v10 = vadd.f32 %v574_v7, %v349_v8 }
  0xa1   :  { %v363_v11 = vadd.f32 %v362_v9, %v350_v10 }
  0xa6   :  { %v375_v12 = vpop.f32.mrf.mxu2  ;;  %v351_v15 = vpop.f32.mrf.mxu0 }
  0xa7   :  { %v388_v13 = vpop.f32.mrf.mxu3  ;;  %v376_v14 = vadd.f32 %v375_v12, %v363_v11  ;;  %v364_v16 = vpop.f32.mrf.mxu1 }
  0xa9   :  { %v389_v17 = vadd.f32 %v388_v13, %v376_v14 }
  0xab   :  { %392 = vst [vmem:[#allocation2] sm:$0x3] %v389_v17 }
  0xac   :  { %403 = dma.vmem_to_hbm [thread:$0]  %s399_s24, 32, %s401_s27, [#allocation3]  }
  0xae   :  { %v377_v18 = vpop.f32.mrf.mxu2 }
  0xaf   :  { %v390_v19 = vpop.f32.mrf.mxu3 }
  0xb0   :  { %599 = dma.done.wait [#allocation3], 32  }
  0xb1   :  { %600 = vsyncadd [#allocation3], 4294967264 }
  0xb2   :  { %408 = vsyncpa [#allocation3], 1 }

</bundles_post_ra>
